<compile_context>
chip_gen: v7x
topology: tpu7x:2x2x1
jax: 0.10.0
libtpu: 0.0.40
codegen_flags: <defaults>
</compile_context>

<pallas_src>
import functools

import jax
import jax.numpy as jnp
from jax.experimental import pallas as pl
from jax.experimental.pallas import tpu as pltpu


def _round_up(x, m):
    return (x + m - 1) // m * m


def _pick_tile(d, choices):
    for t in choices:
        if t <= d and d % t == 0:
            return t
    return d


def _choose_m_tile(m):
    for t in (512, 256, 128):
        if m >= t:
            return t
    return _round_up(max(m, 16), 16)


def _row_tiling(rows, lanes=128, itemsize=2, target_bytes=1 << 20):
    """Row tile so one block is ~1 MiB (and divides the padded row count)."""
    cap = max(16, (target_bytes // (lanes * itemsize)) // 16 * 16)
    if rows <= cap:
        rows_p = _round_up(max(rows, 16), 16)
        return rows_p, rows_p
    rows_p = _round_up(rows, cap)
    return rows_p, cap


# ----------------------------------------------------------------------------
# Pallas kernels
# ----------------------------------------------------------------------------
def _matmul_kernel(x_ref, w_ref, b_ref, o_ref, acc_ref, *, act):
    @pl.when(pl.program_id(2) == 0)
    def _():
        acc_ref[...] = jnp.zeros_like(acc_ref)

    acc_ref[...] += jnp.dot(x_ref[...], w_ref[...],
                            preferred_element_type=jnp.float32)

    @pl.when(pl.program_id(2) == pl.num_programs(2) - 1)
    def _():
        r = acc_ref[...] + b_ref[...]
        if act == "relu":
            r = jnp.maximum(r, 0.0)
        elif act == "sigmoid":
            r = jax.nn.sigmoid(r)
        o_ref[...] = r.astype(o_ref.dtype)


def _matmul_add_kernel(x_ref, w_ref, b_ref, u_ref, o_ref, acc_ref, *, act):
    # Same as above, but the epilogue adds an extra (tm, tn) blocked input
    # (the upsampled coarser decoder map) on the last K step.
    @pl.when(pl.program_id(2) == 0)
    def _():
        acc_ref[...] = jnp.zeros_like(acc_ref)

    acc_ref[...] += jnp.dot(x_ref[...], w_ref[...],
                            preferred_element_type=jnp.float32)

    @pl.when(pl.program_id(2) == pl.num_programs(2) - 1)
    def _():
        r = acc_ref[...] + b_ref[...]
        if act == "relu":
            r = jnp.maximum(r, 0.0)
        o_ref[...] = (r + u_ref[...].astype(jnp.float32)).astype(o_ref.dtype)


def matmul_bias_act(x, lin, act="none", add=None):
    """act(x @ W + b) (+ add) with bf16 x, pre-padded bf16 W; bf16 output."""
    M, K = x.shape
    Kp, Np = lin["w"].shape
    assert K <= Kp

    if x.dtype != jnp.bfloat16:
        x = x.astype(jnp.bfloat16)
    tm = _choose_m_tile(M)
    Mp = _round_up(M, tm)
    tn = _pick_tile(Np, (1024, 512, 256, 128))
    tk = _pick_tile(Kp, (512, 256, 128))

    if Mp != M or Kp != K:
        x = jnp.pad(x, ((0, Mp - M), (0, Kp - K)))

    in_specs = [
        pl.BlockSpec((tm, tk), lambda i, j, k: (i, k)),
        pl.BlockSpec((tk, tn), lambda i, j, k: (k, j)),
        pl.BlockSpec((1, tn), lambda i, j, k: (0, j)),
    ]
    args = [x, lin["w"], lin["b"]]
    if add is not None:
        u = add if add.dtype == jnp.bfloat16 else add.astype(jnp.bfloat16)
        assert u.shape[1] == Np
        if u.shape[0] != Mp:
            u = jnp.pad(u, ((0, Mp - u.shape[0]), (0, 0)))
        in_specs.append(pl.BlockSpec((tm, tn), lambda i, j, k: (i, j)))
        args.append(u)
        kern = functools.partial(_matmul_add_kernel, act=act)
    else:
        kern = functools.partial(_matmul_kernel, act=act)

    out = pl.pallas_call(
        kern,
        out_shape=jax.ShapeDtypeStruct((Mp, Np), jnp.bfloat16),
        grid=(Mp // tm, Np // tn, Kp // tk),
        in_specs=in_specs,
        out_specs=pl.BlockSpec((tm, tn), lambda i, j, k: (i, j)),
        scratch_shapes=[pltpu.VMEM((tm, tn), jnp.float32)],
        compiler_params=pltpu.CompilerParams(
            dimension_semantics=("parallel", "parallel", "arbitrary"),
            vmem_limit_bytes=48 * 1024 * 1024,
        ),
    )(*args)
    return out[:M] if Mp != M else out


def _cmf_proj_kernel(r_ref, d_ref, g_ref, w_ref, b_ref, o_ref, acc_ref):
    # Fused Cross_Modality_Fusion hot path:
    #   relu((R * gate + D) @ Wproj + b)
    # gate block is (1, tk) f32, broadcast over the row tile in-register.
    @pl.when(pl.program_id(3) == 0)
    def _():
        acc_ref[...] = jnp.zeros_like(acc_ref)

    x = (r_ref[...].astype(jnp.float32) * g_ref[...]
         + d_ref[...].astype(jnp.float32)).astype(jnp.bfloat16)
    acc_ref[...] += jnp.dot(x, w_ref[...], preferred_element_type=jnp.float32)

    @pl.when(pl.program_id(3) == pl.num_programs(3) - 1)
    def _():
        o_ref[...] = jnp.maximum(acc_ref[...] + b_ref[...],
                                 0.0).astype(o_ref.dtype)


def cmf_gated_proj(R_nhwc, D_nhwc, gate, lin):
    """relu((R*gate + D) @ W + b); the gated add never touches HBM."""
    n, h, w, ci = R_nhwc.shape
    Kp, Np = lin["w"].shape
    assert ci == Kp
    rows = h * w
    tm = _choose_m_tile(rows)
    rows_p = _round_up(rows, tm)
    tn = _pick_tile(Np, (1024, 512, 256, 128))
    tk = _pick_tile(Kp, (512, 256, 128))

    def prep(x):
        x3 = x.reshape(n, rows, ci)
        if x3.dtype != jnp.bfloat16:
            x3 = x3.astype(jnp.bfloat16)
        if rows_p != rows:
            x3 = jnp.pad(x3, ((0, 0), (0, rows_p - rows), (0, 0)))
        return x3

    g3 = gate.astype(jnp.float32).reshape(n, 1, ci)

    out = pl.pallas_call(
        _cmf_proj_kernel,
        out_shape=jax.ShapeDtypeStruct((n, rows_p, Np), jnp.bfloat16),
        grid=(n, rows_p // tm, Np // tn, Kp // tk),
        in_specs=[
            pl.BlockSpec((None, tm, tk), lambda b, i, j, k: (b, i, k)),
            pl.BlockSpec((None, tm, tk), lambda b, i, j, k: (b, i, k)),
            pl.BlockSpec((None, 1, tk), lambda b, i, j, k: (b, 0, k)),
            pl.BlockSpec((tk, tn), lambda b, i, j, k: (k, j)),
            pl.BlockSpec((1, tn), lambda b, i, j, k: (0, j)),
        ],
        out_specs=pl.BlockSpec((None, tm, tn), lambda b, i, j, k: (b, i, j)),
        scratch_shapes=[pltpu.VMEM((tm, tn), jnp.float32)],
        compiler_params=pltpu.CompilerParams(
            dimension_semantics=("parallel", "parallel", "parallel",
                                 "arbitrary"),
            vmem_limit_bytes=48 * 1024 * 1024,
        ),
    )(prep(R_nhwc), prep(D_nhwc), g3, lin["w"], lin["b"])
    if rows_p != rows:
        out = out[:, :rows, :]
    return out.reshape(n, h, w, Np)


def _ipam_kernel(s_ref, x_ref, o_ref):
    # Per-image filter-bank parameters live in SMEM; bf16 I/O, f32 math.
    b = pl.program_id(0)
    x = x_ref[...].astype(jnp.float32)
    bright = s_ref[b, 0]
    contrast = s_ref[b, 1]
    gamma = s_ref[b, 2]
    w0 = s_ref[b, 3]
    w1 = s_ref[b, 4]
    w2 = s_ref[b, 5]
    w3 = s_ref[b, 6]
    # TODO(synk): reference IPAM source unavailable; the whole image is clipped
    # once before the 4-filter bank (identity/brightness/contrast/gamma).
    xc = jnp.clip(x, 1e-4, 1.0)
    f3 = jnp.exp(gamma * jnp.log(xc))             # gamma filter (EUP)
    o_ref[...] = (w0 * xc +                       # identity
                  w1 * (xc + bright) +            # brightness
                  w2 * (xc * contrast) +          # contrast / gain
                  w3 * f3).astype(o_ref.dtype)    # gamma


def ipam_apply(img_nhwc, scalars):
    """Apply the 4-filter bank; image lane-dense (rows x 128) per batch item."""
    n, h, w, c = img_nhwc.shape
    L = h * w * c
    rows = pl.cdiv(L, 128)
    rows_p, tr = _row_tiling(rows)
    flat = img_nhwc.astype(jnp.bfloat16).reshape(n, L)
    if rows_p * 128 != L:
        flat = jnp.pad(flat, ((0, 0), (0, rows_p * 128 - L)))
    x3 = flat.reshape(n, rows_p, 128)

    out = pl.pallas_call(
        _ipam_kernel,
        out_shape=jax.ShapeDtypeStruct((n, rows_p, 128), jnp.bfloat16),
        grid=(n, rows_p // tr),
        in_specs=[
            pl.BlockSpec(memory_space=pltpu.MemorySpace.SMEM),   # (n,8) scalars
            pl.BlockSpec((None, tr, 128), lambda b, r: (b, r, 0)),
        ],
        out_specs=pl.BlockSpec((None, tr, 128), lambda b, r: (b, r, 0)),
        compiler_params=pltpu.CompilerParams(
            dimension_semantics=("parallel", "parallel"),
            vmem_limit_bytes=32 * 1024 * 1024,
        ),
    )(scalars, x3)
    return out.reshape(n, rows_p * 128)[:, :L].reshape(n, h, w, c)


# ----------------------------------------------------------------------------
# Linear-layer helpers
# ----------------------------------------------------------------------------
def make_linear(key, k, n, scale=None):
    """Pallas matmul layer: weights pre-padded to 128-multiples, bf16 once."""
    if scale is None:
        scale = 1.0 / float(k) ** 0.5
    kp = _round_up(max(k, 128), 128)
    np_ = _round_up(max(n, 128), 128)
    w = scale * jax.random.normal(key, (k, n), jnp.float32)
    w_pad = jnp.zeros((kp, np_), jnp.bfloat16).at[:k, :n].set(
        w.astype(jnp.bfloat16))
    b_pad = jnp.zeros((1, np_), jnp.float32)
    return {"w": w_pad, "b": b_pad, "k": k, "n": n}


def make_small_linear(key, k, n, scale=None):
    """Tiny gap-fed layers go through plain jnp.dot (no pallas launch)."""
    if scale is None:
        scale = 1.0 / float(k) ** 0.5
    w = scale * jax.random.normal(key, (k, n), jnp.float32)
    return {"w": w, "b": jnp.zeros((n,), jnp.float32)}


def small_linear(x, p, act="none"):
    y = jnp.dot(x.astype(jnp.float32), p["w"]) + p["b"]
    if act == "relu":
        y = jnp.maximum(y, 0.0)
    elif act == "sigmoid":
        y = jax.nn.sigmoid(y)
    return y


# ----------------------------------------------------------------------------
# Glue (layout conversion, im2col, pooling, resize) -- kept in XLA
# ----------------------------------------------------------------------------
def nchw_to_nhwc(x):
    return jnp.transpose(x, (0, 2, 3, 1))


def nhwc_to_nchw(x):
    return jnp.transpose(x, (0, 3, 1, 2))


def conv1x1(x_nhwc, lin, act="none"):
    n, h, w, c = x_nhwc.shape
    y = matmul_bias_act(x_nhwc.reshape(n * h * w, c), lin, act)
    return y.reshape(n, h, w, lin["w"].shape[1])


def conv3x3_s2(x_nhwc, lin, act="relu"):
    patches = jax.lax.conv_general_dilated_patches(
        x_nhwc, filter_shape=(3, 3), window_strides=(2, 2), padding="SAME",
        dimension_numbers=("NHWC", "HWIO", "NHWC"))
    n, oh, ow, kc = patches.shape
    y = matmul_bias_act(patches.reshape(n * oh * ow, kc), lin, act)
    return y.reshape(n, oh, ow, lin["w"].shape[1])


def pool2(x_nhwc, mode):
    n, h, w, c = x_nhwc.shape
    xr = x_nhwc.reshape(n, h // 2, 2, w // 2, 2, c)
    return xr.max(axis=(2, 4)) if mode == "max" else xr.mean(axis=(2, 4))


def gap(x_nhwc):
    return jnp.mean(x_nhwc, axis=(1, 2), dtype=jnp.float32)


def upsample2(x_nhwc):
    n, h, w, c = x_nhwc.shape
    return jax.image.resize(x_nhwc, (n, 2 * h, 2 * w, c), method="nearest")


# ----------------------------------------------------------------------------
# Sub-modules (deterministic synthetic parameters)
# ----------------------------------------------------------------------------
# TODO(synk): `resnet.resnet50(include_top=False)` source not provided; stand-in
# backbone reproduces the 4-scale pyramid with channel counts [256,512,1024,2048]
# at strides /4,/8,/16,/32 but not the exact bottleneck-block graph.
def make_backbone_params(key, in_ch):
    ks = jax.random.split(key, 5)
    p = {"stem": make_linear(ks[0], in_ch * 9, 64, 0.05)}
    chans = [(64, 256), (256, 512), (512, 1024), (1024, 2048)]
    for i, (ci, co) in enumerate(chans):
        p[f"s{i}"] = make_linear(ks[i + 1], ci, co, 0.5 / float(ci) ** 0.5)
    return p


def backbone(x_nhwc, p):
    y = conv3x3_s2(x_nhwc, p["stem"], "relu")            # /2,  64 (128 lanes)
    y = pool2(y, "max")                                  # /4
    r1 = conv1x1(y, p["s0"], "relu")                     # /4,  256
    r2 = conv1x1(pool2(r1, "avg"), p["s1"], "relu")      # /8,  512
    r3 = conv1x1(pool2(r2, "avg"), p["s2"], "relu")      # /16, 1024
    r4 = conv1x1(pool2(r3, "avg"), p["s3"], "relu")      # /32, 2048
    return r1, r2, r3, r4


# TODO(synk): exact IPAM filter bank / parameter predictor not provided;
# stand-in predicts (brightness, contrast, gamma) + selection weights Pr from
# global statistics and applies the 4-filter bank per pixel in a Pallas kernel.
def make_ipam_params(key):
    ks = jax.random.split(key, 2)
    return {"fc": make_small_linear(ks[0], 4, 3, 0.1),
            "pr": make_small_linear(ks[1], 4, 4, 0.1)}


def ipam_predict(stats, p):
    raw = small_linear(stats, p["fc"])                                  # (n,3)
    pr = jax.nn.softmax(small_linear(stats, p["pr"]), axis=-1)          # (n,4)
    bright = jnp.tanh(raw[:, 0:1]) * 0.2
    contrast = 1.0 + jnp.tanh(raw[:, 1:2]) * 0.5
    gamma = jnp.exp(jnp.tanh(raw[:, 2:3]))
    filter_parameters = jnp.concatenate([bright, contrast, gamma], axis=1)
    # Pack the per-image scalars into one small SMEM table (8 columns).
    scalars = jnp.concatenate(
        [bright, contrast, gamma, pr,
         jnp.zeros((stats.shape[0], 1), jnp.float32)], axis=1)
    return scalars, pr, filter_parameters
    # TODO(synk): the 4-filter image stack the reference IPAM also returns is
    # not materialized -- it is unused by Architecture.forward's outputs.


# TODO(synk): Attention_module.Cross_Modality_Fusion source not provided;
# stand-in: depth-driven channel attention gates RGB features, residual add
# with depth features, then 1x1 projection in_c -> out_c, all fused in Pallas.
def make_cmf_params(key, ci, co):
    ks = jax.random.split(key, 3)
    hidden = max(ci // 4, 8)
    return {"fc1": make_small_linear(ks[0], ci, hidden),
            "fc2": make_small_linear(ks[1], hidden, ci),
            "proj": make_linear(ks[2], ci, co)}


def cross_modality_fusion(R, D, p):
    a = small_linear(gap(D), p["fc1"], "relu")
    gate = small_linear(a, p["fc2"], "sigmoid")       # (n, ci) channel gate
    return cmf_gated_proj(R, D, gate, p["proj"])      # gated add fused in MXU


# TODO(synk): Attention_module.PMA_decoder source not provided; stand-in is a
# top-down FPN-style decoder with 1x1 laterals (upsample-add fused into the
# lateral matmul epilogue) and per-scale 64->1 prediction heads.
def make_decoder_params(key, chans):
    ks = jax.random.split(key, len(chans) + 1)
    p = {f"lat{i}": make_linear(ks[i], ci, 64) for i, ci in enumerate(chans)}
    wh = 0.125 * jax.random.normal(ks[-1], (64, 4), jnp.float32)
    p["heads_w"] = jnp.zeros((128, 4), jnp.float32).at[:64].set(wh)
    p["heads_b"] = jnp.zeros((4,), jnp.float32)
    return p


def pma_decoder(f1, f2, f3, f4, p, out_hw):
    def lateral(f, lin, up=None):
        n, hh, ww, c = f.shape
        add = None if up is None else up.reshape(n * hh * ww, up.shape[-1])
        y = matmul_bias_act(f.reshape(n * hh * ww, c), lin, "relu", add=add)
        return y.reshape(n, hh, ww, lin["w"].shape[1])

    p4 = lateral(f4, p["lat3"])
    p3 = lateral(f3, p["lat2"], up=upsample2(p4))
    p2 = lateral(f2, p["lat1"], up=upsample2(p3))
    p1 = lateral(f1, p["lat0"], up=upsample2(p2))

    outs = []
    for i, f in enumerate((p1, p2, p3, p4)):
        n, hh, ww, c = f.shape
        head = (jnp.dot(f.reshape(n * hh * ww, c).astype(jnp.float32),
                        p["heads_w"][:, i:i + 1]) + p["heads_b"][i])
        o = head.reshape(n, hh, ww, 1)
        o = jax.image.resize(o, (n, out_hw[0], out_hw[1], 1), method="bilinear")
        outs.append(nhwc_to_nchw(o))
    return tuple(outs)


# ----------------------------------------------------------------------------
# Architecture
# ----------------------------------------------------------------------------
IN_CHANNELS = [256, 512, 1024, 2048]
OUT_CHANNELS = [64, 128, 256, 512]


def make_architecture_params(seed=0):
    k = jax.random.split(jax.random.PRNGKey(seed), 9)
    return {
        "rgb_net": make_backbone_params(k[0], 3),
        "depth_net": make_backbone_params(k[1], 7),   # enhanced: 3+3+1 channels
        "ipam1": make_ipam_params(k[2]),
        "ipam2": make_ipam_params(k[3]),
        "fusion": [make_cmf_params(k[4 + i], IN_CHANNELS[i], OUT_CHANNELS[i])
                   for i in range(4)],
        "decoder": make_decoder_params(k[8], OUT_CHANNELS),
    }


def architecture_forward(params, RGB, depth):
    """RGB: (n,3,h,w) NCHW, depth: (n,1,h,w) NCHW -> 4 saliency maps (n,1,h,w)."""
    n, c, h, w = RGB.shape
    rgb_nhwc = nchw_to_nhwc(RGB).astype(jnp.bfloat16)
    depth_nhwc = nchw_to_nhwc(depth).astype(jnp.bfloat16)

    gap_rgb = gap(rgb_nhwc)                                  # (n, 3)
    gap_d = gap(depth_nhwc)                                  # (n, 1)

    # IPAM 1: enhance the RGB image conditioned on (RGB, depth) statistics.
    s1, _pr, _fp = ipam_predict(
        jnp.concatenate([gap_rgb, gap_d], axis=1), params["ipam1"])
    fi1 = ipam_apply(rgb_nhwc, s1)                           # (n,h,w,3)

    # IPAM 2: the depth triplet's 3 channels are identical -> filter the single
    # depth channel once and broadcast (3x less data through the kernel).
    stats2 = jnp.concatenate([jnp.tile(gap_d, (1, 3)), gap_d], axis=1)
    s2, _, _ = ipam_predict(stats2, params["ipam2"])
    fi2 = jnp.broadcast_to(ipam_apply(depth_nhwc, s2), (n, h, w, 3))

    enhanced = jnp.concatenate([fi1, fi2, depth_nhwc], axis=-1)   # (n,h,w,7)

    R1, R2, R3, R4 = backbone(rgb_nhwc, params["rgb_net"])
    D1, D2, D3, D4 = backbone(enhanced, params["depth_net"])

    f1 = cross_modality_fusion(R1, D1, params["fusion"][0])
    f2 = cross_modality_fusion(R2, D2, params["fusion"][1])
    f3 = cross_modality_fusion(R3, D3, params["fusion"][2])
    f4 = cross_modality_fusion(R4, D4, params["fusion"][3])

    return pma_decoder(f1, f2, f3, f4, params["decoder"], (h, w))


if __name__ == "__main__":
    key = jax.random.PRNGKey(0)
    k1, k2 = jax.random.split(key)
    n, H, W = 2, 32, 32                 # small but keeps the /32 pyramid valid
    RGB = jax.random.uniform(k1, (n, 3, H, W), jnp.float32)
    depth = jax.random.uniform(k2, (n, 1, H, W), jnp.float32)

    params = make_architecture_params(0)
    # params closed over (their Python-int shape metadata stays static).
    fwd = jax.jit(lambda rgb, d: architecture_forward(params, rgb, d))
    out_1, out_2, out_3, out_4 = fwd(RGB, depth)
    jax.block_until_ready((out_1, out_2, out_3, out_4))

    assert out_1.shape == (n, 1, H, W) and out_4.shape == (n, 1, H, W)
    assert all(bool(jnp.all(jnp.isfinite(o)))
               for o in (out_1, out_2, out_3, out_4))
    print("KERNEL_OK")
</pallas_src>

<mosaic_0001>
module attributes {stable_mosaic.version = 11 : i64} {
  func.func @_matmul_kernel(%arg0: i32, %arg1: i32, %arg2: i32, %arg3: memref<512x128xbf16, #tpu.memory_space<vmem>>, %arg4: memref<128x128xbf16, #tpu.memory_space<vmem>>, %arg5: memref<1x128xf32, #tpu.memory_space<vmem>>, %arg6: memref<512x128xbf16, #tpu.memory_space<vmem>>, %arg7: memref<512x128xf32, #tpu.memory_space<vmem>>) attributes {dimension_semantics = [#tpu.dimension_semantics<parallel>, #tpu.dimension_semantics<parallel>, #tpu.dimension_semantics<arbitrary>], iteration_bounds = array<i64: 1, 1, 1>, scalar_prefetch = 0 : i64, scratch_operands = 1 : i64, tpu.core_type = #tpu.core_type<tc>, window_params = [{transform_indices = @transform_0, window_bounds = array<i64: 512, 128>}, {transform_indices = @transform_1, window_bounds = array<i64: 128, 128>}, {transform_indices = @transform_2, window_bounds = array<i64: 1, 128>}, {transform_indices = @transform_3, window_bounds = array<i64: 512, 128>}]} {
    %c0_i32 = arith.constant 0 : i32
    %0 = arith.cmpi eq, %arg2, %c0_i32 : i32
    %1 = arith.extui %0 : i1 to i32
    %c0_i32_0 = arith.constant 0 : i32
    %2 = arith.cmpi ne, %1, %c0_i32_0 : i32
    scf.if %2 {
      %cst_10 = arith.constant 0.000000e+00 : f32
      %12 = vector.broadcast %cst_10 : f32 to vector<512x128xf32>
      %c0_11 = arith.constant 0 : index
      %c0_12 = arith.constant 0 : index
      %13 = vector.load %arg7[%c0_11, %c0_12] : memref<512x128xf32, #tpu.memory_space<vmem>>, vector<512x128xf32>
      tpu.vector_store %arg7[%c0_11, %c0_12], %12 {strides = array<i32>} : memref<512x128xf32, #tpu.memory_space<vmem>>, vector<512x128xf32>,
    } else {
    }
    %c0 = arith.constant 0 : index
    %c0_1 = arith.constant 0 : index
    %3 = vector.load %arg7[%c0, %c0_1] : memref<512x128xf32, #tpu.memory_space<vmem>>, vector<512x128xf32>
    %c0_2 = arith.constant 0 : index
    %c0_3 = arith.constant 0 : index
    %4 = vector.load %arg3[%c0_2, %c0_3] : memref<512x128xbf16, #tpu.memory_space<vmem>>, vector<512x128xbf16>
    %c0_4 = arith.constant 0 : index
    %c0_5 = arith.constant 0 : index
    %5 = vector.load %arg4[%c0_4, %c0_5] : memref<128x128xbf16, #tpu.memory_space<vmem>>, vector<128x128xbf16>
    %cst = arith.constant dense<0.000000e+00> : vector<512x128xf32>
    %6 = tpu.matmul %4, %5, %cst {dimension_numbers = #tpu.dot_dimension_numbers<[1], [0], [0], [1], [0, 0, 1, 1], [], []>} : vector<512x128xbf16>, vector<128x128xbf16>, vector<512x128xf32> -> vector<512x128xf32>
    %7 = arith.addf %3, %6 : vector<512x128xf32>
    %c0_6 = arith.constant 0 : index
    %c0_7 = arith.constant 0 : index
    %8 = vector.load %arg7[%c0_6, %c0_7] : memref<512x128xf32, #tpu.memory_space<vmem>>, vector<512x128xf32>
    tpu.vector_store %arg7[%c0_6, %c0_7], %7 {strides = array<i32>} : memref<512x128xf32, #tpu.memory_space<vmem>>, vector<512x128xf32>,
    %c0_i32_8 = arith.constant 0 : i32
    %9 = arith.cmpi eq, %arg2, %c0_i32_8 : i32
    %10 = arith.extui %9 : i1 to i32
    %c0_i32_9 = arith.constant 0 : i32
    %11 = arith.cmpi ne, %10, %c0_i32_9 : i32
    scf.if %11 {
      %c0_10 = arith.constant 0 : index
      %c0_11 = arith.constant 0 : index
      %12 = vector.load %arg7[%c0_10, %c0_11] : memref<512x128xf32, #tpu.memory_space<vmem>>, vector<512x128xf32>
      %c0_12 = arith.constant 0 : index
      %c0_13 = arith.constant 0 : index
      %13 = vector.load %arg5[%c0_12, %c0_13] : memref<1x128xf32, #tpu.memory_space<vmem>>, vector<1x128xf32>
      %14 = vector.broadcast %13 : vector<1x128xf32> to vector<512x128xf32>
      %15 = arith.addf %12, %14 : vector<512x128xf32>
      %cst_14 = arith.constant 0.000000e+00 : f32
      %16 = vector.broadcast %cst_14 : f32 to vector<512x128xf32>
      %17 = arith.maximumf %15, %16 : vector<512x128xf32>
      %18 = arith.truncf %17 : vector<512x128xf32> to vector<512x128xbf16>
      %c0_15 = arith.constant 0 : index
      %c0_16 = arith.constant 0 : index
      %19 = vector.load %arg6[%c0_15, %c0_16] : memref<512x128xbf16, #tpu.memory_space<vmem>>, vector<512x128xbf16>
      tpu.vector_store %arg6[%c0_15, %c0_16], %18 {strides = array<i32>} : memref<512x128xbf16, #tpu.memory_space<vmem>>, vector<512x128xbf16>,
    } else {
    }
    return
  }
  func.func @transform_0(%arg0: i32, %arg1: i32, %arg2: i32) -> (i32, i32) {
    %c0_i32 = arith.constant 0 : i32
    return %arg0, %arg2 : i32, i32
  }
  func.func @transform_1(%arg0: i32, %arg1: i32, %arg2: i32) -> (i32, i32) {
    %c0_i32 = arith.constant 0 : i32
    return %arg2, %arg1 : i32, i32
  }
  func.func @transform_2(%arg0: i32, %arg1: i32, %arg2: i32) -> (i32, i32) {
    %c0_i32 = arith.constant 0 : i32
    %c0_i32_0 = arith.constant 0 : i32
    return %c0_i32, %arg1 : i32, i32
  }
  func.func @transform_3(%arg0: i32, %arg1: i32, %arg2: i32) -> (i32, i32) {
    %c0_i32 = arith.constant 0 : i32
    return %arg0, %arg1 : i32, i32
  }
}

module attributes {stable_mosaic.version = 11 : i64} {
  func.func @_matmul_kernel(%arg0: i32, %arg1: i32, %arg2: i32, %arg3: memref<128x128xbf16, #tpu.memory_space<vmem>>, %arg4: memref<128x256xbf16, #tpu.memory_space<vmem>>, %arg5: memref<1x256xf32, #tpu.memory_space<vmem>>, %arg6: memref<128x256xbf16, #tpu.memory_space<vmem>>, %arg7: memref<128x256xf32, #tpu.memory_space<vmem>>) attributes {dimension_semantics = [#tpu.dimension_semantics<parallel>, #tpu.dimension_semantics<parallel>, #tpu.dimension_semantics<arbitrary>], iteration_bounds = array<i64: 1, 1, 1>, scalar_prefetch = 0 : i64, scratch_operands = 1 : i64, tpu.core_type = #tpu.core_type<tc>, window_params = [{transform_indices = @transform_0, window_bounds = array<i64: 128, 128>}, {transform_indices = @transform_1, window_bounds = array<i64: 128, 256>}, {transform_indices = @transform_2, window_bounds = array<i64: 1, 256>}, {transform_indices = @transform_3, window_bounds = array<i64: 128, 256>}]} {
    %c0_i32 = arith.constant 0 : i32
    %0 = arith.cmpi eq, %arg2, %c0_i32 : i32
    %1 = arith.extui %0 : i1 to i32
    %c0_i32_0 = arith.constant 0 : i32
    %2 = arith.cmpi ne, %1, %c0_i32_0 : i32
    scf.if %2 {
      %cst_10 = arith.constant 0.000000e+00 : f32
      %12 = vector.broadcast %cst_10 : f32 to vector<128x256xf32>
      %c0_11 = arith.constant 0 : index
      %c0_12 = arith.constant 0 : index
      %13 = vector.load %arg7[%c0_11, %c0_12] : memref<128x256xf32, #tpu.memory_space<vmem>>, vector<128x256xf32>
      tpu.vector_store %arg7[%c0_11, %c0_12], %12 {strides = array<i32>} : memref<128x256xf32, #tpu.memory_space<vmem>>, vector<128x256xf32>,
    } else {
    }
    %c0 = arith.constant 0 : index
    %c0_1 = arith.constant 0 : index
    %3 = vector.load %arg7[%c0, %c0_1] : memref<128x256xf32, #tpu.memory_space<vmem>>, vector<128x256xf32>
    %c0_2 = arith.constant 0 : index
    %c0_3 = arith.constant 0 : index
    %4 = vector.load %arg3[%c0_2, %c0_3] : memref<128x128xbf16, #tpu.memory_space<vmem>>, vector<128x128xbf16>
    %c0_4 = arith.constant 0 : index
    %c0_5 = arith.constant 0 : index
    %5 = vector.load %arg4[%c0_4, %c0_5] : memref<128x256xbf16, #tpu.memory_space<vmem>>, vector<128x256xbf16>
    %cst = arith.constant dense<0.000000e+00> : vector<128x256xf32>
    %6 = tpu.matmul %4, %5, %cst {dimension_numbers = #tpu.dot_dimension_numbers<[1], [0], [0], [1], [0, 0, 1, 1], [], []>} : vector<128x128xbf16>, vector<128x256xbf16>, vector<128x256xf32> -> vector<128x256xf32>
    %7 = arith.addf %3, %6 : vector<128x256xf32>
    %c0_6 = arith.constant 0 : index
    %c0_7 = arith.constant 0 : index
    %8 = vector.load %arg7[%c0_6, %c0_7] : memref<128x256xf32, #tpu.memory_space<vmem>>, vector<128x256xf32>
    tpu.vector_store %arg7[%c0_6, %c0_7], %7 {strides = array<i32>} : memref<128x256xf32, #tpu.memory_space<vmem>>, vector<128x256xf32>,
    %c0_i32_8 = arith.constant 0 : i32
    %9 = arith.cmpi eq, %arg2, %c0_i32_8 : i32
    %10 = arith.extui %9 : i1 to i32
    %c0_i32_9 = arith.constant 0 : i32
    %11 = arith.cmpi ne, %10, %c0_i32_9 : i32
    scf.if %11 {
      %c0_10 = arith.constant 0 : index
      %c0_11 = arith.constant 0 : index
      %12 = vector.load %arg7[%c0_10, %c0_11] : memref<128x256xf32, #tpu.memory_space<vmem>>, vector<128x256xf32>
      %c0_12 = arith.constant 0 : index
      %c0_13 = arith.constant 0 : index
      %13 = vector.load %arg5[%c0_12, %c0_13] : memref<1x256xf32, #tpu.memory_space<vmem>>, vector<1x256xf32>
      %14 = vector.broadcast %13 : vector<1x256xf32> to vector<128x256xf32>
      %15 = arith.addf %12, %14 : vector<128x256xf32>
      %cst_14 = arith.constant 0.000000e+00 : f32
      %16 = vector.broadcast %cst_14 : f32 to vector<128x256xf32>
      %17 = arith.maximumf %15, %16 : vector<128x256xf32>
      %18 = arith.truncf %17 : vector<128x256xf32> to vector<128x256xbf16>
      %c0_15 = arith.constant 0 : index
      %c0_16 = arith.constant 0 : index
      %19 = vector.load %arg6[%c0_15, %c0_16] : memref<128x256xbf16, #tpu.memory_space<vmem>>, vector<128x256xbf16>
      tpu.vector_store %arg6[%c0_15, %c0_16], %18 {strides = array<i32>} : memref<128x256xbf16, #tpu.memory_space<vmem>>, vector<128x256xbf16>,
    } else {
    }
    return
  }
  func.func @transform_0(%arg0: i32, %arg1: i32, %arg2: i32) -> (i32, i32) {
    %c0_i32 = arith.constant 0 : i32
    return %arg0, %arg2 : i32, i32
  }
  func.func @transform_1(%arg0: i32, %arg1: i32, %arg2: i32) -> (i32, i32) {
    %c0_i32 = arith.constant 0 : i32
    return %arg2, %arg1 : i32, i32
  }
  func.func @transform_2(%arg0: i32, %arg1: i32, %arg2: i32) -> (i32, i32) {
    %c0_i32 = arith.constant 0 : i32
    %c0_i32_0 = arith.constant 0 : i32
    return %c0_i32, %arg1 : i32, i32
  }
  func.func @transform_3(%arg0: i32, %arg1: i32, %arg2: i32) -> (i32, i32) {
    %c0_i32 = arith.constant 0 : i32
    return %arg0, %arg1 : i32, i32
  }
}

module attributes {stable_mosaic.version = 11 : i64} {
  func.func @_ipam_kernel(%arg0: i32, %arg1: i32, %arg2: memref<2x8xf32, #tpu.memory_space<smem>>, %arg3: memref<1x16x128xbf16, #tpu.memory_space<vmem>>, %arg4: memref<1x16x128xbf16, #tpu.memory_space<vmem>>) attributes {dimension_semantics = [#tpu.dimension_semantics<parallel>, #tpu.dimension_semantics<parallel>], iteration_bounds = array<i64: 2, 1>, scalar_prefetch = 0 : i64, scratch_operands = 0 : i64, tpu.core_type = #tpu.core_type<tc>, window_params = [{transform_indices = @transform_0, window_bounds = array<i64: 2, 8>}, {transform_indices = @transform_1, window_bounds = array<i64: 1, 16, 128>}, {transform_indices = @transform_2, window_bounds = array<i64: 1, 16, 128>}]} {
    %c0 = arith.constant 0 : index
    %c0_0 = arith.constant 0 : index
    %c0_1 = arith.constant 0 : index
    %0 = vector.load %arg3[%c0, %c0_0, %c0_1] : memref<1x16x128xbf16, #tpu.memory_space<vmem>>, vector<1x16x128xbf16>
    %1 = vector.shape_cast %0 : vector<1x16x128xbf16> to vector<16x128xbf16>
    %2 = arith.extf %1 : vector<16x128xbf16> to vector<16x128xf32>
    %3 = arith.index_cast %arg0 : i32 to index
    %c0_2 = arith.constant 0 : index
    %4 = memref.load %arg2[%3, %c0_2] : memref<2x8xf32, #tpu.memory_space<smem>>
    %5 = arith.index_cast %arg0 : i32 to index
    %c1 = arith.constant 1 : index
    %6 = memref.load %arg2[%5, %c1] : memref<2x8xf32, #tpu.memory_space<smem>>
    %7 = arith.index_cast %arg0 : i32 to index
    %c2 = arith.constant 2 : index
    %8 = memref.load %arg2[%7, %c2] : memref<2x8xf32, #tpu.memory_space<smem>>
    %9 = arith.index_cast %arg0 : i32 to index
    %c3 = arith.constant 3 : index
    %10 = memref.load %arg2[%9, %c3] : memref<2x8xf32, #tpu.memory_space<smem>>
    %11 = arith.index_cast %arg0 : i32 to index
    %c4 = arith.constant 4 : index
    %12 = memref.load %arg2[%11, %c4] : memref<2x8xf32, #tpu.memory_space<smem>>
    %13 = arith.index_cast %arg0 : i32 to index
    %c5 = arith.constant 5 : index
    %14 = memref.load %arg2[%13, %c5] : memref<2x8xf32, #tpu.memory_space<smem>>
    %15 = arith.index_cast %arg0 : i32 to index
    %c6 = arith.constant 6 : index
    %16 = memref.load %arg2[%15, %c6] : memref<2x8xf32, #tpu.memory_space<smem>>
    %cst = arith.constant 9.99999974E-5 : f32
    %cst_3 = arith.constant 1.000000e+00 : f32
    %17 = vector.broadcast %cst : f32 to vector<16x128xf32>
    %18 = arith.maximumf %17, %2 : vector<16x128xf32>
    %19 = vector.broadcast %cst_3 : f32 to vector<16x128xf32>
    %20 = arith.minimumf %19, %18 : vector<16x128xf32>
    %21 = math.log %20 : vector<16x128xf32>
    %22 = vector.broadcast %8 : f32 to vector<16x128xf32>
    %23 = arith.mulf %22, %21 : vector<16x128xf32>
    %24 = math.exp %23 : vector<16x128xf32>
    %25 = vector.broadcast %10 : f32 to vector<16x128xf32>
    %26 = arith.mulf %25, %20 : vector<16x128xf32>
    %27 = vector.broadcast %4 : f32 to vector<16x128xf32>
    %28 = arith.addf %20, %27 : vector<16x128xf32>
    %29 = vector.broadcast %12 : f32 to vector<16x128xf32>
    %30 = arith.mulf %29, %28 : vector<16x128xf32>
    %31 = arith.addf %26, %30 : vector<16x128xf32>
    %32 = vector.broadcast %6 : f32 to vector<16x128xf32>
    %33 = arith.mulf %20, %32 : vector<16x128xf32>
    %34 = vector.broadcast %14 : f32 to vector<16x128xf32>
    %35 = arith.mulf %34, %33 : vector<16x128xf32>
    %36 = arith.addf %31, %35 : vector<16x128xf32>
    %37 = vector.broadcast %16 : f32 to vector<16x128xf32>
    %38 = arith.mulf %37, %24 : vector<16x128xf32>
    %39 = arith.addf %36, %38 : vector<16x128xf32>
    %40 = arith.truncf %39 : vector<16x128xf32> to vector<16x128xbf16>
    %c0_4 = arith.constant 0 : index
    %c0_5 = arith.constant 0 : index
    %c0_6 = arith.constant 0 : index
    %41 = vector.load %arg4[%c0_4, %c0_5, %c0_6] : memref<1x16x128xbf16, #tpu.memory_space<vmem>>, vector<1x16x128xbf16>
    %42 = vector.shape_cast %41 : vector<1x16x128xbf16> to vector<16x128xbf16>
    %43 = vector.shape_cast %40 : vector<16x128xbf16> to vector<1x16x128xbf16>
    tpu.vector_store %arg4[%c0_4, %c0_5, %c0_6], %43 {strides = array<i32>} : memref<1x16x128xbf16, #tpu.memory_space<vmem>>, vector<1x16x128xbf16>,
    return
  }
  func.func @transform_0(%arg0: i32, %arg1: i32) -> (i32, i32) {
    %c0_i32 = arith.constant 0 : i32
    %c0_i32_0 = arith.constant 0 : i32
    %c0_i32_1 = arith.constant 0 : i32
    return %c0_i32, %c0_i32_0 : i32, i32
  }
  func.func @transform_1(%arg0: i32, %arg1: i32) -> (i32, i32, i32) {
    %c0_i32 = arith.constant 0 : i32
    %c0_i32_0 = arith.constant 0 : i32
    return %arg0, %arg1, %c0_i32 : i32, i32, i32
  }
  func.func @transform_2(%arg0: i32, %arg1: i32) -> (i32, i32, i32) {
    %c0_i32 = arith.constant 0 : i32
    %c0_i32_0 = arith.constant 0 : i32
    return %arg0, %arg1, %c0_i32 : i32, i32, i32
  }
}

module attributes {stable_mosaic.version = 11 : i64} {
  func.func @_ipam_kernel(%arg0: i32, %arg1: i32, %arg2: memref<2x8xf32, #tpu.memory_space<smem>>, %arg3: memref<1x32x128xbf16, #tpu.memory_space<vmem>>, %arg4: memref<1x32x128xbf16, #tpu.memory_space<vmem>>) attributes {dimension_semantics = [#tpu.dimension_semantics<parallel>, #tpu.dimension_semantics<parallel>], iteration_bounds = array<i64: 2, 1>, scalar_prefetch = 0 : i64, scratch_operands = 0 : i64, tpu.core_type = #tpu.core_type<tc>, window_params = [{transform_indices = @transform_0, window_bounds = array<i64: 2, 8>}, {transform_indices = @transform_1, window_bounds = array<i64: 1, 32, 128>}, {transform_indices = @transform_2, window_bounds = array<i64: 1, 32, 128>}]} {
    %c0 = arith.constant 0 : index
    %c0_0 = arith.constant 0 : index
    %c0_1 = arith.constant 0 : index
    %0 = vector.load %arg3[%c0, %c0_0, %c0_1] : memref<1x32x128xbf16, #tpu.memory_space<vmem>>, vector<1x32x128xbf16>
    %1 = vector.shape_cast %0 : vector<1x32x128xbf16> to vector<32x128xbf16>
    %2 = arith.extf %1 : vector<32x128xbf16> to vector<32x128xf32>
    %3 = arith.index_cast %arg0 : i32 to index
    %c0_2 = arith.constant 0 : index
    %4 = memref.load %arg2[%3, %c0_2] : memref<2x8xf32, #tpu.memory_space<smem>>
    %5 = arith.index_cast %arg0 : i32 to index
    %c1 = arith.constant 1 : index
    %6 = memref.load %arg2[%5, %c1] : memref<2x8xf32, #tpu.memory_space<smem>>
    %7 = arith.index_cast %arg0 : i32 to index
    %c2 = arith.constant 2 : index
    %8 = memref.load %arg2[%7, %c2] : memref<2x8xf32, #tpu.memory_space<smem>>
    %9 = arith.index_cast %arg0 : i32 to index
    %c3 = arith.constant 3 : index
    %10 = memref.load %arg2[%9, %c3] : memref<2x8xf32, #tpu.memory_space<smem>>
    %11 = arith.index_cast %arg0 : i32 to index
    %c4 = arith.constant 4 : index
    %12 = memref.load %arg2[%11, %c4] : memref<2x8xf32, #tpu.memory_space<smem>>
    %13 = arith.index_cast %arg0 : i32 to index
    %c5 = arith.constant 5 : index
    %14 = memref.load %arg2[%13, %c5] : memref<2x8xf32, #tpu.memory_space<smem>>
    %15 = arith.index_cast %arg0 : i32 to index
    %c6 = arith.constant 6 : index
    %16 = memref.load %arg2[%15, %c6] : memref<2x8xf32, #tpu.memory_space<smem>>
    %cst = arith.constant 9.99999974E-5 : f32
    %cst_3 = arith.constant 1.000000e+00 : f32
    %17 = vector.broadcast %cst : f32 to vector<32x128xf32>
    %18 = arith.maximumf %17, %2 : vector<32x128xf32>
    %19 = vector.broadcast %cst_3 : f32 to vector<32x128xf32>
    %20 = arith.minimumf %19, %18 : vector<32x128xf32>
    %21 = math.log %20 : vector<32x128xf32>
    %22 = vector.broadcast %8 : f32 to vector<32x128xf32>
    %23 = arith.mulf %22, %21 : vector<32x128xf32>
    %24 = math.exp %23 : vector<32x128xf32>
    %25 = vector.broadcast %10 : f32 to vector<32x128xf32>
    %26 = arith.mulf %25, %20 : vector<32x128xf32>
    %27 = vector.broadcast %4 : f32 to vector<32x128xf32>
    %28 = arith.addf %20, %27 : vector<32x128xf32>
    %29 = vector.broadcast %12 : f32 to vector<32x128xf32>
    %30 = arith.mulf %29, %28 : vector<32x128xf32>
    %31 = arith.addf %26, %30 : vector<32x128xf32>
    %32 = vector.broadcast %6 : f32 to vector<32x128xf32>
    %33 = arith.mulf %20, %32 : vector<32x128xf32>
    %34 = vector.broadcast %14 : f32 to vector<32x128xf32>
    %35 = arith.mulf %34, %33 : vector<32x128xf32>
    %36 = arith.addf %31, %35 : vector<32x128xf32>
    %37 = vector.broadcast %16 : f32 to vector<32x128xf32>
    %38 = arith.mulf %37, %24 : vector<32x128xf32>
    %39 = arith.addf %36, %38 : vector<32x128xf32>
    %40 = arith.truncf %39 : vector<32x128xf32> to vector<32x128xbf16>
    %c0_4 = arith.constant 0 : index
    %c0_5 = arith.constant 0 : index
    %c0_6 = arith.constant 0 : index
    %41 = vector.load %arg4[%c0_4, %c0_5, %c0_6] : memref<1x32x128xbf16, #tpu.memory_space<vmem>>, vector<1x32x128xbf16>
    %42 = vector.shape_cast %41 : vector<1x32x128xbf16> to vector<32x128xbf16>
    %43 = vector.shape_cast %40 : vector<32x128xbf16> to vector<1x32x128xbf16>
    tpu.vector_store %arg4[%c0_4, %c0_5, %c0_6], %43 {strides = array<i32>} : memref<1x32x128xbf16, #tpu.memory_space<vmem>>, vector<1x32x128xbf16>,
    return
  }
  func.func @transform_0(%arg0: i32, %arg1: i32) -> (i32, i32) {
    %c0_i32 = arith.constant 0 : i32
    %c0_i32_0 = arith.constant 0 : i32
    %c0_i32_1 = arith.constant 0 : i32
    return %c0_i32, %c0_i32_0 : i32, i32
  }
  func.func @transform_1(%arg0: i32, %arg1: i32) -> (i32, i32, i32) {
    %c0_i32 = arith.constant 0 : i32
    %c0_i32_0 = arith.constant 0 : i32
    return %arg0, %arg1, %c0_i32 : i32, i32, i32
  }
  func.func @transform_2(%arg0: i32, %arg1: i32) -> (i32, i32, i32) {
    %c0_i32 = arith.constant 0 : i32
    %c0_i32_0 = arith.constant 0 : i32
    return %arg0, %arg1, %c0_i32 : i32, i32, i32
  }
}

module attributes {stable_mosaic.version = 11 : i64} {
  func.func @_cmf_proj_kernel(%arg0: i32, %arg1: i32, %arg2: i32, %arg3: i32, %arg4: memref<1x64x256xbf16, #tpu.memory_space<vmem>>, %arg5: memref<1x64x256xbf16, #tpu.memory_space<vmem>>, %arg6: memref<1x1x256xf32, #tpu.memory_space<vmem>>, %arg7: memref<256x128xbf16, #tpu.memory_space<vmem>>, %arg8: memref<1x128xf32, #tpu.memory_space<vmem>>, %arg9: memref<1x64x128xbf16, #tpu.memory_space<vmem>>, %arg10: memref<64x128xf32, #tpu.memory_space<vmem>>) attributes {dimension_semantics = [#tpu.dimension_semantics<parallel>, #tpu.dimension_semantics<parallel>, #tpu.dimension_semantics<parallel>, #tpu.dimension_semantics<arbitrary>], iteration_bounds = array<i64: 2, 1, 1, 1>, scalar_prefetch = 0 : i64, scratch_operands = 1 : i64, tpu.core_type = #tpu.core_type<tc>, window_params = [{transform_indices = @transform_0, window_bounds = array<i64: 1, 64, 256>}, {transform_indices = @transform_1, window_bounds = array<i64: 1, 64, 256>}, {transform_indices = @transform_2, window_bounds = array<i64: 1, 1, 256>}, {transform_indices = @transform_3, window_bounds = array<i64: 256, 128>}, {transform_indices = @transform_4, window_bounds = array<i64: 1, 128>}, {transform_indices = @transform_5, window_bounds = array<i64: 1, 64, 128>}]} {
    %c0_i32 = arith.constant 0 : i32
    %0 = arith.cmpi eq, %arg3, %c0_i32 : i32
    %1 = arith.extui %0 : i1 to i32
    %c0_i32_0 = arith.constant 0 : i32
    %2 = arith.cmpi ne, %1, %c0_i32_0 : i32
    scf.if %2 {
      %cst_17 = arith.constant 0.000000e+00 : f32
      %23 = vector.broadcast %cst_17 : f32 to vector<64x128xf32>
      %c0_18 = arith.constant 0 : index
      %c0_19 = arith.constant 0 : index
      %24 = vector.load %arg10[%c0_18, %c0_19] : memref<64x128xf32, #tpu.memory_space<vmem>>, vector<64x128xf32>
      tpu.vector_store %arg10[%c0_18, %c0_19], %23 {strides = array<i32>} : memref<64x128xf32, #tpu.memory_space<vmem>>, vector<64x128xf32>,
    } else {
    }
    %c0 = arith.constant 0 : index
    %c0_1 = arith.constant 0 : index
    %c0_2 = arith.constant 0 : index
    %3 = vector.load %arg4[%c0, %c0_1, %c0_2] : memref<1x64x256xbf16, #tpu.memory_space<vmem>>, vector<1x64x256xbf16>
    %4 = vector.shape_cast %3 : vector<1x64x256xbf16> to vector<64x256xbf16>
    %5 = arith.extf %4 : vector<64x256xbf16> to vector<64x256xf32>
    %c0_3 = arith.constant 0 : index
    %c0_4 = arith.constant 0 : index
    %c0_5 = arith.constant 0 : index
    %6 = vector.load %arg6[%c0_3, %c0_4, %c0_5] : memref<1x1x256xf32, #tpu.memory_space<vmem>>, vector<1x1x256xf32>
    %7 = vector.shape_cast %6 : vector<1x1x256xf32> to vector<1x256xf32>
    %8 = vector.broadcast %7 : vector<1x256xf32> to vector<64x256xf32>
    %9 = arith.mulf %5, %8 : vector<64x256xf32>
    %c0_6 = arith.constant 0 : index
    %c0_7 = arith.constant 0 : index
    %c0_8 = arith.constant 0 : index
    %10 = vector.load %arg5[%c0_6, %c0_7, %c0_8] : memref<1x64x256xbf16, #tpu.memory_space<vmem>>, vector<1x64x256xbf16>
    %11 = vector.shape_cast %10 : vector<1x64x256xbf16> to vector<64x256xbf16>
    %12 = arith.extf %11 : vector<64x256xbf16> to vector<64x256xf32>
    %13 = arith.addf %9, %12 : vector<64x256xf32>
    %14 = arith.truncf %13 : vector<64x256xf32> to vector<64x256xbf16>
    %c0_9 = arith.constant 0 : index
    %c0_10 = arith.constant 0 : index
    %15 = vector.load %arg10[%c0_9, %c0_10] : memref<64x128xf32, #tpu.memory_space<vmem>>, vector<64x128xf32>
    %c0_11 = arith.constant 0 : index
    %c0_12 = arith.constant 0 : index
    %16 = vector.load %arg7[%c0_11, %c0_12] : memref<256x128xbf16, #tpu.memory_space<vmem>>, vector<256x128xbf16>
    %cst = arith.constant dense<0.000000e+00> : vector<64x128xf32>
    %17 = tpu.matmul %14, %16, %cst {dimension_numbers = #tpu.dot_dimension_numbers<[1], [0], [0], [1], [0, 0, 1, 1], [], []>} : vector<64x256xbf16>, vector<256x128xbf16>, vector<64x128xf32> -> vector<64x128xf32>
    %18 = arith.addf %15, %17 : vector<64x128xf32>
    %c0_13 = arith.constant 0 : index
    %c0_14 = arith.constant 0 : index
    %19 = vector.load %arg10[%c0_13, %c0_14] : memref<64x128xf32, #tpu.memory_space<vmem>>, vector<64x128xf32>
    tpu.vector_store %arg10[%c0_13, %c0_14], %18 {strides = array<i32>} : memref<64x128xf32, #tpu.memory_space<vmem>>, vector<64x128xf32>,
    %c0_i32_15 = arith.constant 0 : i32
    %20 = arith.cmpi eq, %arg3, %c0_i32_15 : i32
    %21 = arith.extui %20 : i1 to i32
    %c0_i32_16 = arith.constant 0 : i32
    %22 = arith.cmpi ne, %21, %c0_i32_16 : i32
    scf.if %22 {
      %c0_17 = arith.constant 0 : index
      %c0_18 = arith.constant 0 : index
      %23 = vector.load %arg10[%c0_17, %c0_18] : memref<64x128xf32, #tpu.memory_space<vmem>>, vector<64x128xf32>
      %c0_19 = arith.constant 0 : index
      %c0_20 = arith.constant 0 : index
      %24 = vector.load %arg8[%c0_19, %c0_20] : memref<1x128xf32, #tpu.memory_space<vmem>>, vector<1x128xf32>
      %25 = vector.broadcast %24 : vector<1x128xf32> to vector<64x128xf32>
      %26 = arith.addf %23, %25 : vector<64x128xf32>
      %cst_21 = arith.constant 0.000000e+00 : f32
      %27 = vector.broadcast %cst_21 : f32 to vector<64x128xf32>
      %28 = arith.maximumf %26, %27 : vector<64x128xf32>
      %29 = arith.truncf %28 : vector<64x128xf32> to vector<64x128xbf16>
      %c0_22 = arith.constant 0 : index
      %c0_23 = arith.constant 0 : index
      %c0_24 = arith.constant 0 : index
      %30 = vector.load %arg9[%c0_22, %c0_23, %c0_24] : memref<1x64x128xbf16, #tpu.memory_space<vmem>>, vector<1x64x128xbf16>
      %31 = vector.shape_cast %30 : vector<1x64x128xbf16> to vector<64x128xbf16>
      %32 = vector.shape_cast %29 : vector<64x128xbf16> to vector<1x64x128xbf16>
      tpu.vector_store %arg9[%c0_22, %c0_23, %c0_24], %32 {strides = array<i32>} : memref<1x64x128xbf16, #tpu.memory_space<vmem>>, vector<1x64x128xbf16>,
    } else {
    }
    return
  }
  func.func @transform_0(%arg0: i32, %arg1: i32, %arg2: i32, %arg3: i32) -> (i32, i32, i32) {
    %c0_i32 = arith.constant 0 : i32
    return %arg0, %arg1, %arg3 : i32, i32, i32
  }
  func.func @transform_1(%arg0: i32, %arg1: i32, %arg2: i32, %arg3: i32) -> (i32, i32, i32) {
    %c0_i32 = arith.constant 0 : i32
    return %arg0, %arg1, %arg3 : i32, i32, i32
  }
  func.func @transform_2(%arg0: i32, %arg1: i32, %arg2: i32, %arg3: i32) -> (i32, i32, i32) {
    %c0_i32 = arith.constant 0 : i32
    %c0_i32_0 = arith.constant 0 : i32
    return %arg0, %c0_i32, %arg3 : i32, i32, i32
  }
  func.func @transform_3(%arg0: i32, %arg1: i32, %arg2: i32, %arg3: i32) -> (i32, i32) {
    %c0_i32 = arith.constant 0 : i32
    return %arg3, %arg2 : i32, i32
  }
  func.func @transform_4(%arg0: i32, %arg1: i32, %arg2: i32, %arg3: i32) -> (i32, i32) {
    %c0_i32 = arith.constant 0 : i32
    %c0_i32_0 = arith.constant 0 : i32
    return %c0_i32, %arg2 : i32, i32
  }
  func.func @transform_5(%arg0: i32, %arg1: i32, %arg2: i32, %arg3: i32) -> (i32, i32, i32) {
    %c0_i32 = arith.constant 0 : i32
    return %arg0, %arg1, %arg2 : i32, i32, i32
  }
}

module attributes {stable_mosaic.version = 11 : i64} {
  func.func @_matmul_kernel(%arg0: i32, %arg1: i32, %arg2: i32, %arg3: memref<32x256xbf16, #tpu.memory_space<vmem>>, %arg4: memref<256x512xbf16, #tpu.memory_space<vmem>>, %arg5: memref<1x512xf32, #tpu.memory_space<vmem>>, %arg6: memref<32x512xbf16, #tpu.memory_space<vmem>>, %arg7: memref<32x512xf32, #tpu.memory_space<vmem>>) attributes {dimension_semantics = [#tpu.dimension_semantics<parallel>, #tpu.dimension_semantics<parallel>, #tpu.dimension_semantics<arbitrary>], iteration_bounds = array<i64: 1, 1, 1>, scalar_prefetch = 0 : i64, scratch_operands = 1 : i64, tpu.core_type = #tpu.core_type<tc>, window_params = [{transform_indices = @transform_0, window_bounds = array<i64: 32, 256>}, {transform_indices = @transform_1, window_bounds = array<i64: 256, 512>}, {transform_indices = @transform_2, window_bounds = array<i64: 1, 512>}, {transform_indices = @transform_3, window_bounds = array<i64: 32, 512>}]} {
    %c0_i32 = arith.constant 0 : i32
    %0 = arith.cmpi eq, %arg2, %c0_i32 : i32
    %1 = arith.extui %0 : i1 to i32
    %c0_i32_0 = arith.constant 0 : i32
    %2 = arith.cmpi ne, %1, %c0_i32_0 : i32
    scf.if %2 {
      %cst_10 = arith.constant 0.000000e+00 : f32
      %12 = vector.broadcast %cst_10 : f32 to vector<32x512xf32>
      %c0_11 = arith.constant 0 : index
      %c0_12 = arith.constant 0 : index
      %13 = vector.load %arg7[%c0_11, %c0_12] : memref<32x512xf32, #tpu.memory_space<vmem>>, vector<32x512xf32>
      tpu.vector_store %arg7[%c0_11, %c0_12], %12 {strides = array<i32>} : memref<32x512xf32, #tpu.memory_space<vmem>>, vector<32x512xf32>,
    } else {
    }
    %c0 = arith.constant 0 : index
    %c0_1 = arith.constant 0 : index
    %3 = vector.load %arg7[%c0, %c0_1] : memref<32x512xf32, #tpu.memory_space<vmem>>, vector<32x512xf32>
    %c0_2 = arith.constant 0 : index
    %c0_3 = arith.constant 0 : index
    %4 = vector.load %arg3[%c0_2, %c0_3] : memref<32x256xbf16, #tpu.memory_space<vmem>>, vector<32x256xbf16>
    %c0_4 = arith.constant 0 : index
    %c0_5 = arith.constant 0 : index
    %5 = vector.load %arg4[%c0_4, %c0_5] : memref<256x512xbf16, #tpu.memory_space<vmem>>, vector<256x512xbf16>
    %cst = arith.constant dense<0.000000e+00> : vector<32x512xf32>
    %6 = tpu.matmul %4, %5, %cst {dimension_numbers = #tpu.dot_dimension_numbers<[1], [0], [0], [1], [0, 0, 1, 1], [], []>} : vector<32x256xbf16>, vector<256x512xbf16>, vector<32x512xf32> -> vector<32x512xf32>
    %7 = arith.addf %3, %6 : vector<32x512xf32>
    %c0_6 = arith.constant 0 : index
    %c0_7 = arith.constant 0 : index
    %8 = vector.load %arg7[%c0_6, %c0_7] : memref<32x512xf32, #tpu.memory_space<vmem>>, vector<32x512xf32>
    tpu.vector_store %arg7[%c0_6, %c0_7], %7 {strides = array<i32>} : memref<32x512xf32, #tpu.memory_space<vmem>>, vector<32x512xf32>,
    %c0_i32_8 = arith.constant 0 : i32
    %9 = arith.cmpi eq, %arg2, %c0_i32_8 : i32
    %10 = arith.extui %9 : i1 to i32
    %c0_i32_9 = arith.constant 0 : i32
    %11 = arith.cmpi ne, %10, %c0_i32_9 : i32
    scf.if %11 {
      %c0_10 = arith.constant 0 : index
      %c0_11 = arith.constant 0 : index
      %12 = vector.load %arg7[%c0_10, %c0_11] : memref<32x512xf32, #tpu.memory_space<vmem>>, vector<32x512xf32>
      %c0_12 = arith.constant 0 : index
      %c0_13 = arith.constant 0 : index
      %13 = vector.load %arg5[%c0_12, %c0_13] : memref<1x512xf32, #tpu.memory_space<vmem>>, vector<1x512xf32>
      %14 = vector.broadcast %13 : vector<1x512xf32> to vector<32x512xf32>
      %15 = arith.addf %12, %14 : vector<32x512xf32>
      %cst_14 = arith.constant 0.000000e+00 : f32
      %16 = vector.broadcast %cst_14 : f32 to vector<32x512xf32>
      %17 = arith.maximumf %15, %16 : vector<32x512xf32>
      %18 = arith.truncf %17 : vector<32x512xf32> to vector<32x512xbf16>
      %c0_15 = arith.constant 0 : index
      %c0_16 = arith.constant 0 : index
      %19 = vector.load %arg6[%c0_15, %c0_16] : memref<32x512xbf16, #tpu.memory_space<vmem>>, vector<32x512xbf16>
      tpu.vector_store %arg6[%c0_15, %c0_16], %18 {strides = array<i32>} : memref<32x512xbf16, #tpu.memory_space<vmem>>, vector<32x512xbf16>,
    } else {
    }
    return
  }
  func.func @transform_0(%arg0: i32, %arg1: i32, %arg2: i32) -> (i32, i32) {
    %c0_i32 = arith.constant 0 : i32
    return %arg0, %arg2 : i32, i32
  }
  func.func @transform_1(%arg0: i32, %arg1: i32, %arg2: i32) -> (i32, i32) {
    %c0_i32 = arith.constant 0 : i32
    return %arg2, %arg1 : i32, i32
  }
  func.func @transform_2(%arg0: i32, %arg1: i32, %arg2: i32) -> (i32, i32) {
    %c0_i32 = arith.constant 0 : i32
    %c0_i32_0 = arith.constant 0 : i32
    return %c0_i32, %arg1 : i32, i32
  }
  func.func @transform_3(%arg0: i32, %arg1: i32, %arg2: i32) -> (i32, i32) {
    %c0_i32 = arith.constant 0 : i32
    return %arg0, %arg1 : i32, i32
  }
}

module attributes {stable_mosaic.version = 11 : i64} {
  func.func @_cmf_proj_kernel(%arg0: i32, %arg1: i32, %arg2: i32, %arg3: i32, %arg4: memref<1x16x512xbf16, #tpu.memory_space<vmem>>, %arg5: memref<1x16x512xbf16, #tpu.memory_space<vmem>>, %arg6: memref<1x1x512xf32, #tpu.memory_space<vmem>>, %arg7: memref<512x128xbf16, #tpu.memory_space<vmem>>, %arg8: memref<1x128xf32, #tpu.memory_space<vmem>>, %arg9: memref<1x16x128xbf16, #tpu.memory_space<vmem>>, %arg10: memref<16x128xf32, #tpu.memory_space<vmem>>) attributes {dimension_semantics = [#tpu.dimension_semantics<parallel>, #tpu.dimension_semantics<parallel>, #tpu.dimension_semantics<parallel>, #tpu.dimension_semantics<arbitrary>], iteration_bounds = array<i64: 2, 1, 1, 1>, scalar_prefetch = 0 : i64, scratch_operands = 1 : i64, tpu.core_type = #tpu.core_type<tc>, window_params = [{transform_indices = @transform_0, window_bounds = array<i64: 1, 16, 512>}, {transform_indices = @transform_1, window_bounds = array<i64: 1, 16, 512>}, {transform_indices = @transform_2, window_bounds = array<i64: 1, 1, 512>}, {transform_indices = @transform_3, window_bounds = array<i64: 512, 128>}, {transform_indices = @transform_4, window_bounds = array<i64: 1, 128>}, {transform_indices = @transform_5, window_bounds = array<i64: 1, 16, 128>}]} {
    %c0_i32 = arith.constant 0 : i32
    %0 = arith.cmpi eq, %arg3, %c0_i32 : i32
    %1 = arith.extui %0 : i1 to i32
    %c0_i32_0 = arith.constant 0 : i32
    %2 = arith.cmpi ne, %1, %c0_i32_0 : i32
    scf.if %2 {
      %cst_17 = arith.constant 0.000000e+00 : f32
      %23 = vector.broadcast %cst_17 : f32 to vector<16x128xf32>
      %c0_18 = arith.constant 0 : index
      %c0_19 = arith.constant 0 : index
      %24 = vector.load %arg10[%c0_18, %c0_19] : memref<16x128xf32, #tpu.memory_space<vmem>>, vector<16x128xf32>
      tpu.vector_store %arg10[%c0_18, %c0_19], %23 {strides = array<i32>} : memref<16x128xf32, #tpu.memory_space<vmem>>, vector<16x128xf32>,
    } else {
    }
    %c0 = arith.constant 0 : index
    %c0_1 = arith.constant 0 : index
    %c0_2 = arith.constant 0 : index
    %3 = vector.load %arg4[%c0, %c0_1, %c0_2] : memref<1x16x512xbf16, #tpu.memory_space<vmem>>, vector<1x16x512xbf16>
    %4 = vector.shape_cast %3 : vector<1x16x512xbf16> to vector<16x512xbf16>
    %5 = arith.extf %4 : vector<16x512xbf16> to vector<16x512xf32>
    %c0_3 = arith.constant 0 : index
    %c0_4 = arith.constant 0 : index
    %c0_5 = arith.constant 0 : index
    %6 = vector.load %arg6[%c0_3, %c0_4, %c0_5] : memref<1x1x512xf32, #tpu.memory_space<vmem>>, vector<1x1x512xf32>
    %7 = vector.shape_cast %6 : vector<1x1x512xf32> to vector<1x512xf32>
    %8 = vector.broadcast %7 : vector<1x512xf32> to vector<16x512xf32>
    %9 = arith.mulf %5, %8 : vector<16x512xf32>
    %c0_6 = arith.constant 0 : index
    %c0_7 = arith.constant 0 : index
    %c0_8 = arith.constant 0 : index
    %10 = vector.load %arg5[%c0_6, %c0_7, %c0_8] : memref<1x16x512xbf16, #tpu.memory_space<vmem>>, vector<1x16x512xbf16>
    %11 = vector.shape_cast %10 : vector<1x16x512xbf16> to vector<16x512xbf16>
    %12 = arith.extf %11 : vector<16x512xbf16> to vector<16x512xf32>
    %13 = arith.addf %9, %12 : vector<16x512xf32>
    %14 = arith.truncf %13 : vector<16x512xf32> to vector<16x512xbf16>
    %c0_9 = arith.constant 0 : index
    %c0_10 = arith.constant 0 : index
    %15 = vector.load %arg10[%c0_9, %c0_10] : memref<16x128xf32, #tpu.memory_space<vmem>>, vector<16x128xf32>
    %c0_11 = arith.constant 0 : index
    %c0_12 = arith.constant 0 : index
    %16 = vector.load %arg7[%c0_11, %c0_12] : memref<512x128xbf16, #tpu.memory_space<vmem>>, vector<512x128xbf16>
    %cst = arith.constant dense<0.000000e+00> : vector<16x128xf32>
    %17 = tpu.matmul %14, %16, %cst {dimension_numbers = #tpu.dot_dimension_numbers<[1], [0], [0], [1], [0, 0, 1, 1], [], []>} : vector<16x512xbf16>, vector<512x128xbf16>, vector<16x128xf32> -> vector<16x128xf32>
    %18 = arith.addf %15, %17 : vector<16x128xf32>
    %c0_13 = arith.constant 0 : index
    %c0_14 = arith.constant 0 : index
    %19 = vector.load %arg10[%c0_13, %c0_14] : memref<16x128xf32, #tpu.memory_space<vmem>>, vector<16x128xf32>
    tpu.vector_store %arg10[%c0_13, %c0_14], %18 {strides = array<i32>} : memref<16x128xf32, #tpu.memory_space<vmem>>, vector<16x128xf32>,
    %c0_i32_15 = arith.constant 0 : i32
    %20 = arith.cmpi eq, %arg3, %c0_i32_15 : i32
    %21 = arith.extui %20 : i1 to i32
    %c0_i32_16 = arith.constant 0 : i32
    %22 = arith.cmpi ne, %21, %c0_i32_16 : i32
    scf.if %22 {
      %c0_17 = arith.constant 0 : index
      %c0_18 = arith.constant 0 : index
      %23 = vector.load %arg10[%c0_17, %c0_18] : memref<16x128xf32, #tpu.memory_space<vmem>>, vector<16x128xf32>
      %c0_19 = arith.constant 0 : index
      %c0_20 = arith.constant 0 : index
      %24 = vector.load %arg8[%c0_19, %c0_20] : memref<1x128xf32, #tpu.memory_space<vmem>>, vector<1x128xf32>
      %25 = vector.broadcast %24 : vector<1x128xf32> to vector<16x128xf32>
      %26 = arith.addf %23, %25 : vector<16x128xf32>
      %cst_21 = arith.constant 0.000000e+00 : f32
      %27 = vector.broadcast %cst_21 : f32 to vector<16x128xf32>
      %28 = arith.maximumf %26, %27 : vector<16x128xf32>
      %29 = arith.truncf %28 : vector<16x128xf32> to vector<16x128xbf16>
      %c0_22 = arith.constant 0 : index
      %c0_23 = arith.constant 0 : index
      %c0_24 = arith.constant 0 : index
      %30 = vector.load %arg9[%c0_22, %c0_23, %c0_24] : memref<1x16x128xbf16, #tpu.memory_space<vmem>>, vector<1x16x128xbf16>
      %31 = vector.shape_cast %30 : vector<1x16x128xbf16> to vector<16x128xbf16>
      %32 = vector.shape_cast %29 : vector<16x128xbf16> to vector<1x16x128xbf16>
      tpu.vector_store %arg9[%c0_22, %c0_23, %c0_24], %32 {strides = array<i32>} : memref<1x16x128xbf16, #tpu.memory_space<vmem>>, vector<1x16x128xbf16>,
    } else {
    }
    return
  }
  func.func @transform_0(%arg0: i32, %arg1: i32, %arg2: i32, %arg3: i32) -> (i32, i32, i32) {
    %c0_i32 = arith.constant 0 : i32
    return %arg0, %arg1, %arg3 : i32, i32, i32
  }
  func.func @transform_1(%arg0: i32, %arg1: i32, %arg2: i32, %arg3: i32) -> (i32, i32, i32) {
    %c0_i32 = arith.constant 0 : i32
    return %arg0, %arg1, %arg3 : i32, i32, i32
  }
  func.func @transform_2(%arg0: i32, %arg1: i32, %arg2: i32, %arg3: i32) -> (i32, i32, i32) {
    %c0_i32 = arith.constant 0 : i32
    %c0_i32_0 = arith.constant 0 : i32
    return %arg0, %c0_i32, %arg3 : i32, i32, i32
  }
  func.func @transform_3(%arg0: i32, %arg1: i32, %arg2: i32, %arg3: i32) -> (i32, i32) {
    %c0_i32 = arith.constant 0 : i32
    return %arg3, %arg2 : i32, i32
  }
  func.func @transform_4(%arg0: i32, %arg1: i32, %arg2: i32, %arg3: i32) -> (i32, i32) {
    %c0_i32 = arith.constant 0 : i32
    %c0_i32_0 = arith.constant 0 : i32
    return %c0_i32, %arg2 : i32, i32
  }
  func.func @transform_5(%arg0: i32, %arg1: i32, %arg2: i32, %arg3: i32) -> (i32, i32, i32) {
    %c0_i32 = arith.constant 0 : i32
    return %arg0, %arg1, %arg2 : i32, i32, i32
  }
}

module attributes {stable_mosaic.version = 11 : i64} {
  func.func @_matmul_kernel(%arg0: i32, %arg1: i32, %arg2: i32, %arg3: memref<16x512xbf16, #tpu.memory_space<vmem>>, %arg4: memref<512x1024xbf16, #tpu.memory_space<vmem>>, %arg5: memref<1x1024xf32, #tpu.memory_space<vmem>>, %arg6: memref<16x1024xbf16, #tpu.memory_space<vmem>>, %arg7: memref<16x1024xf32, #tpu.memory_space<vmem>>) attributes {dimension_semantics = [#tpu.dimension_semantics<parallel>, #tpu.dimension_semantics<parallel>, #tpu.dimension_semantics<arbitrary>], iteration_bounds = array<i64: 1, 1, 1>, scalar_prefetch = 0 : i64, scratch_operands = 1 : i64, tpu.core_type = #tpu.core_type<tc>, window_params = [{transform_indices = @transform_0, window_bounds = array<i64: 16, 512>}, {transform_indices = @transform_1, window_bounds = array<i64: 512, 1024>}, {transform_indices = @transform_2, window_bounds = array<i64: 1, 1024>}, {transform_indices = @transform_3, window_bounds = array<i64: 16, 1024>}]} {
    %c0_i32 = arith.constant 0 : i32
    %0 = arith.cmpi eq, %arg2, %c0_i32 : i32
    %1 = arith.extui %0 : i1 to i32
    %c0_i32_0 = arith.constant 0 : i32
    %2 = arith.cmpi ne, %1, %c0_i32_0 : i32
    scf.if %2 {
      %cst_10 = arith.constant 0.000000e+00 : f32
      %12 = vector.broadcast %cst_10 : f32 to vector<16x1024xf32>
      %c0_11 = arith.constant 0 : index
      %c0_12 = arith.constant 0 : index
      %13 = vector.load %arg7[%c0_11, %c0_12] : memref<16x1024xf32, #tpu.memory_space<vmem>>, vector<16x1024xf32>
      tpu.vector_store %arg7[%c0_11, %c0_12], %12 {strides = array<i32>} : memref<16x1024xf32, #tpu.memory_space<vmem>>, vector<16x1024xf32>,
    } else {
    }
    %c0 = arith.constant 0 : index
    %c0_1 = arith.constant 0 : index
    %3 = vector.load %arg7[%c0, %c0_1] : memref<16x1024xf32, #tpu.memory_space<vmem>>, vector<16x1024xf32>
    %c0_2 = arith.constant 0 : index
    %c0_3 = arith.constant 0 : index
    %4 = vector.load %arg3[%c0_2, %c0_3] : memref<16x512xbf16, #tpu.memory_space<vmem>>, vector<16x512xbf16>
    %c0_4 = arith.constant 0 : index
    %c0_5 = arith.constant 0 : index
    %5 = vector.load %arg4[%c0_4, %c0_5] : memref<512x1024xbf16, #tpu.memory_space<vmem>>, vector<512x1024xbf16>
    %cst = arith.constant dense<0.000000e+00> : vector<16x1024xf32>
    %6 = tpu.matmul %4, %5, %cst {dimension_numbers = #tpu.dot_dimension_numbers<[1], [0], [0], [1], [0, 0, 1, 1], [], []>} : vector<16x512xbf16>, vector<512x1024xbf16>, vector<16x1024xf32> -> vector<16x1024xf32>
    %7 = arith.addf %3, %6 : vector<16x1024xf32>
    %c0_6 = arith.constant 0 : index
    %c0_7 = arith.constant 0 : index
    %8 = vector.load %arg7[%c0_6, %c0_7] : memref<16x1024xf32, #tpu.memory_space<vmem>>, vector<16x1024xf32>
    tpu.vector_store %arg7[%c0_6, %c0_7], %7 {strides = array<i32>} : memref<16x1024xf32, #tpu.memory_space<vmem>>, vector<16x1024xf32>,
    %c0_i32_8 = arith.constant 0 : i32
    %9 = arith.cmpi eq, %arg2, %c0_i32_8 : i32
    %10 = arith.extui %9 : i1 to i32
    %c0_i32_9 = arith.constant 0 : i32
    %11 = arith.cmpi ne, %10, %c0_i32_9 : i32
    scf.if %11 {
      %c0_10 = arith.constant 0 : index
      %c0_11 = arith.constant 0 : index
      %12 = vector.load %arg7[%c0_10, %c0_11] : memref<16x1024xf32, #tpu.memory_space<vmem>>, vector<16x1024xf32>
      %c0_12 = arith.constant 0 : index
      %c0_13 = arith.constant 0 : index
      %13 = vector.load %arg5[%c0_12, %c0_13] : memref<1x1024xf32, #tpu.memory_space<vmem>>, vector<1x1024xf32>
      %14 = vector.broadcast %13 : vector<1x1024xf32> to vector<16x1024xf32>
      %15 = arith.addf %12, %14 : vector<16x1024xf32>
      %cst_14 = arith.constant 0.000000e+00 : f32
      %16 = vector.broadcast %cst_14 : f32 to vector<16x1024xf32>
      %17 = arith.maximumf %15, %16 : vector<16x1024xf32>
      %18 = arith.truncf %17 : vector<16x1024xf32> to vector<16x1024xbf16>
      %c0_15 = arith.constant 0 : index
      %c0_16 = arith.constant 0 : index
      %19 = vector.load %arg6[%c0_15, %c0_16] : memref<16x1024xbf16, #tpu.memory_space<vmem>>, vector<16x1024xbf16>
      tpu.vector_store %arg6[%c0_15, %c0_16], %18 {strides = array<i32>} : memref<16x1024xbf16, #tpu.memory_space<vmem>>, vector<16x1024xbf16>,
    } else {
    }
    return
  }
  func.func @transform_0(%arg0: i32, %arg1: i32, %arg2: i32) -> (i32, i32) {
    %c0_i32 = arith.constant 0 : i32
    return %arg0, %arg2 : i32, i32
  }
  func.func @transform_1(%arg0: i32, %arg1: i32, %arg2: i32) -> (i32, i32) {
    %c0_i32 = arith.constant 0 : i32
    return %arg2, %arg1 : i32, i32
  }
  func.func @transform_2(%arg0: i32, %arg1: i32, %arg2: i32) -> (i32, i32) {
    %c0_i32 = arith.constant 0 : i32
    %c0_i32_0 = arith.constant 0 : i32
    return %c0_i32, %arg1 : i32, i32
  }
  func.func @transform_3(%arg0: i32, %arg1: i32, %arg2: i32) -> (i32, i32) {
    %c0_i32 = arith.constant 0 : i32
    return %arg0, %arg1 : i32, i32
  }
}

module attributes {stable_mosaic.version = 11 : i64} {
  func.func @_cmf_proj_kernel(%arg0: i32, %arg1: i32, %arg2: i32, %arg3: i32, %arg4: memref<1x16x512xbf16, #tpu.memory_space<vmem>>, %arg5: memref<1x16x512xbf16, #tpu.memory_space<vmem>>, %arg6: memref<1x1x512xf32, #tpu.memory_space<vmem>>, %arg7: memref<512x256xbf16, #tpu.memory_space<vmem>>, %arg8: memref<1x256xf32, #tpu.memory_space<vmem>>, %arg9: memref<1x16x256xbf16, #tpu.memory_space<vmem>>, %arg10: memref<16x256xf32, #tpu.memory_space<vmem>>) attributes {dimension_semantics = [#tpu.dimension_semantics<parallel>, #tpu.dimension_semantics<parallel>, #tpu.dimension_semantics<parallel>, #tpu.dimension_semantics<arbitrary>], iteration_bounds = array<i64: 2, 1, 1, 2>, scalar_prefetch = 0 : i64, scratch_operands = 1 : i64, tpu.core_type = #tpu.core_type<tc>, window_params = [{transform_indices = @transform_0, window_bounds = array<i64: 1, 16, 512>}, {transform_indices = @transform_1, window_bounds = array<i64: 1, 16, 512>}, {transform_indices = @transform_2, window_bounds = array<i64: 1, 1, 512>}, {transform_indices = @transform_3, window_bounds = array<i64: 512, 256>}, {transform_indices = @transform_4, window_bounds = array<i64: 1, 256>}, {transform_indices = @transform_5, window_bounds = array<i64: 1, 16, 256>}]} {
    %c0_i32 = arith.constant 0 : i32
    %0 = arith.cmpi eq, %arg3, %c0_i32 : i32
    %1 = arith.extui %0 : i1 to i32
    %c0_i32_0 = arith.constant 0 : i32
    %2 = arith.cmpi ne, %1, %c0_i32_0 : i32
    scf.if %2 {
      %cst_16 = arith.constant 0.000000e+00 : f32
      %23 = vector.broadcast %cst_16 : f32 to vector<16x256xf32>
      %c0_17 = arith.constant 0 : index
      %c0_18 = arith.constant 0 : index
      %24 = vector.load %arg10[%c0_17, %c0_18] : memref<16x256xf32, #tpu.memory_space<vmem>>, vector<16x256xf32>
      tpu.vector_store %arg10[%c0_17, %c0_18], %23 {strides = array<i32>} : memref<16x256xf32, #tpu.memory_space<vmem>>, vector<16x256xf32>,
    } else {
    }
    %c0 = arith.constant 0 : index
    %c0_1 = arith.constant 0 : index
    %c0_2 = arith.constant 0 : index
    %3 = vector.load %arg4[%c0, %c0_1, %c0_2] : memref<1x16x512xbf16, #tpu.memory_space<vmem>>, vector<1x16x512xbf16>
    %4 = vector.shape_cast %3 : vector<1x16x512xbf16> to vector<16x512xbf16>
    %5 = arith.extf %4 : vector<16x512xbf16> to vector<16x512xf32>
    %c0_3 = arith.constant 0 : index
    %c0_4 = arith.constant 0 : index
    %c0_5 = arith.constant 0 : index
    %6 = vector.load %arg6[%c0_3, %c0_4, %c0_5] : memref<1x1x512xf32, #tpu.memory_space<vmem>>, vector<1x1x512xf32>
    %7 = vector.shape_cast %6 : vector<1x1x512xf32> to vector<1x512xf32>
    %8 = vector.broadcast %7 : vector<1x512xf32> to vector<16x512xf32>
    %9 = arith.mulf %5, %8 : vector<16x512xf32>
    %c0_6 = arith.constant 0 : index
    %c0_7 = arith.constant 0 : index
    %c0_8 = arith.constant 0 : index
    %10 = vector.load %arg5[%c0_6, %c0_7, %c0_8] : memref<1x16x512xbf16, #tpu.memory_space<vmem>>, vector<1x16x512xbf16>
    %11 = vector.shape_cast %10 : vector<1x16x512xbf16> to vector<16x512xbf16>
    %12 = arith.extf %11 : vector<16x512xbf16> to vector<16x512xf32>
    %13 = arith.addf %9, %12 : vector<16x512xf32>
    %14 = arith.truncf %13 : vector<16x512xf32> to vector<16x512xbf16>
    %c0_9 = arith.constant 0 : index
    %c0_10 = arith.constant 0 : index
    %15 = vector.load %arg10[%c0_9, %c0_10] : memref<16x256xf32, #tpu.memory_space<vmem>>, vector<16x256xf32>
    %c0_11 = arith.constant 0 : index
    %c0_12 = arith.constant 0 : index
    %16 = vector.load %arg7[%c0_11, %c0_12] : memref<512x256xbf16, #tpu.memory_space<vmem>>, vector<512x256xbf16>
    %cst = arith.constant dense<0.000000e+00> : vector<16x256xf32>
    %17 = tpu.matmul %14, %16, %cst {dimension_numbers = #tpu.dot_dimension_numbers<[1], [0], [0], [1], [0, 0, 1, 1], [], []>} : vector<16x512xbf16>, vector<512x256xbf16>, vector<16x256xf32> -> vector<16x256xf32>
    %18 = arith.addf %15, %17 : vector<16x256xf32>
    %c0_13 = arith.constant 0 : index
    %c0_14 = arith.constant 0 : index
    %19 = vector.load %arg10[%c0_13, %c0_14] : memref<16x256xf32, #tpu.memory_space<vmem>>, vector<16x256xf32>
    tpu.vector_store %arg10[%c0_13, %c0_14], %18 {strides = array<i32>} : memref<16x256xf32, #tpu.memory_space<vmem>>, vector<16x256xf32>,
    %c1_i32 = arith.constant 1 : i32
    %20 = arith.cmpi eq, %arg3, %c1_i32 : i32
    %21 = arith.extui %20 : i1 to i32
    %c0_i32_15 = arith.constant 0 : i32
    %22 = arith.cmpi ne, %21, %c0_i32_15 : i32
    scf.if %22 {
      %c0_16 = arith.constant 0 : index
      %c0_17 = arith.constant 0 : index
      %23 = vector.load %arg10[%c0_16, %c0_17] : memref<16x256xf32, #tpu.memory_space<vmem>>, vector<16x256xf32>
      %c0_18 = arith.constant 0 : index
      %c0_19 = arith.constant 0 : index
      %24 = vector.load %arg8[%c0_18, %c0_19] : memref<1x256xf32, #tpu.memory_space<vmem>>, vector<1x256xf32>
      %25 = vector.broadcast %24 : vector<1x256xf32> to vector<16x256xf32>
      %26 = arith.addf %23, %25 : vector<16x256xf32>
      %cst_20 = arith.constant 0.000000e+00 : f32
      %27 = vector.broadcast %cst_20 : f32 to vector<16x256xf32>
      %28 = arith.maximumf %26, %27 : vector<16x256xf32>
      %29 = arith.truncf %28 : vector<16x256xf32> to vector<16x256xbf16>
      %c0_21 = arith.constant 0 : index
      %c0_22 = arith.constant 0 : index
      %c0_23 = arith.constant 0 : index
      %30 = vector.load %arg9[%c0_21, %c0_22, %c0_23] : memref<1x16x256xbf16, #tpu.memory_space<vmem>>, vector<1x16x256xbf16>
      %31 = vector.shape_cast %30 : vector<1x16x256xbf16> to vector<16x256xbf16>
      %32 = vector.shape_cast %29 : vector<16x256xbf16> to vector<1x16x256xbf16>
      tpu.vector_store %arg9[%c0_21, %c0_22, %c0_23], %32 {strides = array<i32>} : memref<1x16x256xbf16, #tpu.memory_space<vmem>>, vector<1x16x256xbf16>,
    } else {
    }
    return
  }
  func.func @transform_0(%arg0: i32, %arg1: i32, %arg2: i32, %arg3: i32) -> (i32, i32, i32) {
    %c0_i32 = arith.constant 0 : i32
    return %arg0, %arg1, %arg3 : i32, i32, i32
  }
  func.func @transform_1(%arg0: i32, %arg1: i32, %arg2: i32, %arg3: i32) -> (i32, i32, i32) {
    %c0_i32 = arith.constant 0 : i32
    return %arg0, %arg1, %arg3 : i32, i32, i32
  }
  func.func @transform_2(%arg0: i32, %arg1: i32, %arg2: i32, %arg3: i32) -> (i32, i32, i32) {
    %c0_i32 = arith.constant 0 : i32
    %c0_i32_0 = arith.constant 0 : i32
    return %arg0, %c0_i32, %arg3 : i32, i32, i32
  }
  func.func @transform_3(%arg0: i32, %arg1: i32, %arg2: i32, %arg3: i32) -> (i32, i32) {
    %c0_i32 = arith.constant 0 : i32
    return %arg3, %arg2 : i32, i32
  }
  func.func @transform_4(%arg0: i32, %arg1: i32, %arg2: i32, %arg3: i32) -> (i32, i32) {
    %c0_i32 = arith.constant 0 : i32
    %c0_i32_0 = arith.constant 0 : i32
    return %c0_i32, %arg2 : i32, i32
  }
  func.func @transform_5(%arg0: i32, %arg1: i32, %arg2: i32, %arg3: i32) -> (i32, i32, i32) {
    %c0_i32 = arith.constant 0 : i32
    return %arg0, %arg1, %arg2 : i32, i32, i32
  }
}

module attributes {stable_mosaic.version = 11 : i64} {
  func.func @_matmul_kernel(%arg0: i32, %arg1: i32, %arg2: i32, %arg3: memref<16x512xbf16, #tpu.memory_space<vmem>>, %arg4: memref<512x1024xbf16, #tpu.memory_space<vmem>>, %arg5: memref<1x1024xf32, #tpu.memory_space<vmem>>, %arg6: memref<16x1024xbf16, #tpu.memory_space<vmem>>, %arg7: memref<16x1024xf32, #tpu.memory_space<vmem>>) attributes {dimension_semantics = [#tpu.dimension_semantics<parallel>, #tpu.dimension_semantics<parallel>, #tpu.dimension_semantics<arbitrary>], iteration_bounds = array<i64: 1, 2, 2>, scalar_prefetch = 0 : i64, scratch_operands = 1 : i64, tpu.core_type = #tpu.core_type<tc>, window_params = [{transform_indices = @transform_0, window_bounds = array<i64: 16, 512>}, {transform_indices = @transform_1, window_bounds = array<i64: 512, 1024>}, {transform_indices = @transform_2, window_bounds = array<i64: 1, 1024>}, {transform_indices = @transform_3, window_bounds = array<i64: 16, 1024>}]} {
    %c0_i32 = arith.constant 0 : i32
    %0 = arith.cmpi eq, %arg2, %c0_i32 : i32
    %1 = arith.extui %0 : i1 to i32
    %c0_i32_0 = arith.constant 0 : i32
    %2 = arith.cmpi ne, %1, %c0_i32_0 : i32
    scf.if %2 {
      %cst_9 = arith.constant 0.000000e+00 : f32
      %12 = vector.broadcast %cst_9 : f32 to vector<16x1024xf32>
      %c0_10 = arith.constant 0 : index
      %c0_11 = arith.constant 0 : index
      %13 = vector.load %arg7[%c0_10, %c0_11] : memref<16x1024xf32, #tpu.memory_space<vmem>>, vector<16x1024xf32>
      tpu.vector_store %arg7[%c0_10, %c0_11], %12 {strides = array<i32>} : memref<16x1024xf32, #tpu.memory_space<vmem>>, vector<16x1024xf32>,
    } else {
    }
    %c0 = arith.constant 0 : index
    %c0_1 = arith.constant 0 : index
    %3 = vector.load %arg7[%c0, %c0_1] : memref<16x1024xf32, #tpu.memory_space<vmem>>, vector<16x1024xf32>
    %c0_2 = arith.constant 0 : index
    %c0_3 = arith.constant 0 : index
    %4 = vector.load %arg3[%c0_2, %c0_3] : memref<16x512xbf16, #tpu.memory_space<vmem>>, vector<16x512xbf16>
    %c0_4 = arith.constant 0 : index
    %c0_5 = arith.constant 0 : index
    %5 = vector.load %arg4[%c0_4, %c0_5] : memref<512x1024xbf16, #tpu.memory_space<vmem>>, vector<512x1024xbf16>
    %cst = arith.constant dense<0.000000e+00> : vector<16x1024xf32>
    %6 = tpu.matmul %4, %5, %cst {dimension_numbers = #tpu.dot_dimension_numbers<[1], [0], [0], [1], [0, 0, 1, 1], [], []>} : vector<16x512xbf16>, vector<512x1024xbf16>, vector<16x1024xf32> -> vector<16x1024xf32>
    %7 = arith.addf %3, %6 : vector<16x1024xf32>
    %c0_6 = arith.constant 0 : index
    %c0_7 = arith.constant 0 : index
    %8 = vector.load %arg7[%c0_6, %c0_7] : memref<16x1024xf32, #tpu.memory_space<vmem>>, vector<16x1024xf32>
    tpu.vector_store %arg7[%c0_6, %c0_7], %7 {strides = array<i32>} : memref<16x1024xf32, #tpu.memory_space<vmem>>, vector<16x1024xf32>,
    %c1_i32 = arith.constant 1 : i32
    %9 = arith.cmpi eq, %arg2, %c1_i32 : i32
    %10 = arith.extui %9 : i1 to i32
    %c0_i32_8 = arith.constant 0 : i32
    %11 = arith.cmpi ne, %10, %c0_i32_8 : i32
    scf.if %11 {
      %c0_9 = arith.constant 0 : index
      %c0_10 = arith.constant 0 : index
      %12 = vector.load %arg7[%c0_9, %c0_10] : memref<16x1024xf32, #tpu.memory_space<vmem>>, vector<16x1024xf32>
      %c0_11 = arith.constant 0 : index
      %c0_12 = arith.constant 0 : index
      %13 = vector.load %arg5[%c0_11, %c0_12] : memref<1x1024xf32, #tpu.memory_space<vmem>>, vector<1x1024xf32>
      %14 = vector.broadcast %13 : vector<1x1024xf32> to vector<16x1024xf32>
      %15 = arith.addf %12, %14 : vector<16x1024xf32>
      %cst_13 = arith.constant 0.000000e+00 : f32
      %16 = vector.broadcast %cst_13 : f32 to vector<16x1024xf32>
      %17 = arith.maximumf %15, %16 : vector<16x1024xf32>
      %18 = arith.truncf %17 : vector<16x1024xf32> to vector<16x1024xbf16>
      %c0_14 = arith.constant 0 : index
      %c0_15 = arith.constant 0 : index
      %19 = vector.load %arg6[%c0_14, %c0_15] : memref<16x1024xbf16, #tpu.memory_space<vmem>>, vector<16x1024xbf16>
      tpu.vector_store %arg6[%c0_14, %c0_15], %18 {strides = array<i32>} : memref<16x1024xbf16, #tpu.memory_space<vmem>>, vector<16x1024xbf16>,
    } else {
    }
    return
  }
  func.func @transform_0(%arg0: i32, %arg1: i32, %arg2: i32) -> (i32, i32) {
    %c0_i32 = arith.constant 0 : i32
    return %arg0, %arg2 : i32, i32
  }
  func.func @transform_1(%arg0: i32, %arg1: i32, %arg2: i32) -> (i32, i32) {
    %c0_i32 = arith.constant 0 : i32
    return %arg2, %arg1 : i32, i32
  }
  func.func @transform_2(%arg0: i32, %arg1: i32, %arg2: i32) -> (i32, i32) {
    %c0_i32 = arith.constant 0 : i32
    %c0_i32_0 = arith.constant 0 : i32
    return %c0_i32, %arg1 : i32, i32
  }
  func.func @transform_3(%arg0: i32, %arg1: i32, %arg2: i32) -> (i32, i32) {
    %c0_i32 = arith.constant 0 : i32
    return %arg0, %arg1 : i32, i32
  }
}

module attributes {stable_mosaic.version = 11 : i64} {
  func.func @_cmf_proj_kernel(%arg0: i32, %arg1: i32, %arg2: i32, %arg3: i32, %arg4: memref<1x16x512xbf16, #tpu.memory_space<vmem>>, %arg5: memref<1x16x512xbf16, #tpu.memory_space<vmem>>, %arg6: memref<1x1x512xf32, #tpu.memory_space<vmem>>, %arg7: memref<512x512xbf16, #tpu.memory_space<vmem>>, %arg8: memref<1x512xf32, #tpu.memory_space<vmem>>, %arg9: memref<1x16x512xbf16, #tpu.memory_space<vmem>>, %arg10: memref<16x512xf32, #tpu.memory_space<vmem>>) attributes {dimension_semantics = [#tpu.dimension_semantics<parallel>, #tpu.dimension_semantics<parallel>, #tpu.dimension_semantics<parallel>, #tpu.dimension_semantics<arbitrary>], iteration_bounds = array<i64: 2, 1, 1, 4>, scalar_prefetch = 0 : i64, scratch_operands = 1 : i64, tpu.core_type = #tpu.core_type<tc>, window_params = [{transform_indices = @transform_0, window_bounds = array<i64: 1, 16, 512>}, {transform_indices = @transform_1, window_bounds = array<i64: 1, 16, 512>}, {transform_indices = @transform_2, window_bounds = array<i64: 1, 1, 512>}, {transform_indices = @transform_3, window_bounds = array<i64: 512, 512>}, {transform_indices = @transform_4, window_bounds = array<i64: 1, 512>}, {transform_indices = @transform_5, window_bounds = array<i64: 1, 16, 512>}]} {
    %c0_i32 = arith.constant 0 : i32
    %0 = arith.cmpi eq, %arg3, %c0_i32 : i32
    %1 = arith.extui %0 : i1 to i32
    %c0_i32_0 = arith.constant 0 : i32
    %2 = arith.cmpi ne, %1, %c0_i32_0 : i32
    scf.if %2 {
      %cst_16 = arith.constant 0.000000e+00 : f32
      %23 = vector.broadcast %cst_16 : f32 to vector<16x512xf32>
      %c0_17 = arith.constant 0 : index
      %c0_18 = arith.constant 0 : index
      %24 = vector.load %arg10[%c0_17, %c0_18] : memref<16x512xf32, #tpu.memory_space<vmem>>, vector<16x512xf32>
      tpu.vector_store %arg10[%c0_17, %c0_18], %23 {strides = array<i32>} : memref<16x512xf32, #tpu.memory_space<vmem>>, vector<16x512xf32>,
    } else {
    }
    %c0 = arith.constant 0 : index
    %c0_1 = arith.constant 0 : index
    %c0_2 = arith.constant 0 : index
    %3 = vector.load %arg4[%c0, %c0_1, %c0_2] : memref<1x16x512xbf16, #tpu.memory_space<vmem>>, vector<1x16x512xbf16>
    %4 = vector.shape_cast %3 : vector<1x16x512xbf16> to vector<16x512xbf16>
    %5 = arith.extf %4 : vector<16x512xbf16> to vector<16x512xf32>
    %c0_3 = arith.constant 0 : index
    %c0_4 = arith.constant 0 : index
    %c0_5 = arith.constant 0 : index
    %6 = vector.load %arg6[%c0_3, %c0_4, %c0_5] : memref<1x1x512xf32, #tpu.memory_space<vmem>>, vector<1x1x512xf32>
    %7 = vector.shape_cast %6 : vector<1x1x512xf32> to vector<1x512xf32>
    %8 = vector.broadcast %7 : vector<1x512xf32> to vector<16x512xf32>
    %9 = arith.mulf %5, %8 : vector<16x512xf32>
    %c0_6 = arith.constant 0 : index
    %c0_7 = arith.constant 0 : index
    %c0_8 = arith.constant 0 : index
    %10 = vector.load %arg5[%c0_6, %c0_7, %c0_8] : memref<1x16x512xbf16, #tpu.memory_space<vmem>>, vector<1x16x512xbf16>
    %11 = vector.shape_cast %10 : vector<1x16x512xbf16> to vector<16x512xbf16>
    %12 = arith.extf %11 : vector<16x512xbf16> to vector<16x512xf32>
    %13 = arith.addf %9, %12 : vector<16x512xf32>
    %14 = arith.truncf %13 : vector<16x512xf32> to vector<16x512xbf16>
    %c0_9 = arith.constant 0 : index
    %c0_10 = arith.constant 0 : index
    %15 = vector.load %arg10[%c0_9, %c0_10] : memref<16x512xf32, #tpu.memory_space<vmem>>, vector<16x512xf32>
    %c0_11 = arith.constant 0 : index
    %c0_12 = arith.constant 0 : index
    %16 = vector.load %arg7[%c0_11, %c0_12] : memref<512x512xbf16, #tpu.memory_space<vmem>>, vector<512x512xbf16>
    %cst = arith.constant dense<0.000000e+00> : vector<16x512xf32>
    %17 = tpu.matmul %14, %16, %cst {dimension_numbers = #tpu.dot_dimension_numbers<[1], [0], [0], [1], [0, 0, 1, 1], [], []>} : vector<16x512xbf16>, vector<512x512xbf16>, vector<16x512xf32> -> vector<16x512xf32>
    %18 = arith.addf %15, %17 : vector<16x512xf32>
    %c0_13 = arith.constant 0 : index
    %c0_14 = arith.constant 0 : index
    %19 = vector.load %arg10[%c0_13, %c0_14] : memref<16x512xf32, #tpu.memory_space<vmem>>, vector<16x512xf32>
    tpu.vector_store %arg10[%c0_13, %c0_14], %18 {strides = array<i32>} : memref<16x512xf32, #tpu.memory_space<vmem>>, vector<16x512xf32>,
    %c3_i32 = arith.constant 3 : i32
    %20 = arith.cmpi eq, %arg3, %c3_i32 : i32
    %21 = arith.extui %20 : i1 to i32
    %c0_i32_15 = arith.constant 0 : i32
    %22 = arith.cmpi ne, %21, %c0_i32_15 : i32
    scf.if %22 {
      %c0_16 = arith.constant 0 : index
      %c0_17 = arith.constant 0 : index
      %23 = vector.load %arg10[%c0_16, %c0_17] : memref<16x512xf32, #tpu.memory_space<vmem>>, vector<16x512xf32>
      %c0_18 = arith.constant 0 : index
      %c0_19 = arith.constant 0 : index
      %24 = vector.load %arg8[%c0_18, %c0_19] : memref<1x512xf32, #tpu.memory_space<vmem>>, vector<1x512xf32>
      %25 = vector.broadcast %24 : vector<1x512xf32> to vector<16x512xf32>
      %26 = arith.addf %23, %25 : vector<16x512xf32>
      %cst_20 = arith.constant 0.000000e+00 : f32
      %27 = vector.broadcast %cst_20 : f32 to vector<16x512xf32>
      %28 = arith.maximumf %26, %27 : vector<16x512xf32>
      %29 = arith.truncf %28 : vector<16x512xf32> to vector<16x512xbf16>
      %c0_21 = arith.constant 0 : index
      %c0_22 = arith.constant 0 : index
      %c0_23 = arith.constant 0 : index
      %30 = vector.load %arg9[%c0_21, %c0_22, %c0_23] : memref<1x16x512xbf16, #tpu.memory_space<vmem>>, vector<1x16x512xbf16>
      %31 = vector.shape_cast %30 : vector<1x16x512xbf16> to vector<16x512xbf16>
      %32 = vector.shape_cast %29 : vector<16x512xbf16> to vector<1x16x512xbf16>
      tpu.vector_store %arg9[%c0_21, %c0_22, %c0_23], %32 {strides = array<i32>} : memref<1x16x512xbf16, #tpu.memory_space<vmem>>, vector<1x16x512xbf16>,
    } else {
    }
    return
  }
  func.func @transform_0(%arg0: i32, %arg1: i32, %arg2: i32, %arg3: i32) -> (i32, i32, i32) {
    %c0_i32 = arith.constant 0 : i32
    return %arg0, %arg1, %arg3 : i32, i32, i32
  }
  func.func @transform_1(%arg0: i32, %arg1: i32, %arg2: i32, %arg3: i32) -> (i32, i32, i32) {
    %c0_i32 = arith.constant 0 : i32
    return %arg0, %arg1, %arg3 : i32, i32, i32
  }
  func.func @transform_2(%arg0: i32, %arg1: i32, %arg2: i32, %arg3: i32) -> (i32, i32, i32) {
    %c0_i32 = arith.constant 0 : i32
    %c0_i32_0 = arith.constant 0 : i32
    return %arg0, %c0_i32, %arg3 : i32, i32, i32
  }
  func.func @transform_3(%arg0: i32, %arg1: i32, %arg2: i32, %arg3: i32) -> (i32, i32) {
    %c0_i32 = arith.constant 0 : i32
    return %arg3, %arg2 : i32, i32
  }
  func.func @transform_4(%arg0: i32, %arg1: i32, %arg2: i32, %arg3: i32) -> (i32, i32) {
    %c0_i32 = arith.constant 0 : i32
    %c0_i32_0 = arith.constant 0 : i32
    return %c0_i32, %arg2 : i32, i32
  }
  func.func @transform_5(%arg0: i32, %arg1: i32, %arg2: i32, %arg3: i32) -> (i32, i32, i32) {
    %c0_i32 = arith.constant 0 : i32
    return %arg0, %arg1, %arg2 : i32, i32, i32
  }
}

module attributes {stable_mosaic.version = 11 : i64} {
  func.func @_matmul_kernel(%arg0: i32, %arg1: i32, %arg2: i32, %arg3: memref<16x512xbf16, #tpu.memory_space<vmem>>, %arg4: memref<512x128xbf16, #tpu.memory_space<vmem>>, %arg5: memref<1x128xf32, #tpu.memory_space<vmem>>, %arg6: memref<16x128xbf16, #tpu.memory_space<vmem>>, %arg7: memref<16x128xf32, #tpu.memory_space<vmem>>) attributes {dimension_semantics = [#tpu.dimension_semantics<parallel>, #tpu.dimension_semantics<parallel>, #tpu.dimension_semantics<arbitrary>], iteration_bounds = array<i64: 1, 1, 1>, scalar_prefetch = 0 : i64, scratch_operands = 1 : i64, tpu.core_type = #tpu.core_type<tc>, window_params = [{transform_indices = @transform_0, window_bounds = array<i64: 16, 512>}, {transform_indices = @transform_1, window_bounds = array<i64: 512, 128>}, {transform_indices = @transform_2, window_bounds = array<i64: 1, 128>}, {transform_indices = @transform_3, window_bounds = array<i64: 16, 128>}]} {
    %c0_i32 = arith.constant 0 : i32
    %0 = arith.cmpi eq, %arg2, %c0_i32 : i32
    %1 = arith.extui %0 : i1 to i32
    %c0_i32_0 = arith.constant 0 : i32
    %2 = arith.cmpi ne, %1, %c0_i32_0 : i32
    scf.if %2 {
      %cst_10 = arith.constant 0.000000e+00 : f32
      %12 = vector.broadcast %cst_10 : f32 to vector<16x128xf32>
      %c0_11 = arith.constant 0 : index
      %c0_12 = arith.constant 0 : index
      %13 = vector.load %arg7[%c0_11, %c0_12] : memref<16x128xf32, #tpu.memory_space<vmem>>, vector<16x128xf32>
      tpu.vector_store %arg7[%c0_11, %c0_12], %12 {strides = array<i32>} : memref<16x128xf32, #tpu.memory_space<vmem>>, vector<16x128xf32>,
    } else {
    }
    %c0 = arith.constant 0 : index
    %c0_1 = arith.constant 0 : index
    %3 = vector.load %arg7[%c0, %c0_1] : memref<16x128xf32, #tpu.memory_space<vmem>>, vector<16x128xf32>
    %c0_2 = arith.constant 0 : index
    %c0_3 = arith.constant 0 : index
    %4 = vector.load %arg3[%c0_2, %c0_3] : memref<16x512xbf16, #tpu.memory_space<vmem>>, vector<16x512xbf16>
    %c0_4 = arith.constant 0 : index
    %c0_5 = arith.constant 0 : index
    %5 = vector.load %arg4[%c0_4, %c0_5] : memref<512x128xbf16, #tpu.memory_space<vmem>>, vector<512x128xbf16>
    %cst = arith.constant dense<0.000000e+00> : vector<16x128xf32>
    %6 = tpu.matmul %4, %5, %cst {dimension_numbers = #tpu.dot_dimension_numbers<[1], [0], [0], [1], [0, 0, 1, 1], [], []>} : vector<16x512xbf16>, vector<512x128xbf16>, vector<16x128xf32> -> vector<16x128xf32>
    %7 = arith.addf %3, %6 : vector<16x128xf32>
    %c0_6 = arith.constant 0 : index
    %c0_7 = arith.constant 0 : index
    %8 = vector.load %arg7[%c0_6, %c0_7] : memref<16x128xf32, #tpu.memory_space<vmem>>, vector<16x128xf32>
    tpu.vector_store %arg7[%c0_6, %c0_7], %7 {strides = array<i32>} : memref<16x128xf32, #tpu.memory_space<vmem>>, vector<16x128xf32>,
    %c0_i32_8 = arith.constant 0 : i32
    %9 = arith.cmpi eq, %arg2, %c0_i32_8 : i32
    %10 = arith.extui %9 : i1 to i32
    %c0_i32_9 = arith.constant 0 : i32
    %11 = arith.cmpi ne, %10, %c0_i32_9 : i32
    scf.if %11 {
      %c0_10 = arith.constant 0 : index
      %c0_11 = arith.constant 0 : index
      %12 = vector.load %arg7[%c0_10, %c0_11] : memref<16x128xf32, #tpu.memory_space<vmem>>, vector<16x128xf32>
      %c0_12 = arith.constant 0 : index
      %c0_13 = arith.constant 0 : index
      %13 = vector.load %arg5[%c0_12, %c0_13] : memref<1x128xf32, #tpu.memory_space<vmem>>, vector<1x128xf32>
      %14 = vector.broadcast %13 : vector<1x128xf32> to vector<16x128xf32>
      %15 = arith.addf %12, %14 : vector<16x128xf32>
      %cst_14 = arith.constant 0.000000e+00 : f32
      %16 = vector.broadcast %cst_14 : f32 to vector<16x128xf32>
      %17 = arith.maximumf %15, %16 : vector<16x128xf32>
      %18 = arith.truncf %17 : vector<16x128xf32> to vector<16x128xbf16>
      %c0_15 = arith.constant 0 : index
      %c0_16 = arith.constant 0 : index
      %19 = vector.load %arg6[%c0_15, %c0_16] : memref<16x128xbf16, #tpu.memory_space<vmem>>, vector<16x128xbf16>
      tpu.vector_store %arg6[%c0_15, %c0_16], %18 {strides = array<i32>} : memref<16x128xbf16, #tpu.memory_space<vmem>>, vector<16x128xbf16>,
    } else {
    }
    return
  }
  func.func @transform_0(%arg0: i32, %arg1: i32, %arg2: i32) -> (i32, i32) {
    %c0_i32 = arith.constant 0 : i32
    return %arg0, %arg2 : i32, i32
  }
  func.func @transform_1(%arg0: i32, %arg1: i32, %arg2: i32) -> (i32, i32) {
    %c0_i32 = arith.constant 0 : i32
    return %arg2, %arg1 : i32, i32
  }
  func.func @transform_2(%arg0: i32, %arg1: i32, %arg2: i32) -> (i32, i32) {
    %c0_i32 = arith.constant 0 : i32
    %c0_i32_0 = arith.constant 0 : i32
    return %c0_i32, %arg1 : i32, i32
  }
  func.func @transform_3(%arg0: i32, %arg1: i32, %arg2: i32) -> (i32, i32) {
    %c0_i32 = arith.constant 0 : i32
    return %arg0, %arg1 : i32, i32
  }
}

module attributes {stable_mosaic.version = 11 : i64} {
  func.func @_matmul_add_kernel(%arg0: i32, %arg1: i32, %arg2: i32, %arg3: memref<16x256xbf16, #tpu.memory_space<vmem>>, %arg4: memref<256x128xbf16, #tpu.memory_space<vmem>>, %arg5: memref<1x128xf32, #tpu.memory_space<vmem>>, %arg6: memref<16x128xbf16, #tpu.memory_space<vmem>>, %arg7: memref<16x128xbf16, #tpu.memory_space<vmem>>, %arg8: memref<16x128xf32, #tpu.memory_space<vmem>>) attributes {dimension_semantics = [#tpu.dimension_semantics<parallel>, #tpu.dimension_semantics<parallel>, #tpu.dimension_semantics<arbitrary>], iteration_bounds = array<i64: 1, 1, 1>, scalar_prefetch = 0 : i64, scratch_operands = 1 : i64, tpu.core_type = #tpu.core_type<tc>, window_params = [{transform_indices = @transform_0, window_bounds = array<i64: 16, 256>}, {transform_indices = @transform_1, window_bounds = array<i64: 256, 128>}, {transform_indices = @transform_2, window_bounds = array<i64: 1, 128>}, {transform_indices = @transform_3, window_bounds = array<i64: 16, 128>}, {transform_indices = @transform_4, window_bounds = array<i64: 16, 128>}]} {
    %c0_i32 = arith.constant 0 : i32
    %0 = arith.cmpi eq, %arg2, %c0_i32 : i32
    %1 = arith.extui %0 : i1 to i32
    %c0_i32_0 = arith.constant 0 : i32
    %2 = arith.cmpi ne, %1, %c0_i32_0 : i32
    scf.if %2 {
      %cst_10 = arith.constant 0.000000e+00 : f32
      %12 = vector.broadcast %cst_10 : f32 to vector<16x128xf32>
      %c0_11 = arith.constant 0 : index
      %c0_12 = arith.constant 0 : index
      %13 = vector.load %arg8[%c0_11, %c0_12] : memref<16x128xf32, #tpu.memory_space<vmem>>, vector<16x128xf32>
      tpu.vector_store %arg8[%c0_11, %c0_12], %12 {strides = array<i32>} : memref<16x128xf32, #tpu.memory_space<vmem>>, vector<16x128xf32>,
    } else {
    }
    %c0 = arith.constant 0 : index
    %c0_1 = arith.constant 0 : index
    %3 = vector.load %arg8[%c0, %c0_1] : memref<16x128xf32, #tpu.memory_space<vmem>>, vector<16x128xf32>
    %c0_2 = arith.constant 0 : index
    %c0_3 = arith.constant 0 : index
    %4 = vector.load %arg3[%c0_2, %c0_3] : memref<16x256xbf16, #tpu.memory_space<vmem>>, vector<16x256xbf16>
    %c0_4 = arith.constant 0 : index
    %c0_5 = arith.constant 0 : index
    %5 = vector.load %arg4[%c0_4, %c0_5] : memref<256x128xbf16, #tpu.memory_space<vmem>>, vector<256x128xbf16>
    %cst = arith.constant dense<0.000000e+00> : vector<16x128xf32>
    %6 = tpu.matmul %4, %5, %cst {dimension_numbers = #tpu.dot_dimension_numbers<[1], [0], [0], [1], [0, 0, 1, 1], [], []>} : vector<16x256xbf16>, vector<256x128xbf16>, vector<16x128xf32> -> vector<16x128xf32>
    %7 = arith.addf %3, %6 : vector<16x128xf32>
    %c0_6 = arith.constant 0 : index
    %c0_7 = arith.constant 0 : index
    %8 = vector.load %arg8[%c0_6, %c0_7] : memref<16x128xf32, #tpu.memory_space<vmem>>, vector<16x128xf32>
    tpu.vector_store %arg8[%c0_6, %c0_7], %7 {strides = array<i32>} : memref<16x128xf32, #tpu.memory_space<vmem>>, vector<16x128xf32>,
    %c0_i32_8 = arith.constant 0 : i32
    %9 = arith.cmpi eq, %arg2, %c0_i32_8 : i32
    %10 = arith.extui %9 : i1 to i32
    %c0_i32_9 = arith.constant 0 : i32
    %11 = arith.cmpi ne, %10, %c0_i32_9 : i32
    scf.if %11 {
      %c0_10 = arith.constant 0 : index
      %c0_11 = arith.constant 0 : index
      %12 = vector.load %arg8[%c0_10, %c0_11] : memref<16x128xf32, #tpu.memory_space<vmem>>, vector<16x128xf32>
      %c0_12 = arith.constant 0 : index
      %c0_13 = arith.constant 0 : index
      %13 = vector.load %arg5[%c0_12, %c0_13] : memref<1x128xf32, #tpu.memory_space<vmem>>, vector<1x128xf32>
      %14 = vector.broadcast %13 : vector<1x128xf32> to vector<16x128xf32>
      %15 = arith.addf %12, %14 : vector<16x128xf32>
      %cst_14 = arith.constant 0.000000e+00 : f32
      %16 = vector.broadcast %cst_14 : f32 to vector<16x128xf32>
      %17 = arith.maximumf %15, %16 : vector<16x128xf32>
      %c0_15 = arith.constant 0 : index
      %c0_16 = arith.constant 0 : index
      %18 = vector.load %arg6[%c0_15, %c0_16] : memref<16x128xbf16, #tpu.memory_space<vmem>>, vector<16x128xbf16>
      %19 = arith.extf %18 : vector<16x128xbf16> to vector<16x128xf32>
      %20 = arith.addf %17, %19 : vector<16x128xf32>
      %21 = arith.truncf %20 : vector<16x128xf32> to vector<16x128xbf16>
      %c0_17 = arith.constant 0 : index
      %c0_18 = arith.constant 0 : index
      %22 = vector.load %arg7[%c0_17, %c0_18] : memref<16x128xbf16, #tpu.memory_space<vmem>>, vector<16x128xbf16>
      tpu.vector_store %arg7[%c0_17, %c0_18], %21 {strides = array<i32>} : memref<16x128xbf16, #tpu.memory_space<vmem>>, vector<16x128xbf16>,
    } else {
    }
    return
  }
  func.func @transform_0(%arg0: i32, %arg1: i32, %arg2: i32) -> (i32, i32) {
    %c0_i32 = arith.constant 0 : i32
    return %arg0, %arg2 : i32, i32
  }
  func.func @transform_1(%arg0: i32, %arg1: i32, %arg2: i32) -> (i32, i32) {
    %c0_i32 = arith.constant 0 : i32
    return %arg2, %arg1 : i32, i32
  }
  func.func @transform_2(%arg0: i32, %arg1: i32, %arg2: i32) -> (i32, i32) {
    %c0_i32 = arith.constant 0 : i32
    %c0_i32_0 = arith.constant 0 : i32
    return %c0_i32, %arg1 : i32, i32
  }
  func.func @transform_3(%arg0: i32, %arg1: i32, %arg2: i32) -> (i32, i32) {
    %c0_i32 = arith.constant 0 : i32
    return %arg0, %arg1 : i32, i32
  }
  func.func @transform_4(%arg0: i32, %arg1: i32, %arg2: i32) -> (i32, i32) {
    %c0_i32 = arith.constant 0 : i32
    return %arg0, %arg1 : i32, i32
  }
}

module attributes {stable_mosaic.version = 11 : i64} {
  func.func @_matmul_add_kernel(%arg0: i32, %arg1: i32, %arg2: i32, %arg3: memref<32x128xbf16, #tpu.memory_space<vmem>>, %arg4: memref<128x128xbf16, #tpu.memory_space<vmem>>, %arg5: memref<1x128xf32, #tpu.memory_space<vmem>>, %arg6: memref<32x128xbf16, #tpu.memory_space<vmem>>, %arg7: memref<32x128xbf16, #tpu.memory_space<vmem>>, %arg8: memref<32x128xf32, #tpu.memory_space<vmem>>) attributes {dimension_semantics = [#tpu.dimension_semantics<parallel>, #tpu.dimension_semantics<parallel>, #tpu.dimension_semantics<arbitrary>], iteration_bounds = array<i64: 1, 1, 1>, scalar_prefetch = 0 : i64, scratch_operands = 1 : i64, tpu.core_type = #tpu.core_type<tc>, window_params = [{transform_indices = @transform_0, window_bounds = array<i64: 32, 128>}, {transform_indices = @transform_1, window_bounds = array<i64: 128, 128>}, {transform_indices = @transform_2, window_bounds = array<i64: 1, 128>}, {transform_indices = @transform_3, window_bounds = array<i64: 32, 128>}, {transform_indices = @transform_4, window_bounds = array<i64: 32, 128>}]} {
    %c0_i32 = arith.constant 0 : i32
    %0 = arith.cmpi eq, %arg2, %c0_i32 : i32
    %1 = arith.extui %0 : i1 to i32
    %c0_i32_0 = arith.constant 0 : i32
    %2 = arith.cmpi ne, %1, %c0_i32_0 : i32
    scf.if %2 {
      %cst_10 = arith.constant 0.000000e+00 : f32
      %12 = vector.broadcast %cst_10 : f32 to vector<32x128xf32>
      %c0_11 = arith.constant 0 : index
      %c0_12 = arith.constant 0 : index
      %13 = vector.load %arg8[%c0_11, %c0_12] : memref<32x128xf32, #tpu.memory_space<vmem>>, vector<32x128xf32>
      tpu.vector_store %arg8[%c0_11, %c0_12], %12 {strides = array<i32>} : memref<32x128xf32, #tpu.memory_space<vmem>>, vector<32x128xf32>,
    } else {
    }
    %c0 = arith.constant 0 : index
    %c0_1 = arith.constant 0 : index
    %3 = vector.load %arg8[%c0, %c0_1] : memref<32x128xf32, #tpu.memory_space<vmem>>, vector<32x128xf32>
    %c0_2 = arith.constant 0 : index
    %c0_3 = arith.constant 0 : index
    %4 = vector.load %arg3[%c0_2, %c0_3] : memref<32x128xbf16, #tpu.memory_space<vmem>>, vector<32x128xbf16>
    %c0_4 = arith.constant 0 : index
    %c0_5 = arith.constant 0 : index
    %5 = vector.load %arg4[%c0_4, %c0_5] : memref<128x128xbf16, #tpu.memory_space<vmem>>, vector<128x128xbf16>
    %cst = arith.constant dense<0.000000e+00> : vector<32x128xf32>
    %6 = tpu.matmul %4, %5, %cst {dimension_numbers = #tpu.dot_dimension_numbers<[1], [0], [0], [1], [0, 0, 1, 1], [], []>} : vector<32x128xbf16>, vector<128x128xbf16>, vector<32x128xf32> -> vector<32x128xf32>
    %7 = arith.addf %3, %6 : vector<32x128xf32>
    %c0_6 = arith.constant 0 : index
    %c0_7 = arith.constant 0 : index
    %8 = vector.load %arg8[%c0_6, %c0_7] : memref<32x128xf32, #tpu.memory_space<vmem>>, vector<32x128xf32>
    tpu.vector_store %arg8[%c0_6, %c0_7], %7 {strides = array<i32>} : memref<32x128xf32, #tpu.memory_space<vmem>>, vector<32x128xf32>,
    %c0_i32_8 = arith.constant 0 : i32
    %9 = arith.cmpi eq, %arg2, %c0_i32_8 : i32
    %10 = arith.extui %9 : i1 to i32
    %c0_i32_9 = arith.constant 0 : i32
    %11 = arith.cmpi ne, %10, %c0_i32_9 : i32
    scf.if %11 {
      %c0_10 = arith.constant 0 : index
      %c0_11 = arith.constant 0 : index
      %12 = vector.load %arg8[%c0_10, %c0_11] : memref<32x128xf32, #tpu.memory_space<vmem>>, vector<32x128xf32>
      %c0_12 = arith.constant 0 : index
      %c0_13 = arith.constant 0 : index
      %13 = vector.load %arg5[%c0_12, %c0_13] : memref<1x128xf32, #tpu.memory_space<vmem>>, vector<1x128xf32>
      %14 = vector.broadcast %13 : vector<1x128xf32> to vector<32x128xf32>
      %15 = arith.addf %12, %14 : vector<32x128xf32>
      %cst_14 = arith.constant 0.000000e+00 : f32
      %16 = vector.broadcast %cst_14 : f32 to vector<32x128xf32>
      %17 = arith.maximumf %15, %16 : vector<32x128xf32>
      %c0_15 = arith.constant 0 : index
      %c0_16 = arith.constant 0 : index
      %18 = vector.load %arg6[%c0_15, %c0_16] : memref<32x128xbf16, #tpu.memory_space<vmem>>, vector<32x128xbf16>
      %19 = arith.extf %18 : vector<32x128xbf16> to vector<32x128xf32>
      %20 = arith.addf %17, %19 : vector<32x128xf32>
      %21 = arith.truncf %20 : vector<32x128xf32> to vector<32x128xbf16>
      %c0_17 = arith.constant 0 : index
      %c0_18 = arith.constant 0 : index
      %22 = vector.load %arg7[%c0_17, %c0_18] : memref<32x128xbf16, #tpu.memory_space<vmem>>, vector<32x128xbf16>
      tpu.vector_store %arg7[%c0_17, %c0_18], %21 {strides = array<i32>} : memref<32x128xbf16, #tpu.memory_space<vmem>>, vector<32x128xbf16>,
    } else {
    }
    return
  }
  func.func @transform_0(%arg0: i32, %arg1: i32, %arg2: i32) -> (i32, i32) {
    %c0_i32 = arith.constant 0 : i32
    return %arg0, %arg2 : i32, i32
  }
  func.func @transform_1(%arg0: i32, %arg1: i32, %arg2: i32) -> (i32, i32) {
    %c0_i32 = arith.constant 0 : i32
    return %arg2, %arg1 : i32, i32
  }
  func.func @transform_2(%arg0: i32, %arg1: i32, %arg2: i32) -> (i32, i32) {
    %c0_i32 = arith.constant 0 : i32
    %c0_i32_0 = arith.constant 0 : i32
    return %c0_i32, %arg1 : i32, i32
  }
  func.func @transform_3(%arg0: i32, %arg1: i32, %arg2: i32) -> (i32, i32) {
    %c0_i32 = arith.constant 0 : i32
    return %arg0, %arg1 : i32, i32
  }
  func.func @transform_4(%arg0: i32, %arg1: i32, %arg2: i32) -> (i32, i32) {
    %c0_i32 = arith.constant 0 : i32
    return %arg0, %arg1 : i32, i32
  }
}

module attributes {stable_mosaic.version = 11 : i64} {
  func.func @_matmul_add_kernel(%arg0: i32, %arg1: i32, %arg2: i32, %arg3: memref<128x128xbf16, #tpu.memory_space<vmem>>, %arg4: memref<128x128xbf16, #tpu.memory_space<vmem>>, %arg5: memref<1x128xf32, #tpu.memory_space<vmem>>, %arg6: memref<128x128xbf16, #tpu.memory_space<vmem>>, %arg7: memref<128x128xbf16, #tpu.memory_space<vmem>>, %arg8: memref<128x128xf32, #tpu.memory_space<vmem>>) attributes {dimension_semantics = [#tpu.dimension_semantics<parallel>, #tpu.dimension_semantics<parallel>, #tpu.dimension_semantics<arbitrary>], iteration_bounds = array<i64: 1, 1, 1>, scalar_prefetch = 0 : i64, scratch_operands = 1 : i64, tpu.core_type = #tpu.core_type<tc>, window_params = [{transform_indices = @transform_0, window_bounds = array<i64: 128, 128>}, {transform_indices = @transform_1, window_bounds = array<i64: 128, 128>}, {transform_indices = @transform_2, window_bounds = array<i64: 1, 128>}, {transform_indices = @transform_3, window_bounds = array<i64: 128, 128>}, {transform_indices = @transform_4, window_bounds = array<i64: 128, 128>}]} {
    %c0_i32 = arith.constant 0 : i32
    %0 = arith.cmpi eq, %arg2, %c0_i32 : i32
    %1 = arith.extui %0 : i1 to i32
    %c0_i32_0 = arith.constant 0 : i32
    %2 = arith.cmpi ne, %1, %c0_i32_0 : i32
    scf.if %2 {
      %cst_10 = arith.constant 0.000000e+00 : f32
      %12 = vector.broadcast %cst_10 : f32 to vector<128x128xf32>
      %c0_11 = arith.constant 0 : index
      %c0_12 = arith.constant 0 : index
      %13 = vector.load %arg8[%c0_11, %c0_12] : memref<128x128xf32, #tpu.memory_space<vmem>>, vector<128x128xf32>
      tpu.vector_store %arg8[%c0_11, %c0_12], %12 {strides = array<i32>} : memref<128x128xf32, #tpu.memory_space<vmem>>, vector<128x128xf32>,
    } else {
    }
    %c0 = arith.constant 0 : index
    %c0_1 = arith.constant 0 : index
    %3 = vector.load %arg8[%c0, %c0_1] : memref<128x128xf32, #tpu.memory_space<vmem>>, vector<128x128xf32>
    %c0_2 = arith.constant 0 : index
    %c0_3 = arith.constant 0 : index
    %4 = vector.load %arg3[%c0_2, %c0_3] : memref<128x128xbf16, #tpu.memory_space<vmem>>, vector<128x128xbf16>
    %c0_4 = arith.constant 0 : index
    %c0_5 = arith.constant 0 : index
    %5 = vector.load %arg4[%c0_4, %c0_5] : memref<128x128xbf16, #tpu.memory_space<vmem>>, vector<128x128xbf16>
    %cst = arith.constant dense<0.000000e+00> : vector<128x128xf32>
    %6 = tpu.matmul %4, %5, %cst {dimension_numbers = #tpu.dot_dimension_numbers<[1], [0], [0], [1], [0, 0, 1, 1], [], []>} : vector<128x128xbf16>, vector<128x128xbf16>, vector<128x128xf32> -> vector<128x128xf32>
    %7 = arith.addf %3, %6 : vector<128x128xf32>
    %c0_6 = arith.constant 0 : index
    %c0_7 = arith.constant 0 : index
    %8 = vector.load %arg8[%c0_6, %c0_7] : memref<128x128xf32, #tpu.memory_space<vmem>>, vector<128x128xf32>
    tpu.vector_store %arg8[%c0_6, %c0_7], %7 {strides = array<i32>} : memref<128x128xf32, #tpu.memory_space<vmem>>, vector<128x128xf32>,
    %c0_i32_8 = arith.constant 0 : i32
    %9 = arith.cmpi eq, %arg2, %c0_i32_8 : i32
    %10 = arith.extui %9 : i1 to i32
    %c0_i32_9 = arith.constant 0 : i32
    %11 = arith.cmpi ne, %10, %c0_i32_9 : i32
    scf.if %11 {
      %c0_10 = arith.constant 0 : index
      %c0_11 = arith.constant 0 : index
      %12 = vector.load %arg8[%c0_10, %c0_11] : memref<128x128xf32, #tpu.memory_space<vmem>>, vector<128x128xf32>
      %c0_12 = arith.constant 0 : index
      %c0_13 = arith.constant 0 : index
      %13 = vector.load %arg5[%c0_12, %c0_13] : memref<1x128xf32, #tpu.memory_space<vmem>>, vector<1x128xf32>
      %14 = vector.broadcast %13 : vector<1x128xf32> to vector<128x128xf32>
      %15 = arith.addf %12, %14 : vector<128x128xf32>
      %cst_14 = arith.constant 0.000000e+00 : f32
      %16 = vector.broadcast %cst_14 : f32 to vector<128x128xf32>
      %17 = arith.maximumf %15, %16 : vector<128x128xf32>
      %c0_15 = arith.constant 0 : index
      %c0_16 = arith.constant 0 : index
      %18 = vector.load %arg6[%c0_15, %c0_16] : memref<128x128xbf16, #tpu.memory_space<vmem>>, vector<128x128xbf16>
      %19 = arith.extf %18 : vector<128x128xbf16> to vector<128x128xf32>
      %20 = arith.addf %17, %19 : vector<128x128xf32>
      %21 = arith.truncf %20 : vector<128x128xf32> to vector<128x128xbf16>
      %c0_17 = arith.constant 0 : index
      %c0_18 = arith.constant 0 : index
      %22 = vector.load %arg7[%c0_17, %c0_18] : memref<128x128xbf16, #tpu.memory_space<vmem>>, vector<128x128xbf16>
      tpu.vector_store %arg7[%c0_17, %c0_18], %21 {strides = array<i32>} : memref<128x128xbf16, #tpu.memory_space<vmem>>, vector<128x128xbf16>,
    } else {
    }
    return
  }
  func.func @transform_0(%arg0: i32, %arg1: i32, %arg2: i32) -> (i32, i32) {
    %c0_i32 = arith.constant 0 : i32
    return %arg0, %arg2 : i32, i32
  }
  func.func @transform_1(%arg0: i32, %arg1: i32, %arg2: i32) -> (i32, i32) {
    %c0_i32 = arith.constant 0 : i32
    return %arg2, %arg1 : i32, i32
  }
  func.func @transform_2(%arg0: i32, %arg1: i32, %arg2: i32) -> (i32, i32) {
    %c0_i32 = arith.constant 0 : i32
    %c0_i32_0 = arith.constant 0 : i32
    return %c0_i32, %arg1 : i32, i32
  }
  func.func @transform_3(%arg0: i32, %arg1: i32, %arg2: i32) -> (i32, i32) {
    %c0_i32 = arith.constant 0 : i32
    return %arg0, %arg1 : i32, i32
  }
  func.func @transform_4(%arg0: i32, %arg1: i32, %arg2: i32) -> (i32, i32) {
    %c0_i32 = arith.constant 0 : i32
    return %arg0, %arg1 : i32, i32
  }
}

</mosaic_0001>

<bundles_post_ra>
// kernel: _lambda_.22
= control target key start
LH: loop header
LB: loop body
LE: loop exit
PB: predicated region body
PF: predicated region fallthrough
CT: control target
= control target key end

     0   :  { %s2251_s1 = inlined_call_operand.vmem [shape: bf16[128,128], index: 1, kind: input, shape index: {}]   ;;  %s2252_s0 = inlined_call_operand.vmem [shape: bf16[512,128], index: 0, kind: input, shape index: {}]   ;;  %s2253_s2 = inlined_call_operand.vmem [shape: f32[1,128], index: 2, kind: input, shape index: {}]   ;;  %s2254_s3 = inlined_call_operand.vmem [shape: bf16[512,128], index: 3, kind: output, shape index: {}]  }
   0x1   :  { %v1906_v0 = vld [vmem:[%s2251_s1] sm:$0xff]   ;;  %v1907_v1 = vld [vmem:[%s2251_s1 + $0x8] sm:$0xff]   ;;  %v1908_v2 = vld [vmem:[%s2251_s1 + $0x10] sm:$0xff]  }
   0x2   :  { %1810 = vmatprep.subr.bf16.mxu0 %v1906_v0  ;;  %1890 = vmatprep.subr.bf16.mxu1 %v1906_v0  ;;  %v1909_v3 = vld [vmem:[%s2251_s1 + $0x18] sm:$0xff]   ;;  %v1914_v4 = vld [vmem:[%s2252_s0] sm:$0xff]   ;;  %v1911_v7 = vld [vmem:[%s2251_s1 + $0x28] sm:$0xff]  }
   0x3   :  { %1811 = vmatpush3.bf16.msra.mxu0 %v1906_v0  ;;  %1898 = vmatpush3.bf16.msra.mxu1 %v1906_v0  ;;  %v1915_v5 = vld [vmem:[%s2252_s0 + $0x80] sm:$0xff]   ;;  %v1912_v8 = vld [vmem:[%s2251_s1 + $0x30] sm:$0xff]   ;;  %v1913_v9 = vld [vmem:[%s2251_s1 + $0x38] sm:$0xff]  }
   0x4   :  { %1812 = vmatprep.subr.bf16.mxu0 %v1907_v1  ;;  %1891 = vmatprep.subr.bf16.mxu1 %v1907_v1  ;;  %v1910_v6 = vld [vmem:[%s2251_s1 + $0x20] sm:$0xff]   ;;  %v1916_v10 = vld [vmem:[%s2252_s0 + $0x8] sm:$0xff]   ;;  %v1918_v12 = vld [vmem:[%s2252_s0 + $0x10] sm:$0xff]  }
   0x5   :  { %1826 = vmatprep.mubr.bf16.mxu0 %v1914_v4  ;;  %1858 = vmatprep.mubr.bf16.mxu1 %v1915_v5  ;;  %v1917_v11 = vld [vmem:[%s2252_s0 + $0x88] sm:$0xff]   ;;  %v1919_v13 = vld [vmem:[%s2252_s0 + $0x90] sm:$0xff]   ;;  %v1920_v14 = vld [vmem:[%s2252_s0 + $0x18] sm:$0xff]  }
   0x6   :  { %v1921_v15 = vld [vmem:[%s2252_s0 + $0x98] sm:$0xff]   ;;  %v1922_v16 = vld [vmem:[%s2252_s0 + $0x20] sm:$0xff]   ;;  %v1924_v18 = vld [vmem:[%s2252_s0 + $0x28] sm:$0xff]  }
   0x7   :  { %1813 = vmatpush3.bf16.msra.mxu0 %v1907_v1  ;;  %1899 = vmatpush3.bf16.msra.mxu1 %v1907_v1  ;;  %v1923_v17 = vld [vmem:[%s2252_s0 + $0xa0] sm:$0xff]   ;;  %v1925_v19 = vld [vmem:[%s2252_s0 + $0xa8] sm:$0xff]   ;;  %v1926_v20 = vld [vmem:[%s2252_s0 + $0x30] sm:$0xff]  }
   0x8   :  { %1814 = vmatprep.subr.bf16.mxu0 %v1908_v2  ;;  %1892 = vmatprep.subr.bf16.mxu1 %v1908_v2  ;;  %v1927_v21 = vld [vmem:[%s2252_s0 + $0xb0] sm:$0xff]   ;;  %v1928_v22 = vld [vmem:[%s2252_s0 + $0x38] sm:$0xff]   ;;  %v1930_v24 = vld [vmem:[%s2252_s0 + $0x40] sm:$0xff]  }
   0x9   :  { %v1929_v23 = vld [vmem:[%s2252_s0 + $0xb8] sm:$0xff]   ;;  %v1931_v25 = vld [vmem:[%s2252_s0 + $0xc0] sm:$0xff]   ;;  %v1932_v26 = vld [vmem:[%s2252_s0 + $0x48] sm:$0xff]  }
   0xa   :  { %v1933_v27 = vld [vmem:[%s2252_s0 + $0xc8] sm:$0xff]   ;;  %v1934_v28 = vld [vmem:[%s2252_s0 + $0x50] sm:$0xff]   ;;  %v1936_v30 = vld [vmem:[%s2252_s0 + $0x58] sm:$0xff]  }
   0xb   :  { %1815 = vmatpush3.bf16.msra.mxu0 %v1908_v2  ;;  %1900 = vmatpush3.bf16.msra.mxu1 %v1908_v2  ;;  %v1935_v29 = vld [vmem:[%s2252_s0 + $0xd0] sm:$0xff]   ;;  %v1937_v31 = vld [vmem:[%s2252_s0 + $0xd8] sm:$0xff]   ;;  %v1938_v32 = vld [vmem:[%s2252_s0 + $0x60] sm:$0xff]  }
   0xc   :  { %1816 = vmatprep.subr.bf16.mxu0 %v1909_v3  ;;  %1893 = vmatprep.subr.bf16.mxu1 %v1909_v3  ;;  %v1939_v33 = vld [vmem:[%s2252_s0 + $0xe0] sm:$0xff]   ;;  %v1940_v34 = vld [vmem:[%s2252_s0 + $0x68] sm:$0xff]   ;;  %v1942_v36 = vld [vmem:[%s2252_s0 + $0x70] sm:$0xff]  }
   0xd   :  { %v1941_v35 = vld [vmem:[%s2252_s0 + $0xe8] sm:$0xff]   ;;  %v1943_v37 = vld [vmem:[%s2252_s0 + $0xf0] sm:$0xff]   ;;  %v1944_v38 = vld [vmem:[%s2252_s0 + $0x78] sm:$0xff]  }
   0xe   :  { %v1945_v39 = vld [vmem:[%s2252_s0 + $0xf8] sm:$0xff]   ;;  %v2089_v40 = vld [vmem:[%s2253_s2] ss:$0 sm:$0xff] }
   0xf   :  { %1817 = vmatpush3.bf16.msra.mxu0 %v1909_v3  ;;  %1901 = vmatpush3.bf16.msra.mxu1 %v1909_v3 }
  0x10   :  { %1818 = vmatprep.subr.bf16.mxu0 %v1910_v6  ;;  %1894 = vmatprep.subr.bf16.mxu1 %v1910_v6 }
  0x13   :  { %1819 = vmatpush3.bf16.msra.mxu0 %v1910_v6  ;;  %1902 = vmatpush3.bf16.msra.mxu1 %v1910_v6 }
  0x14   :  { %1820 = vmatprep.subr.bf16.mxu0 %v1911_v7  ;;  %1895 = vmatprep.subr.bf16.mxu1 %v1911_v7 }
  0x17   :  { %1821 = vmatpush3.bf16.msra.mxu0 %v1911_v7  ;;  %1903 = vmatpush3.bf16.msra.mxu1 %v1911_v7 }
  0x18   :  { %1822 = vmatprep.subr.bf16.mxu0 %v1912_v8  ;;  %1896 = vmatprep.subr.bf16.mxu1 %v1912_v8 }
  0x1b   :  { %1823 = vmatpush3.bf16.msra.mxu0 %v1912_v8  ;;  %1904 = vmatpush3.bf16.msra.mxu1 %v1912_v8 }
  0x1c   :  { %1824 = vmatprep.subr.bf16.mxu0 %v1913_v9  ;;  %1897 = vmatprep.subr.bf16.mxu1 %v1913_v9 }
  0x1f   :  { %1825 = vmatpush3.bf16.msra.mxu0 %v1913_v9  ;;  %1905 = vmatpush3.bf16.msra.mxu1 %v1913_v9 }
  0x22   :  { %1827 = vmatmul.mubr.bf16.vlgmr.msra.gmra.mrb[0].mxu0 %v1916_v10  ;;  %1859 = vmatmul.mubr.bf16.vlgmr.msra.gmra.mrb[0].mxu1 %v1917_v11 }
  0x23   :  { %1830 = vmatprep.mubr.bf16.mxu0 %v1918_v12  ;;  %1862 = vmatprep.mubr.bf16.mxu1 %v1919_v13 }
  0x2a   :  { %1831 = vmatmul.mubr.bf16.gmra.mrb[4].mxu0 %v1920_v14  ;;  %1863 = vmatmul.mubr.bf16.gmra.mrb[4].mxu1 %v1921_v15 }
  0x2b   :  { %1834 = vmatprep.mubr.bf16.mxu0 %v1922_v16  ;;  %1866 = vmatprep.mubr.bf16.mxu1 %v1923_v17 }
  0x32   :  { %1835 = vmatmul.mubr.bf16.gmra.mrb[8].mxu0 %v1924_v18  ;;  %1867 = vmatmul.mubr.bf16.gmra.mrb[8].mxu1 %v1925_v19 }
  0x33   :  { %1838 = vmatprep.mubr.bf16.mxu0 %v1926_v20  ;;  %1870 = vmatprep.mubr.bf16.mxu1 %v1927_v21 }
  0x3a   :  { %1839 = vmatmul.mubr.bf16.gmra.mrb[12].mxu0 %v1928_v22  ;;  %1871 = vmatmul.mubr.bf16.gmra.mrb[12].mxu1 %v1929_v23 }
  0x3b   :  { %1842 = vmatprep.mubr.bf16.mxu0 %v1930_v24  ;;  %1874 = vmatprep.mubr.bf16.mxu1 %v1931_v25 }
  0x42   :  { %1843 = vmatmul.mubr.bf16.gmra.mrb[16].mxu0 %v1932_v26  ;;  %1875 = vmatmul.mubr.bf16.gmra.mrb[16].mxu1 %v1933_v27 }
  0x43   :  { %1846 = vmatprep.mubr.bf16.mxu0 %v1934_v28  ;;  %1878 = vmatprep.mubr.bf16.mxu1 %v1935_v29 }
  0x4a   :  { %1847 = vmatmul.mubr.bf16.gmra.mrb[20].mxu0 %v1936_v30  ;;  %1879 = vmatmul.mubr.bf16.gmra.mrb[20].mxu1 %v1937_v31 }
  0x4b   :  { %1850 = vmatprep.mubr.bf16.mxu0 %v1938_v32  ;;  %1882 = vmatprep.mubr.bf16.mxu1 %v1939_v33 }
  0x52   :  { %1851 = vmatmul.mubr.bf16.gmra.mrb[24].mxu0 %v1940_v34  ;;  %1883 = vmatmul.mubr.bf16.gmra.mrb[24].mxu1 %v1941_v35 }
  0x53   :  { %1854 = vmatprep.mubr.bf16.mxu0 %v1942_v36  ;;  %1886 = vmatprep.mubr.bf16.mxu1 %v1943_v37 }
  0x5a   :  { %1855 = vmatmul.mubr.bf16.gmra.mrb[28].mxu0 %v1944_v38  ;;  %1887 = vmatmul.mubr.bf16.gmra.mrb[28].mxu1 %v1945_v39 }
  0xf5   :  { %v1828_v41 = vpop.f32.mrb[0].mxu0  ;;  %v1860_v42 = vpop.f32.mrb[0].mxu1 }
  0xf6   :  { %v960_v43 = vadd.f32 %v1828_v41, %v2089_v40  ;;  %v992_v44 = vadd.f32 %v1860_v42, %v2089_v40  ;;  %v501_v45 = vpop.f32.mrb[1].mxu0  ;;  %v629_v46 = vpop.f32.mrb[1].mxu1 }
  0xf7   :  { %v958_v47 = vadd.f32 %v2089_v40, %v501_v45  ;;  %v990_v48 = vadd.f32 %v2089_v40, %v629_v46  ;;  %v1829_v49 = vpop.f32.mrb[2].mxu0  ;;  %v1861_v50 = vpop.f32.mrb[2].mxu1 }
  0xf8   :  { %v961_v51 = vadd.f32 %v1829_v49, %v2089_v40  ;;  %v993_v52 = vadd.f32 %v1861_v50, %v2089_v40  ;;  %v504_v53 = vpop.f32.mrb[3].mxu0  ;;  %v632_v54 = vpop.f32.mrb[3].mxu1  ;;  %v1024_v57 = vmax.f32 %v960_v43, 0.0  ;;  %v1056_v58 = vmax.f32 %v992_v44, 0.0 }
  0xf9   :  { %v959_v55 = vadd.f32 %v2089_v40, %v504_v53  ;;  %v991_v56 = vadd.f32 %v2089_v40, %v632_v54  ;;  %v1022_v61 = vmax.f32 %v958_v47, 0.0  ;;  %v1054_v62 = vmax.f32 %v990_v48, 0.0 }
  0xfa   :  { %v1025_v59 = vmax.f32 %v961_v51, 0.0  ;;  %v1057_v60 = vmax.f32 %v993_v52, 0.0 }
  0xfb   :  { %v1023_v63 = vmax.f32 %v959_v55, 0.0  ;;  %v1055_v0 = vmax.f32 %v991_v56, 0.0 }
  0xfc   :  { %v1587_v1 = vpack.c.bf16 %v1025_v59, %v1024_v57  ;;  %v1667_v2 = vpack.c.bf16 %v1057_v60, %v1056_v58 }
  0xfd   :  { %v1582_v3 = vpack.c.bf16 %v1023_v63, %v1022_v61  ;;  %v1662_v4 = vpack.c.bf16 %v1055_v0, %v1054_v62  ;;  %v1832_v5 = vpop.f32.mrb[4].mxu0  ;;  %v1864_v6 = vpop.f32.mrb[4].mxu1 }
  0xfe   :  { %1739 = vst [vmem:[%s2254_s3 + $0x8] sm:$0xff] %v1587_v1   ;;  %1755 = vst [vmem:[%s2254_s3 + $0x88] sm:$0xff] %v1667_v2   ;;  %v964_v7 = vadd.f32 %v1832_v5, %v2089_v40  ;;  %v996_v8 = vadd.f32 %v1864_v6, %v2089_v40  ;;  %v517_v9 = vpop.f32.mrb[5].mxu0  ;;  %v645_v10 = vpop.f32.mrb[5].mxu1 }
  0xff   :  { %1583 = vst [vmem:[%s2254_s3] sm:$0xff] %v1582_v3   ;;  %1754 = vst [vmem:[%s2254_s3 + $0x80] sm:$0xff] %v1662_v4   ;;  %v962_v11 = vadd.f32 %v2089_v40, %v517_v9  ;;  %v994_v12 = vadd.f32 %v2089_v40, %v645_v10  ;;  %v1833_v13 = vpop.f32.mrb[6].mxu0  ;;  %v1865_v14 = vpop.f32.mrb[6].mxu1 }
 0x100   :  { %v965_v15 = vadd.f32 %v1833_v13, %v2089_v40  ;;  %v997_v16 = vadd.f32 %v1865_v14, %v2089_v40  ;;  %v520_v17 = vpop.f32.mrb[7].mxu0  ;;  %v648_v18 = vpop.f32.mrb[7].mxu1  ;;  %v1028_v21 = vmax.f32 %v964_v7, 0.0  ;;  %v1060_v22 = vmax.f32 %v996_v8, 0.0 }
 0x101   :  { %v963_v19 = vadd.f32 %v2089_v40, %v520_v17  ;;  %v995_v20 = vadd.f32 %v2089_v40, %v648_v18  ;;  %v1026_v25 = vmax.f32 %v962_v11, 0.0  ;;  %v1058_v26 = vmax.f32 %v994_v12, 0.0 }
 0x102   :  { %v1029_v23 = vmax.f32 %v965_v15, 0.0  ;;  %v1061_v24 = vmax.f32 %v997_v16, 0.0 }
 0x103   :  { %v1027_v27 = vmax.f32 %v963_v19, 0.0  ;;  %v1059_v28 = vmax.f32 %v995_v20, 0.0 }
 0x104   :  { %v1597_v29 = vpack.c.bf16 %v1029_v23, %v1028_v21  ;;  %v1677_v30 = vpack.c.bf16 %v1061_v24, %v1060_v22 }
 0x105   :  { %v1592_v31 = vpack.c.bf16 %v1027_v27, %v1026_v25  ;;  %v1672_v32 = vpack.c.bf16 %v1059_v28, %v1058_v26  ;;  %v1836_v33 = vpop.f32.mrb[8].mxu0  ;;  %v1868_v34 = vpop.f32.mrb[8].mxu1 }
 0x106   :  { %1741 = vst [vmem:[%s2254_s3 + $0x18] sm:$0xff] %v1597_v29   ;;  %1757 = vst [vmem:[%s2254_s3 + $0x98] sm:$0xff] %v1677_v30   ;;  %v968_v35 = vadd.f32 %v1836_v33, %v2089_v40  ;;  %v1000_v36 = vadd.f32 %v1868_v34, %v2089_v40  ;;  %v533_v37 = vpop.f32.mrb[9].mxu0  ;;  %v661_v38 = vpop.f32.mrb[9].mxu1 }
 0x107   :  { %1740 = vst [vmem:[%s2254_s3 + $0x10] sm:$0xff] %v1592_v31   ;;  %1756 = vst [vmem:[%s2254_s3 + $0x90] sm:$0xff] %v1672_v32   ;;  %v966_v39 = vadd.f32 %v2089_v40, %v533_v37  ;;  %v998_v41 = vadd.f32 %v2089_v40, %v661_v38  ;;  %v1837_v42 = vpop.f32.mrb[10].mxu0  ;;  %v1869_v43 = vpop.f32.mrb[10].mxu1 }
 0x108   :  { %v969_v44 = vadd.f32 %v1837_v42, %v2089_v40  ;;  %v1001_v45 = vadd.f32 %v1869_v43, %v2089_v40  ;;  %v536_v46 = vpop.f32.mrb[11].mxu0  ;;  %v664_v47 = vpop.f32.mrb[11].mxu1  ;;  %v1032_v50 = vmax.f32 %v968_v35, 0.0  ;;  %v1064_v51 = vmax.f32 %v1000_v36, 0.0 }
 0x109   :  { %v967_v48 = vadd.f32 %v2089_v40, %v536_v46  ;;  %v999_v49 = vadd.f32 %v2089_v40, %v664_v47  ;;  %v1030_v54 = vmax.f32 %v966_v39, 0.0  ;;  %v1062_v55 = vmax.f32 %v998_v41, 0.0 }
 0x10a   :  { %v1033_v52 = vmax.f32 %v969_v44, 0.0  ;;  %v1065_v53 = vmax.f32 %v1001_v45, 0.0 }
 0x10b   :  { %v1031_v56 = vmax.f32 %v967_v48, 0.0  ;;  %v1063_v57 = vmax.f32 %v999_v49, 0.0 }
 0x10c   :  { %v1607_v58 = vpack.c.bf16 %v1033_v52, %v1032_v50  ;;  %v1687_v59 = vpack.c.bf16 %v1065_v53, %v1064_v51 }
 0x10d   :  { %v1602_v60 = vpack.c.bf16 %v1031_v56, %v1030_v54  ;;  %v1682_v61 = vpack.c.bf16 %v1063_v57, %v1062_v55  ;;  %v1840_v62 = vpop.f32.mrb[12].mxu0  ;;  %v1872_v63 = vpop.f32.mrb[12].mxu1 }
 0x10e   :  { %1743 = vst [vmem:[%s2254_s3 + $0x28] sm:$0xff] %v1607_v58   ;;  %1759 = vst [vmem:[%s2254_s3 + $0xa8] sm:$0xff] %v1687_v59   ;;  %v972_v0 = vadd.f32 %v1840_v62, %v2089_v40  ;;  %v1004_v1 = vadd.f32 %v1872_v63, %v2089_v40  ;;  %v549_v2 = vpop.f32.mrb[13].mxu0  ;;  %v677_v3 = vpop.f32.mrb[13].mxu1 }
 0x10f   :  { %1742 = vst [vmem:[%s2254_s3 + $0x20] sm:$0xff] %v1602_v60   ;;  %1758 = vst [vmem:[%s2254_s3 + $0xa0] sm:$0xff] %v1682_v61   ;;  %v970_v4 = vadd.f32 %v2089_v40, %v549_v2  ;;  %v1002_v5 = vadd.f32 %v2089_v40, %v677_v3  ;;  %v1841_v6 = vpop.f32.mrb[14].mxu0  ;;  %v1873_v7 = vpop.f32.mrb[14].mxu1 }
 0x110   :  { %v973_v8 = vadd.f32 %v1841_v6, %v2089_v40  ;;  %v1005_v9 = vadd.f32 %v1873_v7, %v2089_v40  ;;  %v552_v10 = vpop.f32.mrb[15].mxu0  ;;  %v680_v11 = vpop.f32.mrb[15].mxu1  ;;  %v1036_v14 = vmax.f32 %v972_v0, 0.0  ;;  %v1068_v15 = vmax.f32 %v1004_v1, 0.0 }
 0x111   :  { %v971_v12 = vadd.f32 %v2089_v40, %v552_v10  ;;  %v1003_v13 = vadd.f32 %v2089_v40, %v680_v11  ;;  %v1034_v18 = vmax.f32 %v970_v4, 0.0  ;;  %v1066_v19 = vmax.f32 %v1002_v5, 0.0 }
 0x112   :  { %v1037_v16 = vmax.f32 %v973_v8, 0.0  ;;  %v1069_v17 = vmax.f32 %v1005_v9, 0.0 }
 0x113   :  { %v1035_v20 = vmax.f32 %v971_v12, 0.0  ;;  %v1067_v21 = vmax.f32 %v1003_v13, 0.0 }
 0x114   :  { %v1617_v22 = vpack.c.bf16 %v1037_v16, %v1036_v14  ;;  %v1697_v23 = vpack.c.bf16 %v1069_v17, %v1068_v15 }
 0x115   :  { %v1612_v24 = vpack.c.bf16 %v1035_v20, %v1034_v18  ;;  %v1692_v25 = vpack.c.bf16 %v1067_v21, %v1066_v19  ;;  %v1844_v26 = vpop.f32.mrb[16].mxu0  ;;  %v1876_v27 = vpop.f32.mrb[16].mxu1 }
 0x116   :  { %1745 = vst [vmem:[%s2254_s3 + $0x38] sm:$0xff] %v1617_v22   ;;  %1761 = vst [vmem:[%s2254_s3 + $0xb8] sm:$0xff] %v1697_v23   ;;  %v976_v28 = vadd.f32 %v1844_v26, %v2089_v40  ;;  %v1008_v29 = vadd.f32 %v1876_v27, %v2089_v40  ;;  %v565_v30 = vpop.f32.mrb[17].mxu0  ;;  %v693_v31 = vpop.f32.mrb[17].mxu1 }
 0x117   :  { %1744 = vst [vmem:[%s2254_s3 + $0x30] sm:$0xff] %v1612_v24   ;;  %1760 = vst [vmem:[%s2254_s3 + $0xb0] sm:$0xff] %v1692_v25   ;;  %v974_v32 = vadd.f32 %v2089_v40, %v565_v30  ;;  %v1006_v33 = vadd.f32 %v2089_v40, %v693_v31  ;;  %v1845_v34 = vpop.f32.mrb[18].mxu0  ;;  %v1877_v35 = vpop.f32.mrb[18].mxu1 }
 0x118   :  { %v977_v36 = vadd.f32 %v1845_v34, %v2089_v40  ;;  %v1009_v37 = vadd.f32 %v1877_v35, %v2089_v40  ;;  %v568_v38 = vpop.f32.mrb[19].mxu0  ;;  %v696_v39 = vpop.f32.mrb[19].mxu1  ;;  %v1040_v43 = vmax.f32 %v976_v28, 0.0  ;;  %v1072_v44 = vmax.f32 %v1008_v29, 0.0 }
 0x119   :  { %v975_v41 = vadd.f32 %v2089_v40, %v568_v38  ;;  %v1007_v42 = vadd.f32 %v2089_v40, %v696_v39  ;;  %v1038_v47 = vmax.f32 %v974_v32, 0.0  ;;  %v1070_v48 = vmax.f32 %v1006_v33, 0.0 }
 0x11a   :  { %v1041_v45 = vmax.f32 %v977_v36, 0.0  ;;  %v1073_v46 = vmax.f32 %v1009_v37, 0.0 }
 0x11b   :  { %v1039_v49 = vmax.f32 %v975_v41, 0.0  ;;  %v1071_v50 = vmax.f32 %v1007_v42, 0.0 }
 0x11c   :  { %v1627_v51 = vpack.c.bf16 %v1041_v45, %v1040_v43  ;;  %v1707_v52 = vpack.c.bf16 %v1073_v46, %v1072_v44 }
 0x11d   :  { %v1622_v53 = vpack.c.bf16 %v1039_v49, %v1038_v47  ;;  %v1702_v54 = vpack.c.bf16 %v1071_v50, %v1070_v48  ;;  %v1848_v55 = vpop.f32.mrb[20].mxu0  ;;  %v1880_v56 = vpop.f32.mrb[20].mxu1 }
 0x11e   :  { %1747 = vst [vmem:[%s2254_s3 + $0x48] sm:$0xff] %v1627_v51   ;;  %1763 = vst [vmem:[%s2254_s3 + $0xc8] sm:$0xff] %v1707_v52   ;;  %v980_v57 = vadd.f32 %v1848_v55, %v2089_v40  ;;  %v1012_v58 = vadd.f32 %v1880_v56, %v2089_v40  ;;  %v581_v59 = vpop.f32.mrb[21].mxu0  ;;  %v709_v60 = vpop.f32.mrb[21].mxu1 }
 0x11f   :  { %1746 = vst [vmem:[%s2254_s3 + $0x40] sm:$0xff] %v1622_v53   ;;  %1762 = vst [vmem:[%s2254_s3 + $0xc0] sm:$0xff] %v1702_v54   ;;  %v978_v61 = vadd.f32 %v2089_v40, %v581_v59  ;;  %v1010_v62 = vadd.f32 %v2089_v40, %v709_v60  ;;  %v1849_v63 = vpop.f32.mrb[22].mxu0  ;;  %v1881_v0 = vpop.f32.mrb[22].mxu1 }
 0x120   :  { %v981_v1 = vadd.f32 %v1849_v63, %v2089_v40  ;;  %v1013_v2 = vadd.f32 %v1881_v0, %v2089_v40  ;;  %v584_v3 = vpop.f32.mrb[23].mxu0  ;;  %v712_v4 = vpop.f32.mrb[23].mxu1  ;;  %v1044_v7 = vmax.f32 %v980_v57, 0.0  ;;  %v1076_v8 = vmax.f32 %v1012_v58, 0.0 }
 0x121   :  { %v979_v5 = vadd.f32 %v2089_v40, %v584_v3  ;;  %v1011_v6 = vadd.f32 %v2089_v40, %v712_v4  ;;  %v1042_v11 = vmax.f32 %v978_v61, 0.0  ;;  %v1074_v12 = vmax.f32 %v1010_v62, 0.0 }
 0x122   :  { %v1045_v9 = vmax.f32 %v981_v1, 0.0  ;;  %v1077_v10 = vmax.f32 %v1013_v2, 0.0 }
 0x123   :  { %v1043_v13 = vmax.f32 %v979_v5, 0.0  ;;  %v1075_v14 = vmax.f32 %v1011_v6, 0.0 }
 0x124   :  { %v1637_v15 = vpack.c.bf16 %v1045_v9, %v1044_v7  ;;  %v1717_v16 = vpack.c.bf16 %v1077_v10, %v1076_v8 }
 0x125   :  { %v1632_v17 = vpack.c.bf16 %v1043_v13, %v1042_v11  ;;  %v1712_v18 = vpack.c.bf16 %v1075_v14, %v1074_v12  ;;  %v1852_v19 = vpop.f32.mrb[24].mxu0  ;;  %v1884_v20 = vpop.f32.mrb[24].mxu1 }
 0x126   :  { %1749 = vst [vmem:[%s2254_s3 + $0x58] sm:$0xff] %v1637_v15   ;;  %1765 = vst [vmem:[%s2254_s3 + $0xd8] sm:$0xff] %v1717_v16   ;;  %v984_v21 = vadd.f32 %v1852_v19, %v2089_v40  ;;  %v1016_v22 = vadd.f32 %v1884_v20, %v2089_v40  ;;  %v597_v23 = vpop.f32.mrb[25].mxu0  ;;  %v725_v24 = vpop.f32.mrb[25].mxu1 }
 0x127   :  { %1748 = vst [vmem:[%s2254_s3 + $0x50] sm:$0xff] %v1632_v17   ;;  %1764 = vst [vmem:[%s2254_s3 + $0xd0] sm:$0xff] %v1712_v18   ;;  %v982_v25 = vadd.f32 %v2089_v40, %v597_v23  ;;  %v1014_v26 = vadd.f32 %v2089_v40, %v725_v24  ;;  %v1853_v27 = vpop.f32.mrb[26].mxu0  ;;  %v1885_v28 = vpop.f32.mrb[26].mxu1 }
 0x128   :  { %v985_v29 = vadd.f32 %v1853_v27, %v2089_v40  ;;  %v1017_v30 = vadd.f32 %v1885_v28, %v2089_v40  ;;  %v600_v31 = vpop.f32.mrb[27].mxu0  ;;  %v728_v32 = vpop.f32.mrb[27].mxu1  ;;  %v1048_v35 = vmax.f32 %v984_v21, 0.0  ;;  %v1080_v36 = vmax.f32 %v1016_v22, 0.0 }
 0x129   :  { %v983_v33 = vadd.f32 %v2089_v40, %v600_v31  ;;  %v1015_v34 = vadd.f32 %v2089_v40, %v728_v32  ;;  %v1046_v39 = vmax.f32 %v982_v25, 0.0  ;;  %v1078_v41 = vmax.f32 %v1014_v26, 0.0 }
 0x12a   :  { %v1049_v37 = vmax.f32 %v985_v29, 0.0  ;;  %v1081_v38 = vmax.f32 %v1017_v30, 0.0 }
 0x12b   :  { %v1047_v42 = vmax.f32 %v983_v33, 0.0  ;;  %v1079_v43 = vmax.f32 %v1015_v34, 0.0 }
 0x12c   :  { %v1647_v44 = vpack.c.bf16 %v1049_v37, %v1048_v35  ;;  %v1727_v45 = vpack.c.bf16 %v1081_v38, %v1080_v36 }
 0x12d   :  { %v1642_v46 = vpack.c.bf16 %v1047_v42, %v1046_v39  ;;  %v1722_v47 = vpack.c.bf16 %v1079_v43, %v1078_v41  ;;  %v1856_v48 = vpop.f32.mrb[28].mxu0  ;;  %v1888_v49 = vpop.f32.mrb[28].mxu1 }
 0x12e   :  { %1751 = vst [vmem:[%s2254_s3 + $0x68] sm:$0xff] %v1647_v44   ;;  %1767 = vst [vmem:[%s2254_s3 + $0xe8] sm:$0xff] %v1727_v45   ;;  %v988_v50 = vadd.f32 %v1856_v48, %v2089_v40  ;;  %v1020_v51 = vadd.f32 %v1888_v49, %v2089_v40  ;;  %v613_v52 = vpop.f32.mrb[29].mxu0  ;;  %v741_v53 = vpop.f32.mrb[29].mxu1 }
 0x12f   :  { %1750 = vst [vmem:[%s2254_s3 + $0x60] sm:$0xff] %v1642_v46   ;;  %1766 = vst [vmem:[%s2254_s3 + $0xe0] sm:$0xff] %v1722_v47   ;;  %v986_v54 = vadd.f32 %v2089_v40, %v613_v52  ;;  %v1018_v55 = vadd.f32 %v2089_v40, %v741_v53  ;;  %v1857_v56 = vpop.f32.mrb[30].mxu0  ;;  %v1889_v57 = vpop.f32.mrb[30].mxu1 }
 0x130   :  { %v989_v58 = vadd.f32 %v1857_v56, %v2089_v40  ;;  %v1021_v59 = vadd.f32 %v1889_v57, %v2089_v40  ;;  %v616_v60 = vpop.f32.mrb[31].mxu0  ;;  %v744_v61 = vpop.f32.mrb[31].mxu1  ;;  %v1052_v0 = vmax.f32 %v988_v50, 0.0  ;;  %v1084_v1 = vmax.f32 %v1020_v51, 0.0 }
 0x131   :  { %v987_v62 = vadd.f32 %v2089_v40, %v616_v60  ;;  %v1019_v63 = vadd.f32 %v2089_v40, %v744_v61  ;;  %v1050_v4 = vmax.f32 %v986_v54, 0.0  ;;  %v1082_v5 = vmax.f32 %v1018_v55, 0.0 }
 0x132   :  { %v1053_v2 = vmax.f32 %v989_v58, 0.0  ;;  %v1085_v3 = vmax.f32 %v1021_v59, 0.0 }
 0x133   :  { %v1051_v6 = vmax.f32 %v987_v62, 0.0  ;;  %v1083_v7 = vmax.f32 %v1019_v63, 0.0 }
 0x134   :  { %v1657_v8 = vpack.c.bf16 %v1053_v2, %v1052_v0  ;;  %v1737_v9 = vpack.c.bf16 %v1085_v3, %v1084_v1 }
 0x135   :  { %v1652_v10 = vpack.c.bf16 %v1051_v6, %v1050_v4  ;;  %v1732_v11 = vpack.c.bf16 %v1083_v7, %v1082_v5 }
 0x136   :  { %1753 = vst [vmem:[%s2254_s3 + $0x78] sm:$0xff] %v1657_v8   ;;  %1769 = vst [vmem:[%s2254_s3 + $0xf8] sm:$0xff] %v1737_v9  }
 0x137   :  { %1752 = vst [vmem:[%s2254_s3 + $0x70] sm:$0xff] %v1652_v10   ;;  %1768 = vst [vmem:[%s2254_s3 + $0xf0] sm:$0xff] %v1732_v11  }

// kernel: _lambda_.23
= control target key start
LH: loop header
LB: loop body
LE: loop exit
PB: predicated region body
PF: predicated region fallthrough
CT: control target
= control target key end

     0   :  { %v752_v1 = vmov 0   ;;  %v457_v25 = vlaneseq  ;;  %s940_s1 = inlined_call_operand.vmem [shape: bf16[128,256], index: 1, kind: input, shape index: {}]   ;;  %s941_s0 = inlined_call_operand.vmem [shape: bf16[128,128], index: 0, kind: input, shape index: {}]   ;;  %s942_s2 = inlined_call_operand.vmem [shape: f32[1,256], index: 2, kind: input, shape index: {}]   ;;  %s943_s3 = inlined_call_operand.vmem [shape: bf16[128,256], index: 3, kind: output, shape index: {}]  }
   0x1   :  { %v720_v0 = vld [vmem:[%s940_s1 + $0x4] ss:$8 sps:$4 sm:$0xff]   ;;  %275 = vmatprep.mubr.bf16.mxu0 %v752_v1  ;;  %315 = vmatprep.mubr.bf16.mxu1 %v752_v1  ;;  %v722_v2 = vld [vmem:[%s940_s1] ss:$8 sps:$4 sm:$0xff]   ;;  %v723_v3 = vld [vmem:[%s940_s1 + $0x14] ss:$8 sps:$4 sm:$0xff]  }
   0x2   :  { %243 = vmatprep.subr.bf16.mxu0 %v720_v0  ;;  %703 = vmatprep.subr.bf16.mxu1 %v720_v0  ;;  %v725_v4 = vld [vmem:[%s940_s1 + $0x10] ss:$8 sps:$4 sm:$0xff]   ;;  %v726_v5 = vld [vmem:[%s940_s1 + $0x24] ss:$8 sps:$4 sm:$0xff]   ;;  %v728_v6 = vld [vmem:[%s940_s1 + $0x20] ss:$8 sps:$4 sm:$0xff]  }
   0x3   :  { %244 = vmatpush1.bf16.msra.mxu0 %v722_v2  ;;  %711 = vmatpush1.bf16.msra.mxu1 %v722_v2  ;;  %v729_v7 = vld [vmem:[%s940_s1 + $0x34] ss:$8 sps:$4 sm:$0xff]   ;;  %v731_v8 = vld [vmem:[%s940_s1 + $0x30] ss:$8 sps:$4 sm:$0xff]   ;;  %v732_v9 = vld [vmem:[%s940_s1 + $0x44] ss:$8 sps:$4 sm:$0xff]  }
   0x4   :  { %245 = vmatprep.subr.bf16.mxu0 %v723_v3  ;;  %704 = vmatprep.subr.bf16.mxu1 %v723_v3  ;;  %v734_v10 = vld [vmem:[%s940_s1 + $0x40] ss:$8 sps:$4 sm:$0xff]   ;;  %v735_v11 = vld [vmem:[%s940_s1 + $0x54] ss:$8 sps:$4 sm:$0xff]   ;;  %v737_v12 = vld [vmem:[%s940_s1 + $0x50] ss:$8 sps:$4 sm:$0xff]  }
   0x5   :  { %v738_v13 = vld [vmem:[%s940_s1 + $0x64] ss:$8 sps:$4 sm:$0xff]   ;;  %v740_v14 = vld [vmem:[%s940_s1 + $0x60] ss:$8 sps:$4 sm:$0xff]   ;;  %v741_v15 = vld [vmem:[%s940_s1 + $0x74] ss:$8 sps:$4 sm:$0xff]  }
   0x6   :  { %v743_v16 = vld [vmem:[%s940_s1 + $0x70] ss:$8 sps:$4 sm:$0xff]   ;;  %v744_v17 = vld [vmem:[%s941_s0] sm:$0xff]   ;;  %v746_v19 = vld [vmem:[%s941_s0 + $0x8] sm:$0xff]   ;;  %v458_v26 = vshrl.u32 %v457_v25, 7 }
   0x7   :  { %246 = vmatpush1.bf16.msra.mxu0 %v725_v4  ;;  %712 = vmatpush1.bf16.msra.mxu1 %v725_v4  ;;  %v745_v18 = vld [vmem:[%s941_s0 + $0x20] sm:$0xff]   ;;  %v747_v20 = vld [vmem:[%s941_s0 + $0x28] sm:$0xff]   ;;  %v748_v21 = vld [vmem:[%s941_s0 + $0x10] sm:$0xff]  }
   0x8   :  { %247 = vmatprep.subr.bf16.mxu0 %v726_v5  ;;  %705 = vmatprep.subr.bf16.mxu1 %v726_v5  ;;  %v749_v22 = vld [vmem:[%s941_s0 + $0x30] sm:$0xff]   ;;  %v750_v23 = vld [vmem:[%s941_s0 + $0x18] sm:$0xff]   ;;  %v459_v27 = vsub.s32 0, %v458_v26  ;;  %v455_v28 = vld [vmem:[%s942_s2] sm:$0x3]  ;;  %v463_v29 = vsub.s32 1, %v458_v26 }
   0x9   :  { %v751_v24 = vld [vmem:[%s941_s0 + $0x38] sm:$0xff]  }
   0xa   :  { %v856_v30 = vrot.slane %v455_v28, %v459_v27  ;;  %v858_v31 = vrot.slane %v455_v28, %v463_v29 }
   0xb   :  { %248 = vmatpush1.bf16.msra.mxu0 %v728_v6  ;;  %713 = vmatpush1.bf16.msra.mxu1 %v728_v6 }
   0xc   :  { %249 = vmatprep.subr.bf16.mxu0 %v729_v7  ;;  %706 = vmatprep.subr.bf16.mxu1 %v729_v7 }
   0xf   :  { %250 = vmatpush1.bf16.msra.mxu0 %v731_v8  ;;  %714 = vmatpush1.bf16.msra.mxu1 %v731_v8 }
  0x10   :  { %251 = vmatprep.subr.bf16.mxu0 %v732_v9  ;;  %707 = vmatprep.subr.bf16.mxu1 %v732_v9 }
  0x13   :  { %252 = vmatpush1.bf16.msra.mxu0 %v734_v10  ;;  %715 = vmatpush1.bf16.msra.mxu1 %v734_v10 }
  0x14   :  { %253 = vmatprep.subr.bf16.mxu0 %v735_v11  ;;  %708 = vmatprep.subr.bf16.mxu1 %v735_v11 }
  0x17   :  { %254 = vmatpush1.bf16.msra.mxu0 %v737_v12  ;;  %716 = vmatpush1.bf16.msra.mxu1 %v737_v12 }
  0x18   :  { %255 = vmatprep.subr.bf16.mxu0 %v738_v13  ;;  %709 = vmatprep.subr.bf16.mxu1 %v738_v13 }
  0x1b   :  { %256 = vmatpush1.bf16.msra.mxu0 %v740_v14  ;;  %717 = vmatpush1.bf16.msra.mxu1 %v740_v14 }
  0x1c   :  { %257 = vmatprep.subr.bf16.mxu0 %v741_v15  ;;  %710 = vmatprep.subr.bf16.mxu1 %v741_v15 }
  0x1f   :  { %258 = vmatpush1.bf16.msra.mxu0 %v743_v16  ;;  %718 = vmatpush1.bf16.msra.mxu1 %v743_v16 }
  0x22   :  { %276 = vmatmul.mubr.bf16.vlgmr.msra.gmra.mrb[0].mxu0 %v744_v17  ;;  %316 = vmatmul.mubr.bf16.vlgmr.msra.gmra.mrb[0].mxu1 %v745_v18 }
  0x23   :  { %285 = vmatprep.mubr.bf16.mxu0 %v752_v1  ;;  %325 = vmatprep.mubr.bf16.mxu1 %v752_v1 }
  0x2a   :  { %286 = vmatmul.mubr.bf16.gmra.mrb[4].mxu0 %v746_v19  ;;  %326 = vmatmul.mubr.bf16.gmra.mrb[4].mxu1 %v747_v20 }
  0x2b   :  { %295 = vmatprep.mubr.bf16.mxu0 %v752_v1  ;;  %335 = vmatprep.mubr.bf16.mxu1 %v752_v1 }
  0x32   :  { %296 = vmatmul.mubr.bf16.gmra.mrb[8].mxu0 %v748_v21  ;;  %336 = vmatmul.mubr.bf16.gmra.mrb[8].mxu1 %v749_v22 }
  0x33   :  { %305 = vmatprep.mubr.bf16.mxu0 %v752_v1  ;;  %345 = vmatprep.mubr.bf16.mxu1 %v752_v1 }
  0x3a   :  { %306 = vmatmul.mubr.bf16.gmra.mrb[12].mxu0 %v750_v23  ;;  %346 = vmatmul.mubr.bf16.gmra.mrb[12].mxu1 %v751_v24 }
  0xf5   :  { %v277_v32 = vpop.f32.mrb[0].mxu0  ;;  %v317_v33 = vpop.f32.mrb[0].mxu1 }
  0xf6   :  { %v467_v34 = vadd.f32 %v856_v30, %v277_v32  ;;  %v483_v35 = vadd.f32 %v856_v30, %v317_v33  ;;  %v279_v36 = vpop.f32.mrb[1].mxu0  ;;  %v319_v37 = vpop.f32.mrb[1].mxu1 }
  0xf7   :  { %v468_v38 = vadd.f32 %v858_v31, %v279_v36  ;;  %v484_v39 = vadd.f32 %v858_v31, %v319_v37  ;;  %v281_v40 = vpop.f32.mrb[2].mxu0  ;;  %v321_v41 = vpop.f32.mrb[2].mxu1 }
  0xf8   :  { %v499_v42 = vmax.f32 %v467_v34, 0.0  ;;  %v515_v43 = vmax.f32 %v483_v35, 0.0  ;;  %v469_v44 = vadd.f32 %v856_v30, %v281_v40  ;;  %v485_v45 = vadd.f32 %v856_v30, %v321_v41  ;;  %v283_v46 = vpop.f32.mrb[3].mxu0  ;;  %v323_v47 = vpop.f32.mrb[3].mxu1 }
  0xf9   :  { %v500_v48 = vmax.f32 %v468_v38, 0.0  ;;  %v516_v49 = vmax.f32 %v484_v39, 0.0  ;;  %v470_v50 = vadd.f32 %v858_v31, %v283_v46  ;;  %v486_v51 = vadd.f32 %v858_v31, %v323_v47 }
  0xfa   :  { %v501_v52 = vmax.f32 %v469_v44, 0.0  ;;  %v517_v53 = vmax.f32 %v485_v45, 0.0 }
  0xfb   :  { %v687_v54 = vpack.c.bf16 %v500_v48, %v499_v42  ;;  %v695_v55 = vpack.c.bf16 %v516_v49, %v515_v43  ;;  %v502_v56 = vmax.f32 %v470_v50, 0.0  ;;  %v518_v57 = vmax.f32 %v486_v51, 0.0 }
  0xfd   :  { %627 = vst [vmem:[%s943_s3] sm:$0xff] %v687_v54  ;;  %635 = vst [vmem:[%s943_s3 + $0x40] sm:$0xff] %v695_v55  ;;  %v688_v58 = vpack.c.bf16 %v502_v56, %v501_v52  ;;  %v696_v59 = vpack.c.bf16 %v518_v57, %v517_v53  ;;  %v287_v60 = vpop.f32.mrb[4].mxu0  ;;  %v327_v61 = vpop.f32.mrb[4].mxu1 }
  0xfe   :  { %v471_v62 = vadd.f32 %v856_v30, %v287_v60  ;;  %v487_v63 = vadd.f32 %v856_v30, %v327_v61  ;;  %v289_v0 = vpop.f32.mrb[5].mxu0  ;;  %v329_v1 = vpop.f32.mrb[5].mxu1 }
  0xff   :  { %628 = vst [vmem:[%s943_s3 + $0x8] sm:$0xff] %v688_v58  ;;  %636 = vst [vmem:[%s943_s3 + $0x48] sm:$0xff] %v696_v59  ;;  %v472_v2 = vadd.f32 %v858_v31, %v289_v0  ;;  %v488_v3 = vadd.f32 %v858_v31, %v329_v1  ;;  %v291_v4 = vpop.f32.mrb[6].mxu0  ;;  %v331_v5 = vpop.f32.mrb[6].mxu1 }
 0x100   :  { %v503_v6 = vmax.f32 %v471_v62, 0.0  ;;  %v519_v7 = vmax.f32 %v487_v63, 0.0  ;;  %v473_v8 = vadd.f32 %v856_v30, %v291_v4  ;;  %v489_v9 = vadd.f32 %v856_v30, %v331_v5  ;;  %v293_v10 = vpop.f32.mrb[7].mxu0  ;;  %v333_v11 = vpop.f32.mrb[7].mxu1 }
 0x101   :  { %v504_v12 = vmax.f32 %v472_v2, 0.0  ;;  %v520_v13 = vmax.f32 %v488_v3, 0.0  ;;  %v474_v14 = vadd.f32 %v858_v31, %v293_v10  ;;  %v490_v15 = vadd.f32 %v858_v31, %v333_v11 }
 0x102   :  { %v505_v16 = vmax.f32 %v473_v8, 0.0  ;;  %v521_v17 = vmax.f32 %v489_v9, 0.0 }
 0x103   :  { %v689_v18 = vpack.c.bf16 %v504_v12, %v503_v6  ;;  %v697_v19 = vpack.c.bf16 %v520_v13, %v519_v7  ;;  %v506_v20 = vmax.f32 %v474_v14, 0.0  ;;  %v522_v21 = vmax.f32 %v490_v15, 0.0 }
 0x105   :  { %629 = vst [vmem:[%s943_s3 + $0x10] sm:$0xff] %v689_v18  ;;  %637 = vst [vmem:[%s943_s3 + $0x50] sm:$0xff] %v697_v19  ;;  %v690_v22 = vpack.c.bf16 %v506_v20, %v505_v16  ;;  %v698_v23 = vpack.c.bf16 %v522_v21, %v521_v17  ;;  %v297_v24 = vpop.f32.mrb[8].mxu0  ;;  %v337_v25 = vpop.f32.mrb[8].mxu1 }
 0x106   :  { %v475_v26 = vadd.f32 %v856_v30, %v297_v24  ;;  %v491_v27 = vadd.f32 %v856_v30, %v337_v25  ;;  %v299_v28 = vpop.f32.mrb[9].mxu0  ;;  %v339_v29 = vpop.f32.mrb[9].mxu1 }
 0x107   :  { %630 = vst [vmem:[%s943_s3 + $0x18] sm:$0xff] %v690_v22  ;;  %638 = vst [vmem:[%s943_s3 + $0x58] sm:$0xff] %v698_v23  ;;  %v476_v32 = vadd.f32 %v858_v31, %v299_v28  ;;  %v492_v33 = vadd.f32 %v858_v31, %v339_v29  ;;  %v301_v34 = vpop.f32.mrb[10].mxu0  ;;  %v341_v35 = vpop.f32.mrb[10].mxu1 }
 0x108   :  { %v507_v36 = vmax.f32 %v475_v26, 0.0  ;;  %v523_v37 = vmax.f32 %v491_v27, 0.0  ;;  %v477_v38 = vadd.f32 %v856_v30, %v301_v34  ;;  %v493_v39 = vadd.f32 %v856_v30, %v341_v35  ;;  %v303_v40 = vpop.f32.mrb[11].mxu0  ;;  %v343_v41 = vpop.f32.mrb[11].mxu1 }
 0x109   :  { %v508_v42 = vmax.f32 %v476_v32, 0.0  ;;  %v524_v43 = vmax.f32 %v492_v33, 0.0  ;;  %v478_v44 = vadd.f32 %v858_v31, %v303_v40  ;;  %v494_v45 = vadd.f32 %v858_v31, %v343_v41 }
 0x10a   :  { %v509_v46 = vmax.f32 %v477_v38, 0.0  ;;  %v525_v47 = vmax.f32 %v493_v39, 0.0 }
 0x10b   :  { %v691_v48 = vpack.c.bf16 %v508_v42, %v507_v36  ;;  %v699_v49 = vpack.c.bf16 %v524_v43, %v523_v37  ;;  %v510_v50 = vmax.f32 %v478_v44, 0.0  ;;  %v526_v51 = vmax.f32 %v494_v45, 0.0 }
 0x10d   :  { %631 = vst [vmem:[%s943_s3 + $0x20] sm:$0xff] %v691_v48  ;;  %639 = vst [vmem:[%s943_s3 + $0x60] sm:$0xff] %v699_v49  ;;  %v692_v52 = vpack.c.bf16 %v510_v50, %v509_v46  ;;  %v700_v53 = vpack.c.bf16 %v526_v51, %v525_v47  ;;  %v307_v54 = vpop.f32.mrb[12].mxu0  ;;  %v347_v55 = vpop.f32.mrb[12].mxu1 }
 0x10e   :  { %v479_v56 = vadd.f32 %v856_v30, %v307_v54  ;;  %v495_v57 = vadd.f32 %v856_v30, %v347_v55  ;;  %v309_v58 = vpop.f32.mrb[13].mxu0  ;;  %v349_v59 = vpop.f32.mrb[13].mxu1 }
 0x10f   :  { %632 = vst [vmem:[%s943_s3 + $0x28] sm:$0xff] %v692_v52  ;;  %640 = vst [vmem:[%s943_s3 + $0x68] sm:$0xff] %v700_v53  ;;  %v480_v60 = vadd.f32 %v858_v31, %v309_v58  ;;  %v496_v61 = vadd.f32 %v858_v31, %v349_v59  ;;  %v311_v62 = vpop.f32.mrb[14].mxu0  ;;  %v351_v63 = vpop.f32.mrb[14].mxu1 }
 0x110   :  { %v511_v0 = vmax.f32 %v479_v56, 0.0  ;;  %v527_v1 = vmax.f32 %v495_v57, 0.0  ;;  %v481_v2 = vadd.f32 %v856_v30, %v311_v62  ;;  %v497_v3 = vadd.f32 %v856_v30, %v351_v63  ;;  %v313_v4 = vpop.f32.mrb[15].mxu0  ;;  %v353_v5 = vpop.f32.mrb[15].mxu1 }
 0x111   :  { %v512_v6 = vmax.f32 %v480_v60, 0.0  ;;  %v528_v7 = vmax.f32 %v496_v61, 0.0  ;;  %v482_v8 = vadd.f32 %v858_v31, %v313_v4  ;;  %v498_v9 = vadd.f32 %v858_v31, %v353_v5 }
 0x112   :  { %v513_v10 = vmax.f32 %v481_v2, 0.0  ;;  %v529_v11 = vmax.f32 %v497_v3, 0.0 }
 0x113   :  { %v693_v12 = vpack.c.bf16 %v512_v6, %v511_v0  ;;  %v701_v13 = vpack.c.bf16 %v528_v7, %v527_v1  ;;  %v514_v14 = vmax.f32 %v482_v8, 0.0  ;;  %v530_v15 = vmax.f32 %v498_v9, 0.0 }
 0x115   :  { %633 = vst [vmem:[%s943_s3 + $0x30] sm:$0xff] %v693_v12  ;;  %641 = vst [vmem:[%s943_s3 + $0x70] sm:$0xff] %v701_v13  ;;  %v694_v30 = vpack.c.bf16 %v514_v14, %v513_v10  ;;  %v702_v16 = vpack.c.bf16 %v530_v15, %v529_v11 }
 0x117   :  { %634 = vst [vmem:[%s943_s3 + $0x38] sm:$0xff] %v694_v30  ;;  %642 = vst [vmem:[%s943_s3 + $0x78] sm:$0xff] %v702_v16 }

// kernel: _lambda_.21
= control target key start
LH: loop header
LB: loop body
LE: loop exit
PB: predicated region body
PF: predicated region fallthrough
CT: control target
= control target key end

     0   :  { %7 = vsyncpa [#allocation3], 0  ;;  %s494_s9 = smov 0   ;;  %s496_s10 = smov 0   ;;  %s570_s0 = inlined_call_operand.vmem [shape: f32[2,8], index: 0, kind: input, shape index: {}]   ;;  %s571_s1 = inlined_call_operand.vmem [shape: bf16[2,16,128], index: 1, kind: input, shape index: {}]   ;;  %s572_s2 = inlined_call_operand.vmem [shape: bf16[2,16,128], index: 2, kind: output, shape index: {}]  }
   0x1   :  { %s498_s11 = smov 0  }
   0x2 LB: > { %s363_s12 = sadd.s32 4294967295, %s476_s11   ;;  %s25_s13 = sadd.s32 1, %s472_s10  ;;  %s476_s11 = sphi %s498_s11, %s13_s11   ;;  %s472_s10 = sphi %s496_s10, %s576_s10   ;;  %s468_s9 = sphi %s494_s9, %s575_s9  }
   0x3   : > { %p27_p0 = scmp.ge.s32.totalorder %s25_s13, 2  ;;  %p365_p1 = scmp.ge.s32.totalorder %s476_s11, 1 }
   0x4   : > { %p107_p2 = scmp.lt.s32.totalorder %s476_s11, 3  ;;  %p519_p4 = scmp.eq.s32.totalorder %s363_s12, 0 }
   0x5   : > { %s578_s13 = smov (%p27_p0, %s25_s13), 0  ;;  %s120_s18 = sshll.u32 %s570_s0, 4  ;;  %s121_s18 = int_to_ptr.vmem [resolvable:$true] %s120_s18 }
   0x6   : > { %p515_p3 = pnand %p365_p1, %p107_p2  ;;  %s435_s19 = scalar_lea.vmem %s121_s18, 32 }
   0x7   : > { %p436_p7 = scmp.ne.s32.totalorder %s121_s18, %s435_s19  ;;  %p443_p11 = scmp.lt.s32.totalorder %s121_s18, %s121_s18 }
   0x8   : > { %p396_p5 = pneg %p515_p3  ;;  %p444_p12 = scmp.lt.s32.totalorder %s435_s19, %s435_s19 }
   0xa   : > { %p397_p6 = pnand %p519_p4, %p396_p5  ;;  %p445_p13 = por %p444_p12, %p443_p11 }
   0xc   : > { %p437_p8 = pneg %p397_p6 }
   0xe   : > { %p438_p9 = pnand %p437_p8, %p436_p7 }
  0x10   : > { %p439_p10 = pneg %p438_p9 }
  0x12   : > { %p446_p0 = pnand %p445_p13, %p439_p10 }
  0x14   : > { %449 = shalt.err (!%p446_p0)
}
  0x15   : > { %s478_s20 = smov [#allocation2]   ;;  %146 = sbr.rel (%p515_p3) target bundleno = 80 (0x50), region = 28 }
  0x16   : > { %399 = dma.vmem_to_smem (!%p397_p6), %s121_s18, 32, %s478_s20, [#allocation3]  }
  0x1c   : > { %463 = dma.done.wait (%p519_p4), [#allocation3], 32  }
  0x1d   : > { %465 = vsyncadd (%p519_p4), [#allocation3], 4294967264 }
  0x1e   : > { %152 = sfence }
  0x1f   : > { %p178_p1 = scmp.lt.s32.totalorder %s468_s9, 1  ;;  %s547_s26 = sshll.u32 %s468_s9, 7 }
  0x20   : > { %s205_s27 = sadd.s32 2, %s547_s26  ;;  %s202_s29 = sld [smem:[#allocation2 + %s547_s26]] }
  0x21   : > { %s538_s21 = scalar_select %p178_p1, %s468_s9, 1 }
  0x22   : > { %s206_s28 = sld [smem:[#allocation2 + %s205_s27]]  ;;  %s203_s30 = sadd.s32 1, %s547_s26 }
  0x23   : > { %s379_s22 = sshll.u32 %s538_s21, 3  ;;  %s207_s3 = sadd.s32 3, %s547_s26 }
  0x24   : > { %s185_s25 = scalar_lea.vmem %s571_s1, %s379_s22  ;;  %s209_s4 = sadd.s32 4, %s547_s26 }
  0x25   : > { %v384_v0 = vld [vmem:[%s185_s25] sm:$0xff]   ;;  %s204_s5 = sld [smem:[#allocation2 + %s203_s30]]  ;;  %s211_s8 = sadd.s32 5, %s547_s26 }
  0x26   : > { %v385_v1 = vunpack.c.l.bf16 %v384_v0  ;;  %v386_v2 = vunpack.c.h.bf16 %v384_v0  ;;  %s208_s6 = sld [smem:[#allocation2 + %s207_s3]]  ;;  %v233_v11 = vstv %s202_s29  ;;  %s213_s12 = sadd.s32 6, %s547_s26 }
  0x27   : > { %s210_s7 = sld [smem:[#allocation2 + %s209_s4]]  ;;  %s195_s17 = scalar_lea.vmem %s572_s2, %s379_s22 }
  0x28   : > { %v215_v3 = vmax.f32 %v385_v1, 0.0001  ;;  %v216_v4 = vmax.f32 %v386_v2, 0.0001  ;;  %v223_v8 = vstv %s206_s28  ;;  %s212_s9 = sld [smem:[#allocation2 + %s211_s8]] }
  0x29   : > { %s214_s14 = sld [smem:[#allocation2 + %s213_s12]] }
  0x2a   : > { %v217_v5 = vmin.f32 %v215_v3, 1.0  ;;  %v218_v6 = vmin.f32 %v216_v4, 1.0 }
  0x2b   : > { %v241_v16 = vstv %s204_s5 }
  0x2c   : > { %427 = vlog2.f32 %v217_v5  ;;  %v234_v15 = vadd.f32 %v233_v11, %v217_v5  ;;  %v230_v18 = vstv %s208_s6  ;;  %v235_v19 = vadd.f32 %v233_v11, %v218_v6 }
  0x2d   : > { %429 = vlog2.f32 %v218_v6  ;;  %v236_v20 = vstv %s210_s7  ;;  %v231_v22 = vmul.f32 %v230_v18, %v217_v5  ;;  %v242_v24 = vmul.f32 %v241_v16, %v217_v5 }
  0x2e   : > { %v237_v23 = vmul.f32 %v236_v20, %v234_v15  ;;  %v232_v25 = vmul.f32 %v230_v18, %v218_v6  ;;  %v238_v26 = vmul.f32 %v236_v20, %v235_v19  ;;  %v243_v27 = vmul.f32 %v241_v16, %v218_v6 }
  0x2f   : > { %v244_v28 = vstv %s212_s9  ;;  %v249_v33 = vstv %s214_s14 }
  0x30   : > { %v239_v29 = vadd.f32 %v237_v23, %v231_v22  ;;  %v245_v30 = vmul.f32 %v244_v28, %v242_v24  ;;  %v240_v31 = vadd.f32 %v238_v26, %v232_v25  ;;  %v246_v32 = vmul.f32 %v244_v28, %v243_v27 }
  0x32   : > { %v247_v34 = vadd.f32 %v245_v30, %v239_v29  ;;  %v248_v36 = vadd.f32 %v246_v32, %v240_v31 }
  0x36   : > { %v428_v7 = vpop.eup %427 }
  0x37   : > { %v430_v9 = vpop.eup %429  ;;  %v220_v10 = vmul.f32 0.6931472, %v428_v7 }
  0x38   : > { %v222_v12 = vmul.f32 0.6931472, %v430_v9 }
  0x39   : > { %v224_v13 = vmul.f32 %v223_v8, %v220_v10 }
  0x3a   : > { %v225_v14 = vmul.f32 %v223_v8, %v222_v12 }
  0x3b   : > { %v226_v17 = vmul.f32 1.442695, %v224_v13 }
  0x3c   : > { %v228_v21 = vmul.f32 1.442695, %v225_v14 }
  0x3d   : > { %431 = vpow2.f32 %v226_v17 }
  0x3e   : > { %433 = vpow2.f32 %v228_v21 }
  0x47   : > { %v432_v35 = vpop.eup %431 }
  0x48   : > { %v434_v37 = vpop.eup %433  ;;  %v250_v38 = vmul.f32 %v432_v35, %v249_v33 }
  0x49   : > { %v251_v39 = vmul.f32 %v434_v37, %v249_v33 }
  0x4a   : > { %v252_v40 = vadd.f32 %v250_v38, %v247_v34 }
  0x4b   : > { %v253_v41 = vadd.f32 %v251_v39, %v248_v36 }
  0x4d   : > { %v390_v42 = vpack.c.bf16 %v253_v41, %v252_v40 }
  0x4f   : > { %391 = vst [vmem:[%s195_s17] sm:$0xff] %v390_v42  }
  0x50 PF: > { %s13_s11 = sadd.s32 1, %s476_s11   ;;  %s575_s9 = smov %s472_s10 }
  0x51   : > { %p10_p2 = scmp.ge.s32.totalorder %s13_s11, 4   ;;  %s576_s10 = smov %s578_s13 }
  0x53   :  { %12 = sbr.rel (!%p10_p2) target bundleno = 2 (0x2), region = 63 }
  0x5a   :  { %294 = vsyncpa [#allocation3], 1 }
  0x5b   :  { %296 = vsyncpa [#allocation3 + $0x1], 1 }

// kernel: _lambda_.20
= control target key start
LH: loop header
LB: loop body
LE: loop exit
PB: predicated region body
PF: predicated region fallthrough
CT: control target
= control target key end

     0   :  { %7 = vsyncpa [#allocation3], 0  ;;  %s563_s9 = smov 0   ;;  %s565_s10 = smov 0   ;;  %s642_s0 = inlined_call_operand.vmem [shape: f32[2,8], index: 0, kind: input, shape index: {}]   ;;  %s643_s1 = inlined_call_operand.vmem [shape: bf16[2,32,128], index: 1, kind: input, shape index: {}]   ;;  %s644_s2 = inlined_call_operand.vmem [shape: bf16[2,32,128], index: 2, kind: output, shape index: {}]  }
   0x1   :  { %s567_s11 = smov 0  }
   0x2 LB: > { %s409_s12 = sadd.s32 4294967295, %s545_s11   ;;  %s25_s13 = sadd.s32 1, %s541_s10  ;;  %s545_s11 = sphi %s567_s11, %s13_s11   ;;  %s541_s10 = sphi %s565_s10, %s648_s10   ;;  %s537_s9 = sphi %s563_s9, %s647_s9  }
   0x3   : > { %p27_p0 = scmp.ge.s32.totalorder %s25_s13, 2  ;;  %p411_p1 = scmp.ge.s32.totalorder %s545_s11, 1 }
   0x4   : > { %p107_p2 = scmp.lt.s32.totalorder %s545_s11, 3  ;;  %p588_p4 = scmp.eq.s32.totalorder %s409_s12, 0 }
   0x5   : > { %s650_s13 = smov (%p27_p0, %s25_s13), 0  ;;  %s120_s18 = sshll.u32 %s642_s0, 4  ;;  %s121_s18 = int_to_ptr.vmem [resolvable:$true] %s120_s18 }
   0x6   : > { %p584_p3 = pnand %p411_p1, %p107_p2  ;;  %s504_s19 = scalar_lea.vmem %s121_s18, 32 }
   0x7   : > { %p505_p7 = scmp.ne.s32.totalorder %s121_s18, %s504_s19  ;;  %p512_p11 = scmp.lt.s32.totalorder %s121_s18, %s121_s18 }
   0x8   : > { %p457_p5 = pneg %p584_p3  ;;  %p513_p12 = scmp.lt.s32.totalorder %s504_s19, %s504_s19 }
   0xa   : > { %p458_p6 = pnand %p588_p4, %p457_p5  ;;  %p514_p13 = por %p513_p12, %p512_p11 }
   0xc   : > { %p506_p8 = pneg %p458_p6 }
   0xe   : > { %p507_p9 = pnand %p506_p8, %p505_p7 }
  0x10   : > { %p508_p10 = pneg %p507_p9 }
  0x12   : > { %p515_p0 = pnand %p514_p13, %p508_p10 }
  0x14   : > { %518 = shalt.err (!%p515_p0)
}
  0x15   : > { %s547_s20 = smov [#allocation2]   ;;  %146 = sbr.rel (%p584_p3) target bundleno = 82 (0x52), region = 28 }
  0x16   : > { %460 = dma.vmem_to_smem (!%p458_p6), %s121_s18, 32, %s547_s20, [#allocation3]  }
  0x1c   : > { %532 = dma.done.wait (%p588_p4), [#allocation3], 32  }
  0x1d   : > { %534 = vsyncadd (%p588_p4), [#allocation3], 4294967264 }
  0x1e   : > { %152 = sfence }
  0x1f   : > { %p178_p1 = scmp.lt.s32.totalorder %s537_s9, 1  ;;  %s616_s26 = sshll.u32 %s537_s9, 7 }
  0x20   : > { %s209_s27 = sadd.s32 2, %s616_s26  ;;  %s211_s29 = sadd.s32 3, %s616_s26 }
  0x21   : > { %s607_s21 = scalar_select %p178_p1, %s537_s9, 1 }
  0x22   : > { %s210_s28 = sld [smem:[#allocation2 + %s209_s27]]  ;;  %s207_s3 = sadd.s32 1, %s616_s26 }
  0x23   : > { %s427_s22 = sshll.u32 %s607_s21, 4  ;;  %s206_s30 = sld [smem:[#allocation2 + %s616_s26]] }
  0x24   : > { %s185_s25 = scalar_lea.vmem %s643_s1, %s427_s22  ;;  %s213_s4 = sadd.s32 4, %s616_s26 }
  0x25   : > { %v434_v0 = vld [vmem:[%s185_s25] sm:$0xff]   ;;  %v451_v1 = vld [vmem:[%s185_s25 + $0x8] sm:$0xff]   ;;  %s212_s5 = sld [smem:[#allocation2 + %s211_s29]]  ;;  %s215_s8 = sadd.s32 5, %s616_s26 }
  0x26   : > { %v435_v2 = vunpack.c.l.bf16 %v434_v0  ;;  %v436_v3 = vunpack.c.h.bf16 %v434_v0  ;;  %v439_v4 = vunpack.c.l.bf16 %v451_v1  ;;  %v440_v5 = vunpack.c.h.bf16 %v451_v1  ;;  %s208_s6 = sld [smem:[#allocation2 + %s207_s3]]  ;;  %s217_s12 = sadd.s32 6, %s616_s26 }
  0x27   : > { %s214_s7 = sld [smem:[#allocation2 + %s213_s4]]  ;;  %s195_s17 = scalar_lea.vmem %s644_s2, %s427_s22 }
  0x28   : > { %v219_v6 = vmax.f32 %v435_v2, 0.0001  ;;  %v220_v7 = vmax.f32 %v436_v3, 0.0001  ;;  %v221_v8 = vmax.f32 %v439_v4, 0.0001  ;;  %v235_v15 = vstv %s210_s28 }
  0x29   : > { %v222_v9 = vmax.f32 %v440_v5, 0.0001  ;;  %s624_s9 = sld [smem:[#allocation2 + %s215_s8]]  ;;  %v253_v18 = vstv %s206_s30 }
  0x2a   : > { %v223_v10 = vmin.f32 %v219_v6, 1.0  ;;  %v224_v11 = vmin.f32 %v220_v7, 1.0  ;;  %v225_v12 = vmin.f32 %v221_v8, 1.0  ;;  %s218_s14 = sld [smem:[#allocation2 + %s217_s12]] }
  0x2b   : > { %v226_v13 = vmin.f32 %v222_v9, 1.0  ;;  %v248_v24 = vstv %s212_s5 }
  0x2c   : > { %488 = vlog2.f32 %v223_v10  ;;  %v254_v27 = vadd.f32 %v253_v18, %v223_v10  ;;  %v267_v28 = vstv %s208_s6  ;;  %v255_v30 = vadd.f32 %v253_v18, %v224_v11 }
  0x2d   : > { %490 = vlog2.f32 %v224_v11  ;;  %v258_v31 = vstv %s214_s7  ;;  %v249_v34 = vmul.f32 %v248_v24, %v223_v10  ;;  %v256_v36 = vadd.f32 %v253_v18, %v225_v12 }
  0x2e   : > { %492 = vlog2.f32 %v225_v12  ;;  %v250_v37 = vmul.f32 %v248_v24, %v224_v11  ;;  %v257_v39 = vadd.f32 %v253_v18, %v226_v13  ;;  %v259_v40 = vmul.f32 %v258_v31, %v254_v27 }
  0x2f   : > { %494 = vlog2.f32 %v226_v13  ;;  %v268_v41 = vmul.f32 %v267_v28, %v223_v10  ;;  %v260_v43 = vmul.f32 %v258_v31, %v255_v30  ;;  %v269_v44 = vmul.f32 %v267_v28, %v224_v11 }
  0x30   : > { %v272_v45 = vstv %s624_s9  ;;  %v251_v46 = vmul.f32 %v248_v24, %v225_v12  ;;  %v261_v47 = vmul.f32 %v258_v31, %v256_v36  ;;  %v270_v48 = vmul.f32 %v267_v28, %v225_v12 }
  0x31   : > { %v252_v49 = vmul.f32 %v248_v24, %v226_v13  ;;  %v262_v50 = vmul.f32 %v258_v31, %v257_v39  ;;  %v271_v51 = vmul.f32 %v267_v28, %v226_v13  ;;  %v263_v52 = vadd.f32 %v259_v40, %v249_v34 }
  0x32   : > { %v273_v53 = vmul.f32 %v272_v45, %v268_v41  ;;  %v264_v54 = vadd.f32 %v260_v43, %v250_v37  ;;  %v274_v55 = vmul.f32 %v272_v45, %v269_v44  ;;  %v265_v56 = vadd.f32 %v261_v47, %v251_v46 }
  0x33   : > { %v275_v57 = vmul.f32 %v272_v45, %v270_v48  ;;  %v281_v58 = vstv %s218_s14  ;;  %v266_v59 = vadd.f32 %v262_v50, %v252_v49  ;;  %v276_v60 = vmul.f32 %v272_v45, %v271_v51 }
  0x34   : > { %v277_v61 = vadd.f32 %v273_v53, %v263_v52  ;;  %v278_v63 = vadd.f32 %v274_v55, %v264_v54 }
  0x35   : > { %v279_v2 = vadd.f32 %v275_v57, %v265_v56  ;;  %v280_v5 = vadd.f32 %v276_v60, %v266_v59 }
  0x36   : > { %v489_v14 = vpop.eup %488 }
  0x37   : > { %v491_v16 = vpop.eup %490  ;;  %v228_v17 = vmul.f32 0.6931472, %v489_v14 }
  0x38   : > { %v493_v19 = vpop.eup %492  ;;  %v230_v20 = vmul.f32 0.6931472, %v491_v16 }
  0x39   : > { %v495_v21 = vpop.eup %494  ;;  %v232_v22 = vmul.f32 0.6931472, %v493_v19  ;;  %v236_v23 = vmul.f32 %v235_v15, %v228_v17 }
  0x3a   : > { %v234_v25 = vmul.f32 0.6931472, %v495_v21  ;;  %v237_v26 = vmul.f32 %v235_v15, %v230_v20 }
  0x3b   : > { %v240_v29 = vmul.f32 1.442695, %v236_v23  ;;  %v238_v32 = vmul.f32 %v235_v15, %v232_v22 }
  0x3c   : > { %v242_v33 = vmul.f32 1.442695, %v237_v26  ;;  %v239_v35 = vmul.f32 %v235_v15, %v234_v25 }
  0x3d   : > { %496 = vpow2.f32 %v240_v29  ;;  %v244_v38 = vmul.f32 1.442695, %v238_v32 }
  0x3e   : > { %498 = vpow2.f32 %v242_v33  ;;  %v246_v42 = vmul.f32 1.442695, %v239_v35 }
  0x3f   : > { %500 = vpow2.f32 %v244_v38 }
  0x40   : > { %502 = vpow2.f32 %v246_v42 }
  0x47   : > { %v497_v62 = vpop.eup %496 }
  0x48   : > { %v499_v0 = vpop.eup %498  ;;  %v282_v1 = vmul.f32 %v497_v62, %v281_v58 }
  0x49   : > { %v501_v3 = vpop.eup %500  ;;  %v283_v4 = vmul.f32 %v499_v0, %v281_v58 }
  0x4a   : > { %v503_v6 = vpop.eup %502  ;;  %v286_v7 = vadd.f32 %v282_v1, %v277_v61  ;;  %v284_v8 = vmul.f32 %v501_v3, %v281_v58 }
  0x4b   : > { %v287_v9 = vadd.f32 %v283_v4, %v278_v63  ;;  %v285_v10 = vmul.f32 %v503_v6, %v281_v58 }
  0x4c   : > { %v288_v11 = vadd.f32 %v284_v8, %v279_v2 }
  0x4d   : > { %v444_v12 = vpack.c.bf16 %v287_v9, %v286_v7  ;;  %v289_v13 = vadd.f32 %v285_v10, %v280_v5 }
  0x4f   : > { %445 = vst [vmem:[%s195_s17] sm:$0xff] %v444_v12   ;;  %v449_v14 = vpack.c.bf16 %v289_v13, %v288_v11 }
  0x51   : > { %452 = vst [vmem:[%s195_s17 + $0x8] sm:$0xff] %v449_v14  }
  0x52 PF: > { %s13_s11 = sadd.s32 1, %s545_s11   ;;  %s647_s9 = smov %s541_s10 }
  0x53   : > { %p10_p2 = scmp.ge.s32.totalorder %s13_s11, 4   ;;  %s648_s10 = smov %s650_s13 }
  0x55   :  { %12 = sbr.rel (!%p10_p2) target bundleno = 2 (0x2), region = 63 }
  0x5c   :  { %340 = vsyncpa [#allocation3], 1 }
  0x5d   :  { %342 = vsyncpa [#allocation3 + $0x1], 1 }

// kernel: _lambda_.32
= control target key start
LH: loop header
LB: loop body
LE: loop exit
PB: predicated region body
PF: predicated region fallthrough
CT: control target
= control target key end

     0   :  { %s1247_s18 = smov 0   ;;  %s1249_s19 = smov 0   ;;  %s1390_s0 = inlined_call_operand.vmem [shape: bf16[2,64,256], index: 0, kind: input, shape index: {}]   ;;  %s1391_s1 = inlined_call_operand.vmem [shape: bf16[2,64,256], index: 1, kind: input, shape index: {}]   ;;  %s1392_s2 = inlined_call_operand.vmem [shape: f32[2,1,256], index: 2, kind: input, shape index: {}]   ;;  %s1393_s3 = inlined_call_operand.vmem [shape: bf16[256,128], index: 3, kind: input, shape index: {}]   ;;  %s1394_s4 = inlined_call_operand.vmem [shape: f32[1,128], index: 4, kind: input, shape index: {}]   ;;  %s1395_s5 = inlined_call_operand.vmem [shape: bf16[2,64,128], index: 5, kind: output, shape index: {}]  }
   0x1   :  { %s1251_s20 = smov 0  }
   0x2 LB: > { %s41_s21 = sadd.s32 1, %s1211_s19  ;;  %p1028_p0 = scmp.ge.s32.totalorder %s1215_s20, 1  ;;  %s1215_s20 = sphi %s1251_s20, %s15_s20   ;;  %s1211_s19 = sphi %s1249_s19, %s1397_s19   ;;  %s1207_s18 = sphi %s1247_s18, %s1396_s18  }
   0x3   : > { %p43_p1 = scmp.ge.s32.totalorder %s41_s21, 2  ;;  %p297_p2 = scmp.lt.s32.totalorder %s1215_s20, 3 }
   0x5   : > { %s1399_s21 = smov (%p43_p1, %s41_s21), 0  ;;  %p298_p3 = pnand %p1028_p0, %p297_p2 }
   0x6   : > { %v1177_v0 = vld [vmem:[%s1393_s3 + $0x40] sm:$0xff] (!%p298_p3)   ;;  %v1179_v2 = vld [vmem:[%s1393_s3 + $0x48] sm:$0xff] (!%p298_p3)   ;;  %p376_p4 = scmp.lt.s32.totalorder (!%p298_p3), %s1207_s18, 1  ;;  %v1181_v4 = vld [vmem:[%s1393_s3 + $0x50] sm:$0xff] (!%p298_p3)   ;;  %v479_v5 = vlaneseq (!%p298_p3) }
   0x7   : > { %301 = sbr.rel (%p298_p3) target bundleno = 272 (0x110), region = 40  ;;  %v1178_v1 = vld [vmem:[%s1393_s3] sm:$0xff] (!%p298_p3)   ;;  %1097 = vmatprep.subr.bf16.mxu0 (!%p298_p3), %v1177_v0  ;;  %1137 = vmatprep.subr.bf16.mxu1 (!%p298_p3), %v1177_v0  ;;  %v1180_v3 = vld [vmem:[%s1393_s3 + $0x8] sm:$0xff] (!%p298_p3)   ;;  %v1182_v6 = vld [vmem:[%s1393_s3 + $0x10] sm:$0xff] (!%p298_p3)  }
   0x8   : > { %1098 = vmatpush3.bf16.msra.mxu0 (!%p298_p3), %v1178_v1  ;;  %1145 = vmatpush3.bf16.msra.mxu1 (!%p298_p3), %v1178_v1  ;;  %v1183_v7 = vld [vmem:[%s1393_s3 + $0x58] sm:$0xff] (!%p298_p3)   ;;  %v480_v8 = vshrl.u32 (!%p298_p3), %v479_v5, 7  ;;  %v1185_v10 = vld [vmem:[%s1393_s3 + $0x60] sm:$0xff] (!%p298_p3)   ;;  %v1187_v14 = vld [vmem:[%s1393_s3 + $0x68] sm:$0xff] (!%p298_p3)  }
   0x9   : > { %1099 = vmatprep.subr.bf16.mxu0 (!%p298_p3), %v1179_v2  ;;  %1138 = vmatprep.subr.bf16.mxu1 (!%p298_p3), %v1179_v2  ;;  %v1184_v9 = vld [vmem:[%s1393_s3 + $0x18] sm:$0xff] (!%p298_p3)   ;;  %v1186_v12 = vld [vmem:[%s1393_s3 + $0x20] sm:$0xff] (!%p298_p3)   ;;  %v1188_v32 = vld [vmem:[%s1393_s3 + $0x28] sm:$0xff] (!%p298_p3)  }
   0xa   : > { %v481_v11 = vsub.s32 (!%p298_p3), 0, %v480_v8  ;;  %v485_v13 = vsub.s32 (!%p298_p3), 1, %v480_v8  ;;  %v1189_v37 = vld [vmem:[%s1393_s3 + $0x70] sm:$0xff] (!%p298_p3)   ;;  %v1191_v58 = vld [vmem:[%s1393_s3 + $0x78] sm:$0xff] (!%p298_p3)  }
   0xb   : > { %v1190_v52 = vld [vmem:[%s1393_s3 + $0x30] sm:$0xff] (!%p298_p3)  }
   0xc   : > { %1100 = vmatpush3.bf16.msra.mxu0 (!%p298_p3), %v1180_v3  ;;  %1146 = vmatpush3.bf16.msra.mxu1 (!%p298_p3), %v1180_v3 }
   0xd   : > { %1101 = vmatprep.subr.bf16.mxu0 (!%p298_p3), %v1181_v4  ;;  %1139 = vmatprep.subr.bf16.mxu1 (!%p298_p3), %v1181_v4 }
   0xe   : > { %s1401_s18 = smov (!%p376_p4, %s1207_s18), 1 }
   0xf   : > { %s1063_s11 = sshll.u32 %s1401_s18, 6  ;;  %s1033_s12 = sshll.u32 %s1401_s18, 1 }
  0x10   : > { %1102 = vmatpush3.bf16.msra.mxu0 %v1182_v6  ;;  %1147 = vmatpush3.bf16.msra.mxu1 %v1182_v6  ;;  %s1299_s23 = scalar_lea.vmem %s1390_s0, %s1063_s11  ;;  %s413_s26 = scalar_lea.vmem %s1392_s2, %s1033_s12 }
  0x11   : > { %1103 = vmatprep.subr.bf16.mxu0 %v1183_v7  ;;  %1140 = vmatprep.subr.bf16.mxu1 %v1183_v7  ;;  %s1310_s6 = scalar_lea.vmem %s1391_s1, %s1063_s11  ;;  %v453_v15 = vld [vmem:[%s1299_s23] sm:$0xff]  ;;  %v454_v16 = vld [vmem:[%s1299_s23 + $0x8] sm:$0xff]  ;;  %v1336_v42 = vld [vmem:[%s1299_s23 + $0x10] sm:$0xff]  ;;  %s1065_s25 = sshll.u32 %s1401_s18, 5 }
  0x12   : > { %v477_v17 = vld [vmem:[%s413_s26] sm:$0x3]  ;;  %v461_v18 = vunpack.c.l.bf16 %v453_v15  ;;  %v462_v19 = vunpack.c.h.bf16 %v453_v15  ;;  %v463_v20 = vunpack.c.l.bf16 %v454_v16  ;;  %v464_v21 = vunpack.c.h.bf16 %v454_v16  ;;  %v506_v23 = vld [vmem:[%s1310_s6 + $0x8] sm:$0xff]  ;;  %v1340_v47 = vld [vmem:[%s1299_s23 + $0x18] sm:$0xff]  ;;  %s438_s28 = scalar_lea.vmem %s1395_s5, %s1065_s25 }
  0x13   : > { %v505_v22 = vld [vmem:[%s1310_s6] sm:$0xff]  ;;  %v1320_v25 = vrot.slane %v477_v17, %v481_v11  ;;  %v1322_v26 = vrot.slane %v477_v17, %v485_v13  ;;  %v458_v29 = vld [vmem:[%s1299_s23 + $0x28] sm:$0xff]  ;;  %v515_v33 = vunpack.c.l.bf16 %v506_v23  ;;  %v516_v34 = vunpack.c.h.bf16 %v506_v23  ;;  %v507_v57 = vld [vmem:[%s1310_s6 + $0x10] sm:$0xff] }
  0x14   : > { %1104 = vmatpush3.bf16.msra.mxu0 %v1184_v9  ;;  %1148 = vmatpush3.bf16.msra.mxu1 %v1184_v9  ;;  %v457_v24 = vld [vmem:[%s1299_s23 + $0x20] sm:$0xff]  ;;  %v513_v27 = vunpack.c.l.bf16 %v505_v22  ;;  %v514_v28 = vunpack.c.h.bf16 %v505_v22  ;;  %v510_v31 = vld [vmem:[%s1310_s6 + $0x28] sm:$0xff]  ;;  %v471_v40 = vunpack.c.l.bf16 %v458_v29  ;;  %v472_v41 = vunpack.c.h.bf16 %v458_v29  ;;  %v508_v63 = vld [vmem:[%s1310_s6 + $0x18] sm:$0xff] }
  0x15   : > { %1105 = vmatprep.subr.bf16.mxu0 %v1185_v10  ;;  %1141 = vmatprep.subr.bf16.mxu1 %v1185_v10  ;;  %v509_v30 = vld [vmem:[%s1310_s6 + $0x20] sm:$0xff]  ;;  %v469_v35 = vunpack.c.l.bf16 %v457_v24  ;;  %v470_v36 = vunpack.c.h.bf16 %v457_v24  ;;  %v490_v38 = vmul.f32 %v1322_v26, %v462_v19  ;;  %v492_v39 = vmul.f32 %v1322_v26, %v464_v21  ;;  %v459_v0 = vld [vmem:[%s1299_s23 + $0x30] sm:$0xff]  ;;  %v460_v5 = vld [vmem:[%s1299_s23 + $0x38] sm:$0xff] }
  0x16   : > { %v521_v44 = vunpack.c.l.bf16 %v509_v30  ;;  %v522_v45 = vunpack.c.h.bf16 %v509_v30  ;;  %v523_v46 = vunpack.c.l.bf16 %v510_v31  ;;  %v500_v50 = vmul.f32 %v1322_v26, %v472_v41  ;;  %v511_v6 = vld [vmem:[%s1310_s6 + $0x30] sm:$0xff]  ;;  %v512_v7 = vld [vmem:[%s1310_s6 + $0x38] sm:$0xff] }
  0x17   : > { %v498_v43 = vmul.f32 %v1322_v26, %v470_v36  ;;  %v530_v48 = vadd.f32 %v514_v28, %v490_v38  ;;  %v532_v49 = vadd.f32 %v516_v34, %v492_v39  ;;  %v524_v51 = vunpack.c.h.bf16 %v510_v31 }
  0x18   : > { %1106 = vmatpush3.bf16.msra.mxu0 %v1186_v12  ;;  %1149 = vmatpush3.bf16.msra.mxu1 %v1186_v12  ;;  %v489_v54 = vmul.f32 %v1320_v25, %v461_v18  ;;  %v491_v55 = vmul.f32 %v1320_v25, %v463_v20  ;;  %v466_v56 = vunpack.c.h.bf16 %v1336_v42  ;;  %v497_v61 = vmul.f32 %v1320_v25, %v469_v35  ;;  %v1192_v12 = vld [vmem:[%s1393_s3 + $0x38] sm:$0xff]  }
  0x19   : > { %1107 = vmatprep.subr.bf16.mxu0 %v1187_v14  ;;  %1142 = vmatprep.subr.bf16.mxu1 %v1187_v14  ;;  %v538_v53 = vadd.f32 %v522_v45, %v498_v43  ;;  %v546_v59 = vpack.c.bf16 %v532_v49, %v530_v48  ;;  %v540_v60 = vadd.f32 %v524_v51, %v500_v50  ;;  %v468_v62 = vunpack.c.h.bf16 %v1340_v47  ;;  %v1052_v51 = vld [vmem:[%s1394_s4] ss:$0 sm:$0xff] }
  0x1a   : > { %v529_v1 = vadd.f32 %v513_v27, %v489_v54  ;;  %v531_v2 = vadd.f32 %v515_v33, %v491_v55  ;;  %v499_v3 = vmul.f32 %v1320_v25, %v471_v40  ;;  %v494_v4 = vmul.f32 %v1322_v26, %v466_v56 }
  0x1b   : > { %721 = vmatprep.mubr.bf16.mxu0 %v546_v59  ;;  %v550_v8 = vpack.c.bf16 %v540_v60, %v538_v53  ;;  %v537_v9 = vadd.f32 %v521_v44, %v497_v61  ;;  %v496_v10 = vmul.f32 %v1322_v26, %v468_v62  ;;  %v518_v11 = vunpack.c.h.bf16 %v507_v57 }
  0x1c   : > { %1108 = vmatpush3.bf16.msra.mxu0 %v1188_v32  ;;  %1150 = vmatpush3.bf16.msra.mxu1 %v1188_v32  ;;  %v545_v13 = vpack.c.bf16 %v531_v2, %v529_v1  ;;  %v539_v14 = vadd.f32 %v523_v46, %v499_v3  ;;  %v520_v15 = vunpack.c.h.bf16 %v508_v63  ;;  %v474_v16 = vunpack.c.h.bf16 %v459_v0 }
  0x1d   : > { %1109 = vmatprep.subr.bf16.mxu0 %v1189_v37  ;;  %1143 = vmatprep.subr.bf16.mxu1 %v1189_v37  ;;  %v534_v17 = vadd.f32 %v518_v11, %v494_v4  ;;  %v476_v18 = vunpack.c.h.bf16 %v460_v5  ;;  %v526_v19 = vunpack.c.h.bf16 %v511_v6  ;;  %v528_v20 = vunpack.c.h.bf16 %v512_v7 }
  0x1e   : > { %737 = vmatprep.mubr.bf16.mxu1 %v550_v8  ;;  %v549_v21 = vpack.c.bf16 %v539_v14, %v537_v9  ;;  %v536_v22 = vadd.f32 %v520_v15, %v496_v10  ;;  %v502_v23 = vmul.f32 %v1322_v26, %v474_v16  ;;  %v465_v24 = vunpack.c.l.bf16 %v1336_v42 }
  0x1f   : > { %v504_v27 = vmul.f32 %v1322_v26, %v476_v18  ;;  %v467_v28 = vunpack.c.l.bf16 %v1340_v47  ;;  %v517_v29 = vunpack.c.l.bf16 %v507_v57  ;;  %v519_v30 = vunpack.c.l.bf16 %v508_v63 }
  0x20   : > { %1110 = vmatpush3.bf16.msra.mxu0 %v1190_v52  ;;  %1151 = vmatpush3.bf16.msra.mxu1 %v1190_v52  ;;  %v548_v31 = vpack.c.bf16 %v536_v22, %v534_v17  ;;  %v542_v32 = vadd.f32 %v526_v19, %v502_v23  ;;  %v493_v33 = vmul.f32 %v1320_v25, %v465_v24  ;;  %v473_v34 = vunpack.c.l.bf16 %v459_v0 }
  0x21   : > { %1111 = vmatprep.subr.bf16.mxu0 %v1191_v58  ;;  %1144 = vmatprep.subr.bf16.mxu1 %v1191_v58  ;;  %v544_v35 = vadd.f32 %v528_v20, %v504_v27  ;;  %v495_v36 = vmul.f32 %v1320_v25, %v467_v28  ;;  %v475_v37 = vunpack.c.l.bf16 %v460_v5  ;;  %v525_v38 = vunpack.c.l.bf16 %v511_v6 }
  0x22   : > { %v533_v39 = vadd.f32 %v517_v29, %v493_v33  ;;  %v501_v40 = vmul.f32 %v1320_v25, %v473_v34  ;;  %v527_v26 = vunpack.c.l.bf16 %v512_v7 }
  0x23   : > { %v552_v41 = vpack.c.bf16 %v544_v35, %v542_v32  ;;  %v535_v42 = vadd.f32 %v519_v30, %v495_v36  ;;  %v503_v43 = vmul.f32 %v1320_v25, %v475_v37 }
  0x24   : > { %1112 = vmatpush3.bf16.msra.mxu0 %v1192_v12  ;;  %1152 = vmatpush3.bf16.msra.mxu1 %v1192_v12  ;;  %v541_v44 = vadd.f32 %v525_v38, %v501_v40 }
  0x25   : > { %v543_v45 = vadd.f32 %v527_v26, %v503_v43  ;;  %v547_v46 = vpack.c.bf16 %v535_v42, %v533_v39 }
  0x27   : > { %722 = vmatmul.mubr.bf16.vlgmr.msra.gmra.mrb[0].mxu0 %v545_v13  ;;  %738 = vmatmul.mubr.bf16.vlgmr.msra.gmra.mrb[0].mxu1 %v549_v21  ;;  %v551_v47 = vpack.c.bf16 %v543_v45, %v541_v44 }
  0x28   : > { %729 = vmatprep.mubr.bf16.mxu0 %v548_v31  ;;  %745 = vmatprep.mubr.bf16.mxu1 %v552_v41 }
  0x2f   : > { %730 = vmatmul.mubr.bf16.gmra.mrb[4].mxu0 %v547_v46  ;;  %746 = vmatmul.mubr.bf16.gmra.mrb[4].mxu1 %v551_v47 }
  0xfa   : > { %v1113_v48 = vpop.f32.mrb[0].mxu0  ;;  %v1125_v49 = vpop.f32.mrb[0].mxu1 }
  0xfb   : > { %v1114_v50 = vpop.f32.mrb[1].mxu0  ;;  %v1126_v52 = vpop.f32.mrb[1].mxu1 }
  0xfc   : > { %v1115_v53 = vadd.f32 %v1114_v50, %v1113_v48  ;;  %v1127_v54 = vadd.f32 %v1126_v52, %v1125_v49  ;;  %v1116_v25 = vpop.f32.mrb[2].mxu0  ;;  %v1128_v55 = vpop.f32.mrb[2].mxu1 }
  0xfd   : > { %v1117_v56 = vpop.f32.mrb[3].mxu0  ;;  %v1129_v57 = vpop.f32.mrb[3].mxu1 }
  0xfe   : > { %v788_v58 = vadd.f32 %v1115_v53, %v1052_v51  ;;  %v792_v59 = vadd.f32 %v1127_v54, %v1052_v51  ;;  %v1118_v60 = vadd.f32 %v1117_v56, %v1116_v25  ;;  %v1130_v61 = vadd.f32 %v1129_v57, %v1128_v55 }
 0x100   : > { %v789_v62 = vadd.f32 %v1118_v60, %v1052_v51  ;;  %v793_v63 = vadd.f32 %v1130_v61, %v1052_v51  ;;  %v796_v0 = vmax.f32 %v788_v58, 0.0  ;;  %v800_v1 = vmax.f32 %v792_v59, 0.0 }
 0x102   : > { %v797_v2 = vmax.f32 %v789_v62, 0.0  ;;  %v801_v3 = vmax.f32 %v793_v63, 0.0  ;;  %v1119_v4 = vpop.f32.mrb[4].mxu0  ;;  %v1131_v5 = vpop.f32.mrb[4].mxu1 }
 0x103   : > { %v1120_v6 = vpop.f32.mrb[5].mxu0  ;;  %v1132_v7 = vpop.f32.mrb[5].mxu1 }
 0x104   : > { %v1077_v8 = vpack.c.bf16 %v797_v2, %v796_v0  ;;  %v1087_v9 = vpack.c.bf16 %v801_v3, %v800_v1  ;;  %v1121_v10 = vadd.f32 %v1120_v6, %v1119_v4  ;;  %v1133_v11 = vadd.f32 %v1132_v7, %v1131_v5  ;;  %v1122_v12 = vpop.f32.mrb[6].mxu0  ;;  %v1134_v13 = vpop.f32.mrb[6].mxu1 }
 0x105   : > { %v1123_v14 = vpop.f32.mrb[7].mxu0  ;;  %v1135_v15 = vpop.f32.mrb[7].mxu1 }
 0x106   : > { %1078 = vst [vmem:[%s438_s28] sm:$0xff] %v1077_v8   ;;  %1095 = vst [vmem:[%s438_s28 + $0x10] sm:$0xff] %v1087_v9   ;;  %v790_v16 = vadd.f32 %v1121_v10, %v1052_v51  ;;  %v794_v17 = vadd.f32 %v1133_v11, %v1052_v51  ;;  %v1124_v18 = vadd.f32 %v1123_v14, %v1122_v12 }
 0x107   : > { %v1136_v19 = vadd.f32 %v1135_v15, %v1134_v13 }
 0x108   : > { %v791_v20 = vadd.f32 %v1124_v18, %v1052_v51  ;;  %v798_v22 = vmax.f32 %v790_v16, 0.0  ;;  %v802_v23 = vmax.f32 %v794_v17, 0.0 }
 0x109   : > { %v795_v21 = vadd.f32 %v1136_v19, %v1052_v51 }
 0x10a   : > { %v799_v24 = vmax.f32 %v791_v20, 0.0 }
 0x10b   : > { %v803_v27 = vmax.f32 %v795_v21, 0.0 }
 0x10c   : > { %v1082_v28 = vpack.c.bf16 %v799_v24, %v798_v22 }
 0x10d   : > { %v1092_v29 = vpack.c.bf16 %v803_v27, %v802_v23 }
 0x10e   : > { %1094 = vst [vmem:[%s438_s28 + $0x8] sm:$0xff] %v1082_v28  }
 0x10f   : > { %1096 = vst [vmem:[%s438_s28 + $0x18] sm:$0xff] %v1092_v29  }
 0x110 PF: > { %s15_s20 = sadd.s32 1, %s1215_s20   ;;  %s1396_s18 = smov %s1211_s19 }
 0x111   : > { %p12_p5 = scmp.ge.s32.totalorder %s15_s20, 4   ;;  %s1397_s19 = smov %s1399_s21 }
 0x113   :  { %14 = sbr.rel (!%p12_p5) target bundleno = 2 (0x2), region = 90 }

// kernel: _lambda_.24
= control target key start
LH: loop header
LB: loop body
LE: loop exit
PB: predicated region body
PF: predicated region fallthrough
CT: control target
= control target key end

     0   :  { %s1166_s1 = inlined_call_operand.vmem [shape: bf16[256,512], index: 1, kind: input, shape index: {}]   ;;  %s1167_s0 = inlined_call_operand.vmem [shape: bf16[32,256], index: 0, kind: input, shape index: {}]   ;;  %s1168_s2 = inlined_call_operand.vmem [shape: f32[1,512], index: 2, kind: input, shape index: {}]   ;;  %s1169_s3 = inlined_call_operand.vmem [shape: bf16[32,512], index: 3, kind: output, shape index: {}]  }
   0x1   :  { %v813_v0 = vld [vmem:[%s1166_s1 + $0x4] ss:$16 sps:$4 sm:$0xff]   ;;  %v815_v1 = vld [vmem:[%s1166_s1 + $0xc] ss:$16 sps:$4 sm:$0xff]   ;;  %v817_v2 = vld [vmem:[%s1166_s1] ss:$16 sps:$4 sm:$0xff]  }
   0x2   :  { %458 = vmatprep.subr.bf16.mxu0 %v813_v0  ;;  %v818_v3 = vld [vmem:[%s1166_s1 + $0x8] ss:$16 sps:$4 sm:$0xff]   ;;  %511 = vmatprep.subr.bf16.mxu1 %v815_v1  ;;  %v819_v4 = vld [vmem:[%s1166_s1 + $0x24] ss:$16 sps:$4 sm:$0xff]   ;;  %v821_v5 = vld [vmem:[%s1166_s1 + $0x2c] ss:$16 sps:$4 sm:$0xff]  }
   0x3   :  { %459 = vmatpush1.bf16.msra.mxu0 %v817_v2  ;;  %512 = vmatpush1.bf16.msra.mxu1 %v818_v3  ;;  %v823_v6 = vld [vmem:[%s1166_s1 + $0x20] ss:$16 sps:$4 sm:$0xff]   ;;  %v824_v7 = vld [vmem:[%s1166_s1 + $0x28] ss:$16 sps:$4 sm:$0xff]   ;;  %v825_v8 = vld [vmem:[%s1166_s1 + $0x44] ss:$16 sps:$4 sm:$0xff]  }
   0x4   :  { %460 = vmatprep.subr.bf16.mxu0 %v819_v4  ;;  %513 = vmatprep.subr.bf16.mxu1 %v821_v5  ;;  %v827_v9 = vld [vmem:[%s1166_s1 + $0x4c] ss:$16 sps:$4 sm:$0xff]   ;;  %v829_v10 = vld [vmem:[%s1166_s1 + $0x40] ss:$16 sps:$4 sm:$0xff]   ;;  %v830_v11 = vld [vmem:[%s1166_s1 + $0x48] ss:$16 sps:$4 sm:$0xff]   ;;  %v617_v4 = vlaneseq }
   0x5   :  { %v831_v12 = vld [vmem:[%s1166_s1 + $0x64] ss:$16 sps:$4 sm:$0xff]   ;;  %v833_v13 = vld [vmem:[%s1166_s1 + $0x6c] ss:$16 sps:$4 sm:$0xff]   ;;  %v835_v14 = vld [vmem:[%s1166_s1 + $0x60] ss:$16 sps:$4 sm:$0xff]  }
   0x6   :  { %v836_v15 = vld [vmem:[%s1166_s1 + $0x68] ss:$16 sps:$4 sm:$0xff]   ;;  %v837_v16 = vld [vmem:[%s1166_s1 + $0x84] ss:$16 sps:$4 sm:$0xff]   ;;  %v839_v17 = vld [vmem:[%s1166_s1 + $0x8c] ss:$16 sps:$4 sm:$0xff]  }
   0x7   :  { %461 = vmatpush1.bf16.msra.mxu0 %v823_v6  ;;  %514 = vmatpush1.bf16.msra.mxu1 %v824_v7  ;;  %v841_v18 = vld [vmem:[%s1166_s1 + $0x80] ss:$16 sps:$4 sm:$0xff]   ;;  %v842_v19 = vld [vmem:[%s1166_s1 + $0x88] ss:$16 sps:$4 sm:$0xff]   ;;  %v843_v20 = vld [vmem:[%s1166_s1 + $0xa4] ss:$16 sps:$4 sm:$0xff]  }
   0x8   :  { %462 = vmatprep.subr.bf16.mxu0 %v825_v8  ;;  %515 = vmatprep.subr.bf16.mxu1 %v827_v9  ;;  %v845_v21 = vld [vmem:[%s1166_s1 + $0xac] ss:$16 sps:$4 sm:$0xff]   ;;  %v847_v22 = vld [vmem:[%s1166_s1 + $0xa0] ss:$16 sps:$4 sm:$0xff]   ;;  %v848_v23 = vld [vmem:[%s1166_s1 + $0xa8] ss:$16 sps:$4 sm:$0xff]  }
   0x9   :  { %v849_v24 = vld [vmem:[%s1166_s1 + $0xc4] ss:$16 sps:$4 sm:$0xff]   ;;  %v851_v25 = vld [vmem:[%s1166_s1 + $0xcc] ss:$16 sps:$4 sm:$0xff]   ;;  %v853_v26 = vld [vmem:[%s1166_s1 + $0xc0] ss:$16 sps:$4 sm:$0xff]  }
   0xa   :  { %v854_v27 = vld [vmem:[%s1166_s1 + $0xc8] ss:$16 sps:$4 sm:$0xff]   ;;  %v855_v28 = vld [vmem:[%s1166_s1 + $0xe4] ss:$16 sps:$4 sm:$0xff]   ;;  %v857_v29 = vld [vmem:[%s1166_s1 + $0xec] ss:$16 sps:$4 sm:$0xff]  }
   0xb   :  { %463 = vmatpush1.bf16.msra.mxu0 %v829_v10  ;;  %516 = vmatpush1.bf16.msra.mxu1 %v830_v11  ;;  %v859_v30 = vld [vmem:[%s1166_s1 + $0xe0] ss:$16 sps:$4 sm:$0xff]   ;;  %v860_v31 = vld [vmem:[%s1166_s1 + $0xe8] ss:$16 sps:$4 sm:$0xff]   ;;  %v861_v32 = vld [vmem:[%s1166_s1 + $0x104] ss:$16 sps:$4 sm:$0xff]  }
   0xc   :  { %464 = vmatprep.subr.bf16.mxu0 %v831_v12  ;;  %517 = vmatprep.subr.bf16.mxu1 %v833_v13  ;;  %v863_v33 = vld [vmem:[%s1166_s1 + $0x10c] ss:$16 sps:$4 sm:$0xff]   ;;  %v865_v34 = vld [vmem:[%s1166_s1 + $0x100] ss:$16 sps:$4 sm:$0xff]   ;;  %v866_v35 = vld [vmem:[%s1166_s1 + $0x108] ss:$16 sps:$4 sm:$0xff]  }
   0xd   :  { %v867_v36 = vld [vmem:[%s1166_s1 + $0x124] ss:$16 sps:$4 sm:$0xff]   ;;  %v869_v37 = vld [vmem:[%s1166_s1 + $0x12c] ss:$16 sps:$4 sm:$0xff]   ;;  %v871_v38 = vld [vmem:[%s1166_s1 + $0x120] ss:$16 sps:$4 sm:$0xff]  }
   0xe   :  { %v872_v39 = vld [vmem:[%s1166_s1 + $0x128] ss:$16 sps:$4 sm:$0xff]   ;;  %v873_v40 = vld [vmem:[%s1166_s1 + $0x144] ss:$16 sps:$4 sm:$0xff]   ;;  %v875_v41 = vld [vmem:[%s1166_s1 + $0x14c] ss:$16 sps:$4 sm:$0xff]  }
   0xf   :  { %465 = vmatpush1.bf16.msra.mxu0 %v835_v14  ;;  %518 = vmatpush1.bf16.msra.mxu1 %v836_v15  ;;  %v877_v42 = vld [vmem:[%s1166_s1 + $0x140] ss:$16 sps:$4 sm:$0xff]   ;;  %v878_v43 = vld [vmem:[%s1166_s1 + $0x148] ss:$16 sps:$4 sm:$0xff]   ;;  %v879_v44 = vld [vmem:[%s1166_s1 + $0x164] ss:$16 sps:$4 sm:$0xff]  }
  0x10   :  { %466 = vmatprep.subr.bf16.mxu0 %v837_v16  ;;  %519 = vmatprep.subr.bf16.mxu1 %v839_v17  ;;  %v881_v45 = vld [vmem:[%s1166_s1 + $0x16c] ss:$16 sps:$4 sm:$0xff]   ;;  %v883_v46 = vld [vmem:[%s1166_s1 + $0x160] ss:$16 sps:$4 sm:$0xff]   ;;  %v884_v48 = vld [vmem:[%s1166_s1 + $0x168] ss:$16 sps:$4 sm:$0xff]  }
  0x11   :  { %v911_v47 = vld [vmem:[%s1167_s0 + $0x4] ss:$8 sps:$4 sm:$0xff]   ;;  %v889_v51 = vld [vmem:[%s1166_s1 + $0x180] ss:$16 sps:$4 sm:$0xff]   ;;  %v890_v52 = vld [vmem:[%s1166_s1 + $0x188] ss:$16 sps:$4 sm:$0xff]  }
  0x12   :  { %v885_v49 = vld [vmem:[%s1166_s1 + $0x184] ss:$16 sps:$4 sm:$0xff]   ;;  %v887_v50 = vld [vmem:[%s1166_s1 + $0x18c] ss:$16 sps:$4 sm:$0xff]   ;;  %490 = vmatprep.mubr.bf16.mxu0 %v911_v47  ;;  %543 = vmatprep.mubr.bf16.mxu1 %v911_v47  ;;  %v895_v55 = vld [vmem:[%s1166_s1 + $0x1a0] ss:$16 sps:$4 sm:$0xff]  }
  0x13   :  { %467 = vmatpush1.bf16.msra.mxu0 %v841_v18  ;;  %520 = vmatpush1.bf16.msra.mxu1 %v842_v19  ;;  %v891_v53 = vld [vmem:[%s1166_s1 + $0x1a4] ss:$16 sps:$4 sm:$0xff]   ;;  %v893_v54 = vld [vmem:[%s1166_s1 + $0x1ac] ss:$16 sps:$4 sm:$0xff]   ;;  %v896_v56 = vld [vmem:[%s1166_s1 + $0x1a8] ss:$16 sps:$4 sm:$0xff]  }
  0x14   :  { %468 = vmatprep.subr.bf16.mxu0 %v843_v20  ;;  %521 = vmatprep.subr.bf16.mxu1 %v845_v21  ;;  %v897_v57 = vld [vmem:[%s1166_s1 + $0x1c4] ss:$16 sps:$4 sm:$0xff]   ;;  %v899_v58 = vld [vmem:[%s1166_s1 + $0x1cc] ss:$16 sps:$4 sm:$0xff]   ;;  %v901_v59 = vld [vmem:[%s1166_s1 + $0x1c0] ss:$16 sps:$4 sm:$0xff]  }
  0x15   :  { %v902_v60 = vld [vmem:[%s1166_s1 + $0x1c8] ss:$16 sps:$4 sm:$0xff]   ;;  %v903_v61 = vld [vmem:[%s1166_s1 + $0x1e4] ss:$16 sps:$4 sm:$0xff]   ;;  %v905_v62 = vld [vmem:[%s1166_s1 + $0x1ec] ss:$16 sps:$4 sm:$0xff]  }
  0x16   :  { %v907_v63 = vld [vmem:[%s1166_s1 + $0x1e0] ss:$16 sps:$4 sm:$0xff]   ;;  %v908_v0 = vld [vmem:[%s1166_s1 + $0x1e8] ss:$16 sps:$4 sm:$0xff]   ;;  %v912_v2 = vld [vmem:[%s1167_s0 + $0x14] ss:$8 sps:$4 sm:$0xff]  }
  0x17   :  { %469 = vmatpush1.bf16.msra.mxu0 %v847_v22  ;;  %522 = vmatpush1.bf16.msra.mxu1 %v848_v23  ;;  %v909_v1 = vld [vmem:[%s1167_s0] ss:$8 sps:$4 sm:$0xff]   ;;  %v914_v3 = vld [vmem:[%s1167_s0 + $0x10] ss:$8 sps:$4 sm:$0xff]   ;;  %v618_v5 = vshrl.u32 %v617_v4, 7 }
  0x18   :  { %470 = vmatprep.subr.bf16.mxu0 %v849_v24  ;;  %523 = vmatprep.subr.bf16.mxu1 %v851_v25  ;;  %v615_v8 = vld [vmem:[%s1168_s2] sm:$0xf] }
  0x19   :  { %v619_v6 = vsub.s32 0, %v618_v5  ;;  %v627_v7 = vsub.s32 2, %v618_v5  ;;  %v623_v9 = vsub.s32 1, %v618_v5  ;;  %v631_v10 = vsub.s32 3, %v618_v5 }
  0x1b   :  { %471 = vmatpush1.bf16.msra.mxu0 %v853_v26  ;;  %524 = vmatpush1.bf16.msra.mxu1 %v854_v27  ;;  %v620_v11 = vrot.slane %v615_v8, %v619_v6  ;;  %v628_v12 = vrot.slane %v615_v8, %v627_v7  ;;  %v624_v13 = vrot.slane %v615_v8, %v623_v9 }
  0x1c   :  { %472 = vmatprep.subr.bf16.mxu0 %v855_v28  ;;  %525 = vmatprep.subr.bf16.mxu1 %v857_v29  ;;  %v632_v14 = vrot.slane %v615_v8, %v631_v10 }
  0x1f   :  { %473 = vmatpush1.bf16.msra.mxu0 %v859_v30  ;;  %526 = vmatpush1.bf16.msra.mxu1 %v860_v31 }
  0x20   :  { %474 = vmatprep.subr.bf16.mxu0 %v861_v32  ;;  %527 = vmatprep.subr.bf16.mxu1 %v863_v33 }
  0x23   :  { %475 = vmatpush1.bf16.msra.mxu0 %v865_v34  ;;  %528 = vmatpush1.bf16.msra.mxu1 %v866_v35 }
  0x24   :  { %476 = vmatprep.subr.bf16.mxu0 %v867_v36  ;;  %529 = vmatprep.subr.bf16.mxu1 %v869_v37 }
  0x27   :  { %477 = vmatpush1.bf16.msra.mxu0 %v871_v38  ;;  %530 = vmatpush1.bf16.msra.mxu1 %v872_v39 }
  0x28   :  { %478 = vmatprep.subr.bf16.mxu0 %v873_v40  ;;  %531 = vmatprep.subr.bf16.mxu1 %v875_v41 }
  0x2b   :  { %479 = vmatpush1.bf16.msra.mxu0 %v877_v42  ;;  %532 = vmatpush1.bf16.msra.mxu1 %v878_v43 }
  0x2c   :  { %480 = vmatprep.subr.bf16.mxu0 %v879_v44  ;;  %533 = vmatprep.subr.bf16.mxu1 %v881_v45 }
  0x2f   :  { %481 = vmatpush1.bf16.msra.mxu0 %v883_v46  ;;  %534 = vmatpush1.bf16.msra.mxu1 %v884_v48 }
  0x30   :  { %482 = vmatprep.subr.bf16.mxu0 %v885_v49  ;;  %535 = vmatprep.subr.bf16.mxu1 %v887_v50 }
  0x33   :  { %483 = vmatpush1.bf16.msra.mxu0 %v889_v51  ;;  %536 = vmatpush1.bf16.msra.mxu1 %v890_v52 }
  0x34   :  { %484 = vmatprep.subr.bf16.mxu0 %v891_v53  ;;  %537 = vmatprep.subr.bf16.mxu1 %v893_v54 }
  0x37   :  { %485 = vmatpush1.bf16.msra.mxu0 %v895_v55  ;;  %538 = vmatpush1.bf16.msra.mxu1 %v896_v56 }
  0x38   :  { %486 = vmatprep.subr.bf16.mxu0 %v897_v57  ;;  %539 = vmatprep.subr.bf16.mxu1 %v899_v58 }
  0x3b   :  { %487 = vmatpush1.bf16.msra.mxu0 %v901_v59  ;;  %540 = vmatpush1.bf16.msra.mxu1 %v902_v60 }
  0x3c   :  { %488 = vmatprep.subr.bf16.mxu0 %v903_v61  ;;  %541 = vmatprep.subr.bf16.mxu1 %v905_v62 }
  0x3f   :  { %489 = vmatpush1.bf16.msra.mxu0 %v907_v63  ;;  %542 = vmatpush1.bf16.msra.mxu1 %v908_v0 }
  0x42   :  { %491 = vmatmul.mubr.bf16.vlgmr.msra.gmra.mrb[0].mxu0 %v909_v1  ;;  %544 = vmatmul.mubr.bf16.vlgmr.msra.gmra.mrb[0].mxu1 %v909_v1 }
  0x43   :  { %500 = vmatprep.mubr.bf16.mxu0 %v912_v2  ;;  %553 = vmatprep.mubr.bf16.mxu1 %v912_v2 }
  0x4a   :  { %501 = vmatmul.mubr.bf16.gmra.mrb[4].mxu0 %v914_v3  ;;  %554 = vmatmul.mubr.bf16.gmra.mrb[4].mxu1 %v914_v3 }
 0x115   :  { %v492_v15 = vpop.f32.mrb[0].mxu0  ;;  %v545_v16 = vpop.f32.mrb[0].mxu1 }
 0x116   :  { %v637_v17 = vadd.f32 %v620_v11, %v492_v15  ;;  %v639_v18 = vadd.f32 %v628_v12, %v545_v16  ;;  %v494_v19 = vpop.f32.mrb[1].mxu0  ;;  %v547_v20 = vpop.f32.mrb[1].mxu1 }
 0x117   :  { %v638_v21 = vadd.f32 %v624_v13, %v494_v19  ;;  %v640_v22 = vadd.f32 %v632_v14, %v547_v20  ;;  %v496_v23 = vpop.f32.mrb[2].mxu0  ;;  %v549_v24 = vpop.f32.mrb[2].mxu1 }
 0x118   :  { %v653_v25 = vmax.f32 %v637_v17, 0.0  ;;  %v655_v26 = vmax.f32 %v639_v18, 0.0  ;;  %v641_v27 = vadd.f32 %v620_v11, %v496_v23  ;;  %v643_v28 = vadd.f32 %v628_v12, %v549_v24  ;;  %v498_v29 = vpop.f32.mrb[3].mxu0  ;;  %v551_v30 = vpop.f32.mrb[3].mxu1 }
 0x119   :  { %v654_v31 = vmax.f32 %v638_v21, 0.0  ;;  %v656_v32 = vmax.f32 %v640_v22, 0.0  ;;  %v642_v33 = vadd.f32 %v624_v13, %v498_v29  ;;  %v644_v34 = vadd.f32 %v632_v14, %v551_v30 }
 0x11a   :  { %v657_v35 = vmax.f32 %v641_v27, 0.0  ;;  %v659_v36 = vmax.f32 %v643_v28, 0.0 }
 0x11b   :  { %v805_v37 = vpack.c.bf16 %v654_v31, %v653_v25  ;;  %v806_v38 = vpack.c.bf16 %v656_v32, %v655_v26  ;;  %v658_v39 = vmax.f32 %v642_v33, 0.0  ;;  %v660_v40 = vmax.f32 %v644_v34, 0.0 }
 0x11d   :  { %717 = vst [vmem:[%s1169_s3] sm:$0xff] %v805_v37  ;;  %718 = vst [vmem:[%s1169_s3 + $0x8] sm:$0xff] %v806_v38  ;;  %v807_v41 = vpack.c.bf16 %v658_v39, %v657_v35  ;;  %v808_v42 = vpack.c.bf16 %v660_v40, %v659_v36  ;;  %v502_v43 = vpop.f32.mrb[4].mxu0  ;;  %v555_v44 = vpop.f32.mrb[4].mxu1 }
 0x11e   :  { %v645_v45 = vadd.f32 %v620_v11, %v502_v43  ;;  %v647_v46 = vadd.f32 %v628_v12, %v555_v44  ;;  %v504_v47 = vpop.f32.mrb[5].mxu0  ;;  %v557_v48 = vpop.f32.mrb[5].mxu1 }
 0x11f   :  { %719 = vst [vmem:[%s1169_s3 + $0x10] sm:$0xff] %v807_v41  ;;  %720 = vst [vmem:[%s1169_s3 + $0x18] sm:$0xff] %v808_v42  ;;  %v646_v49 = vadd.f32 %v624_v13, %v504_v47  ;;  %v648_v50 = vadd.f32 %v632_v14, %v557_v48  ;;  %v506_v51 = vpop.f32.mrb[6].mxu0  ;;  %v559_v52 = vpop.f32.mrb[6].mxu1 }
 0x120   :  { %v661_v53 = vmax.f32 %v645_v45, 0.0  ;;  %v663_v54 = vmax.f32 %v647_v46, 0.0  ;;  %v649_v55 = vadd.f32 %v620_v11, %v506_v51  ;;  %v651_v56 = vadd.f32 %v628_v12, %v559_v52  ;;  %v508_v57 = vpop.f32.mrb[7].mxu0  ;;  %v561_v58 = vpop.f32.mrb[7].mxu1 }
 0x121   :  { %v662_v59 = vmax.f32 %v646_v49, 0.0  ;;  %v664_v60 = vmax.f32 %v648_v50, 0.0  ;;  %v650_v61 = vadd.f32 %v624_v13, %v508_v57  ;;  %v652_v62 = vadd.f32 %v632_v14, %v561_v58 }
 0x122   :  { %v665_v63 = vmax.f32 %v649_v55, 0.0  ;;  %v667_v0 = vmax.f32 %v651_v56, 0.0 }
 0x123   :  { %v809_v1 = vpack.c.bf16 %v662_v59, %v661_v53  ;;  %v810_v2 = vpack.c.bf16 %v664_v60, %v663_v54  ;;  %v666_v3 = vmax.f32 %v650_v61, 0.0  ;;  %v668_v4 = vmax.f32 %v652_v62, 0.0 }
 0x125   :  { %721 = vst [vmem:[%s1169_s3 + $0x20] sm:$0xff] %v809_v1  ;;  %722 = vst [vmem:[%s1169_s3 + $0x28] sm:$0xff] %v810_v2  ;;  %v811_v5 = vpack.c.bf16 %v666_v3, %v665_v63  ;;  %v812_v6 = vpack.c.bf16 %v668_v4, %v667_v0 }
 0x127   :  { %723 = vst [vmem:[%s1169_s3 + $0x30] sm:$0xff] %v811_v5  ;;  %724 = vst [vmem:[%s1169_s3 + $0x38] sm:$0xff] %v812_v6 }

// kernel: _lambda_.33
= control target key start
LH: loop header
LB: loop body
LE: loop exit
PB: predicated region body
PF: predicated region fallthrough
CT: control target
= control target key end

     0   :  { %s1276_s18 = smov 0   ;;  %s1278_s19 = smov 0   ;;  %s1423_s0 = inlined_call_operand.vmem [shape: bf16[2,16,512], index: 0, kind: input, shape index: {}]   ;;  %s1424_s1 = inlined_call_operand.vmem [shape: bf16[2,16,512], index: 1, kind: input, shape index: {}]   ;;  %s1425_s2 = inlined_call_operand.vmem [shape: f32[2,1,512], index: 2, kind: input, shape index: {}]   ;;  %s1426_s3 = inlined_call_operand.vmem [shape: bf16[512,128], index: 3, kind: input, shape index: {}]   ;;  %s1427_s4 = inlined_call_operand.vmem [shape: f32[1,128], index: 4, kind: input, shape index: {}]   ;;  %s1428_s5 = inlined_call_operand.vmem [shape: bf16[2,16,128], index: 5, kind: output, shape index: {}]  }
   0x1   :  { %s1280_s20 = smov 0  }
   0x2 LB: > { %s41_s21 = sadd.s32 1, %s1240_s19  ;;  %p1067_p0 = scmp.ge.s32.totalorder %s1244_s20, 1  ;;  %s1244_s20 = sphi %s1280_s20, %s15_s20   ;;  %s1240_s19 = sphi %s1278_s19, %s1430_s19   ;;  %s1236_s18 = sphi %s1276_s18, %s1429_s18  }
   0x3   : > { %p43_p1 = scmp.ge.s32.totalorder %s41_s21, 2  ;;  %p297_p2 = scmp.lt.s32.totalorder %s1244_s20, 3 }
   0x5   : > { %s1432_s21 = smov (%p43_p1, %s41_s21), 0  ;;  %p298_p3 = pnand %p1067_p0, %p297_p2 }
   0x6   : > { %v1190_v0 = vld [vmem:[%s1426_s3 + $0x40] sm:$0xff] (!%p298_p3)   ;;  %v1194_v4 = vld [vmem:[%s1426_s3 + $0x48] sm:$0xff] (!%p298_p3)   ;;  %v1198_v8 = vld [vmem:[%s1426_s3 + $0x50] sm:$0xff] (!%p298_p3)   ;;  %p376_p4 = scmp.lt.s32.totalorder (!%p298_p3), %s1236_s18, 1  ;;  %v461_v21 = vlaneseq (!%p298_p3) }
   0x7   : > { %301 = sbr.rel (%p298_p3) target bundleno = 267 (0x10b), region = 40  ;;  %v1191_v1 = vld [vmem:[%s1426_s3 + $0xc0] sm:$0xff] (!%p298_p3)   ;;  %1122 = vmatprep.subr.bf16.mxu0 (!%p298_p3), %v1190_v0  ;;  %v1195_v5 = vld [vmem:[%s1426_s3 + $0xc8] sm:$0xff] (!%p298_p3)   ;;  %v1199_v9 = vld [vmem:[%s1426_s3 + $0xd0] sm:$0xff] (!%p298_p3)  }
   0x8   : > { %v1192_v2 = vld [vmem:[%s1426_s3] sm:$0xff] (!%p298_p3)   ;;  %1144 = vmatprep.subr.bf16.mxu1 (!%p298_p3), %v1191_v1  ;;  %v1196_v6 = vld [vmem:[%s1426_s3 + $0x8] sm:$0xff] (!%p298_p3)   ;;  %v1200_v10 = vld [vmem:[%s1426_s3 + $0x10] sm:$0xff] (!%p298_p3)   ;;  %v462_v26 = vshrl.u32 (!%p298_p3), %v461_v21, 7 }
   0x9   : > { %v1193_v3 = vld [vmem:[%s1426_s3 + $0x80] sm:$0xff] (!%p298_p3)   ;;  %1123 = vmatpush3.bf16.msra.mxu0 (!%p298_p3), %v1192_v2  ;;  %v1197_v7 = vld [vmem:[%s1426_s3 + $0x88] sm:$0xff] (!%p298_p3)   ;;  %v1201_v11 = vld [vmem:[%s1426_s3 + $0x90] sm:$0xff] (!%p298_p3)  }
   0xa   : > { %1145 = vmatpush3.bf16.msra.mxu1 (!%p298_p3), %v1193_v3  ;;  %1124 = vmatprep.subr.bf16.mxu0 (!%p298_p3), %v1194_v4  ;;  %v1202_v12 = vld [vmem:[%s1426_s3 + $0x58] sm:$0xff] (!%p298_p3)   ;;  %v1206_v16 = vld [vmem:[%s1426_s3 + $0x60] sm:$0xff] (!%p298_p3)   ;;  %v1210_v20 = vld [vmem:[%s1426_s3 + $0x68] sm:$0xff] (!%p298_p3)   ;;  %v467_v33 = vsub.s32 (!%p298_p3), 1, %v462_v26  ;;  %v475_v38 = vsub.s32 (!%p298_p3), 3, %v462_v26  ;;  %v463_v44 = vsub.s32 (!%p298_p3), 0, %v462_v26 }
   0xb   : > { %1146 = vmatprep.subr.bf16.mxu1 (!%p298_p3), %v1195_v5  ;;  %v1203_v13 = vld [vmem:[%s1426_s3 + $0xd8] sm:$0xff] (!%p298_p3)   ;;  %v1207_v17 = vld [vmem:[%s1426_s3 + $0xe0] sm:$0xff] (!%p298_p3)   ;;  %v1211_v22 = vld [vmem:[%s1426_s3 + $0xe8] sm:$0xff] (!%p298_p3)   ;;  %v471_v45 = vsub.s32 (!%p298_p3), 2, %v462_v26 }
   0xc   : > { %v1204_v14 = vld [vmem:[%s1426_s3 + $0x18] sm:$0xff] (!%p298_p3)   ;;  %v1208_v18 = vld [vmem:[%s1426_s3 + $0x20] sm:$0xff] (!%p298_p3)   ;;  %v1212_v23 = vld [vmem:[%s1426_s3 + $0x28] sm:$0xff] (!%p298_p3)  }
   0xd   : > { %1125 = vmatpush3.bf16.msra.mxu0 (!%p298_p3), %v1196_v6  ;;  %v1205_v15 = vld [vmem:[%s1426_s3 + $0x98] sm:$0xff] (!%p298_p3)   ;;  %v1209_v19 = vld [vmem:[%s1426_s3 + $0xa0] sm:$0xff] (!%p298_p3)   ;;  %v1213_v24 = vld [vmem:[%s1426_s3 + $0xa8] sm:$0xff] (!%p298_p3)  }
   0xe   : > { %1147 = vmatpush3.bf16.msra.mxu1 %v1197_v7  ;;  %1126 = vmatprep.subr.bf16.mxu0 %v1198_v8  ;;  %s1434_s18 = smov (!%p376_p4, %s1236_s18), 1  ;;  %v1214_v25 = vld [vmem:[%s1426_s3 + $0x70] sm:$0xff]   ;;  %v1218_v30 = vld [vmem:[%s1426_s3 + $0x78] sm:$0xff]  }
   0xf   : > { %1148 = vmatprep.subr.bf16.mxu1 %v1199_v9  ;;  %v1215_v27 = vld [vmem:[%s1426_s3 + $0xf0] sm:$0xff]   ;;  %s1112_s7 = sshll.u32 %s1434_s18, 5  ;;  %s1072_s10 = sshll.u32 %s1434_s18, 2  ;;  %v1219_v31 = vld [vmem:[%s1426_s3 + $0xf8] sm:$0xff]  }
  0x10   : > { %v1216_v28 = vld [vmem:[%s1426_s3 + $0x30] sm:$0xff]   ;;  %s387_s23 = scalar_lea.vmem %s1423_s0, %s1112_s7  ;;  %s413_s26 = scalar_lea.vmem %s1425_s2, %s1072_s10  ;;  %v1220_v32 = vld [vmem:[%s1426_s3 + $0x38] sm:$0xff]  }
  0x11   : > { %1127 = vmatpush3.bf16.msra.mxu0 %v1200_v10  ;;  %v1217_v29 = vld [vmem:[%s1426_s3 + $0xb0] sm:$0xff]   ;;  %s403_s6 = scalar_lea.vmem %s1424_s1, %s1112_s7  ;;  %v1221_v34 = vld [vmem:[%s1426_s3 + $0xb8] sm:$0xff]   ;;  %v447_v35 = vld [vmem:[%s387_s23] sm:$0xff]  ;;  %s1114_s11 = sshll.u32 %s1434_s18, 3 }
  0x12   : > { %1149 = vmatpush3.bf16.msra.mxu1 %v1201_v11  ;;  %1128 = vmatprep.subr.bf16.mxu0 %v1202_v12  ;;  %v449_v36 = vld [vmem:[%s387_s23 + $0x10] sm:$0xff]  ;;  %v459_v37 = vld [vmem:[%s413_s26] sm:$0xf]  ;;  %v452_v39 = vunpack.c.h.bf16 %v447_v35  ;;  %v448_v43 = vld [vmem:[%s387_s23 + $0x8] sm:$0xff]  ;;  %v451_v46 = vunpack.c.l.bf16 %v447_v35  ;;  %s438_s14 = scalar_lea.vmem %s1428_s5, %s1114_s11 }
  0x13   : > { %1150 = vmatprep.subr.bf16.mxu1 %v1203_v13  ;;  %v456_v40 = vunpack.c.h.bf16 %v449_v36  ;;  %v489_v41 = vld [vmem:[%s403_s6] sm:$0xff]  ;;  %v491_v42 = vld [vmem:[%s403_s6 + $0x10] sm:$0xff]  ;;  %v455_v47 = vunpack.c.l.bf16 %v449_v36  ;;  %v468_v48 = vrot.slane %v459_v37, %v467_v33  ;;  %v450_v50 = vld [vmem:[%s387_s23 + $0x18] sm:$0xff]  ;;  %v454_v56 = vunpack.c.h.bf16 %v448_v43 }
  0x14   : > { %v494_v49 = vunpack.c.h.bf16 %v489_v41  ;;  %v490_v51 = vld [vmem:[%s403_s6 + $0x8] sm:$0xff]  ;;  %v492_v52 = vld [vmem:[%s403_s6 + $0x18] sm:$0xff]  ;;  %v493_v53 = vunpack.c.l.bf16 %v489_v41  ;;  %v497_v54 = vunpack.c.l.bf16 %v491_v42  ;;  %v498_v55 = vunpack.c.h.bf16 %v491_v42 }
  0x15   : > { %1129 = vmatpush3.bf16.msra.mxu0 %v1204_v14  ;;  %v482_v57 = vmul.f32 %v468_v48, %v452_v39  ;;  %v486_v58 = vmul.f32 %v468_v48, %v456_v40  ;;  %v458_v59 = vunpack.c.h.bf16 %v450_v50  ;;  %v476_v60 = vrot.slane %v459_v37, %v475_v38 }
  0x16   : > { %1151 = vmatpush3.bf16.msra.mxu1 %v1205_v15  ;;  %1130 = vmatprep.subr.bf16.mxu0 %v1206_v16  ;;  %v453_v61 = vunpack.c.l.bf16 %v448_v43  ;;  %v457_v62 = vunpack.c.l.bf16 %v450_v50  ;;  %v496_v63 = vunpack.c.h.bf16 %v490_v51  ;;  %v500_v0 = vunpack.c.h.bf16 %v492_v52 }
  0x17   : > { %1152 = vmatprep.subr.bf16.mxu1 %v1207_v17  ;;  %v502_v1 = vadd.f32 %v494_v49, %v482_v57  ;;  %v506_v2 = vadd.f32 %v498_v55, %v486_v58  ;;  %v484_v3 = vmul.f32 %v476_v60, %v454_v56  ;;  %v488_v4 = vmul.f32 %v476_v60, %v458_v59 }
  0x18   : > { %v495_v5 = vunpack.c.l.bf16 %v490_v51  ;;  %v499_v6 = vunpack.c.l.bf16 %v492_v52  ;;  %v464_v7 = vrot.slane %v459_v37, %v463_v44  ;;  %v472_v8 = vrot.slane %v459_v37, %v471_v45 }
  0x19   : > { %1131 = vmatpush3.bf16.msra.mxu0 %v1208_v18  ;;  %v510_v9 = vpack.c.bf16 %v506_v2, %v502_v1  ;;  %v504_v10 = vadd.f32 %v496_v63, %v484_v3  ;;  %v508_v11 = vadd.f32 %v500_v0, %v488_v4 }
  0x1a   : > { %1153 = vmatpush3.bf16.msra.mxu1 %v1209_v19  ;;  %1132 = vmatprep.subr.bf16.mxu0 %v1210_v20  ;;  %v481_v12 = vmul.f32 %v464_v7, %v451_v46  ;;  %v485_v13 = vmul.f32 %v464_v7, %v455_v47  ;;  %v483_v14 = vmul.f32 %v472_v8, %v453_v61 }
  0x1b   : > { %1154 = vmatprep.subr.bf16.mxu1 %v1211_v22  ;;  %v487_v15 = vmul.f32 %v472_v8, %v457_v62  ;;  %803 = vmatprep.mubr.bf16.mxu0 %v510_v9  ;;  %v512_v16 = vpack.c.bf16 %v508_v11, %v504_v10 }
  0x1c   : > { %v501_v17 = vadd.f32 %v493_v53, %v481_v12  ;;  %v505_v18 = vadd.f32 %v497_v54, %v485_v13  ;;  %v503_v19 = vadd.f32 %v495_v5, %v483_v14 }
  0x1d   : > { %1133 = vmatpush3.bf16.msra.mxu0 %v1212_v23  ;;  %v507_v20 = vadd.f32 %v499_v6, %v487_v15  ;;  %844 = vmatprep.mubr.bf16.mxu1 %v512_v16 }
  0x1e   : > { %1155 = vmatpush3.bf16.msra.mxu1 %v1213_v24  ;;  %1134 = vmatprep.subr.bf16.mxu0 %v1214_v25  ;;  %v509_v21 = vpack.c.bf16 %v505_v18, %v501_v17 }
  0x1f   : > { %1156 = vmatprep.subr.bf16.mxu1 %v1215_v27  ;;  %v511_v22 = vpack.c.bf16 %v507_v20, %v503_v19 }
  0x21   : > { %1135 = vmatpush3.bf16.msra.mxu0 %v1216_v28 }
  0x22   : > { %1157 = vmatpush3.bf16.msra.mxu1 %v1217_v29  ;;  %1136 = vmatprep.subr.bf16.mxu0 %v1218_v30 }
  0x23   : > { %1158 = vmatprep.subr.bf16.mxu1 %v1219_v31  ;;  %v1107_v31 = vld [vmem:[%s1427_s4] ss:$0 sm:$0xff] }
  0x25   : > { %1137 = vmatpush3.bf16.msra.mxu0 %v1220_v32 }
  0x26   : > { %1159 = vmatpush3.bf16.msra.mxu1 %v1221_v34 }
  0x28   : > { %804 = vmatmul.mubr.bf16.vlgmr.msra.gmra.mrb[0].mxu0 %v509_v21 }
  0x29   : > { %845 = vmatmul.mubr.bf16.vlgmr.msra.gmra.mrb[0].mxu1 %v511_v22 }
  0xfb   : > { %v1138_v23 = vpop.f32.mrb[0].mxu0 }
  0xfc   : > { %v1160_v24 = vpop.f32.mrb[0].mxu1  ;;  %v1139_v25 = vpop.f32.mrb[1].mxu0 }
  0xfd   : > { %v1161_v26 = vpop.f32.mrb[1].mxu1  ;;  %v1140_v27 = vadd.f32 %v1139_v25, %v1138_v23  ;;  %v1141_v29 = vpop.f32.mrb[2].mxu0 }
  0xfe   : > { %v1162_v28 = vadd.f32 %v1161_v26, %v1160_v24  ;;  %v1163_v30 = vpop.f32.mrb[2].mxu1  ;;  %v1142_v32 = vpop.f32.mrb[3].mxu0 }
  0xff   : > { %v1164_v33 = vpop.f32.mrb[3].mxu1  ;;  %v1143_v35 = vadd.f32 %v1142_v32, %v1141_v29 }
 0x100   : > { %v847_v34 = vadd.f32 %v1162_v28, %v1140_v27  ;;  %v1165_v36 = vadd.f32 %v1164_v33, %v1163_v30 }
 0x102   : > { %v869_v37 = vadd.f32 %v1107_v31, %v847_v34  ;;  %v850_v38 = vadd.f32 %v1165_v36, %v1143_v35 }
 0x104   : > { %v870_v39 = vadd.f32 %v1107_v31, %v850_v38  ;;  %v871_v40 = vmax.f32 %v869_v37, 0.0 }
 0x106   : > { %v872_v41 = vmax.f32 %v870_v39, 0.0 }
 0x108   : > { %v1120_v42 = vpack.c.bf16 %v872_v41, %v871_v40 }
 0x10a   : > { %1121 = vst [vmem:[%s438_s14] sm:$0xff] %v1120_v42  }
 0x10b PF: > { %s15_s20 = sadd.s32 1, %s1244_s20   ;;  %s1429_s18 = smov %s1240_s19 }
 0x10c   : > { %p12_p5 = scmp.ge.s32.totalorder %s15_s20, 4   ;;  %s1430_s19 = smov %s1432_s21 }
 0x10e   :  { %14 = sbr.rel (!%p12_p5) target bundleno = 2 (0x2), region = 90 }

// kernel: _lambda_.25
= control target key start
LH: loop header
LB: loop body
LE: loop exit
PB: predicated region body
PF: predicated region fallthrough
CT: control target
= control target key end

     0   :  { %s3288_s1 = inlined_call_operand.vmem [shape: bf16[512,1024], index: 1, kind: input, shape index: {}]   ;;  %s3289_s0 = inlined_call_operand.vmem [shape: bf16[16,512], index: 0, kind: input, shape index: {}]   ;;  %s3290_s2 = inlined_call_operand.vmem [shape: f32[1,1024], index: 2, kind: input, shape index: {}]   ;;  %s3291_s3 = inlined_call_operand.vmem [shape: bf16[16,1024], index: 3, kind: output, shape index: {}]  }
   0x1   :  { %v54_v0 = vld [vmem:[%s3288_s1] sm:$0xff]  ;;  %v55_v2 = vld [vmem:[%s3288_s1 + $0x8] sm:$0xff] }
   0x2   :  { %v58_v1 = vld [vmem:[%s3288_s1 + $0x20] sm:$0xff]  ;;  %v59_v4 = vld [vmem:[%s3288_s1 + $0x28] sm:$0xff] }
   0x3   :  { %v2144_v3 = vcombine.high %v54_v0, %v58_v1  ;;  %v2143_v5 = vcombine.low %v54_v0, %v58_v1  ;;  %v62_v6 = vld [vmem:[%s3288_s1 + $0x40] sm:$0xff]  ;;  %v2146_v8 = vcombine.high %v55_v2, %v59_v4  ;;  %v2145_v9 = vcombine.low %v55_v2, %v59_v4  ;;  %v63_v11 = vld [vmem:[%s3288_s1 + $0x48] sm:$0xff] }
   0x4   :  { %v66_v7 = vld [vmem:[%s3288_s1 + $0x60] sm:$0xff]  ;;  %v67_v12 = vld [vmem:[%s3288_s1 + $0x68] sm:$0xff] }
   0x5   :  { %v2152_v10 = vcombine.high %v62_v6, %v66_v7  ;;  %v70_v13 = vld [vmem:[%s3288_s1 + $0x80] sm:$0xff]  ;;  %1610 = vmatprep.subr.bf16.mxu0 %v2144_v3  ;;  %v2154_v14 = vcombine.high %v63_v11, %v67_v12  ;;  %v71_v16 = vld [vmem:[%s3288_s1 + $0x88] sm:$0xff]  ;;  %1696 = vmatprep.subr.bf16.mxu1 %v2146_v8  ;;  %v2151_v18 = vcombine.low %v62_v6, %v66_v7 }
   0x6   :  { %v74_v15 = vld [vmem:[%s3288_s1 + $0xa0] sm:$0xff]  ;;  %v75_v17 = vld [vmem:[%s3288_s1 + $0xa8] sm:$0xff]  ;;  %1611 = vmatpush1.bf16.msra.mxu0 %v2143_v5  ;;  %1697 = vmatpush1.bf16.msra.mxu1 %v2145_v9  ;;  %v2153_v19 = vcombine.low %v63_v11, %v67_v12 }
   0x7   :  { %1612 = vmatprep.subr.bf16.mxu0 %v2152_v10  ;;  %v2160_v20 = vcombine.high %v70_v13, %v74_v15  ;;  %1698 = vmatprep.subr.bf16.mxu1 %v2154_v14  ;;  %v2162_v21 = vcombine.high %v71_v16, %v75_v17  ;;  %v78_v22 = vld [vmem:[%s3288_s1 + $0xc0] sm:$0xff]  ;;  %v79_v24 = vld [vmem:[%s3288_s1 + $0xc8] sm:$0xff]  ;;  %v2159_v26 = vcombine.low %v70_v13, %v74_v15 }
   0x8   :  { %v82_v23 = vld [vmem:[%s3288_s1 + $0xe0] sm:$0xff]  ;;  %v83_v25 = vld [vmem:[%s3288_s1 + $0xe8] sm:$0xff]  ;;  %v2161_v27 = vcombine.low %v71_v16, %v75_v17 }
   0x9   :  { %v2168_v28 = vcombine.high %v78_v22, %v82_v23  ;;  %v2170_v29 = vcombine.high %v79_v24, %v83_v25  ;;  %v86_v30 = vld [vmem:[%s3288_s1 + $0x100] sm:$0xff]  ;;  %v87_v32 = vld [vmem:[%s3288_s1 + $0x108] sm:$0xff]  ;;  %v2167_v34 = vcombine.low %v78_v22, %v82_v23  ;;  %v2169_v35 = vcombine.low %v79_v24, %v83_v25 }
   0xa   :  { %1613 = vmatpush1.bf16.msra.mxu0 %v2151_v18  ;;  %1699 = vmatpush1.bf16.msra.mxu1 %v2153_v19  ;;  %v90_v31 = vld [vmem:[%s3288_s1 + $0x120] sm:$0xff]  ;;  %v91_v33 = vld [vmem:[%s3288_s1 + $0x128] sm:$0xff] }
   0xb   :  { %1614 = vmatprep.subr.bf16.mxu0 %v2160_v20  ;;  %1700 = vmatprep.subr.bf16.mxu1 %v2162_v21  ;;  %v2176_v36 = vcombine.high %v86_v30, %v90_v31  ;;  %v2178_v37 = vcombine.high %v87_v32, %v91_v33  ;;  %v94_v38 = vld [vmem:[%s3288_s1 + $0x140] sm:$0xff]  ;;  %v95_v40 = vld [vmem:[%s3288_s1 + $0x148] sm:$0xff]  ;;  %v2175_v42 = vcombine.low %v86_v30, %v90_v31 }
   0xc   :  { %v98_v39 = vld [vmem:[%s3288_s1 + $0x160] sm:$0xff]  ;;  %v99_v41 = vld [vmem:[%s3288_s1 + $0x168] sm:$0xff]  ;;  %v2177_v43 = vcombine.low %v87_v32, %v91_v33 }
   0xd   :  { %v2184_v44 = vcombine.high %v94_v38, %v98_v39  ;;  %v2186_v45 = vcombine.high %v95_v40, %v99_v41  ;;  %v102_v46 = vld [vmem:[%s3288_s1 + $0x180] sm:$0xff]  ;;  %v103_v48 = vld [vmem:[%s3288_s1 + $0x188] sm:$0xff]  ;;  %v2183_v50 = vcombine.low %v94_v38, %v98_v39  ;;  %v2185_v51 = vcombine.low %v95_v40, %v99_v41 }
   0xe   :  { %1615 = vmatpush1.bf16.msra.mxu0 %v2159_v26  ;;  %1701 = vmatpush1.bf16.msra.mxu1 %v2161_v27  ;;  %v106_v47 = vld [vmem:[%s3288_s1 + $0x1a0] sm:$0xff]  ;;  %v107_v49 = vld [vmem:[%s3288_s1 + $0x1a8] sm:$0xff] }
   0xf   :  { %1616 = vmatprep.subr.bf16.mxu0 %v2168_v28  ;;  %1702 = vmatprep.subr.bf16.mxu1 %v2170_v29  ;;  %v2192_v52 = vcombine.high %v102_v46, %v106_v47  ;;  %v2194_v53 = vcombine.high %v103_v48, %v107_v49  ;;  %v110_v54 = vld [vmem:[%s3288_s1 + $0x1c0] sm:$0xff]  ;;  %v111_v57 = vld [vmem:[%s3288_s1 + $0x1c8] sm:$0xff]  ;;  %v2191_v59 = vcombine.low %v102_v46, %v106_v47 }
  0x10   :  { %v114_v55 = vld [vmem:[%s3288_s1 + $0x1e0] sm:$0xff]  ;;  %v115_v58 = vld [vmem:[%s3288_s1 + $0x1e8] sm:$0xff]  ;;  %v2193_v60 = vcombine.low %v103_v48, %v107_v49 }
  0x11   :  { %v2550_v56 = vld [vmem:[%s3289_s0 + $0x4] ss:$16 sps:$4 sm:$0xff]   ;;  %v2200_v61 = vcombine.high %v110_v54, %v114_v55  ;;  %v2202_v62 = vcombine.high %v111_v57, %v115_v58  ;;  %v119_v1 = vld [vmem:[%s3288_s1 + $0x208] sm:$0xff]  ;;  %v2199_v3 = vcombine.low %v110_v54, %v114_v55  ;;  %v2201_v4 = vcombine.low %v111_v57, %v115_v58 }
  0x12   :  { %1617 = vmatpush1.bf16.msra.mxu0 %v2167_v34  ;;  %1703 = vmatpush1.bf16.msra.mxu1 %v2169_v35  ;;  %v118_v63 = vld [vmem:[%s3288_s1 + $0x200] sm:$0xff]  ;;  %v123_v2 = vld [vmem:[%s3288_s1 + $0x228] sm:$0xff] }
  0x13   :  { %1618 = vmatprep.subr.bf16.mxu0 %v2176_v36  ;;  %1704 = vmatprep.subr.bf16.mxu1 %v2178_v37  ;;  %v122_v0 = vld [vmem:[%s3288_s1 + $0x220] sm:$0xff]  ;;  %v2210_v6 = vcombine.high %v119_v1, %v123_v2  ;;  %v127_v9 = vld [vmem:[%s3288_s1 + $0x248] sm:$0xff]  ;;  %v2209_v12 = vcombine.low %v119_v1, %v123_v2 }
  0x14   :  { %1642 = vmatprep.mubr.bf16.mxu0 %v2550_v56  ;;  %1728 = vmatprep.mubr.bf16.mxu1 %v2550_v56  ;;  %v2208_v5 = vcombine.high %v118_v63, %v122_v0  ;;  %v126_v7 = vld [vmem:[%s3288_s1 + $0x240] sm:$0xff]  ;;  %v131_v10 = vld [vmem:[%s3288_s1 + $0x268] sm:$0xff]  ;;  %v2207_v11 = vcombine.low %v118_v63, %v122_v0 }
  0x15   :  { %v130_v8 = vld [vmem:[%s3288_s1 + $0x260] sm:$0xff]  ;;  %v2218_v14 = vcombine.high %v127_v9, %v131_v10  ;;  %v135_v17 = vld [vmem:[%s3288_s1 + $0x288] sm:$0xff]  ;;  %v2217_v20 = vcombine.low %v127_v9, %v131_v10 }
  0x16   :  { %1619 = vmatpush1.bf16.msra.mxu0 %v2175_v42  ;;  %1705 = vmatpush1.bf16.msra.mxu1 %v2177_v43  ;;  %v2216_v13 = vcombine.high %v126_v7, %v130_v8  ;;  %v134_v15 = vld [vmem:[%s3288_s1 + $0x280] sm:$0xff]  ;;  %v139_v18 = vld [vmem:[%s3288_s1 + $0x2a8] sm:$0xff]  ;;  %v2215_v19 = vcombine.low %v126_v7, %v130_v8 }
  0x17   :  { %1620 = vmatprep.subr.bf16.mxu0 %v2184_v44  ;;  %1706 = vmatprep.subr.bf16.mxu1 %v2186_v45  ;;  %v138_v16 = vld [vmem:[%s3288_s1 + $0x2a0] sm:$0xff]  ;;  %v2226_v22 = vcombine.high %v135_v17, %v139_v18  ;;  %v143_v25 = vld [vmem:[%s3288_s1 + $0x2c8] sm:$0xff]  ;;  %v2225_v28 = vcombine.low %v135_v17, %v139_v18 }
  0x18   :  { %v2224_v21 = vcombine.high %v134_v15, %v138_v16  ;;  %v142_v23 = vld [vmem:[%s3288_s1 + $0x2c0] sm:$0xff]  ;;  %v147_v26 = vld [vmem:[%s3288_s1 + $0x2e8] sm:$0xff]  ;;  %v2223_v27 = vcombine.low %v134_v15, %v138_v16 }
  0x19   :  { %v146_v24 = vld [vmem:[%s3288_s1 + $0x2e0] sm:$0xff]  ;;  %v2234_v30 = vcombine.high %v143_v25, %v147_v26  ;;  %v151_v33 = vld [vmem:[%s3288_s1 + $0x308] sm:$0xff]  ;;  %v2233_v36 = vcombine.low %v143_v25, %v147_v26 }
  0x1a   :  { %1621 = vmatpush1.bf16.msra.mxu0 %v2183_v50  ;;  %1707 = vmatpush1.bf16.msra.mxu1 %v2185_v51  ;;  %v2232_v29 = vcombine.high %v142_v23, %v146_v24  ;;  %v150_v31 = vld [vmem:[%s3288_s1 + $0x300] sm:$0xff]  ;;  %v155_v34 = vld [vmem:[%s3288_s1 + $0x328] sm:$0xff]  ;;  %v2231_v35 = vcombine.low %v142_v23, %v146_v24 }
  0x1b   :  { %1622 = vmatprep.subr.bf16.mxu0 %v2192_v52  ;;  %1708 = vmatprep.subr.bf16.mxu1 %v2194_v53  ;;  %v154_v32 = vld [vmem:[%s3288_s1 + $0x320] sm:$0xff]  ;;  %v2242_v38 = vcombine.high %v151_v33, %v155_v34  ;;  %v159_v41 = vld [vmem:[%s3288_s1 + $0x348] sm:$0xff]  ;;  %v2241_v44 = vcombine.low %v151_v33, %v155_v34 }
  0x1c   :  { %v2240_v37 = vcombine.high %v150_v31, %v154_v32  ;;  %v158_v39 = vld [vmem:[%s3288_s1 + $0x340] sm:$0xff]  ;;  %v163_v42 = vld [vmem:[%s3288_s1 + $0x368] sm:$0xff]  ;;  %v2239_v43 = vcombine.low %v150_v31, %v154_v32 }
  0x1d   :  { %v162_v40 = vld [vmem:[%s3288_s1 + $0x360] sm:$0xff]  ;;  %v2250_v46 = vcombine.high %v159_v41, %v163_v42  ;;  %v167_v49 = vld [vmem:[%s3288_s1 + $0x388] sm:$0xff]  ;;  %v2249_v52 = vcombine.low %v159_v41, %v163_v42 }
  0x1e   :  { %1623 = vmatpush1.bf16.msra.mxu0 %v2191_v59  ;;  %1709 = vmatpush1.bf16.msra.mxu1 %v2193_v60  ;;  %v2248_v45 = vcombine.high %v158_v39, %v162_v40  ;;  %v166_v47 = vld [vmem:[%s3288_s1 + $0x380] sm:$0xff]  ;;  %v171_v50 = vld [vmem:[%s3288_s1 + $0x3a8] sm:$0xff]  ;;  %v2247_v51 = vcombine.low %v158_v39, %v162_v40 }
  0x1f   :  { %1624 = vmatprep.subr.bf16.mxu0 %v2200_v61  ;;  %1710 = vmatprep.subr.bf16.mxu1 %v2202_v62  ;;  %v170_v48 = vld [vmem:[%s3288_s1 + $0x3a0] sm:$0xff]  ;;  %v2258_v54 = vcombine.high %v167_v49, %v171_v50  ;;  %v175_v58 = vld [vmem:[%s3288_s1 + $0x3c8] sm:$0xff]  ;;  %v2257_v61 = vcombine.low %v167_v49, %v171_v50 }
  0x20   :  { %v2256_v53 = vcombine.high %v166_v47, %v170_v48  ;;  %v174_v55 = vld [vmem:[%s3288_s1 + $0x3c0] sm:$0xff]  ;;  %v179_v59 = vld [vmem:[%s3288_s1 + $0x3e8] sm:$0xff]  ;;  %v2255_v60 = vcombine.low %v166_v47, %v170_v48 }
  0x21   :  { %v178_v57 = vld [vmem:[%s3288_s1 + $0x3e0] sm:$0xff]  ;;  %v2266_v63 = vcombine.high %v175_v58, %v179_v59  ;;  %v183_v2 = vld [vmem:[%s3288_s1 + $0x408] sm:$0xff] }
  0x22   :  { %1625 = vmatpush1.bf16.msra.mxu0 %v2199_v3  ;;  %1711 = vmatpush1.bf16.msra.mxu1 %v2201_v4  ;;  %v2264_v62 = vcombine.high %v174_v55, %v178_v57  ;;  %v182_v0 = vld [vmem:[%s3288_s1 + $0x400] sm:$0xff]  ;;  %v187_v3 = vld [vmem:[%s3288_s1 + $0x428] sm:$0xff]  ;;  %v2263_v4 = vcombine.low %v174_v55, %v178_v57 }
  0x23   :  { %1626 = vmatprep.subr.bf16.mxu0 %v2208_v5  ;;  %1712 = vmatprep.subr.bf16.mxu1 %v2210_v6  ;;  %v186_v1 = vld [vmem:[%s3288_s1 + $0x420] sm:$0xff]  ;;  %v2265_v5 = vcombine.low %v175_v58, %v179_v59  ;;  %v2274_v7 = vcombine.high %v183_v2, %v187_v3 }
  0x24   :  { %v2272_v6 = vcombine.high %v182_v0, %v186_v1  ;;  %v190_v8 = vld [vmem:[%s3288_s1 + $0x440] sm:$0xff] }
  0x25   :  { %v194_v9 = vld [vmem:[%s3288_s1 + $0x460] sm:$0xff] }
  0x26   :  { %1627 = vmatpush1.bf16.msra.mxu0 %v2207_v11  ;;  %1713 = vmatpush1.bf16.msra.mxu1 %v2209_v12  ;;  %v2677_v10 = vld [vmem:[%s3289_s0] ss:$16 sps:$4 sm:$0xff]   ;;  %v191_v11 = vld [vmem:[%s3288_s1 + $0x448] sm:$0xff]  ;;  %v2280_v15 = vcombine.high %v190_v8, %v194_v9 }
  0x27   :  { %1628 = vmatprep.subr.bf16.mxu0 %v2216_v13  ;;  %1714 = vmatprep.subr.bf16.mxu1 %v2218_v14  ;;  %v195_v12 = vld [vmem:[%s3288_s1 + $0x468] sm:$0xff]  ;;  %v2271_v13 = vcombine.low %v182_v0, %v186_v1  ;;  %v2273_v14 = vcombine.low %v183_v2, %v187_v3  ;;  %v198_v17 = vld [vmem:[%s3288_s1 + $0x480] sm:$0xff] }
  0x28   :  { %v2282_v16 = vcombine.high %v191_v11, %v195_v12  ;;  %v202_v18 = vld [vmem:[%s3288_s1 + $0x4a0] sm:$0xff]  ;;  %v2281_v23 = vcombine.low %v191_v11, %v195_v12 }
  0x29   :  { %v2288_v24 = vcombine.high %v198_v17, %v202_v18  ;;  %v206_v26 = vld [vmem:[%s3288_s1 + $0x4c0] sm:$0xff] }
  0x2a   :  { %1629 = vmatpush1.bf16.msra.mxu0 %v2215_v19  ;;  %1715 = vmatpush1.bf16.msra.mxu1 %v2217_v20  ;;  %v2694_v19 = vld [vmem:[%s3289_s0 + $0xc] ss:$16 sps:$4 sm:$0xff]   ;;  %v214_v34 = vld [vmem:[%s3288_s1 + $0x500] sm:$0xff] }
  0x2b   :  { %1630 = vmatprep.subr.bf16.mxu0 %v2224_v21  ;;  %1716 = vmatprep.subr.bf16.mxu1 %v2226_v22  ;;  %v199_v20 = vld [vmem:[%s3288_s1 + $0x488] sm:$0xff]  ;;  %v2279_v22 = vcombine.low %v190_v8, %v194_v9  ;;  %v222_v42 = vld [vmem:[%s3288_s1 + $0x540] sm:$0xff] }
  0x2c   :  { %v203_v21 = vld [vmem:[%s3288_s1 + $0x4a8] sm:$0xff]  ;;  %v230_v50 = vld [vmem:[%s3288_s1 + $0x580] sm:$0xff] }
  0x2d   :  { %v2290_v25 = vcombine.high %v199_v20, %v203_v21  ;;  %v2289_v31 = vcombine.low %v199_v20, %v203_v21  ;;  %v238_v59 = vld [vmem:[%s3288_s1 + $0x5c0] sm:$0xff] }
  0x2e   :  { %1631 = vmatpush1.bf16.msra.mxu0 %v2223_v27  ;;  %1717 = vmatpush1.bf16.msra.mxu1 %v2225_v28  ;;  %v210_v27 = vld [vmem:[%s3288_s1 + $0x4e0] sm:$0xff]  ;;  %v207_v28 = vld [vmem:[%s3288_s1 + $0x4c8] sm:$0xff] }
  0x2f   :  { %1632 = vmatprep.subr.bf16.mxu0 %v2232_v29  ;;  %1718 = vmatprep.subr.bf16.mxu1 %v2234_v30  ;;  %v211_v29 = vld [vmem:[%s3288_s1 + $0x4e8] sm:$0xff]  ;;  %v2287_v30 = vcombine.low %v198_v17, %v202_v18  ;;  %v2296_v32 = vcombine.high %v206_v26, %v210_v27  ;;  %v246_v3 = vld [vmem:[%s3288_s1 + $0x600] sm:$0xff] }
  0x30   :  { %v2298_v33 = vcombine.high %v207_v28, %v211_v29  ;;  %v2297_v39 = vcombine.low %v207_v28, %v211_v29  ;;  %v254_v12 = vld [vmem:[%s3288_s1 + $0x640] sm:$0xff] }
  0x31   :  { %v262_v21 = vld [vmem:[%s3288_s1 + $0x680] sm:$0xff] }
  0x32   :  { %1633 = vmatpush1.bf16.msra.mxu0 %v2231_v35  ;;  %1719 = vmatpush1.bf16.msra.mxu1 %v2233_v36  ;;  %v218_v35 = vld [vmem:[%s3288_s1 + $0x520] sm:$0xff]  ;;  %v215_v36 = vld [vmem:[%s3288_s1 + $0x508] sm:$0xff] }
  0x33   :  { %1634 = vmatprep.subr.bf16.mxu0 %v2240_v37  ;;  %1720 = vmatprep.subr.bf16.mxu1 %v2242_v38  ;;  %v219_v37 = vld [vmem:[%s3288_s1 + $0x528] sm:$0xff]  ;;  %v2295_v38 = vcombine.low %v206_v26, %v210_v27  ;;  %v2304_v40 = vcombine.high %v214_v34, %v218_v35  ;;  %v270_v29 = vld [vmem:[%s3288_s1 + $0x6c0] sm:$0xff] }
  0x34   :  { %v2306_v41 = vcombine.high %v215_v36, %v219_v37  ;;  %v2305_v47 = vcombine.low %v215_v36, %v219_v37  ;;  %v278_v37 = vld [vmem:[%s3288_s1 + $0x700] sm:$0xff] }
  0x36   :  { %1635 = vmatpush1.bf16.msra.mxu0 %v2239_v43  ;;  %1721 = vmatpush1.bf16.msra.mxu1 %v2241_v44  ;;  %v226_v43 = vld [vmem:[%s3288_s1 + $0x560] sm:$0xff]  ;;  %v223_v44 = vld [vmem:[%s3288_s1 + $0x548] sm:$0xff] }
  0x37   :  { %1636 = vmatprep.subr.bf16.mxu0 %v2248_v45  ;;  %1722 = vmatprep.subr.bf16.mxu1 %v2250_v46  ;;  %v227_v45 = vld [vmem:[%s3288_s1 + $0x568] sm:$0xff]  ;;  %v2303_v46 = vcombine.low %v214_v34, %v218_v35  ;;  %v2312_v48 = vcombine.high %v222_v42, %v226_v43 }
  0x38   :  { %v2314_v49 = vcombine.high %v223_v44, %v227_v45  ;;  %v2313_v55 = vcombine.low %v223_v44, %v227_v45  ;;  %v286_v45 = vld [vmem:[%s3288_s1 + $0x740] sm:$0xff] }
  0x3a   :  { %1637 = vmatpush1.bf16.msra.mxu0 %v2247_v51  ;;  %1723 = vmatpush1.bf16.msra.mxu1 %v2249_v52  ;;  %v234_v51 = vld [vmem:[%s3288_s1 + $0x5a0] sm:$0xff]  ;;  %v231_v52 = vld [vmem:[%s3288_s1 + $0x588] sm:$0xff] }
  0x3b   :  { %1638 = vmatprep.subr.bf16.mxu0 %v2256_v53  ;;  %1724 = vmatprep.subr.bf16.mxu1 %v2258_v54  ;;  %v235_v53 = vld [vmem:[%s3288_s1 + $0x5a8] sm:$0xff]  ;;  %v2311_v54 = vcombine.low %v222_v42, %v226_v43  ;;  %v2320_v57 = vcombine.high %v230_v50, %v234_v51 }
  0x3c   :  { %v2322_v58 = vcombine.high %v231_v52, %v235_v53  ;;  %v2321_v0 = vcombine.low %v231_v52, %v235_v53  ;;  %v294_v53 = vld [vmem:[%s3288_s1 + $0x780] sm:$0xff] }
  0x3e   :  { %1639 = vmatpush1.bf16.msra.mxu0 %v2255_v60  ;;  %1725 = vmatpush1.bf16.msra.mxu1 %v2257_v61  ;;  %v242_v60 = vld [vmem:[%s3288_s1 + $0x5e0] sm:$0xff]  ;;  %v239_v61 = vld [vmem:[%s3288_s1 + $0x5c8] sm:$0xff] }
  0x3f   :  { %1640 = vmatprep.subr.bf16.mxu0 %v2264_v62  ;;  %1726 = vmatprep.subr.bf16.mxu1 %v2266_v63  ;;  %v243_v62 = vld [vmem:[%s3288_s1 + $0x5e8] sm:$0xff]  ;;  %v2319_v63 = vcombine.low %v230_v50, %v234_v51  ;;  %v2328_v1 = vcombine.high %v238_v59, %v242_v60 }
  0x40   :  { %v2330_v2 = vcombine.high %v239_v61, %v243_v62  ;;  %v2329_v8 = vcombine.low %v239_v61, %v243_v62  ;;  %v302_v62 = vld [vmem:[%s3288_s1 + $0x7c0] sm:$0xff] }
  0x42   :  { %1641 = vmatpush1.bf16.msra.mxu0 %v2263_v4  ;;  %1727 = vmatpush1.bf16.msra.mxu1 %v2265_v5  ;;  %v250_v4 = vld [vmem:[%s3288_s1 + $0x620] sm:$0xff]  ;;  %v247_v5 = vld [vmem:[%s3288_s1 + $0x608] sm:$0xff] }
  0x43   :  { %1653 = vmatprep.subr.bf16.mxu0 %v2272_v6  ;;  %1739 = vmatprep.subr.bf16.mxu1 %v2274_v7  ;;  %v251_v6 = vld [vmem:[%s3288_s1 + $0x628] sm:$0xff]  ;;  %v2327_v7 = vcombine.low %v238_v59, %v242_v60  ;;  %v2336_v9 = vcombine.high %v246_v3, %v250_v4 }
  0x44   :  { %v2338_v11 = vcombine.high %v247_v5, %v251_v6  ;;  %v2337_v17 = vcombine.low %v247_v5, %v251_v6  ;;  %v56_v6 = vld [vmem:[%s3288_s1 + $0x10] sm:$0xff] }
  0x45   :  { %1643 = vmatmul.mubr.bf16.vlgmr.msra.gmra.mrb[0].mxu0 %v2677_v10  ;;  %1729 = vmatmul.mubr.bf16.vlgmr.msra.gmra.mrb[0].mxu1 %v2677_v10 }
  0x46   :  { %1654 = vmatpush1.bf16.msra.mxu0 %v2271_v13  ;;  %1740 = vmatpush1.bf16.msra.mxu1 %v2273_v14  ;;  %v258_v13 = vld [vmem:[%s3288_s1 + $0x660] sm:$0xff]  ;;  %v255_v14 = vld [vmem:[%s3288_s1 + $0x648] sm:$0xff] }
  0x47   :  { %1655 = vmatprep.subr.bf16.mxu0 %v2280_v15  ;;  %1741 = vmatprep.subr.bf16.mxu1 %v2282_v16  ;;  %v259_v15 = vld [vmem:[%s3288_s1 + $0x668] sm:$0xff]  ;;  %v2335_v16 = vcombine.low %v246_v3, %v250_v4  ;;  %v2344_v18 = vcombine.high %v254_v12, %v258_v13 }
  0x48   :  { %1685 = vmatprep.mubr.bf16.mxu0 %v2694_v19  ;;  %1771 = vmatprep.mubr.bf16.mxu1 %v2694_v19  ;;  %v2346_v20 = vcombine.high %v255_v14, %v259_v15  ;;  %v2345_v26 = vcombine.low %v255_v14, %v259_v15  ;;  %v64_v15 = vld [vmem:[%s3288_s1 + $0x50] sm:$0xff] }
  0x4a   :  { %1656 = vmatpush1.bf16.msra.mxu0 %v2279_v22  ;;  %1742 = vmatpush1.bf16.msra.mxu1 %v2281_v23  ;;  %v266_v22 = vld [vmem:[%s3288_s1 + $0x6a0] sm:$0xff]  ;;  %v263_v23 = vld [vmem:[%s3288_s1 + $0x688] sm:$0xff] }
  0x4b   :  { %1657 = vmatprep.subr.bf16.mxu0 %v2288_v24  ;;  %1743 = vmatprep.subr.bf16.mxu1 %v2290_v25  ;;  %v267_v24 = vld [vmem:[%s3288_s1 + $0x6a8] sm:$0xff]  ;;  %v2343_v25 = vcombine.low %v254_v12, %v258_v13  ;;  %v2352_v27 = vcombine.high %v262_v21, %v266_v22 }
  0x4c   :  { %v2354_v28 = vcombine.high %v263_v23, %v267_v24  ;;  %v2353_v34 = vcombine.low %v263_v23, %v267_v24 }
  0x4e   :  { %1658 = vmatpush1.bf16.msra.mxu0 %v2287_v30  ;;  %1744 = vmatpush1.bf16.msra.mxu1 %v2289_v31  ;;  %v274_v30 = vld [vmem:[%s3288_s1 + $0x6e0] sm:$0xff]  ;;  %v271_v31 = vld [vmem:[%s3288_s1 + $0x6c8] sm:$0xff] }
  0x4f   :  { %1659 = vmatprep.subr.bf16.mxu0 %v2296_v32  ;;  %1745 = vmatprep.subr.bf16.mxu1 %v2298_v33  ;;  %v275_v32 = vld [vmem:[%s3288_s1 + $0x6e8] sm:$0xff]  ;;  %v2351_v33 = vcombine.low %v262_v21, %v266_v22  ;;  %v2360_v35 = vcombine.high %v270_v29, %v274_v30 }
  0x50   :  { %v2362_v36 = vcombine.high %v271_v31, %v275_v32  ;;  %v2361_v42 = vcombine.low %v271_v31, %v275_v32 }
  0x52   :  { %1660 = vmatpush1.bf16.msra.mxu0 %v2295_v38  ;;  %1746 = vmatpush1.bf16.msra.mxu1 %v2297_v39  ;;  %v282_v38 = vld [vmem:[%s3288_s1 + $0x720] sm:$0xff]  ;;  %v279_v39 = vld [vmem:[%s3288_s1 + $0x708] sm:$0xff] }
  0x53   :  { %1661 = vmatprep.subr.bf16.mxu0 %v2304_v40  ;;  %1747 = vmatprep.subr.bf16.mxu1 %v2306_v41  ;;  %v283_v40 = vld [vmem:[%s3288_s1 + $0x728] sm:$0xff]  ;;  %v2359_v41 = vcombine.low %v270_v29, %v274_v30  ;;  %v2368_v43 = vcombine.high %v278_v37, %v282_v38 }
  0x54   :  { %v2370_v44 = vcombine.high %v279_v39, %v283_v40  ;;  %v2369_v50 = vcombine.low %v279_v39, %v283_v40 }
  0x56   :  { %1662 = vmatpush1.bf16.msra.mxu0 %v2303_v46  ;;  %1748 = vmatpush1.bf16.msra.mxu1 %v2305_v47  ;;  %v290_v46 = vld [vmem:[%s3288_s1 + $0x760] sm:$0xff]  ;;  %v287_v47 = vld [vmem:[%s3288_s1 + $0x748] sm:$0xff] }
  0x57   :  { %1663 = vmatprep.subr.bf16.mxu0 %v2312_v48  ;;  %1749 = vmatprep.subr.bf16.mxu1 %v2314_v49  ;;  %v291_v48 = vld [vmem:[%s3288_s1 + $0x768] sm:$0xff]  ;;  %v2367_v49 = vcombine.low %v278_v37, %v282_v38  ;;  %v2376_v51 = vcombine.high %v286_v45, %v290_v46 }
  0x58   :  { %v2378_v52 = vcombine.high %v287_v47, %v291_v48  ;;  %v2377_v59 = vcombine.low %v287_v47, %v291_v48  ;;  %v96_v48 = vld [vmem:[%s3288_s1 + $0x150] sm:$0xff] }
  0x5a   :  { %1664 = vmatpush1.bf16.msra.mxu0 %v2311_v54  ;;  %1750 = vmatpush1.bf16.msra.mxu1 %v2313_v55  ;;  %v298_v54 = vld [vmem:[%s3288_s1 + $0x7a0] sm:$0xff]  ;;  %v295_v55 = vld [vmem:[%s3288_s1 + $0x788] sm:$0xff] }
  0x5b   :  { %1665 = vmatprep.subr.bf16.mxu0 %v2320_v57  ;;  %1751 = vmatprep.subr.bf16.mxu1 %v2322_v58  ;;  %v299_v57 = vld [vmem:[%s3288_s1 + $0x7a8] sm:$0xff]  ;;  %v2375_v58 = vcombine.low %v286_v45, %v290_v46  ;;  %v2384_v60 = vcombine.high %v294_v53, %v298_v54 }
  0x5c   :  { %v2386_v61 = vcombine.high %v295_v55, %v299_v57  ;;  %v2385_v3 = vcombine.low %v295_v55, %v299_v57  ;;  %v104_v57 = vld [vmem:[%s3288_s1 + $0x190] sm:$0xff] }
  0x5e   :  { %1666 = vmatpush1.bf16.msra.mxu0 %v2319_v63  ;;  %1752 = vmatpush1.bf16.msra.mxu1 %v2321_v0  ;;  %v306_v63 = vld [vmem:[%s3288_s1 + $0x7e0] sm:$0xff]  ;;  %v303_v0 = vld [vmem:[%s3288_s1 + $0x7c8] sm:$0xff] }
  0x5f   :  { %1667 = vmatprep.subr.bf16.mxu0 %v2328_v1  ;;  %1753 = vmatprep.subr.bf16.mxu1 %v2330_v2  ;;  %v307_v1 = vld [vmem:[%s3288_s1 + $0x7e8] sm:$0xff]  ;;  %v2383_v2 = vcombine.low %v294_v53, %v298_v54  ;;  %v2392_v4 = vcombine.high %v302_v62, %v306_v63 }
  0x60   :  { %v2394_v5 = vcombine.high %v303_v0, %v307_v1  ;;  %v2393_v12 = vcombine.low %v303_v0, %v307_v1  ;;  %v112_v1 = vld [vmem:[%s3288_s1 + $0x1d0] sm:$0xff] }
  0x62   :  { %1668 = vmatpush1.bf16.msra.mxu0 %v2327_v7  ;;  %1754 = vmatpush1.bf16.msra.mxu1 %v2329_v8  ;;  %v60_v7 = vld [vmem:[%s3288_s1 + $0x30] sm:$0xff]  ;;  %v57_v8 = vld [vmem:[%s3288_s1 + $0x18] sm:$0xff] }
  0x63   :  { %1669 = vmatprep.subr.bf16.mxu0 %v2336_v9  ;;  %1755 = vmatprep.subr.bf16.mxu1 %v2338_v11  ;;  %v61_v9 = vld [vmem:[%s3288_s1 + $0x38] sm:$0xff]  ;;  %v2391_v11 = vcombine.low %v302_v62, %v306_v63  ;;  %v2148_v13 = vcombine.high %v56_v6, %v60_v7  ;;  %v2147_v21 = vcombine.low %v56_v6, %v60_v7 }
  0x64   :  { %v2150_v14 = vcombine.high %v57_v8, %v61_v9  ;;  %v2149_v22 = vcombine.low %v57_v8, %v61_v9  ;;  %v120_v9 = vld [vmem:[%s3288_s1 + $0x210] sm:$0xff] }
  0x66   :  { %1670 = vmatpush1.bf16.msra.mxu0 %v2335_v16  ;;  %1756 = vmatpush1.bf16.msra.mxu1 %v2337_v17  ;;  %v68_v16 = vld [vmem:[%s3288_s1 + $0x70] sm:$0xff]  ;;  %v2883_v17 = vld [vmem:[%s3289_s0 + $0x8] ss:$16 sps:$4 sm:$0xff]  }
  0x67   :  { %1671 = vmatprep.subr.bf16.mxu0 %v2344_v18  ;;  %1757 = vmatprep.subr.bf16.mxu1 %v2346_v20  ;;  %v65_v18 = vld [vmem:[%s3288_s1 + $0x58] sm:$0xff]  ;;  %v2156_v23 = vcombine.high %v64_v15, %v68_v16  ;;  %v2155_v29 = vcombine.low %v64_v15, %v68_v16 }
  0x68   :  { %v69_v20 = vld [vmem:[%s3288_s1 + $0x78] sm:$0xff] }
  0x69   :  { %v2158_v24 = vcombine.high %v65_v18, %v69_v20  ;;  %v2157_v30 = vcombine.low %v65_v18, %v69_v20  ;;  %v128_v20 = vld [vmem:[%s3288_s1 + $0x250] sm:$0xff] }
  0x6a   :  { %1672 = vmatpush1.bf16.msra.mxu0 %v2343_v25  ;;  %1758 = vmatpush1.bf16.msra.mxu1 %v2345_v26  ;;  %v72_v25 = vld [vmem:[%s3288_s1 + $0x90] sm:$0xff] }
  0x6b   :  { %1673 = vmatprep.subr.bf16.mxu0 %v2352_v27  ;;  %1759 = vmatprep.subr.bf16.mxu1 %v2354_v28  ;;  %v76_v26 = vld [vmem:[%s3288_s1 + $0xb0] sm:$0xff]  ;;  %v73_v27 = vld [vmem:[%s3288_s1 + $0x98] sm:$0xff] }
  0x6c   :  { %v77_v28 = vld [vmem:[%s3288_s1 + $0xb8] sm:$0xff]  ;;  %v2164_v31 = vcombine.high %v72_v25, %v76_v26  ;;  %v2163_v37 = vcombine.low %v72_v25, %v76_v26 }
  0x6d   :  { %v2166_v32 = vcombine.high %v73_v27, %v77_v28  ;;  %v2165_v38 = vcombine.low %v73_v27, %v77_v28  ;;  %v136_v28 = vld [vmem:[%s3288_s1 + $0x290] sm:$0xff] }
  0x6e   :  { %1674 = vmatpush1.bf16.msra.mxu0 %v2351_v33  ;;  %1760 = vmatpush1.bf16.msra.mxu1 %v2353_v34  ;;  %v80_v33 = vld [vmem:[%s3288_s1 + $0xd0] sm:$0xff] }
  0x6f   :  { %1675 = vmatprep.subr.bf16.mxu0 %v2360_v35  ;;  %1761 = vmatprep.subr.bf16.mxu1 %v2362_v36  ;;  %v84_v34 = vld [vmem:[%s3288_s1 + $0xf0] sm:$0xff]  ;;  %v81_v35 = vld [vmem:[%s3288_s1 + $0xd8] sm:$0xff] }
  0x70   :  { %v85_v36 = vld [vmem:[%s3288_s1 + $0xf8] sm:$0xff]  ;;  %v2172_v39 = vcombine.high %v80_v33, %v84_v34 }
  0x71   :  { %v2174_v40 = vcombine.high %v81_v35, %v85_v36  ;;  %v2173_v45 = vcombine.low %v81_v35, %v85_v36  ;;  %v144_v36 = vld [vmem:[%s3288_s1 + $0x2d0] sm:$0xff] }
  0x72   :  { %1676 = vmatpush1.bf16.msra.mxu0 %v2359_v41  ;;  %1762 = vmatpush1.bf16.msra.mxu1 %v2361_v42  ;;  %v88_v41 = vld [vmem:[%s3288_s1 + $0x110] sm:$0xff] }
  0x73   :  { %1677 = vmatprep.subr.bf16.mxu0 %v2368_v43  ;;  %1763 = vmatprep.subr.bf16.mxu1 %v2370_v44  ;;  %v92_v42 = vld [vmem:[%s3288_s1 + $0x130] sm:$0xff]  ;;  %v93_v43 = vld [vmem:[%s3288_s1 + $0x138] sm:$0xff]  ;;  %v2171_v44 = vcombine.low %v80_v33, %v84_v34 }
  0x74   :  { %v2180_v46 = vcombine.high %v88_v41, %v92_v42 }
  0x76   :  { %1678 = vmatpush1.bf16.msra.mxu0 %v2367_v49  ;;  %1764 = vmatpush1.bf16.msra.mxu1 %v2369_v50  ;;  %v100_v49 = vld [vmem:[%s3288_s1 + $0x170] sm:$0xff]  ;;  %v97_v50 = vld [vmem:[%s3288_s1 + $0x158] sm:$0xff] }
  0x77   :  { %1679 = vmatprep.subr.bf16.mxu0 %v2376_v51  ;;  %1765 = vmatprep.subr.bf16.mxu1 %v2378_v52  ;;  %v101_v51 = vld [vmem:[%s3288_s1 + $0x178] sm:$0xff]  ;;  %v2179_v52 = vcombine.low %v88_v41, %v92_v42  ;;  %v2188_v54 = vcombine.high %v96_v48, %v100_v49 }
  0x78   :  { %v2190_v55 = vcombine.high %v97_v50, %v101_v51  ;;  %v2189_v62 = vcombine.low %v97_v50, %v101_v51  ;;  %v160_v51 = vld [vmem:[%s3288_s1 + $0x350] sm:$0xff] }
  0x7a   :  { %1680 = vmatpush1.bf16.msra.mxu0 %v2375_v58  ;;  %1766 = vmatpush1.bf16.msra.mxu1 %v2377_v59  ;;  %v108_v58 = vld [vmem:[%s3288_s1 + $0x1b0] sm:$0xff]  ;;  %v105_v59 = vld [vmem:[%s3288_s1 + $0x198] sm:$0xff] }
  0x7b   :  { %1681 = vmatprep.subr.bf16.mxu0 %v2384_v60  ;;  %1767 = vmatprep.subr.bf16.mxu1 %v2386_v61  ;;  %v109_v60 = vld [vmem:[%s3288_s1 + $0x1b8] sm:$0xff]  ;;  %v2187_v61 = vcombine.low %v96_v48, %v100_v49  ;;  %v2196_v63 = vcombine.high %v104_v57, %v108_v58 }
  0x7c   :  { %v2198_v0 = vcombine.high %v105_v59, %v109_v60  ;;  %v2197_v6 = vcombine.low %v105_v59, %v109_v60  ;;  %v168_v60 = vld [vmem:[%s3288_s1 + $0x390] sm:$0xff] }
  0x7e   :  { %1682 = vmatpush1.bf16.msra.mxu0 %v2383_v2  ;;  %1768 = vmatpush1.bf16.msra.mxu1 %v2385_v3  ;;  %v116_v2 = vld [vmem:[%s3288_s1 + $0x1f0] sm:$0xff]  ;;  %v113_v3 = vld [vmem:[%s3288_s1 + $0x1d8] sm:$0xff] }
  0x7f   :  { %1683 = vmatprep.subr.bf16.mxu0 %v2392_v4  ;;  %1769 = vmatprep.subr.bf16.mxu1 %v2394_v5  ;;  %v117_v4 = vld [vmem:[%s3288_s1 + $0x1f8] sm:$0xff]  ;;  %v2195_v5 = vcombine.low %v104_v57, %v108_v58  ;;  %v2204_v7 = vcombine.high %v112_v1, %v116_v2 }
  0x80   :  { %v2206_v8 = vcombine.high %v113_v3, %v117_v4  ;;  %v2205_v15 = vcombine.low %v113_v3, %v117_v4  ;;  %v176_v4 = vld [vmem:[%s3288_s1 + $0x3d0] sm:$0xff] }
  0x82   :  { %1684 = vmatpush1.bf16.msra.mxu0 %v2391_v11  ;;  %1770 = vmatpush1.bf16.msra.mxu1 %v2393_v12  ;;  %v124_v11 = vld [vmem:[%s3288_s1 + $0x230] sm:$0xff]  ;;  %v121_v12 = vld [vmem:[%s3288_s1 + $0x218] sm:$0xff] }
  0x83   :  { %1782 = vmatprep.subr.bf16.mxu0 %v2148_v13  ;;  %1868 = vmatprep.subr.bf16.mxu1 %v2150_v14  ;;  %v125_v13 = vld [vmem:[%s3288_s1 + $0x238] sm:$0xff]  ;;  %v2203_v14 = vcombine.low %v112_v1, %v116_v2  ;;  %v2212_v16 = vcombine.high %v120_v9, %v124_v11 }
  0x84   :  { %v2214_v18 = vcombine.high %v121_v12, %v125_v13  ;;  %v2213_v25 = vcombine.low %v121_v12, %v125_v13  ;;  %v184_v13 = vld [vmem:[%s3288_s1 + $0x410] sm:$0xff] }
  0x85   :  { %1686 = vmatmul.mubr.bf16.vlgmr.msra.gmra.mrb[0].mxu0 %v2883_v17  ;;  %1772 = vmatmul.mubr.bf16.vlgmr.msra.gmra.mrb[0].mxu1 %v2883_v17 }
  0x86   :  { %1783 = vmatpush1.bf16.msra.mxu0 %v2147_v21  ;;  %1869 = vmatpush1.bf16.msra.mxu1 %v2149_v22  ;;  %v132_v21 = vld [vmem:[%s3288_s1 + $0x270] sm:$0xff]  ;;  %v129_v22 = vld [vmem:[%s3288_s1 + $0x258] sm:$0xff] }
  0x87   :  { %1784 = vmatprep.subr.bf16.mxu0 %v2156_v23  ;;  %1870 = vmatprep.subr.bf16.mxu1 %v2158_v24  ;;  %v133_v23 = vld [vmem:[%s3288_s1 + $0x278] sm:$0xff]  ;;  %v2211_v24 = vcombine.low %v120_v9, %v124_v11  ;;  %v2220_v26 = vcombine.high %v128_v20, %v132_v21 }
  0x88   :  { %1814 = vmatprep.mubr.bf16.mxu0 %v2550_v56  ;;  %1900 = vmatprep.mubr.bf16.mxu1 %v2550_v56  ;;  %v89_v56 = vld [vmem:[%s3288_s1 + $0x118] sm:$0xff]  ;;  %v2222_v27 = vcombine.high %v129_v22, %v133_v23  ;;  %v2221_v33 = vcombine.low %v129_v22, %v133_v23  ;;  %v192_v23 = vld [vmem:[%s3288_s1 + $0x450] sm:$0xff] }
  0x89   :  { %v2182_v47 = vcombine.high %v89_v56, %v93_v43  ;;  %v2181_v53 = vcombine.low %v89_v56, %v93_v43  ;;  %v152_v43 = vld [vmem:[%s3288_s1 + $0x310] sm:$0xff] }
  0x8a   :  { %1785 = vmatpush1.bf16.msra.mxu0 %v2155_v29  ;;  %1871 = vmatpush1.bf16.msra.mxu1 %v2157_v30  ;;  %v140_v29 = vld [vmem:[%s3288_s1 + $0x2b0] sm:$0xff]  ;;  %v137_v30 = vld [vmem:[%s3288_s1 + $0x298] sm:$0xff] }
  0x8b   :  { %1786 = vmatprep.subr.bf16.mxu0 %v2164_v31  ;;  %1872 = vmatprep.subr.bf16.mxu1 %v2166_v32  ;;  %v141_v31 = vld [vmem:[%s3288_s1 + $0x2b8] sm:$0xff]  ;;  %v2219_v32 = vcombine.low %v128_v20, %v132_v21  ;;  %v2228_v34 = vcombine.high %v136_v28, %v140_v29 }
  0x8c   :  { %v2230_v35 = vcombine.high %v137_v30, %v141_v31  ;;  %v2229_v41 = vcombine.low %v137_v30, %v141_v31  ;;  %v200_v31 = vld [vmem:[%s3288_s1 + $0x490] sm:$0xff] }
  0x8e   :  { %1787 = vmatpush1.bf16.msra.mxu0 %v2163_v37  ;;  %1873 = vmatpush1.bf16.msra.mxu1 %v2165_v38  ;;  %v148_v37 = vld [vmem:[%s3288_s1 + $0x2f0] sm:$0xff]  ;;  %v145_v38 = vld [vmem:[%s3288_s1 + $0x2d8] sm:$0xff] }
  0x8f   :  { %1788 = vmatprep.subr.bf16.mxu0 %v2172_v39  ;;  %1874 = vmatprep.subr.bf16.mxu1 %v2174_v40  ;;  %v149_v39 = vld [vmem:[%s3288_s1 + $0x2f8] sm:$0xff]  ;;  %v2227_v40 = vcombine.low %v136_v28, %v140_v29  ;;  %v2236_v42 = vcombine.high %v144_v36, %v148_v37 }
  0x90   :  { %v2238_v56 = vcombine.high %v145_v38, %v149_v39  ;;  %v2237_v48 = vcombine.low %v145_v38, %v149_v39  ;;  %v208_v39 = vld [vmem:[%s3288_s1 + $0x4d0] sm:$0xff] }
  0x92   :  { %1789 = vmatpush1.bf16.msra.mxu0 %v2171_v44  ;;  %1875 = vmatpush1.bf16.msra.mxu1 %v2173_v45  ;;  %v156_v44 = vld [vmem:[%s3288_s1 + $0x330] sm:$0xff]  ;;  %v153_v45 = vld [vmem:[%s3288_s1 + $0x318] sm:$0xff] }
  0x93   :  { %1790 = vmatprep.subr.bf16.mxu0 %v2180_v46  ;;  %1876 = vmatprep.subr.bf16.mxu1 %v2182_v47  ;;  %v157_v46 = vld [vmem:[%s3288_s1 + $0x338] sm:$0xff]  ;;  %v2235_v47 = vcombine.low %v144_v36, %v148_v37  ;;  %v2244_v49 = vcombine.high %v152_v43, %v156_v44 }
  0x94   :  { %v2246_v50 = vcombine.high %v153_v45, %v157_v46  ;;  %v2245_v57 = vcombine.low %v153_v45, %v157_v46  ;;  %v216_v45 = vld [vmem:[%s3288_s1 + $0x510] sm:$0xff] }
  0x95   :  { %v220_v46 = vld [vmem:[%s3288_s1 + $0x530] sm:$0xff] }
  0x96   :  { %1791 = vmatpush1.bf16.msra.mxu0 %v2179_v52  ;;  %1877 = vmatpush1.bf16.msra.mxu1 %v2181_v53  ;;  %v164_v52 = vld [vmem:[%s3288_s1 + $0x370] sm:$0xff]  ;;  %v161_v53 = vld [vmem:[%s3288_s1 + $0x358] sm:$0xff] }
  0x97   :  { %1792 = vmatprep.subr.bf16.mxu0 %v2188_v54  ;;  %1878 = vmatprep.subr.bf16.mxu1 %v2190_v55  ;;  %v165_v54 = vld [vmem:[%s3288_s1 + $0x378] sm:$0xff]  ;;  %v2243_v55 = vcombine.low %v152_v43, %v156_v44  ;;  %v2252_v58 = vcombine.high %v160_v51, %v164_v52 }
  0x98   :  { %v2254_v59 = vcombine.high %v161_v53, %v165_v54  ;;  %v2253_v1 = vcombine.low %v161_v53, %v165_v54  ;;  %v228_v53 = vld [vmem:[%s3288_s1 + $0x570] sm:$0xff]  ;;  %v225_v54 = vld [vmem:[%s3288_s1 + $0x558] sm:$0xff] }
  0x9a   :  { %1793 = vmatpush1.bf16.msra.mxu0 %v2187_v61  ;;  %1879 = vmatpush1.bf16.msra.mxu1 %v2189_v62  ;;  %v172_v61 = vld [vmem:[%s3288_s1 + $0x3b0] sm:$0xff]  ;;  %v169_v62 = vld [vmem:[%s3288_s1 + $0x398] sm:$0xff] }
  0x9b   :  { %1794 = vmatprep.subr.bf16.mxu0 %v2196_v63  ;;  %1880 = vmatprep.subr.bf16.mxu1 %v2198_v0  ;;  %v173_v63 = vld [vmem:[%s3288_s1 + $0x3b8] sm:$0xff]  ;;  %v2251_v0 = vcombine.low %v160_v51, %v164_v52  ;;  %v2260_v2 = vcombine.high %v168_v60, %v172_v61  ;;  %v224_v52 = vld [vmem:[%s3288_s1 + $0x550] sm:$0xff] }
  0x9c   :  { %v2262_v3 = vcombine.high %v169_v62, %v173_v63  ;;  %v2261_v9 = vcombine.low %v169_v62, %v173_v63  ;;  %v236_v62 = vld [vmem:[%s3288_s1 + $0x5b0] sm:$0xff]  ;;  %v233_v63 = vld [vmem:[%s3288_s1 + $0x598] sm:$0xff] }
  0x9e   :  { %1795 = vmatpush1.bf16.msra.mxu0 %v2195_v5  ;;  %1881 = vmatpush1.bf16.msra.mxu1 %v2197_v6  ;;  %v180_v5 = vld [vmem:[%s3288_s1 + $0x3f0] sm:$0xff]  ;;  %v177_v6 = vld [vmem:[%s3288_s1 + $0x3d8] sm:$0xff] }
  0x9f   :  { %1796 = vmatprep.subr.bf16.mxu0 %v2204_v7  ;;  %1882 = vmatprep.subr.bf16.mxu1 %v2206_v8  ;;  %v181_v7 = vld [vmem:[%s3288_s1 + $0x3f8] sm:$0xff]  ;;  %v2259_v8 = vcombine.low %v168_v60, %v172_v61  ;;  %v2268_v11 = vcombine.high %v176_v4, %v180_v5  ;;  %v232_v61 = vld [vmem:[%s3288_s1 + $0x590] sm:$0xff] }
  0xa0   :  { %v2270_v12 = vcombine.high %v177_v6, %v181_v7  ;;  %v2269_v20 = vcombine.low %v177_v6, %v181_v7  ;;  %v244_v6 = vld [vmem:[%s3288_s1 + $0x5f0] sm:$0xff]  ;;  %v241_v7 = vld [vmem:[%s3288_s1 + $0x5d8] sm:$0xff] }
  0xa2   :  { %1797 = vmatpush1.bf16.msra.mxu0 %v2203_v14  ;;  %1883 = vmatpush1.bf16.msra.mxu1 %v2205_v15  ;;  %v188_v14 = vld [vmem:[%s3288_s1 + $0x430] sm:$0xff]  ;;  %v185_v15 = vld [vmem:[%s3288_s1 + $0x418] sm:$0xff] }
  0xa3   :  { %1798 = vmatprep.subr.bf16.mxu0 %v2212_v16  ;;  %1884 = vmatprep.subr.bf16.mxu1 %v2214_v18  ;;  %v189_v16 = vld [vmem:[%s3288_s1 + $0x438] sm:$0xff]  ;;  %v2267_v18 = vcombine.low %v176_v4, %v180_v5  ;;  %v2276_v21 = vcombine.high %v184_v13, %v188_v14  ;;  %v240_v5 = vld [vmem:[%s3288_s1 + $0x5d0] sm:$0xff] }
  0xa4   :  { %v2278_v22 = vcombine.high %v185_v15, %v189_v16  ;;  %v2277_v28 = vcombine.low %v185_v15, %v189_v16  ;;  %v252_v15 = vld [vmem:[%s3288_s1 + $0x630] sm:$0xff]  ;;  %v249_v16 = vld [vmem:[%s3288_s1 + $0x618] sm:$0xff] }
  0xa6   :  { %1799 = vmatpush1.bf16.msra.mxu0 %v2211_v24  ;;  %1885 = vmatpush1.bf16.msra.mxu1 %v2213_v25  ;;  %v196_v24 = vld [vmem:[%s3288_s1 + $0x470] sm:$0xff]  ;;  %v193_v25 = vld [vmem:[%s3288_s1 + $0x458] sm:$0xff] }
  0xa7   :  { %1800 = vmatprep.subr.bf16.mxu0 %v2220_v26  ;;  %1886 = vmatprep.subr.bf16.mxu1 %v2222_v27  ;;  %v197_v26 = vld [vmem:[%s3288_s1 + $0x478] sm:$0xff]  ;;  %v2275_v27 = vcombine.low %v184_v13, %v188_v14  ;;  %v2284_v29 = vcombine.high %v192_v23, %v196_v24  ;;  %v248_v14 = vld [vmem:[%s3288_s1 + $0x610] sm:$0xff] }
  0xa8   :  { %v2286_v30 = vcombine.high %v193_v25, %v197_v26  ;;  %v2285_v36 = vcombine.low %v193_v25, %v197_v26  ;;  %v260_v25 = vld [vmem:[%s3288_s1 + $0x670] sm:$0xff]  ;;  %v257_v26 = vld [vmem:[%s3288_s1 + $0x658] sm:$0xff] }
  0xaa   :  { %1801 = vmatpush1.bf16.msra.mxu0 %v2219_v32  ;;  %1887 = vmatpush1.bf16.msra.mxu1 %v2221_v33  ;;  %v204_v32 = vld [vmem:[%s3288_s1 + $0x4b0] sm:$0xff]  ;;  %v201_v33 = vld [vmem:[%s3288_s1 + $0x498] sm:$0xff] }
  0xab   :  { %1802 = vmatprep.subr.bf16.mxu0 %v2228_v34  ;;  %1888 = vmatprep.subr.bf16.mxu1 %v2230_v35  ;;  %v205_v34 = vld [vmem:[%s3288_s1 + $0x4b8] sm:$0xff]  ;;  %v2283_v35 = vcombine.low %v192_v23, %v196_v24  ;;  %v2292_v37 = vcombine.high %v200_v31, %v204_v32  ;;  %v256_v24 = vld [vmem:[%s3288_s1 + $0x650] sm:$0xff] }
  0xac   :  { %v2294_v38 = vcombine.high %v201_v33, %v205_v34 }
  0xae   :  { %1803 = vmatpush1.bf16.msra.mxu0 %v2227_v40  ;;  %1889 = vmatpush1.bf16.msra.mxu1 %v2229_v41  ;;  %v212_v40 = vld [vmem:[%s3288_s1 + $0x4f0] sm:$0xff]  ;;  %v213_v41 = vld [vmem:[%s3288_s1 + $0x4f8] sm:$0xff] }
  0xaf   :  { %1804 = vmatprep.subr.bf16.mxu0 %v2236_v42  ;;  %1890 = vmatprep.subr.bf16.mxu1 %v2238_v56  ;;  %v2291_v42 = vcombine.low %v200_v31, %v204_v32  ;;  %v2293_v56 = vcombine.low %v201_v33, %v205_v34  ;;  %v2300_v43 = vcombine.high %v208_v39, %v212_v40  ;;  %v264_v32 = vld [vmem:[%s3288_s1 + $0x690] sm:$0xff]  ;;  %v265_v34 = vld [vmem:[%s3288_s1 + $0x698] sm:$0xff] }
  0xb0   :  { %v268_v33 = vld [vmem:[%s3288_s1 + $0x6b0] sm:$0xff] }
  0xb2   :  { %1805 = vmatpush1.bf16.msra.mxu0 %v2235_v47  ;;  %1891 = vmatpush1.bf16.msra.mxu1 %v2237_v48  ;;  %v221_v47 = vld [vmem:[%s3288_s1 + $0x538] sm:$0xff]  ;;  %v2299_v48 = vcombine.low %v208_v39, %v212_v40  ;;  %v272_v40 = vld [vmem:[%s3288_s1 + $0x6d0] sm:$0xff] }
  0xb3   :  { %1806 = vmatprep.subr.bf16.mxu0 %v2244_v49  ;;  %1892 = vmatprep.subr.bf16.mxu1 %v2246_v50  ;;  %v2308_v50 = vcombine.high %v216_v45, %v220_v46 }
  0xb6   :  { %1807 = vmatpush1.bf16.msra.mxu0 %v2243_v55  ;;  %1893 = vmatpush1.bf16.msra.mxu1 %v2245_v57  ;;  %v229_v55 = vld [vmem:[%s3288_s1 + $0x578] sm:$0xff]  ;;  %v2307_v57 = vcombine.low %v216_v45, %v220_v46  ;;  %v280_v46 = vld [vmem:[%s3288_s1 + $0x710] sm:$0xff] }
  0xb7   :  { %1808 = vmatprep.subr.bf16.mxu0 %v2252_v58  ;;  %1894 = vmatprep.subr.bf16.mxu1 %v2254_v59  ;;  %v2316_v59 = vcombine.high %v224_v52, %v228_v53  ;;  %v2318_v60 = vcombine.high %v225_v54, %v229_v55 }
  0xba   :  { %1809 = vmatpush1.bf16.msra.mxu0 %v2251_v0  ;;  %1895 = vmatpush1.bf16.msra.mxu1 %v2253_v1  ;;  %v237_v0 = vld [vmem:[%s3288_s1 + $0x5b8] sm:$0xff]  ;;  %v2315_v1 = vcombine.low %v224_v52, %v228_v53  ;;  %v288_v53 = vld [vmem:[%s3288_s1 + $0x750] sm:$0xff] }
  0xbb   :  { %1810 = vmatprep.subr.bf16.mxu0 %v2260_v2  ;;  %1896 = vmatprep.subr.bf16.mxu1 %v2262_v3  ;;  %v2317_v2 = vcombine.low %v225_v54, %v229_v55  ;;  %v2324_v3 = vcombine.high %v232_v61, %v236_v62  ;;  %v2326_v4 = vcombine.high %v233_v63, %v237_v0  ;;  %v292_v54 = vld [vmem:[%s3288_s1 + $0x770] sm:$0xff]  ;;  %v289_v55 = vld [vmem:[%s3288_s1 + $0x758] sm:$0xff] }
  0xbe   :  { %1811 = vmatpush1.bf16.msra.mxu0 %v2259_v8  ;;  %1897 = vmatpush1.bf16.msra.mxu1 %v2261_v9  ;;  %v245_v8 = vld [vmem:[%s3288_s1 + $0x5f8] sm:$0xff]  ;;  %v2323_v9 = vcombine.low %v232_v61, %v236_v62  ;;  %v296_v62 = vld [vmem:[%s3288_s1 + $0x790] sm:$0xff] }
  0xbf   :  { %1812 = vmatprep.subr.bf16.mxu0 %v2268_v11  ;;  %1898 = vmatprep.subr.bf16.mxu1 %v2270_v12  ;;  %v2325_v11 = vcombine.low %v233_v63, %v237_v0  ;;  %v2332_v12 = vcombine.high %v240_v5, %v244_v6  ;;  %v2334_v13 = vcombine.high %v241_v7, %v245_v8  ;;  %v300_v63 = vld [vmem:[%s3288_s1 + $0x7b0] sm:$0xff]  ;;  %v297_v0 = vld [vmem:[%s3288_s1 + $0x798] sm:$0xff] }
  0xc2   :  { %1813 = vmatpush1.bf16.msra.mxu0 %v2267_v18  ;;  %1899 = vmatpush1.bf16.msra.mxu1 %v2269_v20  ;;  %v253_v18 = vld [vmem:[%s3288_s1 + $0x638] sm:$0xff]  ;;  %v2331_v20 = vcombine.low %v240_v5, %v244_v6  ;;  %v304_v6 = vld [vmem:[%s3288_s1 + $0x7d0] sm:$0xff] }
  0xc3   :  { %1825 = vmatprep.subr.bf16.mxu0 %v2276_v21  ;;  %1911 = vmatprep.subr.bf16.mxu1 %v2278_v22  ;;  %v2333_v21 = vcombine.low %v241_v7, %v245_v8  ;;  %v2340_v22 = vcombine.high %v248_v14, %v252_v15  ;;  %v2342_v23 = vcombine.high %v249_v16, %v253_v18  ;;  %v308_v7 = vld [vmem:[%s3288_s1 + $0x7f0] sm:$0xff]  ;;  %v305_v8 = vld [vmem:[%s3288_s1 + $0x7d8] sm:$0xff] }
  0xc5   :  { %1815 = vmatmul.mubr.bf16.vlgmr.msra.gmra.mrb[4].mxu0 %v2677_v10  ;;  %1901 = vmatmul.mubr.bf16.vlgmr.msra.gmra.mrb[4].mxu1 %v2677_v10  ;;  %v209_v10 = vld [vmem:[%s3288_s1 + $0x4d8] sm:$0xff] }
  0xc6   :  { %1826 = vmatpush1.bf16.msra.mxu0 %v2275_v27  ;;  %1912 = vmatpush1.bf16.msra.mxu1 %v2277_v28  ;;  %v2302_v44 = vcombine.high %v209_v10, %v213_v41  ;;  %v2301_v49 = vcombine.low %v209_v10, %v213_v41  ;;  %v261_v27 = vld [vmem:[%s3288_s1 + $0x678] sm:$0xff]  ;;  %v2339_v28 = vcombine.low %v248_v14, %v252_v15  ;;  %v276_v10 = vld [vmem:[%s3288_s1 + $0x6f0] sm:$0xff] }
  0xc7   :  { %1827 = vmatprep.subr.bf16.mxu0 %v2284_v29  ;;  %1913 = vmatprep.subr.bf16.mxu1 %v2286_v30  ;;  %v2341_v29 = vcombine.low %v249_v16, %v253_v18  ;;  %v2348_v30 = vcombine.high %v256_v24, %v260_v25  ;;  %v2350_v31 = vcombine.high %v257_v26, %v261_v27  ;;  %v273_v41 = vld [vmem:[%s3288_s1 + $0x6d8] sm:$0xff]  ;;  %v2007_v18 = vlaneseq }
  0xc8   :  { %1857 = vmatprep.mubr.bf16.mxu0 %v2694_v19  ;;  %1943 = vmatprep.mubr.bf16.mxu1 %v2694_v19  ;;  %v217_v19 = vld [vmem:[%s3288_s1 + $0x518] sm:$0xff]  ;;  %v2395_v15 = vcombine.low %v304_v6, %v308_v7 }
  0xc9   :  { %v2310_v51 = vcombine.high %v217_v19, %v221_v47  ;;  %v2309_v58 = vcombine.low %v217_v19, %v221_v47  ;;  %v284_v19 = vld [vmem:[%s3288_s1 + $0x730] sm:$0xff]  ;;  %v281_v47 = vld [vmem:[%s3288_s1 + $0x718] sm:$0xff] }
  0xca   :  { %1828 = vmatpush1.bf16.msra.mxu0 %v2283_v35  ;;  %1914 = vmatpush1.bf16.msra.mxu1 %v2285_v36  ;;  %v269_v35 = vld [vmem:[%s3288_s1 + $0x6b8] sm:$0xff]  ;;  %v2347_v36 = vcombine.low %v256_v24, %v260_v25 }
  0xcb   :  { %1829 = vmatprep.subr.bf16.mxu0 %v2292_v37  ;;  %1915 = vmatprep.subr.bf16.mxu1 %v2294_v38  ;;  %v2349_v37 = vcombine.low %v257_v26, %v261_v27  ;;  %v2356_v38 = vcombine.high %v264_v32, %v268_v33  ;;  %v2358_v39 = vcombine.high %v265_v34, %v269_v35 }
  0xce   :  { %1830 = vmatpush1.bf16.msra.mxu0 %v2291_v42  ;;  %1916 = vmatpush1.bf16.msra.mxu1 %v2293_v56  ;;  %v277_v42 = vld [vmem:[%s3288_s1 + $0x6f8] sm:$0xff]  ;;  %v2355_v56 = vcombine.low %v264_v32, %v268_v33 }
  0xcf   :  { %1831 = vmatprep.subr.bf16.mxu0 %v2300_v43  ;;  %1917 = vmatprep.subr.bf16.mxu1 %v2302_v44  ;;  %v2357_v43 = vcombine.low %v265_v34, %v269_v35  ;;  %v2364_v44 = vcombine.high %v272_v40, %v276_v10  ;;  %v2366_v45 = vcombine.high %v273_v41, %v277_v42 }
  0xd2   :  { %1832 = vmatpush1.bf16.msra.mxu0 %v2299_v48  ;;  %1918 = vmatpush1.bf16.msra.mxu1 %v2301_v49  ;;  %v285_v48 = vld [vmem:[%s3288_s1 + $0x738] sm:$0xff]  ;;  %v2363_v49 = vcombine.low %v272_v40, %v276_v10 }
  0xd3   :  { %1833 = vmatprep.subr.bf16.mxu0 %v2308_v50  ;;  %1919 = vmatprep.subr.bf16.mxu1 %v2310_v51  ;;  %v2365_v50 = vcombine.low %v273_v41, %v277_v42  ;;  %v2372_v51 = vcombine.high %v280_v46, %v284_v19  ;;  %v2374_v52 = vcombine.high %v281_v47, %v285_v48 }
  0xd6   :  { %1834 = vmatpush1.bf16.msra.mxu0 %v2307_v57  ;;  %1920 = vmatpush1.bf16.msra.mxu1 %v2309_v58  ;;  %v293_v57 = vld [vmem:[%s3288_s1 + $0x778] sm:$0xff]  ;;  %v2371_v58 = vcombine.low %v280_v46, %v284_v19 }
  0xd7   :  { %1835 = vmatprep.subr.bf16.mxu0 %v2316_v59  ;;  %1921 = vmatprep.subr.bf16.mxu1 %v2318_v60  ;;  %v2373_v59 = vcombine.low %v281_v47, %v285_v48  ;;  %v2380_v60 = vcombine.high %v288_v53, %v292_v54  ;;  %v2382_v61 = vcombine.high %v289_v55, %v293_v57 }
  0xda   :  { %1836 = vmatpush1.bf16.msra.mxu0 %v2315_v1  ;;  %1922 = vmatpush1.bf16.msra.mxu1 %v2317_v2  ;;  %v301_v1 = vld [vmem:[%s3288_s1 + $0x7b8] sm:$0xff]  ;;  %v2379_v2 = vcombine.low %v288_v53, %v292_v54 }
  0xdb   :  { %1837 = vmatprep.subr.bf16.mxu0 %v2324_v3  ;;  %1923 = vmatprep.subr.bf16.mxu1 %v2326_v4  ;;  %v2381_v3 = vcombine.low %v289_v55, %v293_v57  ;;  %v2388_v4 = vcombine.high %v296_v62, %v300_v63  ;;  %v2390_v5 = vcombine.high %v297_v0, %v301_v1 }
  0xde   :  { %1838 = vmatpush1.bf16.msra.mxu0 %v2323_v9  ;;  %1924 = vmatpush1.bf16.msra.mxu1 %v2325_v11  ;;  %v309_v9 = vld [vmem:[%s3288_s1 + $0x7f8] sm:$0xff]  ;;  %v2387_v11 = vcombine.low %v296_v62, %v300_v63 }
  0xdf   :  { %1839 = vmatprep.subr.bf16.mxu0 %v2332_v12  ;;  %1925 = vmatprep.subr.bf16.mxu1 %v2334_v13  ;;  %v2389_v12 = vcombine.low %v297_v0, %v301_v1  ;;  %v2396_v13 = vcombine.high %v304_v6, %v308_v7  ;;  %v2398_v14 = vcombine.high %v305_v8, %v309_v9 }
  0xe0   :  { %v2397_v16 = vcombine.low %v305_v8, %v309_v9 }
  0xe2   :  { %1840 = vmatpush1.bf16.msra.mxu0 %v2331_v20  ;;  %1926 = vmatpush1.bf16.msra.mxu1 %v2333_v21  ;;  %v2008_v20 = vshrl.u32 %v2007_v18, 7 }
  0xe3   :  { %1841 = vmatprep.subr.bf16.mxu0 %v2340_v22  ;;  %1927 = vmatprep.subr.bf16.mxu1 %v2342_v23  ;;  %v2005_v22 = vld [vmem:[%s3290_s2] sm:$0xff] }
  0xe4   :  { %v2009_v21 = vsub.s32 0, %v2008_v20  ;;  %v2017_v23 = vsub.s32 2, %v2008_v20  ;;  %v2013_v24 = vsub.s32 1, %v2008_v20  ;;  %v2021_v25 = vsub.s32 3, %v2008_v20 }
  0xe5   :  { %v2025_v54 = vsub.s32 4, %v2008_v20  ;;  %v2033_v55 = vsub.s32 6, %v2008_v20  ;;  %v2029_v57 = vsub.s32 5, %v2008_v20 }
  0xe6   :  { %1842 = vmatpush1.bf16.msra.mxu0 %v2339_v28  ;;  %1928 = vmatpush1.bf16.msra.mxu1 %v2341_v29  ;;  %v2010_v26 = vrot.slane %v2005_v22, %v2009_v21  ;;  %v2018_v27 = vrot.slane %v2005_v22, %v2017_v23  ;;  %v2014_v28 = vrot.slane %v2005_v22, %v2013_v24 }
  0xe7   :  { %1843 = vmatprep.subr.bf16.mxu0 %v2348_v30  ;;  %1929 = vmatprep.subr.bf16.mxu1 %v2350_v31  ;;  %v2022_v29 = vrot.slane %v2005_v22, %v2021_v25 }
  0xea   :  { %1844 = vmatpush1.bf16.msra.mxu0 %v2347_v36  ;;  %1930 = vmatpush1.bf16.msra.mxu1 %v2349_v37 }
  0xeb   :  { %1845 = vmatprep.subr.bf16.mxu0 %v2356_v38  ;;  %1931 = vmatprep.subr.bf16.mxu1 %v2358_v39 }
  0xee   :  { %1846 = vmatpush1.bf16.msra.mxu0 %v2355_v56  ;;  %1932 = vmatpush1.bf16.msra.mxu1 %v2357_v43 }
  0xef   :  { %1847 = vmatprep.subr.bf16.mxu0 %v2364_v44  ;;  %1933 = vmatprep.subr.bf16.mxu1 %v2366_v45 }
  0xf2   :  { %1848 = vmatpush1.bf16.msra.mxu0 %v2363_v49  ;;  %1934 = vmatpush1.bf16.msra.mxu1 %v2365_v50 }
  0xf3   :  { %1849 = vmatprep.subr.bf16.mxu0 %v2372_v51  ;;  %1935 = vmatprep.subr.bf16.mxu1 %v2374_v52 }
  0xf6   :  { %1850 = vmatpush1.bf16.msra.mxu0 %v2371_v58  ;;  %1936 = vmatpush1.bf16.msra.mxu1 %v2373_v59  ;;  %v2037_v58 = vsub.s32 7, %v2008_v20  ;;  %v2026_v59 = vrot.slane %v2005_v22, %v2025_v54 }
  0xf7   :  { %1851 = vmatprep.subr.bf16.mxu0 %v2380_v60  ;;  %1937 = vmatprep.subr.bf16.mxu1 %v2382_v61  ;;  %v2034_v60 = vrot.slane %v2005_v22, %v2033_v55  ;;  %v2030_v61 = vrot.slane %v2005_v22, %v2029_v57 }
  0xf8   :  { %v2038_v62 = vrot.slane %v2005_v22, %v2037_v58 }
  0xfa   :  { %1852 = vmatpush1.bf16.msra.mxu0 %v2379_v2  ;;  %1938 = vmatpush1.bf16.msra.mxu1 %v2381_v3 }
  0xfb   :  { %1853 = vmatprep.subr.bf16.mxu0 %v2388_v4  ;;  %1939 = vmatprep.subr.bf16.mxu1 %v2390_v5 }
  0xfe   :  { %1854 = vmatpush1.bf16.msra.mxu0 %v2387_v11  ;;  %1940 = vmatpush1.bf16.msra.mxu1 %v2389_v12 }
  0xff   :  { %1855 = vmatprep.subr.bf16.mxu0 %v2396_v13  ;;  %1941 = vmatprep.subr.bf16.mxu1 %v2398_v14 }
 0x102   :  { %1856 = vmatpush1.bf16.msra.mxu0 %v2395_v15  ;;  %1942 = vmatpush1.bf16.msra.mxu1 %v2397_v16 }
 0x105   :  { %1858 = vmatmul.mubr.bf16.vlgmr.msra.gmra.mrb[4].mxu0 %v2883_v17  ;;  %1944 = vmatmul.mubr.bf16.vlgmr.msra.gmra.mrb[4].mxu1 %v2883_v17 }
 0x158   :  { %v1687_v30 = vpop.f32.mrb[0].mxu0  ;;  %v1773_v32 = vpop.f32.mrb[0].mxu1 }
 0x159   :  { %v2047_v31 = vadd.f32 %v2010_v26, %v1687_v30  ;;  %v1689_v33 = vpop.f32.mrb[1].mxu0  ;;  %v2049_v34 = vadd.f32 %v2018_v27, %v1773_v32  ;;  %v1775_v35 = vpop.f32.mrb[1].mxu1 }
 0x15a   :  { %v2048_v17 = vadd.f32 %v2014_v28, %v1689_v33  ;;  %v1691_v36 = vpop.f32.mrb[2].mxu0  ;;  %v2050_v38 = vadd.f32 %v2022_v29, %v1775_v35  ;;  %v1777_v40 = vpop.f32.mrb[2].mxu1 }
 0x15b   :  { %v2063_v37 = vmax.f32 %v2047_v31, 0.0  ;;  %v2055_v39 = vadd.f32 %v2010_v26, %v1691_v36  ;;  %v1693_v10 = vpop.f32.mrb[3].mxu0  ;;  %v2065_v41 = vmax.f32 %v2049_v34, 0.0  ;;  %v2057_v56 = vadd.f32 %v2018_v27, %v1777_v40  ;;  %v1779_v44 = vpop.f32.mrb[3].mxu1 }
 0x15c   :  { %v2064_v42 = vmax.f32 %v2048_v17, 0.0  ;;  %v2056_v43 = vadd.f32 %v2014_v28, %v1693_v10  ;;  %v2066_v45 = vmax.f32 %v2050_v38, 0.0  ;;  %v2058_v19 = vadd.f32 %v2022_v29, %v1779_v44 }
 0x15d   :  { %v2071_v46 = vmax.f32 %v2055_v39, 0.0  ;;  %v2073_v48 = vmax.f32 %v2057_v56, 0.0 }
 0x15e   :  { %v2407_v47 = vpack.c.bf16 %v2064_v42, %v2063_v37  ;;  %v2072_v49 = vmax.f32 %v2056_v43, 0.0  ;;  %v2408_v50 = vpack.c.bf16 %v2066_v45, %v2065_v41  ;;  %v2074_v51 = vmax.f32 %v2058_v19, 0.0 }
 0x160   :  { %2127 = vst [vmem:[%s3291_s3] sm:$0xff] %v2407_v47  ;;  %v2411_v52 = vpack.c.bf16 %v2072_v49, %v2071_v46  ;;  %2128 = vst [vmem:[%s3291_s3 + $0x8] sm:$0xff] %v2408_v50  ;;  %v2412_v53 = vpack.c.bf16 %v2074_v51, %v2073_v48 }
 0x162   :  { %2131 = vst [vmem:[%s3291_s3 + $0x20] sm:$0xff] %v2411_v52  ;;  %2132 = vst [vmem:[%s3291_s3 + $0x28] sm:$0xff] %v2412_v53 }
 0x1d8   :  { %v1859_v63 = vpop.f32.mrb[4].mxu0  ;;  %v1945_v1 = vpop.f32.mrb[4].mxu1 }
 0x1d9   :  { %v2051_v0 = vadd.f32 %v2026_v59, %v1859_v63  ;;  %v1861_v2 = vpop.f32.mrb[5].mxu0  ;;  %v2053_v3 = vadd.f32 %v2034_v60, %v1945_v1  ;;  %v1947_v5 = vpop.f32.mrb[5].mxu1 }
 0x1da   :  { %v2052_v4 = vadd.f32 %v2030_v61, %v1861_v2  ;;  %v1863_v6 = vpop.f32.mrb[6].mxu0  ;;  %v2054_v8 = vadd.f32 %v2038_v62, %v1947_v5  ;;  %v1949_v11 = vpop.f32.mrb[6].mxu1 }
 0x1db   :  { %v2067_v7 = vmax.f32 %v2051_v0, 0.0  ;;  %v2059_v9 = vadd.f32 %v2026_v59, %v1863_v6  ;;  %v1865_v12 = vpop.f32.mrb[7].mxu0  ;;  %v2069_v13 = vmax.f32 %v2053_v3, 0.0  ;;  %v2061_v15 = vadd.f32 %v2034_v60, %v1949_v11  ;;  %v1951_v18 = vpop.f32.mrb[7].mxu1 }
 0x1dc   :  { %v2068_v14 = vmax.f32 %v2052_v4, 0.0  ;;  %v2060_v16 = vadd.f32 %v2030_v61, %v1865_v12  ;;  %v2070_v20 = vmax.f32 %v2054_v8, 0.0  ;;  %v2062_v22 = vadd.f32 %v2038_v62, %v1951_v18 }
 0x1dd   :  { %v2075_v21 = vmax.f32 %v2059_v9, 0.0  ;;  %v2077_v24 = vmax.f32 %v2061_v15, 0.0 }
 0x1de   :  { %v2409_v23 = vpack.c.bf16 %v2068_v14, %v2067_v7  ;;  %v2076_v25 = vmax.f32 %v2060_v16, 0.0  ;;  %v2410_v26 = vpack.c.bf16 %v2070_v20, %v2069_v13  ;;  %v2078_v27 = vmax.f32 %v2062_v22, 0.0 }
 0x1e0   :  { %2129 = vst [vmem:[%s3291_s3 + $0x10] sm:$0xff] %v2409_v23  ;;  %v2413_v28 = vpack.c.bf16 %v2076_v25, %v2075_v21  ;;  %2130 = vst [vmem:[%s3291_s3 + $0x18] sm:$0xff] %v2410_v26  ;;  %v2414_v29 = vpack.c.bf16 %v2078_v27, %v2077_v24 }
 0x1e2   :  { %2133 = vst [vmem:[%s3291_s3 + $0x30] sm:$0xff] %v2413_v28  ;;  %2134 = vst [vmem:[%s3291_s3 + $0x38] sm:$0xff] %v2414_v29 }

// kernel: _lambda_.34
= control target key start
LH: loop header
LB: loop body
LE: loop exit
PB: predicated region body
PF: predicated region fallthrough
CT: control target
= control target key end

     0   :  { %s1825_s0 = inlined_call_operand.vmem [shape: bf16[2,16,1024], index: 0, kind: input, shape index: {}]   ;;  %s1826_s1 = inlined_call_operand.vmem [shape: bf16[2,16,1024], index: 1, kind: input, shape index: {}]   ;;  %s1827_s2 = inlined_call_operand.vmem [shape: f32[2,1,1024], index: 2, kind: input, shape index: {}]   ;;  %s1828_s3 = inlined_call_operand.vmem [shape: bf16[1024,256], index: 3, kind: input, shape index: {}]   ;;  %s1829_s4 = inlined_call_operand.vmem [shape: f32[1,256], index: 4, kind: input, shape index: {}]   ;;  %s1830_s5 = inlined_call_operand.vmem [shape: bf16[2,16,256], index: 5, kind: output, shape index: {}]  }
   0x1   :  { %1831 = sst [smem:[#allocation5_spill]] %s1825_s0 }
   0x2   :  { %s1589_s18 = smov 0   ;;  %s1591_s19 = smov 0  }
   0x3   :  { %s1593_s20 = smov 0   ;;  %s1595_s21 = smov 0  }
   0x4   :  { %s1597_s22 = smov 0   ;;  %s1599_s23 = smov 0  }
   0x5   :  { %s1601_s24 = smov 0  }
   0x6 LB: > { %s30_s25 = sadd.s32 1, %s1548_s22  ;;  %s41_s26 = sadd.s32 1, %s1552_s23  ;;  %s1556_s24 = sphi %s1601_s24, %s15_s24   ;;  %s1552_s23 = sphi %s1599_s23, %s1839_s23   ;;  %s1548_s22 = sphi %s1597_s22, %s1838_s22   ;;  %s1544_s21 = sphi %s1595_s21, %s1837_s21   ;;  %s1540_s20 = sphi %s1593_s20, %s1836_s20   ;;  %s1536_s19 = sphi %s1591_s19, %s1835_s19   ;;  %s1532_s18 = sphi %s1589_s18, %s1834_s18  }
   0x7   : > { %p31_p0 = scmp.ge.s32.totalorder %s30_s25, 2  ;;  %p59_p1 = scmp.ne.s32.totalorder %s1536_s19, %s1532_s18 }
   0x8   : > { %p60_p2 = scmp.eq.s32.totalorder %s1556_s24, 0  ;;  %s52_s6 = sadd.s32 1, %s1536_s19 }
   0x9   : > { %s1841_s25 = smov (%p31_p0, %s30_s25), 0  ;;  %s1843_s26 = smov (!%p31_p0, %s41_s26), %s1552_s23 }
   0xa   : > { %p1632_p3 = por %p60_p2, %p59_p1  ;;  %p43_p4 = scmp.ge.s32.totalorder %s1843_s26, 2 }
   0xb   : > { %s48_s28 = ssub.s32 %s1548_s22, %s1841_s25  ;;  %p1252_p6 = scmp.ge.s32.totalorder %s1556_s24, 4 }
   0xc   : > { %s1845_s26 = smov (%p43_p4, %s1843_s26), 0 }
   0xd   : > { %s45_s29 = ssub.s32 %s1552_s23, %s1845_s26  ;;  %235 = sbr.rel (%p1252_p6) target bundleno = 41 (0x29), region = 20 }
   0xe   : > { %s49_s30 = sor.u32 %s48_s28, %s45_s29 }
   0xf   : > { %p50_p5 = scmp.eq.s32.totalorder %s49_s30, 0 }
  0x11   : > { %s1644_s7 = scalar_select %p50_p5, %s1536_s19, %s52_s6  }
  0x14   : > { %238 = sbr.rel (!%p1632_p3) target bundleno = 32 (0x20), region = 24  ;;  %s240_s8 = sand.u32 (%p1632_p3), 1, %s1536_s19  }
  0x15   : > { %s1254_s9 = sshll.u32 (%p1632_p3), %s1548_s22, 2  ;;  %s1253_s10 = sshll.u32 (%p1632_p3), %s240_s8, 5 }
  0x16   : > { %s1255_s11 = sshll.u32 (%p1632_p3), %s1552_s23, 4  ;;  %s1833_s0 = sld [smem:[#allocation5_spill]] (%p1632_p3) }
  0x17   : > { %s248_s12 = sadd.s32 (%p1632_p3), %s1255_s11, %s1254_s9  ;;  %s242_s17 = scalar_lea.vmem (%p1632_p3), [#allocation3], %s1253_s10 }
  0x18   : > { %s1256_s13 = sshll.u32 (%p1632_p3), %s248_s12, 2 }
  0x1c   : > { %s250_s16 = scalar_lea.vmem %s1833_s0, %s1256_s13 }
  0x1d   : > { %v263_v0 = vld [vmem:[%s250_s16] sm:$0xff]  ;;  %v265_v1 = vld [vmem:[%s250_s16 + $0x8] sm:$0xff] }
  0x1e   : > { %v267_v2 = vld [vmem:[%s250_s16 + $0x20] sm:$0xff]  ;;  %264 = vst [vmem:[%s242_s17] sm:$0xff] %v263_v0  ;;  %266 = vst [vmem:[%s242_s17 + $0x8] sm:$0xff] %v265_v1  ;;  %v269_v3 = vld [vmem:[%s250_s16 + $0x28] sm:$0xff] }
  0x1f   : > { %268 = vst [vmem:[%s242_s17 + $0x10] sm:$0xff] %v267_v2  ;;  %270 = vst [vmem:[%s242_s17 + $0x18] sm:$0xff] %v269_v3 }
  0x20 PF: > { %276 = sbr.rel (!%p1632_p3) target bundleno = 41 (0x29), region = 47  ;;  %s278_s28 = sand.u32 (%p1632_p3), 1, %s1536_s19  }
  0x21   : > { %s1258_s29 = sshll.u32 (%p1632_p3), %s1548_s22, 2  ;;  %s1257_s30 = sshll.u32 (%p1632_p3), %s278_s28, 5 }
  0x22   : > { %s1259_s6 = sshll.u32 (%p1632_p3), %s1552_s23, 4  ;;  %s280_s13 = scalar_lea.vmem (%p1632_p3), [#allocation4], %s1257_s30 }
  0x23   : > { %s286_s8 = sadd.s32 (%p1632_p3), %s1259_s6, %s1258_s29 }
  0x24   : > { %s1260_s9 = sshll.u32 (%p1632_p3), %s286_s8, 2 }
  0x25   : > { %s288_s12 = scalar_lea.vmem (%p1632_p3), %s1826_s1, %s1260_s9 }
  0x26   : > { %v301_v4 = vld [vmem:[%s288_s12] sm:$0xff] (%p1632_p3)  ;;  %v303_v5 = vld [vmem:[%s288_s12 + $0x8] sm:$0xff] (%p1632_p3) }
  0x27   : > { %v305_v6 = vld [vmem:[%s288_s12 + $0x20] sm:$0xff]  ;;  %302 = vst [vmem:[%s280_s13] sm:$0xff] %v301_v4  ;;  %304 = vst [vmem:[%s280_s13 + $0x8] sm:$0xff] %v303_v5  ;;  %v307_v7 = vld [vmem:[%s288_s12 + $0x28] sm:$0xff] }
  0x28   : > { %306 = vst [vmem:[%s280_s13 + $0x10] sm:$0xff] %v305_v6  ;;  %308 = vst [vmem:[%s280_s13 + $0x18] sm:$0xff] %v307_v7 }
  0x29 PF: > { %p1261_p7 = scmp.ge.s32.totalorder %s1556_s24, 1  ;;  %p340_p8 = scmp.lt.s32.totalorder %s1556_s24, 5 }
  0x2b   : > { %p341_p9 = pnand %p1261_p7, %p340_p8 }
  0x2c   : > { %s347_s27 = sand.u32 (!%p341_p9), 1, %s1532_s18   ;;  %s1264_s14 = sshll.u32 (!%p341_p9), %s1540_s20, 2 }
  0x2d   : > { %344 = sbr.rel (%p341_p9) target bundleno = 364 (0x16c), region = 78  ;;  %s1262_s15 = sshll.u32 (!%p341_p9), %s347_s27, 5 }
  0x2e   : > { %p421_p10 = scmp.lt.s32.totalorder (!%p341_p9), %s1544_s21, 1  ;;  %p423_p11 = scmp.lt.s32.totalorder (!%p341_p9), %s1264_s14, 7 }
  0x2f   : > { %s1266_s16 = sshll.u32 (!%p341_p9), %s1540_s20, 6  ;;  %s1686_s0 = scalar_lea.vmem (!%p341_p9), [#allocation3], %s1262_s15 }
  0x30   : > { %p431_p12 = scmp.lt.s32.totalorder (!%p341_p9), %s1266_s16, 127  ;;  %p1271_p13 = scmp.ne.s32.totalorder (!%p341_p9), %s1540_s20, 0 }
  0x34   : > { %s1847_s21 = smov (!%p421_p10, %s1544_s21), 1  ;;  %s1849_s14 = smov (!%p423_p11, %s1264_s14), 7 }
  0x35   : > { %s1265_s17 = sshll.u32 %s1847_s21, 3  ;;  %s1851_s16 = smov (!%p431_p12, %s1266_s16), 127  ;;  %v1558_v8 = vmov (!%p1271_p13), 0.0  }
  0x36   : > { %s1670_s28 = sadd.s32 %s1265_s17, %s1849_s14  ;;  %s1342_s29 = sshll.u32 %s1847_s21, 4  ;;  %466 = vst [vmem:[#allocation2] sm:$0xff] (!%p1271_p13), %v1558_v8  ;;  %467 = vst [vmem:[#allocation2 + $0x8] sm:$0xff] (!%p1271_p13), %v1558_v8 }
  0x37   : > { %s427_s8 = scalar_lea.vmem %s1827_s2, %s1670_s28  ;;  %s1341_s9 = sshll.u32 %s1851_s16, 3  ;;  %468 = vst [vmem:[#allocation2 + $0x10] sm:$0xff] (!%p1271_p13), %v1558_v8  ;;  %469 = vst [vmem:[#allocation2 + $0x18] sm:$0xff] (!%p1271_p13), %v1558_v8 }
  0x38   : > { %s1679_s10 = scalar_lea.vmem %s1828_s3, %s1341_s9  ;;  %s1684_s27 = scalar_lea.vmem %s1830_s5, %s1342_s29 }
  0x39   : > { %s1688_s14 = scalar_lea.vmem [#allocation4], %s1262_s15  ;;  %465 = sbr.rel (%p1271_p13) target bundleno = 64 (0x40), region = 90 }
  0x40 PF: > { %v1406_v9 = vld [vmem:[%s1679_s10 + $0x4] ss:$8 sps:$4 sm:$0xff]   ;;  %v1410_v11 = vld [vmem:[%s1679_s10] ss:$8 sps:$4 sm:$0xff]   ;;  %v1412_v13 = vld [vmem:[%s1679_s10 + $0x14] ss:$8 sps:$4 sm:$0xff]   ;;  %v484_v46 = vlaneseq }
  0x41   : > { %v1408_v10 = vld [vmem:[%s1679_s10 + $0x104] ss:$8 sps:$4 sm:$0xff]   ;;  %924 = vmatprep.subr.bf16.mxu1 %v1406_v9  ;;  %v1411_v12 = vld [vmem:[%s1679_s10 + $0x100] ss:$8 sps:$4 sm:$0xff]   ;;  %v1414_v14 = vld [vmem:[%s1679_s10 + $0x114] ss:$8 sps:$4 sm:$0xff]  }
  0x42   : > { %967 = vmatprep.subr.bf16.mxu0 %v1408_v10  ;;  %925 = vmatpush1.bf16.msra.mxu1 %v1410_v11  ;;  %v1416_v15 = vld [vmem:[%s1679_s10 + $0x10] ss:$8 sps:$4 sm:$0xff]   ;;  %v1418_v17 = vld [vmem:[%s1679_s10 + $0x24] ss:$8 sps:$4 sm:$0xff]   ;;  %v1422_v19 = vld [vmem:[%s1679_s10 + $0x20] ss:$8 sps:$4 sm:$0xff]  }
  0x43   : > { %968 = vmatpush1.bf16.msra.mxu0 %v1411_v12  ;;  %926 = vmatprep.subr.bf16.mxu1 %v1412_v13  ;;  %v1417_v16 = vld [vmem:[%s1679_s10 + $0x110] ss:$8 sps:$4 sm:$0xff]   ;;  %v1420_v18 = vld [vmem:[%s1679_s10 + $0x124] ss:$8 sps:$4 sm:$0xff]   ;;  %v1423_v20 = vld [vmem:[%s1679_s10 + $0x120] ss:$8 sps:$4 sm:$0xff]  }
  0x44   : > { %969 = vmatprep.subr.bf16.mxu0 %v1414_v14  ;;  %v1424_v21 = vld [vmem:[%s1679_s10 + $0x34] ss:$8 sps:$4 sm:$0xff]   ;;  %v1428_v23 = vld [vmem:[%s1679_s10 + $0x30] ss:$8 sps:$4 sm:$0xff]   ;;  %v1430_v25 = vld [vmem:[%s1679_s10 + $0x44] ss:$8 sps:$4 sm:$0xff]  }
  0x45   : > { %v1426_v22 = vld [vmem:[%s1679_s10 + $0x134] ss:$8 sps:$4 sm:$0xff]   ;;  %v1429_v24 = vld [vmem:[%s1679_s10 + $0x130] ss:$8 sps:$4 sm:$0xff]   ;;  %v1432_v26 = vld [vmem:[%s1679_s10 + $0x144] ss:$8 sps:$4 sm:$0xff]  }
  0x46   : > { %927 = vmatpush1.bf16.msra.mxu1 %v1416_v15  ;;  %v1434_v27 = vld [vmem:[%s1679_s10 + $0x40] ss:$8 sps:$4 sm:$0xff]   ;;  %v1436_v29 = vld [vmem:[%s1679_s10 + $0x54] ss:$8 sps:$4 sm:$0xff]   ;;  %v1440_v31 = vld [vmem:[%s1679_s10 + $0x50] ss:$8 sps:$4 sm:$0xff]  }
  0x47   : > { %970 = vmatpush1.bf16.msra.mxu0 %v1417_v16  ;;  %928 = vmatprep.subr.bf16.mxu1 %v1418_v17  ;;  %v1435_v28 = vld [vmem:[%s1679_s10 + $0x140] ss:$8 sps:$4 sm:$0xff]   ;;  %v1438_v30 = vld [vmem:[%s1679_s10 + $0x154] ss:$8 sps:$4 sm:$0xff]   ;;  %v1441_v32 = vld [vmem:[%s1679_s10 + $0x150] ss:$8 sps:$4 sm:$0xff]  }
  0x48   : > { %971 = vmatprep.subr.bf16.mxu0 %v1420_v18  ;;  %v1442_v33 = vld [vmem:[%s1679_s10 + $0x64] ss:$8 sps:$4 sm:$0xff]   ;;  %v1446_v35 = vld [vmem:[%s1679_s10 + $0x60] ss:$8 sps:$4 sm:$0xff]   ;;  %v1448_v37 = vld [vmem:[%s1679_s10 + $0x74] ss:$8 sps:$4 sm:$0xff]  }
  0x49   : > { %v1444_v34 = vld [vmem:[%s1679_s10 + $0x164] ss:$8 sps:$4 sm:$0xff]   ;;  %v1447_v36 = vld [vmem:[%s1679_s10 + $0x160] ss:$8 sps:$4 sm:$0xff]   ;;  %v1450_v38 = vld [vmem:[%s1679_s10 + $0x174] ss:$8 sps:$4 sm:$0xff]  }
  0x4a   : > { %929 = vmatpush1.bf16.msra.mxu1 %v1422_v19  ;;  %v1452_v39 = vld [vmem:[%s1679_s10 + $0x70] ss:$8 sps:$4 sm:$0xff]   ;;  %v1454_v41 = vld [vmem:[%s1679_s10 + $0x84] ss:$8 sps:$4 sm:$0xff]   ;;  %v1458_v43 = vld [vmem:[%s1679_s10 + $0x80] ss:$8 sps:$4 sm:$0xff]  }
  0x4b   : > { %972 = vmatpush1.bf16.msra.mxu0 %v1423_v20  ;;  %930 = vmatprep.subr.bf16.mxu1 %v1424_v21  ;;  %v1453_v40 = vld [vmem:[%s1679_s10 + $0x170] ss:$8 sps:$4 sm:$0xff]   ;;  %v1456_v42 = vld [vmem:[%s1679_s10 + $0x184] ss:$8 sps:$4 sm:$0xff]   ;;  %v1459_v44 = vld [vmem:[%s1679_s10 + $0x180] ss:$8 sps:$4 sm:$0xff]  }
  0x4c   : > { %973 = vmatprep.subr.bf16.mxu0 %v1426_v22  ;;  %v1460_v45 = vld [vmem:[%s1679_s10 + $0x94] ss:$8 sps:$4 sm:$0xff]   ;;  %v1464_v48 = vld [vmem:[%s1679_s10 + $0x90] ss:$8 sps:$4 sm:$0xff]   ;;  %v1466_v50 = vld [vmem:[%s1679_s10 + $0xa4] ss:$8 sps:$4 sm:$0xff]  }
  0x4d   : > { %v1462_v47 = vld [vmem:[%s1679_s10 + $0x194] ss:$8 sps:$4 sm:$0xff]   ;;  %v1465_v49 = vld [vmem:[%s1679_s10 + $0x190] ss:$8 sps:$4 sm:$0xff]   ;;  %v1732_v51 = vshrl.u32 %v484_v46, 7  ;;  %v1743_v60 = vld [vmem:[%s1686_s0] sm:$0xff] }
  0x4e   : > { %931 = vmatpush1.bf16.msra.mxu1 %v1428_v23  ;;  %v1468_v52 = vld [vmem:[%s1679_s10 + $0x1a4] ss:$8 sps:$4 sm:$0xff]   ;;  %v1470_v53 = vld [vmem:[%s1679_s10 + $0xa0] ss:$8 sps:$4 sm:$0xff]   ;;  %v1472_v55 = vld [vmem:[%s1679_s10 + $0xb4] ss:$8 sps:$4 sm:$0xff]   ;;  %v475_v63 = vunpack.c.h.bf16 %v1743_v60 }
  0x4f   : > { %974 = vmatpush1.bf16.msra.mxu0 %v1429_v24  ;;  %932 = vmatprep.subr.bf16.mxu1 %v1430_v25  ;;  %v1471_v54 = vld [vmem:[%s1679_s10 + $0x1a0] ss:$8 sps:$4 sm:$0xff]   ;;  %v490_v56 = vsub.s32 1, %v1732_v51  ;;  %v1474_v57 = vld [vmem:[%s1679_s10 + $0x1b4] ss:$8 sps:$4 sm:$0xff]   ;;  %v498_v2 = vsub.s32 3, %v1732_v51 }
  0x50   : > { %975 = vmatprep.subr.bf16.mxu0 %v1432_v26  ;;  %v1476_v58 = vld [vmem:[%s1679_s10 + $0xb0] ss:$8 sps:$4 sm:$0xff]   ;;  %v1478_v61 = vld [vmem:[%s1679_s10 + $0xc4] ss:$8 sps:$4 sm:$0xff]   ;;  %v482_v0 = vld [vmem:[%s427_s8] sm:$0xf] }
  0x51   : > { %v1477_v59 = vld [vmem:[%s1679_s10 + $0x1b0] ss:$8 sps:$4 sm:$0xff]   ;;  %v1756_v1 = vld [vmem:[%s1688_s14] sm:$0xff]  ;;  %v491_v4 = vrot.slane %v482_v0, %v490_v56  ;;  %v471_v6 = vld [vmem:[%s1686_s0 + $0x8] sm:$0xff]  ;;  %v486_v16 = vsub.s32 0, %v1732_v51  ;;  %v499_v18 = vrot.slane %v482_v0, %v498_v2  ;;  %v494_v20 = vsub.s32 2, %v1732_v51 }
  0x52   : > { %933 = vmatpush1.bf16.msra.mxu1 %v1434_v27  ;;  %v1747_v62 = vld [vmem:[%s1686_s0 + $0x10] sm:$0xff]  ;;  %v473_v7 = vld [vmem:[%s1686_s0 + $0x18] sm:$0xff]  ;;  %v1480_v8 = vld [vmem:[%s1679_s10 + $0x1c4] ss:$8 sps:$4 sm:$0xff]   ;;  %v517_v9 = vunpack.c.h.bf16 %v1756_v1  ;;  %v477_v15 = vunpack.c.h.bf16 %v471_v6  ;;  %p1336_p0 = scmp.ne.s32.totalorder %s1540_s20, 1 }
  0x53   : > { %976 = vmatpush1.bf16.msra.mxu0 %v1435_v28  ;;  %934 = vmatprep.subr.bf16.mxu1 %v1436_v29  ;;  %v479_v3 = vunpack.c.h.bf16 %v1747_v62  ;;  %v1763_v5 = vld [vmem:[%s1688_s14 + $0x10] sm:$0xff]  ;;  %v513_v11 = vld [vmem:[%s1688_s14 + $0x8] sm:$0xff]  ;;  %v515_v12 = vld [vmem:[%s1688_s14 + $0x18] sm:$0xff]  ;;  %v505_v13 = vmul.f32 %v491_v4, %v475_v63  ;;  %v481_v17 = vunpack.c.h.bf16 %v473_v7  ;;  %v474_v28 = vunpack.c.l.bf16 %v1743_v60 }
  0x54   : > { %977 = vmatprep.subr.bf16.mxu0 %v1438_v30  ;;  %v521_v10 = vunpack.c.h.bf16 %v1763_v5  ;;  %v519_v19 = vunpack.c.h.bf16 %v513_v11  ;;  %v1482_v21 = vld [vmem:[%s1679_s10 + $0xc0] ss:$8 sps:$4 sm:$0xff]   ;;  %v523_v25 = vunpack.c.h.bf16 %v515_v12  ;;  %v1484_v26 = vld [vmem:[%s1679_s10 + $0xd4] ss:$8 sps:$4 sm:$0xff]   ;;  %v507_v29 = vmul.f32 %v499_v18, %v477_v15  ;;  %v1501_v63 = vld [vmem:[%s1679_s10 + $0x1f0] ss:$8 sps:$4 sm:$0xff]  }
  0x55   : > { %v509_v14 = vmul.f32 %v491_v4, %v479_v3  ;;  %v1483_v22 = vld [vmem:[%s1679_s10 + $0x1c0] ss:$8 sps:$4 sm:$0xff]   ;;  %v525_v23 = vadd.f32 %v517_v9, %v505_v13  ;;  %v1486_v27 = vld [vmem:[%s1679_s10 + $0x1d4] ss:$8 sps:$4 sm:$0xff]   ;;  %v511_v30 = vmul.f32 %v499_v18, %v481_v17  ;;  %v518_v46 = vunpack.c.l.bf16 %v513_v11 }
  0x56   : > { %935 = vmatpush1.bf16.msra.mxu1 %v1440_v31  ;;  %v478_v31 = vunpack.c.l.bf16 %v1747_v62  ;;  %v1500_v62 = vld [vmem:[%s1679_s10 + $0xf0] ss:$8 sps:$4 sm:$0xff]   ;;  %v536_v3 = vld [vmem:[#allocation2] sm:$0xff] }
  0x57   : > { %978 = vmatpush1.bf16.msra.mxu0 %v1441_v32  ;;  %936 = vmatprep.subr.bf16.mxu1 %v1442_v33  ;;  %v529_v24 = vadd.f32 %v521_v10, %v509_v14  ;;  %v476_v33 = vunpack.c.l.bf16 %v471_v6  ;;  %v538_v11 = vld [vmem:[#allocation2 + $0x10] sm:$0xff]  ;;  %v539_v17 = vld [vmem:[#allocation2 + $0x18] sm:$0xff] }
  0x58   : > { %979 = vmatprep.subr.bf16.mxu0 %v1444_v34  ;;  %v480_v34 = vunpack.c.l.bf16 %v473_v7  ;;  %v537_v7 = vld [vmem:[#allocation2 + $0x8] sm:$0xff] }
  0x59   : > { %v533_v32 = vpack.c.bf16 %v529_v24, %v525_v23 }
  0x5a   : > { %937 = vmatpush1.bf16.msra.mxu1 %v1446_v35  ;;  %v527_v35 = vadd.f32 %v519_v19, %v507_v29 }
  0x5b   : > { %980 = vmatpush1.bf16.msra.mxu0 %v1447_v36  ;;  %938 = vmatprep.subr.bf16.mxu1 %v1448_v37  ;;  %v531_v36 = vadd.f32 %v523_v25, %v511_v30  ;;  %v487_v37 = vrot.slane %v482_v0, %v486_v16  ;;  %v1026_v25 = vld [vmem:[%s1829_s4] sm:$0x3] (!%p1336_p0) }
  0x5c   : > { %981 = vmatprep.subr.bf16.mxu0 %v1450_v38  ;;  %v495_v38 = vrot.slane %v482_v0, %v494_v20  ;;  %956 = vmatprep.mubr.bf16.mxu1 %v533_v32 }
  0x5e   : > { %939 = vmatpush1.bf16.msra.mxu1 %v1452_v39  ;;  %v1488_v39 = vld [vmem:[%s1679_s10 + $0xd0] ss:$8 sps:$4 sm:$0xff]  }
  0x5f   : > { %982 = vmatpush1.bf16.msra.mxu0 %v1453_v40  ;;  %940 = vmatprep.subr.bf16.mxu1 %v1454_v41  ;;  %v1489_v40 = vld [vmem:[%s1679_s10 + $0x1d0] ss:$8 sps:$4 sm:$0xff]   ;;  %v1490_v41 = vld [vmem:[%s1679_s10 + $0xe4] ss:$8 sps:$4 sm:$0xff]  }
  0x60   : > { %983 = vmatprep.subr.bf16.mxu0 %v1456_v42  ;;  %v1492_v42 = vld [vmem:[%s1679_s10 + $0x1e4] ss:$8 sps:$4 sm:$0xff]  }
  0x62   : > { %941 = vmatpush1.bf16.msra.mxu1 %v1458_v43  ;;  %v535_v43 = vpack.c.bf16 %v531_v36, %v527_v35 }
  0x63   : > { %984 = vmatpush1.bf16.msra.mxu0 %v1459_v44  ;;  %942 = vmatprep.subr.bf16.mxu1 %v1460_v45  ;;  %v516_v44 = vunpack.c.l.bf16 %v1756_v1  ;;  %v520_v45 = vunpack.c.l.bf16 %v1763_v5 }
  0x64   : > { %985 = vmatprep.subr.bf16.mxu0 %v1462_v47  ;;  %v522_v47 = vunpack.c.l.bf16 %v515_v12  ;;  %999 = vmatprep.mubr.bf16.mxu0 %v535_v43 }
  0x66   : > { %943 = vmatpush1.bf16.msra.mxu1 %v1464_v48  ;;  %v504_v48 = vmul.f32 %v487_v37, %v474_v28 }
  0x67   : > { %986 = vmatpush1.bf16.msra.mxu0 %v1465_v49  ;;  %944 = vmatprep.subr.bf16.mxu1 %v1466_v50  ;;  %v508_v49 = vmul.f32 %v487_v37, %v478_v31  ;;  %v506_v50 = vmul.f32 %v495_v38, %v476_v33 }
  0x68   : > { %987 = vmatprep.subr.bf16.mxu0 %v1468_v52  ;;  %v510_v52 = vmul.f32 %v495_v38, %v480_v34 }
  0x69   : > { %v526_v60 = vadd.f32 %v518_v46, %v506_v50 }
  0x6a   : > { %945 = vmatpush1.bf16.msra.mxu1 %v1470_v53  ;;  %v1494_v53 = vld [vmem:[%s1679_s10 + $0xe0] ss:$8 sps:$4 sm:$0xff]  }
  0x6b   : > { %988 = vmatpush1.bf16.msra.mxu0 %v1471_v54  ;;  %946 = vmatprep.subr.bf16.mxu1 %v1472_v55  ;;  %v1495_v54 = vld [vmem:[%s1679_s10 + $0x1e0] ss:$8 sps:$4 sm:$0xff]   ;;  %v1496_v55 = vld [vmem:[%s1679_s10 + $0xf4] ss:$8 sps:$4 sm:$0xff]  }
  0x6c   : > { %989 = vmatprep.subr.bf16.mxu0 %v1474_v57  ;;  %v1498_v57 = vld [vmem:[%s1679_s10 + $0x1f4] ss:$8 sps:$4 sm:$0xff]  }
  0x6e   : > { %947 = vmatpush1.bf16.msra.mxu1 %v1476_v58  ;;  %v524_v58 = vadd.f32 %v516_v44, %v504_v48 }
  0x6f   : > { %990 = vmatpush1.bf16.msra.mxu0 %v1477_v59  ;;  %948 = vmatprep.subr.bf16.mxu1 %v1478_v61  ;;  %v528_v59 = vadd.f32 %v520_v45, %v508_v49  ;;  %v530_v61 = vadd.f32 %v522_v47, %v510_v52 }
  0x70   : > { %991 = vmatprep.subr.bf16.mxu0 %v1480_v8 }
  0x71   : > { %v532_v0 = vpack.c.bf16 %v528_v59, %v524_v58  ;;  %v534_v1 = vpack.c.bf16 %v530_v61, %v526_v60 }
  0x72   : > { %949 = vmatpush1.bf16.msra.mxu1 %v1482_v21 }
  0x73   : > { %992 = vmatpush1.bf16.msra.mxu0 %v1483_v22  ;;  %950 = vmatprep.subr.bf16.mxu1 %v1484_v26  ;;  %v1031_v26 = vrot.slane (!%p1336_p0), %v1026_v25, %v486_v16 }
  0x74   : > { %993 = vmatprep.subr.bf16.mxu0 %v1486_v27  ;;  %v1035_v27 = vrot.slane (!%p1336_p0), %v1026_v25, %v490_v56 }
  0x76   : > { %951 = vmatpush1.bf16.msra.mxu1 %v1488_v39 }
  0x77   : > { %994 = vmatpush1.bf16.msra.mxu0 %v1489_v40  ;;  %952 = vmatprep.subr.bf16.mxu1 %v1490_v41 }
  0x78   : > { %995 = vmatprep.subr.bf16.mxu0 %v1492_v42 }
  0x7a   : > { %953 = vmatpush1.bf16.msra.mxu1 %v1494_v53 }
  0x7b   : > { %996 = vmatpush1.bf16.msra.mxu0 %v1495_v54  ;;  %954 = vmatprep.subr.bf16.mxu1 %v1496_v55 }
  0x7c   : > { %997 = vmatprep.subr.bf16.mxu0 %v1498_v57 }
  0x7e   : > { %955 = vmatpush1.bf16.msra.mxu1 %v1500_v62 }
  0x7f   : > { %998 = vmatpush1.bf16.msra.mxu0 %v1501_v63 }
  0x81   : > { %957 = vmatmul.mubr.bf16.vlgmr.msra.gmra.mrb[0].mxu1 %v532_v0 }
  0x82   : > { %1000 = vmatmul.mubr.bf16.vlgmr.msra.gmra.mrb[0].mxu0 %v534_v1 }
 0x154   : > { %v958_v2 = vpop.f32.mrb[0].mxu1 }
 0x155   : > { %v1001_v4 = vpop.f32.mrb[0].mxu0  ;;  %v960_v6 = vpop.f32.mrb[1].mxu1 }
 0x156   : > { %v1002_v5 = vadd.f32 %v1001_v4, %v958_v2  ;;  %v1003_v8 = vpop.f32.mrb[1].mxu0  ;;  %v962_v10 = vpop.f32.mrb[2].mxu1 }
 0x157   : > { %v1004_v9 = vadd.f32 %v1003_v8, %v960_v6  ;;  %v1005_v12 = vpop.f32.mrb[2].mxu0  ;;  %v964_v15 = vpop.f32.mrb[3].mxu1  ;;  %1021 = sbr.rel (%p1336_p0) target bundleno = 364 (0x16c), region = 94 }
 0x158   : > { %v1010_v13 = vadd.f32 %v1002_v5, %v536_v3  ;;  %v1006_v14 = vadd.f32 %v1005_v12, %v962_v10  ;;  %v1007_v18 = vpop.f32.mrb[3].mxu0 }
 0x159   : > { %v1011_v19 = vadd.f32 %v1004_v9, %v537_v7  ;;  %v1008_v20 = vadd.f32 %v1007_v18, %v964_v15 }
 0x15a   : > { %1014 = vst [vmem:[#allocation2] sm:$0xff] %v1010_v13  ;;  %v1012_v21 = vadd.f32 %v1006_v14, %v538_v11 }
 0x15b   : > { %1015 = vst [vmem:[#allocation2 + $0x8] sm:$0xff] %v1011_v19  ;;  %v1013_v22 = vadd.f32 %v1008_v20, %v539_v17 }
 0x15c   : > { %1016 = vst [vmem:[#allocation2 + $0x10] sm:$0xff] %v1012_v21 }
 0x15d   : > { %1017 = vst [vmem:[#allocation2 + $0x18] sm:$0xff] %v1013_v22 }
 0x161   : > { %v1022_v23 = vld [vmem:[#allocation2] sm:$0xff] }
 0x162   : > { %v1023_v24 = vld [vmem:[#allocation2 + $0x8] sm:$0xff]  ;;  %v1038_v30 = vadd.f32 %v1031_v26, %v1022_v23 }
 0x163   : > { %v1024_v28 = vld [vmem:[#allocation2 + $0x10] sm:$0xff]  ;;  %v1039_v31 = vadd.f32 %v1035_v27, %v1023_v24 }
 0x164   : > { %v1025_v29 = vld [vmem:[#allocation2 + $0x18] sm:$0xff]  ;;  %v1040_v32 = vadd.f32 %v1031_v26, %v1024_v28  ;;  %v1042_v34 = vmax.f32 %v1038_v30, 0.0 }
 0x165   : > { %v1041_v33 = vadd.f32 %v1035_v27, %v1025_v29  ;;  %v1043_v35 = vmax.f32 %v1039_v31, 0.0 }
 0x166   : > { %v1044_v36 = vmax.f32 %v1040_v32, 0.0 }
 0x167   : > { %v1045_v37 = vmax.f32 %v1041_v33, 0.0  ;;  %v1343_v38 = vpack.c.bf16 %v1043_v35, %v1042_v34 }
 0x169   : > { %v1344_v39 = vpack.c.bf16 %v1045_v37, %v1044_v36  ;;  %1058 = vst [vmem:[%s1684_s27] sm:$0xff] %v1343_v38 }
 0x16b   : > { %1059 = vst [vmem:[%s1684_s27 + $0x8] sm:$0xff] %v1344_v39 }
 0x16c PF: > { %s15_s24 = sadd.s32 1, %s1556_s24   ;;  %s1834_s18 = smov %s1536_s19 }
 0x16d   : > { %p12_p1 = scmp.ge.s32.totalorder %s15_s24, 6   ;;  %s1835_s19 = smov %s1644_s7 }
 0x16e   : > { %s1836_s20 = smov %s1548_s22  ;;  %s1837_s21 = smov %s1552_s23 }
 0x16f   : > { %s1838_s22 = smov %s1841_s25  ;;  %s1839_s23 = smov %s1845_s26 }
 0x170   :  { %14 = sbr.rel (!%p12_p1) target bundleno = 6 (0x6), region = 146 }

// kernel: _lambda_.26
= control target key start
LH: loop header
LB: loop body
LE: loop exit
PB: predicated region body
PF: predicated region fallthrough
CT: control target
= control target key end

     0   :  { %s4587_s0 = inlined_call_operand.vmem [shape: bf16[16,1024], index: 0, kind: input, shape index: {}]   ;;  %s4588_s1 = inlined_call_operand.vmem [shape: bf16[1024,2048], index: 1, kind: input, shape index: {}]   ;;  %s4589_s2 = inlined_call_operand.vmem [shape: f32[1,2048], index: 2, kind: input, shape index: {}]   ;;  %s4590_s3 = inlined_call_operand.vmem [shape: bf16[16,2048], index: 3, kind: output, shape index: {}]  }
   0x1   :  { %4592 = sst [smem:[#allocation7_spill]] %s4587_s0 }
   0x2   :  { %4593 = sst [smem:[#allocation8_spill]] %s4588_s1 }
   0x3   :  { %s3593_s12 = smov 0   ;;  %s3595_s13 = smov 0  }
   0x4   :  { %s3597_s14 = smov 0   ;;  %s3599_s15 = smov 0  }
   0x5   :  { %s3601_s16 = smov 0   ;;  %s3603_s17 = smov 0  }
   0x6   :  { %s3605_s18 = smov 0   ;;  %s3607_s19 = smov 0  }
   0x7   :  { %s3609_s20 = smov 0   ;;  %s3611_s21 = smov 0  }
   0x8   :  { %s3613_s22 = smov 0  }
   0x9 LB: > { %s3070_s23 = sadd.s32 4294967295, %s3570_s22   ;;  %s25_s24 = sadd.s32 1, %s3562_s20  ;;  %s3570_s22 = sphi %s3613_s22, %s13_s22   ;;  %s3566_s21 = sphi %s3611_s21, %s4610_s21   ;;  %s3562_s20 = sphi %s3609_s20, %s4609_s20   ;;  %s3558_s19 = sphi %s3607_s19, %s4608_s19   ;;  %s3554_s18 = sphi %s3605_s18, %s4607_s18   ;;  %s3550_s17 = sphi %s3603_s17, %s4606_s17   ;;  %s3546_s16 = sphi %s3601_s16, %s4605_s16   ;;  %s3542_s15 = sphi %s3599_s15, %s4604_s15   ;;  %s3538_s14 = sphi %s3597_s14, %s4603_s14   ;;  %s3534_s13 = sphi %s3595_s13, %s4602_s13   ;;  %s3530_s12 = sphi %s3593_s12, %s4601_s12  }
   0xa   : > { %p26_p0 = scmp.ge.s32.totalorder %s25_s24, 2  ;;  %s28_s25 = sadd.s32 1, %s3566_s21 }
   0xb   : > { %s41_s26 = sadd.s32 1, %s3550_s17  ;;  %p48_p1 = scmp.ne.s32.totalorder %s3550_s17, %s3546_s16 }
   0xc   : > { %s4612_s24 = smov (%p26_p0, %s25_s24), 0  ;;  %s4614_s25 = smov (!%p26_p0, %s28_s25), %s3566_s21 }
   0xd   : > { %s37_s27 = ssub.s32 %s3562_s20, %s4612_s24  ;;  %p49_p2 = scmp.eq.s32.totalorder %s3570_s22, 0 }
   0xe   : > { %p30_p3 = scmp.ge.s32.totalorder %s4614_s25, 2  ;;  %p39_p4 = scmp.eq.s32.totalorder %s37_s27, 0 }
   0xf   : > { %p3660_p5 = por %p49_p2, %p48_p1  ;;  %s69_s29 = sadd.s32 1, %s3542_s15 }
  0x10   : > { %s4616_s25 = smov (%p30_p3, %s4614_s25), 0  ;;  %p76_p6 = scmp.ne.s32.totalorder %s3542_s15, %s3538_s14 }
  0x11   : > { %4595 = sst [smem:[#allocation6_spill]] %s4616_s25  ;;  %s65_s4 = ssub.s32 %s3566_s21, %s4616_s25 }
  0x12   : > { %s3668_s30 = scalar_select %p39_p4, %s3550_s17, %s41_s26  }
  0x13   : > { %s66_s5 = sor.u32 %s65_s4, %s37_s27  ;;  %p121_p7 = scmp.eq.s32.totalorder %s65_s4, 0 }
  0x14   : > { %p67_p8 = scmp.eq.s32.totalorder %s66_s5, 0  ;;  %p3674_p9 = por %p76_p6, %p49_p2 }
  0x15   : > { %s123_s7 = sadd.s32 1, %s3534_s13  ;;  %p133_p10 = scmp.ne.s32.totalorder %s3534_s13, %s3530_s12 }
  0x16   : > { %s3682_s8 = scalar_select %p67_p8, %s3542_s15, %s69_s29  }
  0x17   : > { %s3685_s9 = scalar_select %p121_p7, %s3534_s13, %s123_s7  }
  0x18   : > { %p134_p11 = scmp.eq.s32.totalorder %s3070_s23, 3  ;;  %p3073_p13 = scmp.ge.s32.totalorder %s3570_s22, 4 }
  0x1a   : > { %p3687_p12 = por %p134_p11, %p133_p10  ;;  %156 = sbr.rel (%p3073_p13) target bundleno = 183 (0xb7), region = 16 }
  0x21   : > { %159 = sbr.rel (!%p3660_p5) target bundleno = 45 (0x2d), region = 20  ;;  %s161_s11 = sand.u32 (%p3660_p5), 1, %s3550_s17  }
  0x22   : > { %s3362_s26 = sshll.u32 (%p3660_p5), %s3562_s20, 4  ;;  %s3074_s27 = sshll.u32 (%p3660_p5), %s161_s11, 5 }
  0x23   : > { %s4598_s0 = sld [smem:[#allocation7_spill]] (%p3660_p5)  ;;  %s163_s23 = scalar_lea.vmem (%p3660_p5), [#allocation3], %s3074_s27 }
  0x29   : > { %s169_s5 = scalar_lea.vmem %s4598_s0, %s3362_s26 }
  0x2a   : > { %v182_v0 = vld [vmem:[%s169_s5] sm:$0xff]  ;;  %v184_v1 = vld [vmem:[%s169_s5 + $0x8] sm:$0xff] }
  0x2b   : > { %v186_v2 = vld [vmem:[%s169_s5 + $0x20] sm:$0xff]  ;;  %183 = vst [vmem:[%s163_s23] sm:$0xff] %v182_v0  ;;  %185 = vst [vmem:[%s163_s23 + $0x8] sm:$0xff] %v184_v1  ;;  %v188_v3 = vld [vmem:[%s169_s5 + $0x28] sm:$0xff] }
  0x2c   : > { %187 = vst [vmem:[%s163_s23 + $0x10] sm:$0xff] %v186_v2  ;;  %189 = vst [vmem:[%s163_s23 + $0x18] sm:$0xff] %v188_v3 }
  0x2d PF: > { %195 = sbr.rel (!%p3674_p9) target bundleno = 183 (0xb7), region = 43  ;;  %s197_s28 = sand.u32 (%p3674_p9), 1, %s3542_s15  }
  0x2e   : > { %s3079_s7 = sshll.u32 (%p3674_p9), %s3566_s21, 3  ;;  %s3077_s11 = sshll.u32 (%p3674_p9), %s197_s28, 11 }
  0x2f   : > { %s3363_s26 = sshll.u32 (%p3674_p9), %s3562_s20, 10  ;;  %s4599_s1 = sld [smem:[#allocation8_spill]] (%p3674_p9) }
  0x30   : > { %s203_s29 = sadd.s32 (%p3674_p9), %s3363_s26, %s3079_s7  ;;  %s3712_s6 = scalar_lea.vmem (%p3674_p9), [#allocation4], %s3077_s11 }
  0x31   : > { %s3081_s4 = sshll.u32 (%p3674_p9), %s203_s29, 2 }
  0x35   : > { %s3707_s25 = scalar_lea.vmem %s4599_s1, %s3081_s4 }
  0x36   : > { %v218_v4 = vld [vmem:[%s3707_s25] sm:$0xff]  ;;  %v220_v5 = vld [vmem:[%s3707_s25 + $0x8] sm:$0xff]  ;;  %v222_v6 = vld [vmem:[%s3707_s25 + $0x10] sm:$0xff] }
  0x37   : > { %219 = vst [vmem:[%s3712_s6] sm:$0xff] %v218_v4  ;;  %221 = vst [vmem:[%s3712_s6 + $0x8] sm:$0xff] %v220_v5  ;;  %v224_v7 = vld [vmem:[%s3707_s25 + $0x18] sm:$0xff]  ;;  %v226_v8 = vld [vmem:[%s3707_s25 + $0x40] sm:$0xff] }
  0x38   : > { %223 = vst [vmem:[%s3712_s6 + $0x10] sm:$0xff] %v222_v6  ;;  %v228_v9 = vld [vmem:[%s3707_s25 + $0x48] sm:$0xff]  ;;  %225 = vst [vmem:[%s3712_s6 + $0x18] sm:$0xff] %v224_v7  ;;  %v230_v10 = vld [vmem:[%s3707_s25 + $0x50] sm:$0xff] }
  0x39   : > { %227 = vst [vmem:[%s3712_s6 + $0x20] sm:$0xff] %v226_v8  ;;  %229 = vst [vmem:[%s3712_s6 + $0x28] sm:$0xff] %v228_v9  ;;  %v232_v11 = vld [vmem:[%s3707_s25 + $0x58] sm:$0xff]  ;;  %v234_v12 = vld [vmem:[%s3707_s25 + $0x80] sm:$0xff] }
  0x3a   : > { %231 = vst [vmem:[%s3712_s6 + $0x30] sm:$0xff] %v230_v10  ;;  %233 = vst [vmem:[%s3712_s6 + $0x38] sm:$0xff] %v232_v11  ;;  %v236_v13 = vld [vmem:[%s3707_s25 + $0x88] sm:$0xff]  ;;  %v238_v14 = vld [vmem:[%s3707_s25 + $0x90] sm:$0xff] }
  0x3b   : > { %235 = vst [vmem:[%s3712_s6 + $0x40] sm:$0xff] %v234_v12  ;;  %v240_v15 = vld [vmem:[%s3707_s25 + $0x98] sm:$0xff]  ;;  %237 = vst [vmem:[%s3712_s6 + $0x48] sm:$0xff] %v236_v13  ;;  %v242_v16 = vld [vmem:[%s3707_s25 + $0xc0] sm:$0xff] }
  0x3c   : > { %239 = vst [vmem:[%s3712_s6 + $0x50] sm:$0xff] %v238_v14  ;;  %241 = vst [vmem:[%s3712_s6 + $0x58] sm:$0xff] %v240_v15  ;;  %v244_v17 = vld [vmem:[%s3707_s25 + $0xc8] sm:$0xff]  ;;  %v246_v18 = vld [vmem:[%s3707_s25 + $0xd0] sm:$0xff] }
  0x3d   : > { %243 = vst [vmem:[%s3712_s6 + $0x60] sm:$0xff] %v242_v16  ;;  %245 = vst [vmem:[%s3712_s6 + $0x68] sm:$0xff] %v244_v17  ;;  %v248_v19 = vld [vmem:[%s3707_s25 + $0xd8] sm:$0xff]  ;;  %v250_v20 = vld [vmem:[%s3707_s25 + $0x100] sm:$0xff] }
  0x3e   : > { %247 = vst [vmem:[%s3712_s6 + $0x70] sm:$0xff] %v246_v18  ;;  %v252_v21 = vld [vmem:[%s3707_s25 + $0x108] sm:$0xff]  ;;  %249 = vst [vmem:[%s3712_s6 + $0x78] sm:$0xff] %v248_v19  ;;  %v254_v22 = vld [vmem:[%s3707_s25 + $0x110] sm:$0xff] }
  0x3f   : > { %251 = vst [vmem:[%s3712_s6 + $0x80] sm:$0xff] %v250_v20  ;;  %253 = vst [vmem:[%s3712_s6 + $0x88] sm:$0xff] %v252_v21  ;;  %v256_v23 = vld [vmem:[%s3707_s25 + $0x118] sm:$0xff]  ;;  %v258_v24 = vld [vmem:[%s3707_s25 + $0x140] sm:$0xff] }
  0x40   : > { %255 = vst [vmem:[%s3712_s6 + $0x90] sm:$0xff] %v254_v22  ;;  %257 = vst [vmem:[%s3712_s6 + $0x98] sm:$0xff] %v256_v23  ;;  %v260_v25 = vld [vmem:[%s3707_s25 + $0x148] sm:$0xff]  ;;  %v262_v26 = vld [vmem:[%s3707_s25 + $0x150] sm:$0xff] }
  0x41   : > { %259 = vst [vmem:[%s3712_s6 + $0xa0] sm:$0xff] %v258_v24  ;;  %v264_v27 = vld [vmem:[%s3707_s25 + $0x158] sm:$0xff]  ;;  %261 = vst [vmem:[%s3712_s6 + $0xa8] sm:$0xff] %v260_v25  ;;  %v266_v28 = vld [vmem:[%s3707_s25 + $0x180] sm:$0xff] }
  0x42   : > { %263 = vst [vmem:[%s3712_s6 + $0xb0] sm:$0xff] %v262_v26  ;;  %265 = vst [vmem:[%s3712_s6 + $0xb8] sm:$0xff] %v264_v27  ;;  %v268_v29 = vld [vmem:[%s3707_s25 + $0x188] sm:$0xff]  ;;  %v270_v30 = vld [vmem:[%s3707_s25 + $0x190] sm:$0xff] }
  0x43   : > { %267 = vst [vmem:[%s3712_s6 + $0xc0] sm:$0xff] %v266_v28  ;;  %269 = vst [vmem:[%s3712_s6 + $0xc8] sm:$0xff] %v268_v29  ;;  %v272_v31 = vld [vmem:[%s3707_s25 + $0x198] sm:$0xff]  ;;  %v274_v32 = vld [vmem:[%s3707_s25 + $0x1c0] sm:$0xff] }
  0x44   : > { %271 = vst [vmem:[%s3712_s6 + $0xd0] sm:$0xff] %v270_v30  ;;  %v276_v33 = vld [vmem:[%s3707_s25 + $0x1c8] sm:$0xff]  ;;  %273 = vst [vmem:[%s3712_s6 + $0xd8] sm:$0xff] %v272_v31  ;;  %v278_v34 = vld [vmem:[%s3707_s25 + $0x1d0] sm:$0xff] }
  0x45   : > { %275 = vst [vmem:[%s3712_s6 + $0xe0] sm:$0xff] %v274_v32  ;;  %277 = vst [vmem:[%s3712_s6 + $0xe8] sm:$0xff] %v276_v33  ;;  %v280_v35 = vld [vmem:[%s3707_s25 + $0x1d8] sm:$0xff]  ;;  %v282_v36 = vld [vmem:[%s3707_s25 + $0x200] sm:$0xff] }
  0x46   : > { %279 = vst [vmem:[%s3712_s6 + $0xf0] sm:$0xff] %v278_v34  ;;  %281 = vst [vmem:[%s3712_s6 + $0xf8] sm:$0xff] %v280_v35  ;;  %v284_v37 = vld [vmem:[%s3707_s25 + $0x208] sm:$0xff]  ;;  %v286_v38 = vld [vmem:[%s3707_s25 + $0x210] sm:$0xff] }
  0x47   : > { %283 = vst [vmem:[%s3712_s6 + $0x100] sm:$0xff] %v282_v36  ;;  %v288_v39 = vld [vmem:[%s3707_s25 + $0x218] sm:$0xff]  ;;  %285 = vst [vmem:[%s3712_s6 + $0x108] sm:$0xff] %v284_v37  ;;  %v290_v40 = vld [vmem:[%s3707_s25 + $0x240] sm:$0xff] }
  0x48   : > { %287 = vst [vmem:[%s3712_s6 + $0x110] sm:$0xff] %v286_v38  ;;  %289 = vst [vmem:[%s3712_s6 + $0x118] sm:$0xff] %v288_v39  ;;  %v292_v41 = vld [vmem:[%s3707_s25 + $0x248] sm:$0xff]  ;;  %v294_v42 = vld [vmem:[%s3707_s25 + $0x250] sm:$0xff] }
  0x49   : > { %291 = vst [vmem:[%s3712_s6 + $0x120] sm:$0xff] %v290_v40  ;;  %293 = vst [vmem:[%s3712_s6 + $0x128] sm:$0xff] %v292_v41  ;;  %v296_v43 = vld [vmem:[%s3707_s25 + $0x258] sm:$0xff]  ;;  %v298_v44 = vld [vmem:[%s3707_s25 + $0x280] sm:$0xff] }
  0x4a   : > { %295 = vst [vmem:[%s3712_s6 + $0x130] sm:$0xff] %v294_v42  ;;  %v300_v45 = vld [vmem:[%s3707_s25 + $0x288] sm:$0xff]  ;;  %297 = vst [vmem:[%s3712_s6 + $0x138] sm:$0xff] %v296_v43  ;;  %v302_v46 = vld [vmem:[%s3707_s25 + $0x290] sm:$0xff] }
  0x4b   : > { %299 = vst [vmem:[%s3712_s6 + $0x140] sm:$0xff] %v298_v44  ;;  %301 = vst [vmem:[%s3712_s6 + $0x148] sm:$0xff] %v300_v45  ;;  %v304_v47 = vld [vmem:[%s3707_s25 + $0x298] sm:$0xff]  ;;  %v306_v48 = vld [vmem:[%s3707_s25 + $0x2c0] sm:$0xff] }
  0x4c   : > { %303 = vst [vmem:[%s3712_s6 + $0x150] sm:$0xff] %v302_v46  ;;  %305 = vst [vmem:[%s3712_s6 + $0x158] sm:$0xff] %v304_v47  ;;  %v308_v49 = vld [vmem:[%s3707_s25 + $0x2c8] sm:$0xff]  ;;  %v310_v50 = vld [vmem:[%s3707_s25 + $0x2d0] sm:$0xff] }
  0x4d   : > { %307 = vst [vmem:[%s3712_s6 + $0x160] sm:$0xff] %v306_v48  ;;  %v312_v51 = vld [vmem:[%s3707_s25 + $0x2d8] sm:$0xff]  ;;  %309 = vst [vmem:[%s3712_s6 + $0x168] sm:$0xff] %v308_v49  ;;  %v314_v52 = vld [vmem:[%s3707_s25 + $0x300] sm:$0xff] }
  0x4e   : > { %311 = vst [vmem:[%s3712_s6 + $0x170] sm:$0xff] %v310_v50  ;;  %313 = vst [vmem:[%s3712_s6 + $0x178] sm:$0xff] %v312_v51  ;;  %v316_v53 = vld [vmem:[%s3707_s25 + $0x308] sm:$0xff]  ;;  %v318_v54 = vld [vmem:[%s3707_s25 + $0x310] sm:$0xff] }
  0x4f   : > { %315 = vst [vmem:[%s3712_s6 + $0x180] sm:$0xff] %v314_v52  ;;  %317 = vst [vmem:[%s3712_s6 + $0x188] sm:$0xff] %v316_v53  ;;  %v320_v55 = vld [vmem:[%s3707_s25 + $0x318] sm:$0xff]  ;;  %v322_v56 = vld [vmem:[%s3707_s25 + $0x340] sm:$0xff] }
  0x50   : > { %319 = vst [vmem:[%s3712_s6 + $0x190] sm:$0xff] %v318_v54  ;;  %v324_v57 = vld [vmem:[%s3707_s25 + $0x348] sm:$0xff]  ;;  %321 = vst [vmem:[%s3712_s6 + $0x198] sm:$0xff] %v320_v55  ;;  %v326_v58 = vld [vmem:[%s3707_s25 + $0x350] sm:$0xff] }
  0x51   : > { %323 = vst [vmem:[%s3712_s6 + $0x1a0] sm:$0xff] %v322_v56  ;;  %325 = vst [vmem:[%s3712_s6 + $0x1a8] sm:$0xff] %v324_v57  ;;  %v328_v59 = vld [vmem:[%s3707_s25 + $0x358] sm:$0xff]  ;;  %v330_v60 = vld [vmem:[%s3707_s25 + $0x380] sm:$0xff] }
  0x52   : > { %327 = vst [vmem:[%s3712_s6 + $0x1b0] sm:$0xff] %v326_v58  ;;  %329 = vst [vmem:[%s3712_s6 + $0x1b8] sm:$0xff] %v328_v59  ;;  %v332_v61 = vld [vmem:[%s3707_s25 + $0x388] sm:$0xff]  ;;  %v334_v62 = vld [vmem:[%s3707_s25 + $0x390] sm:$0xff] }
  0x53   : > { %331 = vst [vmem:[%s3712_s6 + $0x1c0] sm:$0xff] %v330_v60  ;;  %v336_v63 = vld [vmem:[%s3707_s25 + $0x398] sm:$0xff]  ;;  %333 = vst [vmem:[%s3712_s6 + $0x1c8] sm:$0xff] %v332_v61  ;;  %v338_v0 = vld [vmem:[%s3707_s25 + $0x3c0] sm:$0xff] }
  0x54   : > { %335 = vst [vmem:[%s3712_s6 + $0x1d0] sm:$0xff] %v334_v62  ;;  %337 = vst [vmem:[%s3712_s6 + $0x1d8] sm:$0xff] %v336_v63  ;;  %v340_v1 = vld [vmem:[%s3707_s25 + $0x3c8] sm:$0xff]  ;;  %v342_v2 = vld [vmem:[%s3707_s25 + $0x3d0] sm:$0xff] }
  0x55   : > { %339 = vst [vmem:[%s3712_s6 + $0x1e0] sm:$0xff] %v338_v0  ;;  %341 = vst [vmem:[%s3712_s6 + $0x1e8] sm:$0xff] %v340_v1  ;;  %v344_v3 = vld [vmem:[%s3707_s25 + $0x3d8] sm:$0xff]  ;;  %v346_v4 = vld [vmem:[%s3707_s25 + $0x400] sm:$0xff] }
  0x56   : > { %343 = vst [vmem:[%s3712_s6 + $0x1f0] sm:$0xff] %v342_v2  ;;  %v348_v5 = vld [vmem:[%s3707_s25 + $0x408] sm:$0xff]  ;;  %345 = vst [vmem:[%s3712_s6 + $0x1f8] sm:$0xff] %v344_v3  ;;  %v350_v6 = vld [vmem:[%s3707_s25 + $0x410] sm:$0xff] }
  0x57   : > { %347 = vst [vmem:[%s3712_s6 + $0x200] sm:$0xff] %v346_v4  ;;  %349 = vst [vmem:[%s3712_s6 + $0x208] sm:$0xff] %v348_v5  ;;  %v352_v7 = vld [vmem:[%s3707_s25 + $0x418] sm:$0xff]  ;;  %v354_v8 = vld [vmem:[%s3707_s25 + $0x440] sm:$0xff] }
  0x58   : > { %351 = vst [vmem:[%s3712_s6 + $0x210] sm:$0xff] %v350_v6  ;;  %353 = vst [vmem:[%s3712_s6 + $0x218] sm:$0xff] %v352_v7  ;;  %v356_v9 = vld [vmem:[%s3707_s25 + $0x448] sm:$0xff]  ;;  %v358_v10 = vld [vmem:[%s3707_s25 + $0x450] sm:$0xff] }
  0x59   : > { %355 = vst [vmem:[%s3712_s6 + $0x220] sm:$0xff] %v354_v8  ;;  %v360_v11 = vld [vmem:[%s3707_s25 + $0x458] sm:$0xff]  ;;  %357 = vst [vmem:[%s3712_s6 + $0x228] sm:$0xff] %v356_v9  ;;  %v362_v12 = vld [vmem:[%s3707_s25 + $0x480] sm:$0xff] }
  0x5a   : > { %359 = vst [vmem:[%s3712_s6 + $0x230] sm:$0xff] %v358_v10  ;;  %361 = vst [vmem:[%s3712_s6 + $0x238] sm:$0xff] %v360_v11  ;;  %v364_v13 = vld [vmem:[%s3707_s25 + $0x488] sm:$0xff]  ;;  %v366_v14 = vld [vmem:[%s3707_s25 + $0x490] sm:$0xff] }
  0x5b   : > { %363 = vst [vmem:[%s3712_s6 + $0x240] sm:$0xff] %v362_v12  ;;  %365 = vst [vmem:[%s3712_s6 + $0x248] sm:$0xff] %v364_v13  ;;  %v368_v15 = vld [vmem:[%s3707_s25 + $0x498] sm:$0xff]  ;;  %v370_v16 = vld [vmem:[%s3707_s25 + $0x4c0] sm:$0xff] }
  0x5c   : > { %367 = vst [vmem:[%s3712_s6 + $0x250] sm:$0xff] %v366_v14  ;;  %v372_v17 = vld [vmem:[%s3707_s25 + $0x4c8] sm:$0xff]  ;;  %369 = vst [vmem:[%s3712_s6 + $0x258] sm:$0xff] %v368_v15  ;;  %v374_v18 = vld [vmem:[%s3707_s25 + $0x4d0] sm:$0xff] }
  0x5d   : > { %371 = vst [vmem:[%s3712_s6 + $0x260] sm:$0xff] %v370_v16  ;;  %373 = vst [vmem:[%s3712_s6 + $0x268] sm:$0xff] %v372_v17  ;;  %v376_v19 = vld [vmem:[%s3707_s25 + $0x4d8] sm:$0xff]  ;;  %v378_v20 = vld [vmem:[%s3707_s25 + $0x500] sm:$0xff] }
  0x5e   : > { %375 = vst [vmem:[%s3712_s6 + $0x270] sm:$0xff] %v374_v18  ;;  %377 = vst [vmem:[%s3712_s6 + $0x278] sm:$0xff] %v376_v19  ;;  %v380_v21 = vld [vmem:[%s3707_s25 + $0x508] sm:$0xff]  ;;  %v382_v22 = vld [vmem:[%s3707_s25 + $0x510] sm:$0xff] }
  0x5f   : > { %379 = vst [vmem:[%s3712_s6 + $0x280] sm:$0xff] %v378_v20  ;;  %v384_v23 = vld [vmem:[%s3707_s25 + $0x518] sm:$0xff]  ;;  %381 = vst [vmem:[%s3712_s6 + $0x288] sm:$0xff] %v380_v21  ;;  %v386_v24 = vld [vmem:[%s3707_s25 + $0x540] sm:$0xff] }
  0x60   : > { %383 = vst [vmem:[%s3712_s6 + $0x290] sm:$0xff] %v382_v22  ;;  %385 = vst [vmem:[%s3712_s6 + $0x298] sm:$0xff] %v384_v23  ;;  %v388_v25 = vld [vmem:[%s3707_s25 + $0x548] sm:$0xff]  ;;  %v390_v26 = vld [vmem:[%s3707_s25 + $0x550] sm:$0xff] }
  0x61   : > { %387 = vst [vmem:[%s3712_s6 + $0x2a0] sm:$0xff] %v386_v24  ;;  %389 = vst [vmem:[%s3712_s6 + $0x2a8] sm:$0xff] %v388_v25  ;;  %v392_v27 = vld [vmem:[%s3707_s25 + $0x558] sm:$0xff]  ;;  %v394_v28 = vld [vmem:[%s3707_s25 + $0x580] sm:$0xff] }
  0x62   : > { %391 = vst [vmem:[%s3712_s6 + $0x2b0] sm:$0xff] %v390_v26  ;;  %v396_v29 = vld [vmem:[%s3707_s25 + $0x588] sm:$0xff]  ;;  %393 = vst [vmem:[%s3712_s6 + $0x2b8] sm:$0xff] %v392_v27  ;;  %v398_v30 = vld [vmem:[%s3707_s25 + $0x590] sm:$0xff] }
  0x63   : > { %395 = vst [vmem:[%s3712_s6 + $0x2c0] sm:$0xff] %v394_v28  ;;  %397 = vst [vmem:[%s3712_s6 + $0x2c8] sm:$0xff] %v396_v29  ;;  %v400_v31 = vld [vmem:[%s3707_s25 + $0x598] sm:$0xff]  ;;  %v402_v32 = vld [vmem:[%s3707_s25 + $0x5c0] sm:$0xff] }
  0x64   : > { %399 = vst [vmem:[%s3712_s6 + $0x2d0] sm:$0xff] %v398_v30  ;;  %401 = vst [vmem:[%s3712_s6 + $0x2d8] sm:$0xff] %v400_v31  ;;  %v404_v33 = vld [vmem:[%s3707_s25 + $0x5c8] sm:$0xff]  ;;  %v406_v34 = vld [vmem:[%s3707_s25 + $0x5d0] sm:$0xff] }
  0x65   : > { %403 = vst [vmem:[%s3712_s6 + $0x2e0] sm:$0xff] %v402_v32  ;;  %v408_v35 = vld [vmem:[%s3707_s25 + $0x5d8] sm:$0xff]  ;;  %405 = vst [vmem:[%s3712_s6 + $0x2e8] sm:$0xff] %v404_v33  ;;  %v410_v36 = vld [vmem:[%s3707_s25 + $0x600] sm:$0xff] }
  0x66   : > { %407 = vst [vmem:[%s3712_s6 + $0x2f0] sm:$0xff] %v406_v34  ;;  %409 = vst [vmem:[%s3712_s6 + $0x2f8] sm:$0xff] %v408_v35  ;;  %v412_v37 = vld [vmem:[%s3707_s25 + $0x608] sm:$0xff]  ;;  %v414_v38 = vld [vmem:[%s3707_s25 + $0x610] sm:$0xff] }
  0x67   : > { %411 = vst [vmem:[%s3712_s6 + $0x300] sm:$0xff] %v410_v36  ;;  %413 = vst [vmem:[%s3712_s6 + $0x308] sm:$0xff] %v412_v37  ;;  %v416_v39 = vld [vmem:[%s3707_s25 + $0x618] sm:$0xff]  ;;  %v418_v40 = vld [vmem:[%s3707_s25 + $0x640] sm:$0xff] }
  0x68   : > { %415 = vst [vmem:[%s3712_s6 + $0x310] sm:$0xff] %v414_v38  ;;  %v420_v41 = vld [vmem:[%s3707_s25 + $0x648] sm:$0xff]  ;;  %417 = vst [vmem:[%s3712_s6 + $0x318] sm:$0xff] %v416_v39  ;;  %v422_v42 = vld [vmem:[%s3707_s25 + $0x650] sm:$0xff] }
  0x69   : > { %419 = vst [vmem:[%s3712_s6 + $0x320] sm:$0xff] %v418_v40  ;;  %421 = vst [vmem:[%s3712_s6 + $0x328] sm:$0xff] %v420_v41  ;;  %v424_v43 = vld [vmem:[%s3707_s25 + $0x658] sm:$0xff]  ;;  %v426_v44 = vld [vmem:[%s3707_s25 + $0x680] sm:$0xff] }
  0x6a   : > { %423 = vst [vmem:[%s3712_s6 + $0x330] sm:$0xff] %v422_v42  ;;  %425 = vst [vmem:[%s3712_s6 + $0x338] sm:$0xff] %v424_v43  ;;  %v428_v45 = vld [vmem:[%s3707_s25 + $0x688] sm:$0xff]  ;;  %v430_v46 = vld [vmem:[%s3707_s25 + $0x690] sm:$0xff] }
  0x6b   : > { %427 = vst [vmem:[%s3712_s6 + $0x340] sm:$0xff] %v426_v44  ;;  %v432_v47 = vld [vmem:[%s3707_s25 + $0x698] sm:$0xff]  ;;  %429 = vst [vmem:[%s3712_s6 + $0x348] sm:$0xff] %v428_v45  ;;  %v434_v48 = vld [vmem:[%s3707_s25 + $0x6c0] sm:$0xff] }
  0x6c   : > { %431 = vst [vmem:[%s3712_s6 + $0x350] sm:$0xff] %v430_v46  ;;  %433 = vst [vmem:[%s3712_s6 + $0x358] sm:$0xff] %v432_v47  ;;  %v436_v49 = vld [vmem:[%s3707_s25 + $0x6c8] sm:$0xff]  ;;  %v438_v50 = vld [vmem:[%s3707_s25 + $0x6d0] sm:$0xff] }
  0x6d   : > { %435 = vst [vmem:[%s3712_s6 + $0x360] sm:$0xff] %v434_v48  ;;  %437 = vst [vmem:[%s3712_s6 + $0x368] sm:$0xff] %v436_v49  ;;  %v440_v51 = vld [vmem:[%s3707_s25 + $0x6d8] sm:$0xff]  ;;  %v442_v52 = vld [vmem:[%s3707_s25 + $0x700] sm:$0xff] }
  0x6e   : > { %439 = vst [vmem:[%s3712_s6 + $0x370] sm:$0xff] %v438_v50  ;;  %v444_v53 = vld [vmem:[%s3707_s25 + $0x708] sm:$0xff]  ;;  %441 = vst [vmem:[%s3712_s6 + $0x378] sm:$0xff] %v440_v51  ;;  %v446_v54 = vld [vmem:[%s3707_s25 + $0x710] sm:$0xff] }
  0x6f   : > { %443 = vst [vmem:[%s3712_s6 + $0x380] sm:$0xff] %v442_v52  ;;  %445 = vst [vmem:[%s3712_s6 + $0x388] sm:$0xff] %v444_v53  ;;  %v448_v55 = vld [vmem:[%s3707_s25 + $0x718] sm:$0xff]  ;;  %v450_v56 = vld [vmem:[%s3707_s25 + $0x740] sm:$0xff] }
  0x70   : > { %447 = vst [vmem:[%s3712_s6 + $0x390] sm:$0xff] %v446_v54  ;;  %449 = vst [vmem:[%s3712_s6 + $0x398] sm:$0xff] %v448_v55  ;;  %v452_v57 = vld [vmem:[%s3707_s25 + $0x748] sm:$0xff]  ;;  %v454_v58 = vld [vmem:[%s3707_s25 + $0x750] sm:$0xff] }
  0x71   : > { %451 = vst [vmem:[%s3712_s6 + $0x3a0] sm:$0xff] %v450_v56  ;;  %v456_v59 = vld [vmem:[%s3707_s25 + $0x758] sm:$0xff]  ;;  %453 = vst [vmem:[%s3712_s6 + $0x3a8] sm:$0xff] %v452_v57  ;;  %v458_v60 = vld [vmem:[%s3707_s25 + $0x780] sm:$0xff] }
  0x72   : > { %455 = vst [vmem:[%s3712_s6 + $0x3b0] sm:$0xff] %v454_v58  ;;  %457 = vst [vmem:[%s3712_s6 + $0x3b8] sm:$0xff] %v456_v59  ;;  %v460_v61 = vld [vmem:[%s3707_s25 + $0x788] sm:$0xff]  ;;  %v462_v62 = vld [vmem:[%s3707_s25 + $0x790] sm:$0xff] }
  0x73   : > { %459 = vst [vmem:[%s3712_s6 + $0x3c0] sm:$0xff] %v458_v60  ;;  %461 = vst [vmem:[%s3712_s6 + $0x3c8] sm:$0xff] %v460_v61  ;;  %v464_v63 = vld [vmem:[%s3707_s25 + $0x798] sm:$0xff]  ;;  %v466_v0 = vld [vmem:[%s3707_s25 + $0x7c0] sm:$0xff] }
  0x74   : > { %463 = vst [vmem:[%s3712_s6 + $0x3d0] sm:$0xff] %v462_v62  ;;  %v468_v1 = vld [vmem:[%s3707_s25 + $0x7c8] sm:$0xff]  ;;  %465 = vst [vmem:[%s3712_s6 + $0x3d8] sm:$0xff] %v464_v63  ;;  %v470_v2 = vld [vmem:[%s3707_s25 + $0x7d0] sm:$0xff] }
  0x75   : > { %467 = vst [vmem:[%s3712_s6 + $0x3e0] sm:$0xff] %v466_v0  ;;  %469 = vst [vmem:[%s3712_s6 + $0x3e8] sm:$0xff] %v468_v1  ;;  %v472_v3 = vld [vmem:[%s3707_s25 + $0x7d8] sm:$0xff]  ;;  %v474_v4 = vld [vmem:[%s3707_s25 + $0x800] sm:$0xff] }
  0x76   : > { %471 = vst [vmem:[%s3712_s6 + $0x3f0] sm:$0xff] %v470_v2  ;;  %473 = vst [vmem:[%s3712_s6 + $0x3f8] sm:$0xff] %v472_v3  ;;  %v476_v5 = vld [vmem:[%s3707_s25 + $0x808] sm:$0xff]  ;;  %v478_v6 = vld [vmem:[%s3707_s25 + $0x810] sm:$0xff] }
  0x77   : > { %475 = vst [vmem:[%s3712_s6 + $0x400] sm:$0xff] %v474_v4  ;;  %v480_v7 = vld [vmem:[%s3707_s25 + $0x818] sm:$0xff]  ;;  %477 = vst [vmem:[%s3712_s6 + $0x408] sm:$0xff] %v476_v5  ;;  %v482_v8 = vld [vmem:[%s3707_s25 + $0x840] sm:$0xff] }
  0x78   : > { %479 = vst [vmem:[%s3712_s6 + $0x410] sm:$0xff] %v478_v6  ;;  %481 = vst [vmem:[%s3712_s6 + $0x418] sm:$0xff] %v480_v7  ;;  %v484_v9 = vld [vmem:[%s3707_s25 + $0x848] sm:$0xff]  ;;  %v486_v10 = vld [vmem:[%s3707_s25 + $0x850] sm:$0xff] }
  0x79   : > { %483 = vst [vmem:[%s3712_s6 + $0x420] sm:$0xff] %v482_v8  ;;  %485 = vst [vmem:[%s3712_s6 + $0x428] sm:$0xff] %v484_v9  ;;  %v488_v11 = vld [vmem:[%s3707_s25 + $0x858] sm:$0xff]  ;;  %v490_v12 = vld [vmem:[%s3707_s25 + $0x880] sm:$0xff] }
  0x7a   : > { %487 = vst [vmem:[%s3712_s6 + $0x430] sm:$0xff] %v486_v10  ;;  %v492_v13 = vld [vmem:[%s3707_s25 + $0x888] sm:$0xff]  ;;  %489 = vst [vmem:[%s3712_s6 + $0x438] sm:$0xff] %v488_v11  ;;  %v494_v14 = vld [vmem:[%s3707_s25 + $0x890] sm:$0xff] }
  0x7b   : > { %491 = vst [vmem:[%s3712_s6 + $0x440] sm:$0xff] %v490_v12  ;;  %493 = vst [vmem:[%s3712_s6 + $0x448] sm:$0xff] %v492_v13  ;;  %v496_v15 = vld [vmem:[%s3707_s25 + $0x898] sm:$0xff]  ;;  %v498_v16 = vld [vmem:[%s3707_s25 + $0x8c0] sm:$0xff] }
  0x7c   : > { %495 = vst [vmem:[%s3712_s6 + $0x450] sm:$0xff] %v494_v14  ;;  %497 = vst [vmem:[%s3712_s6 + $0x458] sm:$0xff] %v496_v15  ;;  %v500_v17 = vld [vmem:[%s3707_s25 + $0x8c8] sm:$0xff]  ;;  %v502_v18 = vld [vmem:[%s3707_s25 + $0x8d0] sm:$0xff] }
  0x7d   : > { %499 = vst [vmem:[%s3712_s6 + $0x460] sm:$0xff] %v498_v16  ;;  %v504_v19 = vld [vmem:[%s3707_s25 + $0x8d8] sm:$0xff]  ;;  %501 = vst [vmem:[%s3712_s6 + $0x468] sm:$0xff] %v500_v17  ;;  %v506_v20 = vld [vmem:[%s3707_s25 + $0x900] sm:$0xff] }
  0x7e   : > { %503 = vst [vmem:[%s3712_s6 + $0x470] sm:$0xff] %v502_v18  ;;  %505 = vst [vmem:[%s3712_s6 + $0x478] sm:$0xff] %v504_v19  ;;  %v508_v21 = vld [vmem:[%s3707_s25 + $0x908] sm:$0xff]  ;;  %v510_v22 = vld [vmem:[%s3707_s25 + $0x910] sm:$0xff] }
  0x7f   : > { %507 = vst [vmem:[%s3712_s6 + $0x480] sm:$0xff] %v506_v20  ;;  %509 = vst [vmem:[%s3712_s6 + $0x488] sm:$0xff] %v508_v21  ;;  %v512_v23 = vld [vmem:[%s3707_s25 + $0x918] sm:$0xff]  ;;  %v514_v24 = vld [vmem:[%s3707_s25 + $0x940] sm:$0xff] }
  0x80   : > { %511 = vst [vmem:[%s3712_s6 + $0x490] sm:$0xff] %v510_v22  ;;  %v516_v25 = vld [vmem:[%s3707_s25 + $0x948] sm:$0xff]  ;;  %513 = vst [vmem:[%s3712_s6 + $0x498] sm:$0xff] %v512_v23  ;;  %v518_v26 = vld [vmem:[%s3707_s25 + $0x950] sm:$0xff] }
  0x81   : > { %515 = vst [vmem:[%s3712_s6 + $0x4a0] sm:$0xff] %v514_v24  ;;  %517 = vst [vmem:[%s3712_s6 + $0x4a8] sm:$0xff] %v516_v25  ;;  %v520_v27 = vld [vmem:[%s3707_s25 + $0x958] sm:$0xff]  ;;  %v522_v28 = vld [vmem:[%s3707_s25 + $0x980] sm:$0xff] }
  0x82   : > { %519 = vst [vmem:[%s3712_s6 + $0x4b0] sm:$0xff] %v518_v26  ;;  %521 = vst [vmem:[%s3712_s6 + $0x4b8] sm:$0xff] %v520_v27  ;;  %v524_v29 = vld [vmem:[%s3707_s25 + $0x988] sm:$0xff]  ;;  %v526_v30 = vld [vmem:[%s3707_s25 + $0x990] sm:$0xff] }
  0x83   : > { %523 = vst [vmem:[%s3712_s6 + $0x4c0] sm:$0xff] %v522_v28  ;;  %v528_v31 = vld [vmem:[%s3707_s25 + $0x998] sm:$0xff]  ;;  %525 = vst [vmem:[%s3712_s6 + $0x4c8] sm:$0xff] %v524_v29  ;;  %v530_v32 = vld [vmem:[%s3707_s25 + $0x9c0] sm:$0xff] }
  0x84   : > { %527 = vst [vmem:[%s3712_s6 + $0x4d0] sm:$0xff] %v526_v30  ;;  %529 = vst [vmem:[%s3712_s6 + $0x4d8] sm:$0xff] %v528_v31  ;;  %v532_v33 = vld [vmem:[%s3707_s25 + $0x9c8] sm:$0xff]  ;;  %v534_v34 = vld [vmem:[%s3707_s25 + $0x9d0] sm:$0xff] }
  0x85   : > { %531 = vst [vmem:[%s3712_s6 + $0x4e0] sm:$0xff] %v530_v32  ;;  %533 = vst [vmem:[%s3712_s6 + $0x4e8] sm:$0xff] %v532_v33  ;;  %v536_v35 = vld [vmem:[%s3707_s25 + $0x9d8] sm:$0xff]  ;;  %v538_v36 = vld [vmem:[%s3707_s25 + $0xa00] sm:$0xff] }
  0x86   : > { %535 = vst [vmem:[%s3712_s6 + $0x4f0] sm:$0xff] %v534_v34  ;;  %v540_v37 = vld [vmem:[%s3707_s25 + $0xa08] sm:$0xff]  ;;  %537 = vst [vmem:[%s3712_s6 + $0x4f8] sm:$0xff] %v536_v35  ;;  %v542_v38 = vld [vmem:[%s3707_s25 + $0xa10] sm:$0xff] }
  0x87   : > { %539 = vst [vmem:[%s3712_s6 + $0x500] sm:$0xff] %v538_v36  ;;  %541 = vst [vmem:[%s3712_s6 + $0x508] sm:$0xff] %v540_v37  ;;  %v544_v39 = vld [vmem:[%s3707_s25 + $0xa18] sm:$0xff]  ;;  %v546_v40 = vld [vmem:[%s3707_s25 + $0xa40] sm:$0xff] }
  0x88   : > { %543 = vst [vmem:[%s3712_s6 + $0x510] sm:$0xff] %v542_v38  ;;  %545 = vst [vmem:[%s3712_s6 + $0x518] sm:$0xff] %v544_v39  ;;  %v548_v41 = vld [vmem:[%s3707_s25 + $0xa48] sm:$0xff]  ;;  %v550_v42 = vld [vmem:[%s3707_s25 + $0xa50] sm:$0xff] }
  0x89   : > { %547 = vst [vmem:[%s3712_s6 + $0x520] sm:$0xff] %v546_v40  ;;  %v552_v43 = vld [vmem:[%s3707_s25 + $0xa58] sm:$0xff]  ;;  %549 = vst [vmem:[%s3712_s6 + $0x528] sm:$0xff] %v548_v41  ;;  %v554_v44 = vld [vmem:[%s3707_s25 + $0xa80] sm:$0xff] }
  0x8a   : > { %551 = vst [vmem:[%s3712_s6 + $0x530] sm:$0xff] %v550_v42  ;;  %553 = vst [vmem:[%s3712_s6 + $0x538] sm:$0xff] %v552_v43  ;;  %v556_v45 = vld [vmem:[%s3707_s25 + $0xa88] sm:$0xff]  ;;  %v558_v46 = vld [vmem:[%s3707_s25 + $0xa90] sm:$0xff] }
  0x8b   : > { %555 = vst [vmem:[%s3712_s6 + $0x540] sm:$0xff] %v554_v44  ;;  %557 = vst [vmem:[%s3712_s6 + $0x548] sm:$0xff] %v556_v45  ;;  %v560_v47 = vld [vmem:[%s3707_s25 + $0xa98] sm:$0xff]  ;;  %v562_v48 = vld [vmem:[%s3707_s25 + $0xac0] sm:$0xff] }
  0x8c   : > { %559 = vst [vmem:[%s3712_s6 + $0x550] sm:$0xff] %v558_v46  ;;  %v564_v49 = vld [vmem:[%s3707_s25 + $0xac8] sm:$0xff]  ;;  %561 = vst [vmem:[%s3712_s6 + $0x558] sm:$0xff] %v560_v47  ;;  %v566_v50 = vld [vmem:[%s3707_s25 + $0xad0] sm:$0xff] }
  0x8d   : > { %563 = vst [vmem:[%s3712_s6 + $0x560] sm:$0xff] %v562_v48  ;;  %565 = vst [vmem:[%s3712_s6 + $0x568] sm:$0xff] %v564_v49  ;;  %v568_v51 = vld [vmem:[%s3707_s25 + $0xad8] sm:$0xff]  ;;  %v570_v52 = vld [vmem:[%s3707_s25 + $0xb00] sm:$0xff] }
  0x8e   : > { %567 = vst [vmem:[%s3712_s6 + $0x570] sm:$0xff] %v566_v50  ;;  %569 = vst [vmem:[%s3712_s6 + $0x578] sm:$0xff] %v568_v51  ;;  %v572_v53 = vld [vmem:[%s3707_s25 + $0xb08] sm:$0xff]  ;;  %v574_v54 = vld [vmem:[%s3707_s25 + $0xb10] sm:$0xff] }
  0x8f   : > { %571 = vst [vmem:[%s3712_s6 + $0x580] sm:$0xff] %v570_v52  ;;  %v576_v55 = vld [vmem:[%s3707_s25 + $0xb18] sm:$0xff]  ;;  %573 = vst [vmem:[%s3712_s6 + $0x588] sm:$0xff] %v572_v53  ;;  %v578_v56 = vld [vmem:[%s3707_s25 + $0xb40] sm:$0xff] }
  0x90   : > { %575 = vst [vmem:[%s3712_s6 + $0x590] sm:$0xff] %v574_v54  ;;  %577 = vst [vmem:[%s3712_s6 + $0x598] sm:$0xff] %v576_v55  ;;  %v580_v57 = vld [vmem:[%s3707_s25 + $0xb48] sm:$0xff]  ;;  %v582_v58 = vld [vmem:[%s3707_s25 + $0xb50] sm:$0xff] }
  0x91   : > { %579 = vst [vmem:[%s3712_s6 + $0x5a0] sm:$0xff] %v578_v56  ;;  %581 = vst [vmem:[%s3712_s6 + $0x5a8] sm:$0xff] %v580_v57  ;;  %v584_v59 = vld [vmem:[%s3707_s25 + $0xb58] sm:$0xff]  ;;  %v586_v60 = vld [vmem:[%s3707_s25 + $0xb80] sm:$0xff] }
  0x92   : > { %583 = vst [vmem:[%s3712_s6 + $0x5b0] sm:$0xff] %v582_v58  ;;  %v588_v61 = vld [vmem:[%s3707_s25 + $0xb88] sm:$0xff]  ;;  %585 = vst [vmem:[%s3712_s6 + $0x5b8] sm:$0xff] %v584_v59  ;;  %v590_v62 = vld [vmem:[%s3707_s25 + $0xb90] sm:$0xff] }
  0x93   : > { %587 = vst [vmem:[%s3712_s6 + $0x5c0] sm:$0xff] %v586_v60  ;;  %589 = vst [vmem:[%s3712_s6 + $0x5c8] sm:$0xff] %v588_v61  ;;  %v592_v63 = vld [vmem:[%s3707_s25 + $0xb98] sm:$0xff]  ;;  %v594_v0 = vld [vmem:[%s3707_s25 + $0xbc0] sm:$0xff] }
  0x94   : > { %591 = vst [vmem:[%s3712_s6 + $0x5d0] sm:$0xff] %v590_v62  ;;  %593 = vst [vmem:[%s3712_s6 + $0x5d8] sm:$0xff] %v592_v63  ;;  %v596_v1 = vld [vmem:[%s3707_s25 + $0xbc8] sm:$0xff]  ;;  %v598_v2 = vld [vmem:[%s3707_s25 + $0xbd0] sm:$0xff] }
  0x95   : > { %595 = vst [vmem:[%s3712_s6 + $0x5e0] sm:$0xff] %v594_v0  ;;  %v600_v3 = vld [vmem:[%s3707_s25 + $0xbd8] sm:$0xff]  ;;  %597 = vst [vmem:[%s3712_s6 + $0x5e8] sm:$0xff] %v596_v1  ;;  %v602_v4 = vld [vmem:[%s3707_s25 + $0xc00] sm:$0xff] }
  0x96   : > { %599 = vst [vmem:[%s3712_s6 + $0x5f0] sm:$0xff] %v598_v2  ;;  %601 = vst [vmem:[%s3712_s6 + $0x5f8] sm:$0xff] %v600_v3  ;;  %v604_v5 = vld [vmem:[%s3707_s25 + $0xc08] sm:$0xff]  ;;  %v606_v6 = vld [vmem:[%s3707_s25 + $0xc10] sm:$0xff] }
  0x97   : > { %603 = vst [vmem:[%s3712_s6 + $0x600] sm:$0xff] %v602_v4  ;;  %605 = vst [vmem:[%s3712_s6 + $0x608] sm:$0xff] %v604_v5  ;;  %v608_v7 = vld [vmem:[%s3707_s25 + $0xc18] sm:$0xff]  ;;  %v610_v8 = vld [vmem:[%s3707_s25 + $0xc40] sm:$0xff] }
  0x98   : > { %607 = vst [vmem:[%s3712_s6 + $0x610] sm:$0xff] %v606_v6  ;;  %v612_v9 = vld [vmem:[%s3707_s25 + $0xc48] sm:$0xff]  ;;  %609 = vst [vmem:[%s3712_s6 + $0x618] sm:$0xff] %v608_v7  ;;  %v614_v10 = vld [vmem:[%s3707_s25 + $0xc50] sm:$0xff] }
  0x99   : > { %611 = vst [vmem:[%s3712_s6 + $0x620] sm:$0xff] %v610_v8  ;;  %613 = vst [vmem:[%s3712_s6 + $0x628] sm:$0xff] %v612_v9  ;;  %v616_v11 = vld [vmem:[%s3707_s25 + $0xc58] sm:$0xff]  ;;  %v618_v12 = vld [vmem:[%s3707_s25 + $0xc80] sm:$0xff] }
  0x9a   : > { %615 = vst [vmem:[%s3712_s6 + $0x630] sm:$0xff] %v614_v10  ;;  %617 = vst [vmem:[%s3712_s6 + $0x638] sm:$0xff] %v616_v11  ;;  %v620_v13 = vld [vmem:[%s3707_s25 + $0xc88] sm:$0xff]  ;;  %v622_v14 = vld [vmem:[%s3707_s25 + $0xc90] sm:$0xff] }
  0x9b   : > { %619 = vst [vmem:[%s3712_s6 + $0x640] sm:$0xff] %v618_v12  ;;  %v624_v15 = vld [vmem:[%s3707_s25 + $0xc98] sm:$0xff]  ;;  %621 = vst [vmem:[%s3712_s6 + $0x648] sm:$0xff] %v620_v13  ;;  %v626_v16 = vld [vmem:[%s3707_s25 + $0xcc0] sm:$0xff] }
  0x9c   : > { %623 = vst [vmem:[%s3712_s6 + $0x650] sm:$0xff] %v622_v14  ;;  %625 = vst [vmem:[%s3712_s6 + $0x658] sm:$0xff] %v624_v15  ;;  %v628_v17 = vld [vmem:[%s3707_s25 + $0xcc8] sm:$0xff]  ;;  %v630_v18 = vld [vmem:[%s3707_s25 + $0xcd0] sm:$0xff] }
  0x9d   : > { %627 = vst [vmem:[%s3712_s6 + $0x660] sm:$0xff] %v626_v16  ;;  %629 = vst [vmem:[%s3712_s6 + $0x668] sm:$0xff] %v628_v17  ;;  %v632_v19 = vld [vmem:[%s3707_s25 + $0xcd8] sm:$0xff]  ;;  %v634_v20 = vld [vmem:[%s3707_s25 + $0xd00] sm:$0xff] }
  0x9e   : > { %631 = vst [vmem:[%s3712_s6 + $0x670] sm:$0xff] %v630_v18  ;;  %v636_v21 = vld [vmem:[%s3707_s25 + $0xd08] sm:$0xff]  ;;  %633 = vst [vmem:[%s3712_s6 + $0x678] sm:$0xff] %v632_v19  ;;  %v638_v22 = vld [vmem:[%s3707_s25 + $0xd10] sm:$0xff] }
  0x9f   : > { %635 = vst [vmem:[%s3712_s6 + $0x680] sm:$0xff] %v634_v20  ;;  %637 = vst [vmem:[%s3712_s6 + $0x688] sm:$0xff] %v636_v21  ;;  %v640_v23 = vld [vmem:[%s3707_s25 + $0xd18] sm:$0xff]  ;;  %v642_v24 = vld [vmem:[%s3707_s25 + $0xd40] sm:$0xff] }
  0xa0   : > { %639 = vst [vmem:[%s3712_s6 + $0x690] sm:$0xff] %v638_v22  ;;  %641 = vst [vmem:[%s3712_s6 + $0x698] sm:$0xff] %v640_v23  ;;  %v644_v25 = vld [vmem:[%s3707_s25 + $0xd48] sm:$0xff]  ;;  %v646_v26 = vld [vmem:[%s3707_s25 + $0xd50] sm:$0xff] }
  0xa1   : > { %643 = vst [vmem:[%s3712_s6 + $0x6a0] sm:$0xff] %v642_v24  ;;  %v648_v27 = vld [vmem:[%s3707_s25 + $0xd58] sm:$0xff]  ;;  %645 = vst [vmem:[%s3712_s6 + $0x6a8] sm:$0xff] %v644_v25  ;;  %v650_v28 = vld [vmem:[%s3707_s25 + $0xd80] sm:$0xff] }
  0xa2   : > { %647 = vst [vmem:[%s3712_s6 + $0x6b0] sm:$0xff] %v646_v26  ;;  %649 = vst [vmem:[%s3712_s6 + $0x6b8] sm:$0xff] %v648_v27  ;;  %v652_v29 = vld [vmem:[%s3707_s25 + $0xd88] sm:$0xff]  ;;  %v654_v30 = vld [vmem:[%s3707_s25 + $0xd90] sm:$0xff] }
  0xa3   : > { %651 = vst [vmem:[%s3712_s6 + $0x6c0] sm:$0xff] %v650_v28  ;;  %653 = vst [vmem:[%s3712_s6 + $0x6c8] sm:$0xff] %v652_v29  ;;  %v656_v31 = vld [vmem:[%s3707_s25 + $0xd98] sm:$0xff]  ;;  %v658_v32 = vld [vmem:[%s3707_s25 + $0xdc0] sm:$0xff] }
  0xa4   : > { %655 = vst [vmem:[%s3712_s6 + $0x6d0] sm:$0xff] %v654_v30  ;;  %v660_v33 = vld [vmem:[%s3707_s25 + $0xdc8] sm:$0xff]  ;;  %657 = vst [vmem:[%s3712_s6 + $0x6d8] sm:$0xff] %v656_v31  ;;  %v662_v34 = vld [vmem:[%s3707_s25 + $0xdd0] sm:$0xff] }
  0xa5   : > { %659 = vst [vmem:[%s3712_s6 + $0x6e0] sm:$0xff] %v658_v32  ;;  %661 = vst [vmem:[%s3712_s6 + $0x6e8] sm:$0xff] %v660_v33  ;;  %v664_v35 = vld [vmem:[%s3707_s25 + $0xdd8] sm:$0xff]  ;;  %v666_v36 = vld [vmem:[%s3707_s25 + $0xe00] sm:$0xff] }
  0xa6   : > { %663 = vst [vmem:[%s3712_s6 + $0x6f0] sm:$0xff] %v662_v34  ;;  %665 = vst [vmem:[%s3712_s6 + $0x6f8] sm:$0xff] %v664_v35  ;;  %v668_v37 = vld [vmem:[%s3707_s25 + $0xe08] sm:$0xff]  ;;  %v670_v38 = vld [vmem:[%s3707_s25 + $0xe10] sm:$0xff] }
  0xa7   : > { %667 = vst [vmem:[%s3712_s6 + $0x700] sm:$0xff] %v666_v36  ;;  %v672_v39 = vld [vmem:[%s3707_s25 + $0xe18] sm:$0xff]  ;;  %669 = vst [vmem:[%s3712_s6 + $0x708] sm:$0xff] %v668_v37  ;;  %v674_v40 = vld [vmem:[%s3707_s25 + $0xe40] sm:$0xff] }
  0xa8   : > { %671 = vst [vmem:[%s3712_s6 + $0x710] sm:$0xff] %v670_v38  ;;  %673 = vst [vmem:[%s3712_s6 + $0x718] sm:$0xff] %v672_v39  ;;  %v676_v41 = vld [vmem:[%s3707_s25 + $0xe48] sm:$0xff]  ;;  %v678_v42 = vld [vmem:[%s3707_s25 + $0xe50] sm:$0xff] }
  0xa9   : > { %675 = vst [vmem:[%s3712_s6 + $0x720] sm:$0xff] %v674_v40  ;;  %677 = vst [vmem:[%s3712_s6 + $0x728] sm:$0xff] %v676_v41  ;;  %v680_v43 = vld [vmem:[%s3707_s25 + $0xe58] sm:$0xff]  ;;  %v682_v44 = vld [vmem:[%s3707_s25 + $0xe80] sm:$0xff] }
  0xaa   : > { %679 = vst [vmem:[%s3712_s6 + $0x730] sm:$0xff] %v678_v42  ;;  %v684_v45 = vld [vmem:[%s3707_s25 + $0xe88] sm:$0xff]  ;;  %681 = vst [vmem:[%s3712_s6 + $0x738] sm:$0xff] %v680_v43  ;;  %v686_v46 = vld [vmem:[%s3707_s25 + $0xe90] sm:$0xff] }
  0xab   : > { %683 = vst [vmem:[%s3712_s6 + $0x740] sm:$0xff] %v682_v44  ;;  %685 = vst [vmem:[%s3712_s6 + $0x748] sm:$0xff] %v684_v45  ;;  %v688_v47 = vld [vmem:[%s3707_s25 + $0xe98] sm:$0xff]  ;;  %v690_v48 = vld [vmem:[%s3707_s25 + $0xec0] sm:$0xff] }
  0xac   : > { %687 = vst [vmem:[%s3712_s6 + $0x750] sm:$0xff] %v686_v46  ;;  %689 = vst [vmem:[%s3712_s6 + $0x758] sm:$0xff] %v688_v47  ;;  %v692_v49 = vld [vmem:[%s3707_s25 + $0xec8] sm:$0xff]  ;;  %v694_v50 = vld [vmem:[%s3707_s25 + $0xed0] sm:$0xff] }
  0xad   : > { %691 = vst [vmem:[%s3712_s6 + $0x760] sm:$0xff] %v690_v48  ;;  %v696_v51 = vld [vmem:[%s3707_s25 + $0xed8] sm:$0xff]  ;;  %693 = vst [vmem:[%s3712_s6 + $0x768] sm:$0xff] %v692_v49  ;;  %v698_v52 = vld [vmem:[%s3707_s25 + $0xf00] sm:$0xff] }
  0xae   : > { %695 = vst [vmem:[%s3712_s6 + $0x770] sm:$0xff] %v694_v50  ;;  %697 = vst [vmem:[%s3712_s6 + $0x778] sm:$0xff] %v696_v51  ;;  %v700_v53 = vld [vmem:[%s3707_s25 + $0xf08] sm:$0xff]  ;;  %v702_v54 = vld [vmem:[%s3707_s25 + $0xf10] sm:$0xff] }
  0xaf   : > { %699 = vst [vmem:[%s3712_s6 + $0x780] sm:$0xff] %v698_v52  ;;  %701 = vst [vmem:[%s3712_s6 + $0x788] sm:$0xff] %v700_v53  ;;  %v704_v55 = vld [vmem:[%s3707_s25 + $0xf18] sm:$0xff]  ;;  %v706_v56 = vld [vmem:[%s3707_s25 + $0xf40] sm:$0xff] }
  0xb0   : > { %703 = vst [vmem:[%s3712_s6 + $0x790] sm:$0xff] %v702_v54  ;;  %v708_v57 = vld [vmem:[%s3707_s25 + $0xf48] sm:$0xff]  ;;  %705 = vst [vmem:[%s3712_s6 + $0x798] sm:$0xff] %v704_v55  ;;  %v710_v58 = vld [vmem:[%s3707_s25 + $0xf50] sm:$0xff] }
  0xb1   : > { %707 = vst [vmem:[%s3712_s6 + $0x7a0] sm:$0xff] %v706_v56  ;;  %709 = vst [vmem:[%s3712_s6 + $0x7a8] sm:$0xff] %v708_v57  ;;  %v712_v59 = vld [vmem:[%s3707_s25 + $0xf58] sm:$0xff]  ;;  %v714_v60 = vld [vmem:[%s3707_s25 + $0xf80] sm:$0xff] }
  0xb2   : > { %711 = vst [vmem:[%s3712_s6 + $0x7b0] sm:$0xff] %v710_v58  ;;  %713 = vst [vmem:[%s3712_s6 + $0x7b8] sm:$0xff] %v712_v59  ;;  %v716_v61 = vld [vmem:[%s3707_s25 + $0xf88] sm:$0xff]  ;;  %v718_v62 = vld [vmem:[%s3707_s25 + $0xf90] sm:$0xff] }
  0xb3   : > { %715 = vst [vmem:[%s3712_s6 + $0x7c0] sm:$0xff] %v714_v60  ;;  %v720_v63 = vld [vmem:[%s3707_s25 + $0xf98] sm:$0xff]  ;;  %717 = vst [vmem:[%s3712_s6 + $0x7c8] sm:$0xff] %v716_v61  ;;  %v722_v0 = vld [vmem:[%s3707_s25 + $0xfc0] sm:$0xff] }
  0xb4   : > { %719 = vst [vmem:[%s3712_s6 + $0x7d0] sm:$0xff] %v718_v62  ;;  %721 = vst [vmem:[%s3712_s6 + $0x7d8] sm:$0xff] %v720_v63  ;;  %v724_v1 = vld [vmem:[%s3707_s25 + $0xfc8] sm:$0xff]  ;;  %v726_v2 = vld [vmem:[%s3707_s25 + $0xfd0] sm:$0xff] }
  0xb5   : > { %723 = vst [vmem:[%s3712_s6 + $0x7e0] sm:$0xff] %v722_v0  ;;  %725 = vst [vmem:[%s3712_s6 + $0x7e8] sm:$0xff] %v724_v1  ;;  %v728_v3 = vld [vmem:[%s3707_s25 + $0xfd8] sm:$0xff] }
  0xb6   : > { %727 = vst [vmem:[%s3712_s6 + $0x7f0] sm:$0xff] %v726_v2  ;;  %729 = vst [vmem:[%s3712_s6 + $0x7f8] sm:$0xff] %v728_v3 }
  0xb7 PF: > { %p3082_p0 = scmp.ge.s32.totalorder %s3570_s22, 1  ;;  %p742_p1 = scmp.lt.s32.totalorder %s3570_s22, 5 }
  0xb9   : > { %p743_p2 = pnand %p3082_p0, %p742_p1 }
  0xba   : > { %s749_s0 = sand.u32 (!%p743_p2), 1, %s3546_s16   ;;  %s756_s5 = sand.u32 (!%p743_p2), 1, %s3538_s14  }
  0xbb   : > { %746 = sbr.rel (%p743_p2) target bundleno = 705 (0x2c1), region = 70  ;;  %s3083_s23 = sshll.u32 (!%p743_p2), %s749_s0, 5 }
  0xbc   : > { %s3084_s28 = sshll.u32 (!%p743_p2), %s756_s5, 11  ;;  %s783_s7 = sand.u32 (!%p743_p2), 1, %s3530_s12  }
  0xbd   : > { %s3086_s11 = sshll.u32 (!%p743_p2), %s3558_s19, 3  ;;  %s3085_s25 = sshll.u32 (!%p743_p2), %s783_s7, 6 }
  0xbe   : > { %p791_p3 = scmp.lt.s32.totalorder (!%p743_p2), %s3086_s11, 15  ;;  %s4235_s27 = scalar_lea.vmem (!%p743_p2), [#allocation3], %s3083_s23 }
  0xbf   : > { %s4237_s6 = scalar_lea.vmem (!%p743_p2), [#allocation4], %s3084_s28  ;;  %s4239_s1 = scalar_lea.vmem (!%p743_p2), [#allocation5], %s3085_s25 }
  0xc0   : > { %p3087_p4 = scmp.ne.s32.totalorder (!%p743_p2), %s3554_s18, 0 }
  0xc2   : > { %s4618_s11 = smov (!%p791_p3, %s3086_s11), 15  ;;  %800 = sbr.rel (%p3087_p4) target bundleno = 204 (0xcc), region = 82 }
  0xc3   : > { %s793_s4 = scalar_lea.vmem %s4589_s2, %s4618_s11  ;;  %v3572_v4 = vmov (!%p3087_p4), 0.0  }
  0xc4   : > { %801 = vst [vmem:[#allocation2] sm:$0xff] (!%p3087_p4), %v3572_v4  ;;  %802 = vst [vmem:[#allocation2 + $0x8] sm:$0xff] (!%p3087_p4), %v3572_v4 }
  0xc5   : > { %803 = vst [vmem:[#allocation2 + $0x10] sm:$0xff] (!%p3087_p4), %v3572_v4  ;;  %804 = vst [vmem:[#allocation2 + $0x18] sm:$0xff] (!%p3087_p4), %v3572_v4 }
  0xc6   : > { %805 = vst [vmem:[#allocation2 + $0x20] sm:$0xff] (!%p3087_p4), %v3572_v4  ;;  %806 = vst [vmem:[#allocation2 + $0x28] sm:$0xff] (!%p3087_p4), %v3572_v4 }
  0xc7   : > { %807 = vst [vmem:[#allocation2 + $0x30] sm:$0xff] (!%p3087_p4), %v3572_v4  ;;  %808 = vst [vmem:[#allocation2 + $0x38] sm:$0xff] (!%p3087_p4), %v3572_v4 }
  0xc8   : > { %809 = vst [vmem:[#allocation2 + $0x40] sm:$0xff] (!%p3087_p4), %v3572_v4  ;;  %810 = vst [vmem:[#allocation2 + $0x48] sm:$0xff] (!%p3087_p4), %v3572_v4 }
  0xc9   : > { %811 = vst [vmem:[#allocation2 + $0x50] sm:$0xff] %v3572_v4  ;;  %812 = vst [vmem:[#allocation2 + $0x58] sm:$0xff] %v3572_v4 }
  0xca   : > { %813 = vst [vmem:[#allocation2 + $0x60] sm:$0xff] %v3572_v4  ;;  %814 = vst [vmem:[#allocation2 + $0x68] sm:$0xff] %v3572_v4 }
  0xcb   : > { %815 = vst [vmem:[#allocation2 + $0x70] sm:$0xff] %v3572_v4  ;;  %816 = vst [vmem:[#allocation2 + $0x78] sm:$0xff] %v3572_v4 }
  0xcc PF: > { %v837_v5 = vld [vmem:[%s4237_s6] sm:$0xff]  ;;  %v838_v7 = vld [vmem:[%s4237_s6 + $0x8] sm:$0xff]  ;;  %p3348_p5 = scmp.ne.s32.totalorder %s3554_s18, 1 }
  0xcd   : > { %v841_v6 = vld [vmem:[%s4237_s6 + $0x20] sm:$0xff]  ;;  %v842_v9 = vld [vmem:[%s4237_s6 + $0x28] sm:$0xff] }
  0xce   : > { %v3093_v8 = vcombine.high %v837_v5, %v841_v6  ;;  %v3092_v10 = vcombine.low %v837_v5, %v841_v6  ;;  %v845_v11 = vld [vmem:[%s4237_s6 + $0x40] sm:$0xff]  ;;  %v3095_v13 = vcombine.high %v838_v7, %v842_v9  ;;  %v3094_v14 = vcombine.low %v838_v7, %v842_v9  ;;  %v846_v16 = vld [vmem:[%s4237_s6 + $0x48] sm:$0xff] }
  0xcf   : > { %v849_v12 = vld [vmem:[%s4237_s6 + $0x60] sm:$0xff]  ;;  %v850_v17 = vld [vmem:[%s4237_s6 + $0x68] sm:$0xff] }
  0xd0   : > { %v3101_v15 = vcombine.high %v845_v11, %v849_v12  ;;  %v853_v18 = vld [vmem:[%s4237_s6 + $0x80] sm:$0xff]  ;;  %2393 = vmatprep.subr.bf16.mxu0 %v3093_v8  ;;  %v3103_v19 = vcombine.high %v846_v16, %v850_v17  ;;  %v854_v21 = vld [vmem:[%s4237_s6 + $0x88] sm:$0xff]  ;;  %2479 = vmatprep.subr.bf16.mxu1 %v3095_v13  ;;  %v3100_v23 = vcombine.low %v845_v11, %v849_v12 }
  0xd1   : > { %v857_v20 = vld [vmem:[%s4237_s6 + $0xa0] sm:$0xff]  ;;  %v858_v22 = vld [vmem:[%s4237_s6 + $0xa8] sm:$0xff]  ;;  %2394 = vmatpush1.bf16.msra.mxu0 %v3092_v10  ;;  %2480 = vmatpush1.bf16.msra.mxu1 %v3094_v14  ;;  %v3102_v24 = vcombine.low %v846_v16, %v850_v17 }
  0xd2   : > { %2395 = vmatprep.subr.bf16.mxu0 %v3101_v15  ;;  %v3109_v25 = vcombine.high %v853_v18, %v857_v20  ;;  %2481 = vmatprep.subr.bf16.mxu1 %v3103_v19  ;;  %v3111_v26 = vcombine.high %v854_v21, %v858_v22  ;;  %v861_v27 = vld [vmem:[%s4237_s6 + $0xc0] sm:$0xff]  ;;  %v862_v29 = vld [vmem:[%s4237_s6 + $0xc8] sm:$0xff]  ;;  %v3108_v31 = vcombine.low %v853_v18, %v857_v20 }
  0xd3   : > { %v865_v28 = vld [vmem:[%s4237_s6 + $0xe0] sm:$0xff]  ;;  %v866_v30 = vld [vmem:[%s4237_s6 + $0xe8] sm:$0xff]  ;;  %v3110_v32 = vcombine.low %v854_v21, %v858_v22 }
  0xd4   : > { %v3117_v33 = vcombine.high %v861_v27, %v865_v28  ;;  %v3119_v34 = vcombine.high %v862_v29, %v866_v30  ;;  %v869_v35 = vld [vmem:[%s4237_s6 + $0x100] sm:$0xff]  ;;  %v870_v37 = vld [vmem:[%s4237_s6 + $0x108] sm:$0xff]  ;;  %v3116_v39 = vcombine.low %v861_v27, %v865_v28  ;;  %v3118_v40 = vcombine.low %v862_v29, %v866_v30 }
  0xd5   : > { %2396 = vmatpush1.bf16.msra.mxu0 %v3100_v23  ;;  %2482 = vmatpush1.bf16.msra.mxu1 %v3102_v24  ;;  %v873_v36 = vld [vmem:[%s4237_s6 + $0x120] sm:$0xff]  ;;  %v874_v38 = vld [vmem:[%s4237_s6 + $0x128] sm:$0xff] }
  0xd6   : > { %2397 = vmatprep.subr.bf16.mxu0 %v3109_v25  ;;  %2483 = vmatprep.subr.bf16.mxu1 %v3111_v26  ;;  %v3125_v41 = vcombine.high %v869_v35, %v873_v36  ;;  %v3127_v42 = vcombine.high %v870_v37, %v874_v38  ;;  %v877_v43 = vld [vmem:[%s4237_s6 + $0x140] sm:$0xff]  ;;  %v878_v45 = vld [vmem:[%s4237_s6 + $0x148] sm:$0xff]  ;;  %v3124_v47 = vcombine.low %v869_v35, %v873_v36 }
  0xd7   : > { %v881_v44 = vld [vmem:[%s4237_s6 + $0x160] sm:$0xff]  ;;  %v882_v46 = vld [vmem:[%s4237_s6 + $0x168] sm:$0xff]  ;;  %v3126_v48 = vcombine.low %v870_v37, %v874_v38 }
  0xd8   : > { %v3133_v49 = vcombine.high %v877_v43, %v881_v44  ;;  %v3135_v50 = vcombine.high %v878_v45, %v882_v46  ;;  %v885_v51 = vld [vmem:[%s4237_s6 + $0x180] sm:$0xff]  ;;  %v886_v53 = vld [vmem:[%s4237_s6 + $0x188] sm:$0xff]  ;;  %v3132_v55 = vcombine.low %v877_v43, %v881_v44  ;;  %v3134_v56 = vcombine.low %v878_v45, %v882_v46 }
  0xd9   : > { %2398 = vmatpush1.bf16.msra.mxu0 %v3108_v31  ;;  %2484 = vmatpush1.bf16.msra.mxu1 %v3110_v32  ;;  %v889_v52 = vld [vmem:[%s4237_s6 + $0x1a0] sm:$0xff]  ;;  %v890_v54 = vld [vmem:[%s4237_s6 + $0x1a8] sm:$0xff] }
  0xda   : > { %2399 = vmatprep.subr.bf16.mxu0 %v3117_v33  ;;  %2485 = vmatprep.subr.bf16.mxu1 %v3119_v34  ;;  %v3141_v57 = vcombine.high %v885_v51, %v889_v52  ;;  %v3143_v58 = vcombine.high %v886_v53, %v890_v54  ;;  %v893_v59 = vld [vmem:[%s4237_s6 + $0x1c0] sm:$0xff]  ;;  %v894_v62 = vld [vmem:[%s4237_s6 + $0x1c8] sm:$0xff]  ;;  %v3140_v0 = vcombine.low %v885_v51, %v889_v52 }
  0xdb   : > { %v897_v60 = vld [vmem:[%s4237_s6 + $0x1e0] sm:$0xff]  ;;  %v898_v63 = vld [vmem:[%s4237_s6 + $0x1e8] sm:$0xff]  ;;  %v3142_v1 = vcombine.low %v886_v53, %v890_v54 }
  0xdc   : > { %v4273_v61 = vld [vmem:[%s4235_s27 + $0x4] ss:$16 sps:$4 sm:$0xff]   ;;  %v3149_v2 = vcombine.high %v893_v59, %v897_v60  ;;  %v3151_v3 = vcombine.high %v894_v62, %v898_v63  ;;  %v902_v6 = vld [vmem:[%s4237_s6 + $0x208] sm:$0xff]  ;;  %v3148_v8 = vcombine.low %v893_v59, %v897_v60  ;;  %v3150_v9 = vcombine.low %v894_v62, %v898_v63 }
  0xdd   : > { %2400 = vmatpush1.bf16.msra.mxu0 %v3116_v39  ;;  %2486 = vmatpush1.bf16.msra.mxu1 %v3118_v40  ;;  %v901_v4 = vld [vmem:[%s4237_s6 + $0x200] sm:$0xff]  ;;  %v906_v7 = vld [vmem:[%s4237_s6 + $0x228] sm:$0xff] }
  0xde   : > { %2401 = vmatprep.subr.bf16.mxu0 %v3125_v41  ;;  %2487 = vmatprep.subr.bf16.mxu1 %v3127_v42  ;;  %v905_v5 = vld [vmem:[%s4237_s6 + $0x220] sm:$0xff]  ;;  %v3159_v11 = vcombine.high %v902_v6, %v906_v7  ;;  %v910_v14 = vld [vmem:[%s4237_s6 + $0x248] sm:$0xff]  ;;  %v3158_v17 = vcombine.low %v902_v6, %v906_v7 }
  0xdf   : > { %2425 = vmatprep.mubr.bf16.mxu0 %v4273_v61  ;;  %2511 = vmatprep.mubr.bf16.mxu1 %v4273_v61  ;;  %v3157_v10 = vcombine.high %v901_v4, %v905_v5  ;;  %v909_v12 = vld [vmem:[%s4237_s6 + $0x240] sm:$0xff]  ;;  %v914_v15 = vld [vmem:[%s4237_s6 + $0x268] sm:$0xff]  ;;  %v3156_v16 = vcombine.low %v901_v4, %v905_v5 }
  0xe0   : > { %v913_v13 = vld [vmem:[%s4237_s6 + $0x260] sm:$0xff]  ;;  %v3167_v19 = vcombine.high %v910_v14, %v914_v15  ;;  %v918_v22 = vld [vmem:[%s4237_s6 + $0x288] sm:$0xff]  ;;  %v3166_v25 = vcombine.low %v910_v14, %v914_v15 }
  0xe1   : > { %2402 = vmatpush1.bf16.msra.mxu0 %v3124_v47  ;;  %2488 = vmatpush1.bf16.msra.mxu1 %v3126_v48  ;;  %v3165_v18 = vcombine.high %v909_v12, %v913_v13  ;;  %v917_v20 = vld [vmem:[%s4237_s6 + $0x280] sm:$0xff]  ;;  %v922_v23 = vld [vmem:[%s4237_s6 + $0x2a8] sm:$0xff]  ;;  %v3164_v24 = vcombine.low %v909_v12, %v913_v13 }
  0xe2   : > { %2403 = vmatprep.subr.bf16.mxu0 %v3133_v49  ;;  %2489 = vmatprep.subr.bf16.mxu1 %v3135_v50  ;;  %v921_v21 = vld [vmem:[%s4237_s6 + $0x2a0] sm:$0xff]  ;;  %v3175_v27 = vcombine.high %v918_v22, %v922_v23  ;;  %v926_v30 = vld [vmem:[%s4237_s6 + $0x2c8] sm:$0xff]  ;;  %v3174_v33 = vcombine.low %v918_v22, %v922_v23 }
  0xe3   : > { %v3173_v26 = vcombine.high %v917_v20, %v921_v21  ;;  %v925_v28 = vld [vmem:[%s4237_s6 + $0x2c0] sm:$0xff]  ;;  %v930_v31 = vld [vmem:[%s4237_s6 + $0x2e8] sm:$0xff]  ;;  %v3172_v32 = vcombine.low %v917_v20, %v921_v21 }
  0xe4   : > { %v929_v29 = vld [vmem:[%s4237_s6 + $0x2e0] sm:$0xff]  ;;  %v3183_v35 = vcombine.high %v926_v30, %v930_v31  ;;  %v934_v38 = vld [vmem:[%s4237_s6 + $0x308] sm:$0xff]  ;;  %v3182_v41 = vcombine.low %v926_v30, %v930_v31 }
  0xe5   : > { %2404 = vmatpush1.bf16.msra.mxu0 %v3132_v55  ;;  %2490 = vmatpush1.bf16.msra.mxu1 %v3134_v56  ;;  %v3181_v34 = vcombine.high %v925_v28, %v929_v29  ;;  %v933_v36 = vld [vmem:[%s4237_s6 + $0x300] sm:$0xff]  ;;  %v938_v39 = vld [vmem:[%s4237_s6 + $0x328] sm:$0xff]  ;;  %v3180_v40 = vcombine.low %v925_v28, %v929_v29 }
  0xe6   : > { %2405 = vmatprep.subr.bf16.mxu0 %v3141_v57  ;;  %2491 = vmatprep.subr.bf16.mxu1 %v3143_v58  ;;  %v937_v37 = vld [vmem:[%s4237_s6 + $0x320] sm:$0xff]  ;;  %v3191_v43 = vcombine.high %v934_v38, %v938_v39  ;;  %v942_v46 = vld [vmem:[%s4237_s6 + $0x348] sm:$0xff]  ;;  %v3190_v49 = vcombine.low %v934_v38, %v938_v39 }
  0xe7   : > { %v3189_v42 = vcombine.high %v933_v36, %v937_v37  ;;  %v941_v44 = vld [vmem:[%s4237_s6 + $0x340] sm:$0xff]  ;;  %v946_v47 = vld [vmem:[%s4237_s6 + $0x368] sm:$0xff]  ;;  %v3188_v48 = vcombine.low %v933_v36, %v937_v37 }
  0xe8   : > { %v945_v45 = vld [vmem:[%s4237_s6 + $0x360] sm:$0xff]  ;;  %v3199_v51 = vcombine.high %v942_v46, %v946_v47  ;;  %v950_v54 = vld [vmem:[%s4237_s6 + $0x388] sm:$0xff]  ;;  %v3198_v57 = vcombine.low %v942_v46, %v946_v47 }
  0xe9   : > { %2406 = vmatpush1.bf16.msra.mxu0 %v3140_v0  ;;  %2492 = vmatpush1.bf16.msra.mxu1 %v3142_v1  ;;  %v3197_v50 = vcombine.high %v941_v44, %v945_v45  ;;  %v949_v52 = vld [vmem:[%s4237_s6 + $0x380] sm:$0xff]  ;;  %v954_v55 = vld [vmem:[%s4237_s6 + $0x3a8] sm:$0xff]  ;;  %v3196_v56 = vcombine.low %v941_v44, %v945_v45 }
  0xea   : > { %2407 = vmatprep.subr.bf16.mxu0 %v3149_v2  ;;  %2493 = vmatprep.subr.bf16.mxu1 %v3151_v3  ;;  %v953_v53 = vld [vmem:[%s4237_s6 + $0x3a0] sm:$0xff]  ;;  %v3207_v59 = vcombine.high %v950_v54, %v954_v55  ;;  %v958_v63 = vld [vmem:[%s4237_s6 + $0x3c8] sm:$0xff]  ;;  %v3206_v2 = vcombine.low %v950_v54, %v954_v55 }
  0xeb   : > { %v3205_v58 = vcombine.high %v949_v52, %v953_v53  ;;  %v957_v60 = vld [vmem:[%s4237_s6 + $0x3c0] sm:$0xff]  ;;  %v962_v0 = vld [vmem:[%s4237_s6 + $0x3e8] sm:$0xff]  ;;  %v3204_v1 = vcombine.low %v949_v52, %v953_v53 }
  0xec   : > { %v961_v62 = vld [vmem:[%s4237_s6 + $0x3e0] sm:$0xff]  ;;  %v3215_v4 = vcombine.high %v958_v63, %v962_v0  ;;  %v966_v7 = vld [vmem:[%s4237_s6 + $0x408] sm:$0xff] }
  0xed   : > { %2408 = vmatpush1.bf16.msra.mxu0 %v3148_v8  ;;  %2494 = vmatpush1.bf16.msra.mxu1 %v3150_v9  ;;  %v3213_v3 = vcombine.high %v957_v60, %v961_v62  ;;  %v965_v5 = vld [vmem:[%s4237_s6 + $0x400] sm:$0xff]  ;;  %v970_v8 = vld [vmem:[%s4237_s6 + $0x428] sm:$0xff]  ;;  %v3212_v9 = vcombine.low %v957_v60, %v961_v62 }
  0xee   : > { %2409 = vmatprep.subr.bf16.mxu0 %v3157_v10  ;;  %2495 = vmatprep.subr.bf16.mxu1 %v3159_v11  ;;  %v969_v6 = vld [vmem:[%s4237_s6 + $0x420] sm:$0xff]  ;;  %v3214_v10 = vcombine.low %v958_v63, %v962_v0  ;;  %v3223_v12 = vcombine.high %v966_v7, %v970_v8 }
  0xef   : > { %v3221_v11 = vcombine.high %v965_v5, %v969_v6  ;;  %v973_v13 = vld [vmem:[%s4237_s6 + $0x440] sm:$0xff] }
  0xf0   : > { %v977_v14 = vld [vmem:[%s4237_s6 + $0x460] sm:$0xff] }
  0xf1   : > { %2410 = vmatpush1.bf16.msra.mxu0 %v3156_v16  ;;  %2496 = vmatpush1.bf16.msra.mxu1 %v3158_v17  ;;  %v4318_v15 = vld [vmem:[%s4235_s27] ss:$16 sps:$4 sm:$0xff]   ;;  %v974_v16 = vld [vmem:[%s4237_s6 + $0x448] sm:$0xff]  ;;  %v3229_v20 = vcombine.high %v973_v13, %v977_v14 }
  0xf2   : > { %2411 = vmatprep.subr.bf16.mxu0 %v3165_v18  ;;  %2497 = vmatprep.subr.bf16.mxu1 %v3167_v19  ;;  %v978_v17 = vld [vmem:[%s4237_s6 + $0x468] sm:$0xff]  ;;  %v3220_v18 = vcombine.low %v965_v5, %v969_v6  ;;  %v3222_v19 = vcombine.low %v966_v7, %v970_v8  ;;  %v981_v22 = vld [vmem:[%s4237_s6 + $0x480] sm:$0xff] }
  0xf3   : > { %v3231_v21 = vcombine.high %v974_v16, %v978_v17  ;;  %v985_v23 = vld [vmem:[%s4237_s6 + $0x4a0] sm:$0xff]  ;;  %v3230_v28 = vcombine.low %v974_v16, %v978_v17 }
  0xf4   : > { %v3237_v29 = vcombine.high %v981_v22, %v985_v23  ;;  %v989_v31 = vld [vmem:[%s4237_s6 + $0x4c0] sm:$0xff] }
  0xf5   : > { %2412 = vmatpush1.bf16.msra.mxu0 %v3164_v24  ;;  %2498 = vmatpush1.bf16.msra.mxu1 %v3166_v25  ;;  %v4325_v24 = vld [vmem:[%s4235_s27 + $0xc] ss:$16 sps:$4 sm:$0xff]   ;;  %v997_v39 = vld [vmem:[%s4237_s6 + $0x500] sm:$0xff] }
  0xf6   : > { %2413 = vmatprep.subr.bf16.mxu0 %v3173_v26  ;;  %2499 = vmatprep.subr.bf16.mxu1 %v3175_v27  ;;  %v982_v25 = vld [vmem:[%s4237_s6 + $0x488] sm:$0xff]  ;;  %v3228_v27 = vcombine.low %v973_v13, %v977_v14  ;;  %v1005_v47 = vld [vmem:[%s4237_s6 + $0x540] sm:$0xff] }
  0xf7   : > { %v986_v26 = vld [vmem:[%s4237_s6 + $0x4a8] sm:$0xff]  ;;  %v1013_v55 = vld [vmem:[%s4237_s6 + $0x580] sm:$0xff] }
  0xf8   : > { %v3239_v30 = vcombine.high %v982_v25, %v986_v26  ;;  %v3238_v36 = vcombine.low %v982_v25, %v986_v26  ;;  %v1021_v0 = vld [vmem:[%s4237_s6 + $0x5c0] sm:$0xff] }
  0xf9   : > { %2414 = vmatpush1.bf16.msra.mxu0 %v3172_v32  ;;  %2500 = vmatpush1.bf16.msra.mxu1 %v3174_v33  ;;  %v993_v32 = vld [vmem:[%s4237_s6 + $0x4e0] sm:$0xff]  ;;  %v990_v33 = vld [vmem:[%s4237_s6 + $0x4c8] sm:$0xff] }
  0xfa   : > { %2415 = vmatprep.subr.bf16.mxu0 %v3181_v34  ;;  %2501 = vmatprep.subr.bf16.mxu1 %v3183_v35  ;;  %v994_v34 = vld [vmem:[%s4237_s6 + $0x4e8] sm:$0xff]  ;;  %v3236_v35 = vcombine.low %v981_v22, %v985_v23  ;;  %v3245_v37 = vcombine.high %v989_v31, %v993_v32  ;;  %v1029_v8 = vld [vmem:[%s4237_s6 + $0x600] sm:$0xff] }
  0xfb   : > { %v3247_v38 = vcombine.high %v990_v33, %v994_v34  ;;  %v3246_v44 = vcombine.low %v990_v33, %v994_v34  ;;  %v1037_v17 = vld [vmem:[%s4237_s6 + $0x640] sm:$0xff] }
  0xfc   : > { %v1045_v26 = vld [vmem:[%s4237_s6 + $0x680] sm:$0xff] }
  0xfd   : > { %2416 = vmatpush1.bf16.msra.mxu0 %v3180_v40  ;;  %2502 = vmatpush1.bf16.msra.mxu1 %v3182_v41  ;;  %v1001_v40 = vld [vmem:[%s4237_s6 + $0x520] sm:$0xff]  ;;  %v998_v41 = vld [vmem:[%s4237_s6 + $0x508] sm:$0xff] }
  0xfe   : > { %2417 = vmatprep.subr.bf16.mxu0 %v3189_v42  ;;  %2503 = vmatprep.subr.bf16.mxu1 %v3191_v43  ;;  %v1002_v42 = vld [vmem:[%s4237_s6 + $0x528] sm:$0xff]  ;;  %v3244_v43 = vcombine.low %v989_v31, %v993_v32  ;;  %v3253_v45 = vcombine.high %v997_v39, %v1001_v40  ;;  %v1053_v34 = vld [vmem:[%s4237_s6 + $0x6c0] sm:$0xff] }
  0xff   : > { %v3255_v46 = vcombine.high %v998_v41, %v1002_v42  ;;  %v3254_v52 = vcombine.low %v998_v41, %v1002_v42  ;;  %v1061_v42 = vld [vmem:[%s4237_s6 + $0x700] sm:$0xff] }
 0x101   : > { %2418 = vmatpush1.bf16.msra.mxu0 %v3188_v48  ;;  %2504 = vmatpush1.bf16.msra.mxu1 %v3190_v49  ;;  %v1009_v48 = vld [vmem:[%s4237_s6 + $0x560] sm:$0xff]  ;;  %v1006_v49 = vld [vmem:[%s4237_s6 + $0x548] sm:$0xff] }
 0x102   : > { %2419 = vmatprep.subr.bf16.mxu0 %v3197_v50  ;;  %2505 = vmatprep.subr.bf16.mxu1 %v3199_v51  ;;  %v1010_v50 = vld [vmem:[%s4237_s6 + $0x568] sm:$0xff]  ;;  %v3252_v51 = vcombine.low %v997_v39, %v1001_v40  ;;  %v3261_v53 = vcombine.high %v1005_v47, %v1009_v48 }
 0x103   : > { %v3263_v54 = vcombine.high %v1006_v49, %v1010_v50  ;;  %v3262_v60 = vcombine.low %v1006_v49, %v1010_v50  ;;  %v1069_v50 = vld [vmem:[%s4237_s6 + $0x740] sm:$0xff] }
 0x105   : > { %2420 = vmatpush1.bf16.msra.mxu0 %v3196_v56  ;;  %2506 = vmatpush1.bf16.msra.mxu1 %v3198_v57  ;;  %v1017_v56 = vld [vmem:[%s4237_s6 + $0x5a0] sm:$0xff]  ;;  %v1014_v57 = vld [vmem:[%s4237_s6 + $0x588] sm:$0xff] }
 0x106   : > { %2421 = vmatprep.subr.bf16.mxu0 %v3205_v58  ;;  %2507 = vmatprep.subr.bf16.mxu1 %v3207_v59  ;;  %v1018_v58 = vld [vmem:[%s4237_s6 + $0x5a8] sm:$0xff]  ;;  %v3260_v59 = vcombine.low %v1005_v47, %v1009_v48  ;;  %v3269_v62 = vcombine.high %v1013_v55, %v1017_v56 }
 0x107   : > { %v3271_v63 = vcombine.high %v1014_v57, %v1018_v58  ;;  %v3270_v5 = vcombine.low %v1014_v57, %v1018_v58  ;;  %v1077_v58 = vld [vmem:[%s4237_s6 + $0x780] sm:$0xff] }
 0x109   : > { %2422 = vmatpush1.bf16.msra.mxu0 %v3204_v1  ;;  %2508 = vmatpush1.bf16.msra.mxu1 %v3206_v2  ;;  %v1025_v1 = vld [vmem:[%s4237_s6 + $0x5e0] sm:$0xff]  ;;  %v1022_v2 = vld [vmem:[%s4237_s6 + $0x5c8] sm:$0xff] }
 0x10a   : > { %2423 = vmatprep.subr.bf16.mxu0 %v3213_v3  ;;  %2509 = vmatprep.subr.bf16.mxu1 %v3215_v4  ;;  %v1026_v3 = vld [vmem:[%s4237_s6 + $0x5e8] sm:$0xff]  ;;  %v3268_v4 = vcombine.low %v1013_v55, %v1017_v56  ;;  %v3277_v6 = vcombine.high %v1021_v0, %v1025_v1 }
 0x10b   : > { %v3279_v7 = vcombine.high %v1022_v2, %v1026_v3  ;;  %v3278_v13 = vcombine.low %v1022_v2, %v1026_v3  ;;  %v1085_v3 = vld [vmem:[%s4237_s6 + $0x7c0] sm:$0xff] }
 0x10d   : > { %2424 = vmatpush1.bf16.msra.mxu0 %v3212_v9  ;;  %2510 = vmatpush1.bf16.msra.mxu1 %v3214_v10  ;;  %v1033_v9 = vld [vmem:[%s4237_s6 + $0x620] sm:$0xff]  ;;  %v1030_v10 = vld [vmem:[%s4237_s6 + $0x608] sm:$0xff] }
 0x10e   : > { %2436 = vmatprep.subr.bf16.mxu0 %v3221_v11  ;;  %2522 = vmatprep.subr.bf16.mxu1 %v3223_v12  ;;  %v1034_v11 = vld [vmem:[%s4237_s6 + $0x628] sm:$0xff]  ;;  %v3276_v12 = vcombine.low %v1021_v0, %v1025_v1  ;;  %v3285_v14 = vcombine.high %v1029_v8, %v1033_v9 }
 0x10f   : > { %v3287_v16 = vcombine.high %v1030_v10, %v1034_v11  ;;  %v3286_v22 = vcombine.low %v1030_v10, %v1034_v11  ;;  %v839_v11 = vld [vmem:[%s4237_s6 + $0x10] sm:$0xff] }
 0x110   : > { %2426 = vmatmul.mubr.bf16.vlgmr.msra.gmra.mrb[0].mxu0 %v4318_v15  ;;  %2512 = vmatmul.mubr.bf16.vlgmr.msra.gmra.mrb[0].mxu1 %v4318_v15 }
 0x111   : > { %2437 = vmatpush1.bf16.msra.mxu0 %v3220_v18  ;;  %2523 = vmatpush1.bf16.msra.mxu1 %v3222_v19  ;;  %v1041_v18 = vld [vmem:[%s4237_s6 + $0x660] sm:$0xff]  ;;  %v1038_v19 = vld [vmem:[%s4237_s6 + $0x648] sm:$0xff] }
 0x112   : > { %2438 = vmatprep.subr.bf16.mxu0 %v3229_v20  ;;  %2524 = vmatprep.subr.bf16.mxu1 %v3231_v21  ;;  %v1042_v20 = vld [vmem:[%s4237_s6 + $0x668] sm:$0xff]  ;;  %v3284_v21 = vcombine.low %v1029_v8, %v1033_v9  ;;  %v3293_v23 = vcombine.high %v1037_v17, %v1041_v18 }
 0x113   : > { %2468 = vmatprep.mubr.bf16.mxu0 %v4325_v24  ;;  %2554 = vmatprep.mubr.bf16.mxu1 %v4325_v24  ;;  %v3295_v25 = vcombine.high %v1038_v19, %v1042_v20  ;;  %v3294_v31 = vcombine.low %v1038_v19, %v1042_v20  ;;  %v847_v20 = vld [vmem:[%s4237_s6 + $0x50] sm:$0xff] }
 0x115   : > { %2439 = vmatpush1.bf16.msra.mxu0 %v3228_v27  ;;  %2525 = vmatpush1.bf16.msra.mxu1 %v3230_v28  ;;  %v1049_v27 = vld [vmem:[%s4237_s6 + $0x6a0] sm:$0xff]  ;;  %v1046_v28 = vld [vmem:[%s4237_s6 + $0x688] sm:$0xff] }
 0x116   : > { %2440 = vmatprep.subr.bf16.mxu0 %v3237_v29  ;;  %2526 = vmatprep.subr.bf16.mxu1 %v3239_v30  ;;  %v1050_v29 = vld [vmem:[%s4237_s6 + $0x6a8] sm:$0xff]  ;;  %v3292_v30 = vcombine.low %v1037_v17, %v1041_v18  ;;  %v3301_v32 = vcombine.high %v1045_v26, %v1049_v27 }
 0x117   : > { %v3303_v33 = vcombine.high %v1046_v28, %v1050_v29  ;;  %v3302_v39 = vcombine.low %v1046_v28, %v1050_v29 }
 0x119   : > { %2441 = vmatpush1.bf16.msra.mxu0 %v3236_v35  ;;  %2527 = vmatpush1.bf16.msra.mxu1 %v3238_v36  ;;  %v1057_v35 = vld [vmem:[%s4237_s6 + $0x6e0] sm:$0xff]  ;;  %v1054_v36 = vld [vmem:[%s4237_s6 + $0x6c8] sm:$0xff] }
 0x11a   : > { %2442 = vmatprep.subr.bf16.mxu0 %v3245_v37  ;;  %2528 = vmatprep.subr.bf16.mxu1 %v3247_v38  ;;  %v1058_v37 = vld [vmem:[%s4237_s6 + $0x6e8] sm:$0xff]  ;;  %v3300_v38 = vcombine.low %v1045_v26, %v1049_v27  ;;  %v3309_v40 = vcombine.high %v1053_v34, %v1057_v35 }
 0x11b   : > { %v3311_v41 = vcombine.high %v1054_v36, %v1058_v37  ;;  %v3310_v47 = vcombine.low %v1054_v36, %v1058_v37 }
 0x11d   : > { %2443 = vmatpush1.bf16.msra.mxu0 %v3244_v43  ;;  %2529 = vmatpush1.bf16.msra.mxu1 %v3246_v44  ;;  %v1065_v43 = vld [vmem:[%s4237_s6 + $0x720] sm:$0xff]  ;;  %v1062_v44 = vld [vmem:[%s4237_s6 + $0x708] sm:$0xff] }
 0x11e   : > { %2444 = vmatprep.subr.bf16.mxu0 %v3253_v45  ;;  %2530 = vmatprep.subr.bf16.mxu1 %v3255_v46  ;;  %v1066_v45 = vld [vmem:[%s4237_s6 + $0x728] sm:$0xff]  ;;  %v3308_v46 = vcombine.low %v1053_v34, %v1057_v35  ;;  %v3317_v48 = vcombine.high %v1061_v42, %v1065_v43 }
 0x11f   : > { %v3319_v49 = vcombine.high %v1062_v44, %v1066_v45  ;;  %v3318_v55 = vcombine.low %v1062_v44, %v1066_v45 }
 0x121   : > { %2445 = vmatpush1.bf16.msra.mxu0 %v3252_v51  ;;  %2531 = vmatpush1.bf16.msra.mxu1 %v3254_v52  ;;  %v1073_v51 = vld [vmem:[%s4237_s6 + $0x760] sm:$0xff]  ;;  %v1070_v52 = vld [vmem:[%s4237_s6 + $0x748] sm:$0xff] }
 0x122   : > { %2446 = vmatprep.subr.bf16.mxu0 %v3261_v53  ;;  %2532 = vmatprep.subr.bf16.mxu1 %v3263_v54  ;;  %v1074_v53 = vld [vmem:[%s4237_s6 + $0x768] sm:$0xff]  ;;  %v3316_v54 = vcombine.low %v1061_v42, %v1065_v43  ;;  %v3325_v56 = vcombine.high %v1069_v50, %v1073_v51 }
 0x123   : > { %v3327_v57 = vcombine.high %v1070_v52, %v1074_v53  ;;  %v3326_v0 = vcombine.low %v1070_v52, %v1074_v53  ;;  %v879_v53 = vld [vmem:[%s4237_s6 + $0x150] sm:$0xff] }
 0x125   : > { %2447 = vmatpush1.bf16.msra.mxu0 %v3260_v59  ;;  %2533 = vmatpush1.bf16.msra.mxu1 %v3262_v60  ;;  %v1081_v59 = vld [vmem:[%s4237_s6 + $0x7a0] sm:$0xff]  ;;  %v1078_v60 = vld [vmem:[%s4237_s6 + $0x788] sm:$0xff] }
 0x126   : > { %2448 = vmatprep.subr.bf16.mxu0 %v3269_v62  ;;  %2534 = vmatprep.subr.bf16.mxu1 %v3271_v63  ;;  %v1082_v62 = vld [vmem:[%s4237_s6 + $0x7a8] sm:$0xff]  ;;  %v3324_v63 = vcombine.low %v1069_v50, %v1073_v51  ;;  %v3333_v1 = vcombine.high %v1077_v58, %v1081_v59 }
 0x127   : > { %v3335_v2 = vcombine.high %v1078_v60, %v1082_v62  ;;  %v3334_v8 = vcombine.low %v1078_v60, %v1082_v62  ;;  %v887_v62 = vld [vmem:[%s4237_s6 + $0x190] sm:$0xff] }
 0x129   : > { %2449 = vmatpush1.bf16.msra.mxu0 %v3268_v4  ;;  %2535 = vmatpush1.bf16.msra.mxu1 %v3270_v5  ;;  %v1089_v4 = vld [vmem:[%s4237_s6 + $0x7e0] sm:$0xff]  ;;  %v1086_v5 = vld [vmem:[%s4237_s6 + $0x7c8] sm:$0xff] }
 0x12a   : > { %2450 = vmatprep.subr.bf16.mxu0 %v3277_v6  ;;  %2536 = vmatprep.subr.bf16.mxu1 %v3279_v7  ;;  %v1090_v6 = vld [vmem:[%s4237_s6 + $0x7e8] sm:$0xff]  ;;  %v3332_v7 = vcombine.low %v1077_v58, %v1081_v59  ;;  %v3341_v9 = vcombine.high %v1085_v3, %v1089_v4 }
 0x12b   : > { %v3343_v10 = vcombine.high %v1086_v5, %v1090_v6  ;;  %v3342_v17 = vcombine.low %v1086_v5, %v1090_v6  ;;  %v895_v6 = vld [vmem:[%s4237_s6 + $0x1d0] sm:$0xff] }
 0x12d   : > { %2451 = vmatpush1.bf16.msra.mxu0 %v3276_v12  ;;  %2537 = vmatpush1.bf16.msra.mxu1 %v3278_v13  ;;  %v843_v12 = vld [vmem:[%s4237_s6 + $0x30] sm:$0xff]  ;;  %v840_v13 = vld [vmem:[%s4237_s6 + $0x18] sm:$0xff] }
 0x12e   : > { %2452 = vmatprep.subr.bf16.mxu0 %v3285_v14  ;;  %2538 = vmatprep.subr.bf16.mxu1 %v3287_v16  ;;  %v844_v14 = vld [vmem:[%s4237_s6 + $0x38] sm:$0xff]  ;;  %v3340_v16 = vcombine.low %v1085_v3, %v1089_v4  ;;  %v3097_v18 = vcombine.high %v839_v11, %v843_v12  ;;  %v3096_v26 = vcombine.low %v839_v11, %v843_v12 }
 0x12f   : > { %v3099_v19 = vcombine.high %v840_v13, %v844_v14  ;;  %v3098_v27 = vcombine.low %v840_v13, %v844_v14  ;;  %v903_v14 = vld [vmem:[%s4237_s6 + $0x210] sm:$0xff] }
 0x131   : > { %2453 = vmatpush1.bf16.msra.mxu0 %v3284_v21  ;;  %2539 = vmatpush1.bf16.msra.mxu1 %v3286_v22  ;;  %v851_v21 = vld [vmem:[%s4237_s6 + $0x70] sm:$0xff]  ;;  %v4392_v22 = vld [vmem:[%s4235_s27 + $0x8] ss:$16 sps:$4 sm:$0xff]  }
 0x132   : > { %2454 = vmatprep.subr.bf16.mxu0 %v3293_v23  ;;  %2540 = vmatprep.subr.bf16.mxu1 %v3295_v25  ;;  %v848_v23 = vld [vmem:[%s4237_s6 + $0x58] sm:$0xff]  ;;  %v3105_v28 = vcombine.high %v847_v20, %v851_v21  ;;  %v3104_v34 = vcombine.low %v847_v20, %v851_v21 }
 0x133   : > { %v852_v25 = vld [vmem:[%s4237_s6 + $0x78] sm:$0xff] }
 0x134   : > { %v3107_v29 = vcombine.high %v848_v23, %v852_v25  ;;  %v3106_v35 = vcombine.low %v848_v23, %v852_v25  ;;  %v911_v25 = vld [vmem:[%s4237_s6 + $0x250] sm:$0xff] }
 0x135   : > { %2455 = vmatpush1.bf16.msra.mxu0 %v3292_v30  ;;  %2541 = vmatpush1.bf16.msra.mxu1 %v3294_v31  ;;  %v855_v30 = vld [vmem:[%s4237_s6 + $0x90] sm:$0xff] }
 0x136   : > { %2456 = vmatprep.subr.bf16.mxu0 %v3301_v32  ;;  %2542 = vmatprep.subr.bf16.mxu1 %v3303_v33  ;;  %v859_v31 = vld [vmem:[%s4237_s6 + $0xb0] sm:$0xff]  ;;  %v856_v32 = vld [vmem:[%s4237_s6 + $0x98] sm:$0xff] }
 0x137   : > { %v860_v33 = vld [vmem:[%s4237_s6 + $0xb8] sm:$0xff]  ;;  %v3113_v36 = vcombine.high %v855_v30, %v859_v31  ;;  %v3112_v42 = vcombine.low %v855_v30, %v859_v31 }
 0x138   : > { %v3115_v37 = vcombine.high %v856_v32, %v860_v33  ;;  %v3114_v43 = vcombine.low %v856_v32, %v860_v33  ;;  %v919_v33 = vld [vmem:[%s4237_s6 + $0x290] sm:$0xff] }
 0x139   : > { %2457 = vmatpush1.bf16.msra.mxu0 %v3300_v38  ;;  %2543 = vmatpush1.bf16.msra.mxu1 %v3302_v39  ;;  %v863_v38 = vld [vmem:[%s4237_s6 + $0xd0] sm:$0xff] }
 0x13a   : > { %2458 = vmatprep.subr.bf16.mxu0 %v3309_v40  ;;  %2544 = vmatprep.subr.bf16.mxu1 %v3311_v41  ;;  %v867_v39 = vld [vmem:[%s4237_s6 + $0xf0] sm:$0xff]  ;;  %v864_v40 = vld [vmem:[%s4237_s6 + $0xd8] sm:$0xff] }
 0x13b   : > { %v868_v41 = vld [vmem:[%s4237_s6 + $0xf8] sm:$0xff]  ;;  %v3121_v44 = vcombine.high %v863_v38, %v867_v39  ;;  %v3120_v50 = vcombine.low %v863_v38, %v867_v39 }
 0x13c   : > { %v3123_v45 = vcombine.high %v864_v40, %v868_v41 }
 0x13d   : > { %2459 = vmatpush1.bf16.msra.mxu0 %v3308_v46  ;;  %2545 = vmatpush1.bf16.msra.mxu1 %v3310_v47  ;;  %v871_v46 = vld [vmem:[%s4237_s6 + $0x110] sm:$0xff] }
 0x13e   : > { %2460 = vmatprep.subr.bf16.mxu0 %v3317_v48  ;;  %2546 = vmatprep.subr.bf16.mxu1 %v3319_v49  ;;  %v875_v47 = vld [vmem:[%s4237_s6 + $0x130] sm:$0xff]  ;;  %v872_v48 = vld [vmem:[%s4237_s6 + $0x118] sm:$0xff] }
 0x13f   : > { %v876_v49 = vld [vmem:[%s4237_s6 + $0x138] sm:$0xff]  ;;  %v3129_v51 = vcombine.high %v871_v46, %v875_v47 }
 0x140   : > { %v3131_v52 = vcombine.high %v872_v48, %v876_v49  ;;  %v3130_v58 = vcombine.low %v872_v48, %v876_v49  ;;  %v935_v49 = vld [vmem:[%s4237_s6 + $0x310] sm:$0xff] }
 0x141   : > { %2461 = vmatpush1.bf16.msra.mxu0 %v3316_v54  ;;  %2547 = vmatpush1.bf16.msra.mxu1 %v3318_v55  ;;  %v883_v54 = vld [vmem:[%s4237_s6 + $0x170] sm:$0xff]  ;;  %v880_v55 = vld [vmem:[%s4237_s6 + $0x158] sm:$0xff] }
 0x142   : > { %2462 = vmatprep.subr.bf16.mxu0 %v3325_v56  ;;  %2548 = vmatprep.subr.bf16.mxu1 %v3327_v57  ;;  %v884_v56 = vld [vmem:[%s4237_s6 + $0x178] sm:$0xff]  ;;  %v3128_v57 = vcombine.low %v871_v46, %v875_v47  ;;  %v3137_v59 = vcombine.high %v879_v53, %v883_v54 }
 0x143   : > { %v3139_v60 = vcombine.high %v880_v55, %v884_v56  ;;  %v3138_v3 = vcombine.low %v880_v55, %v884_v56  ;;  %v943_v56 = vld [vmem:[%s4237_s6 + $0x350] sm:$0xff] }
 0x145   : > { %2463 = vmatpush1.bf16.msra.mxu0 %v3324_v63  ;;  %2549 = vmatpush1.bf16.msra.mxu1 %v3326_v0  ;;  %v891_v63 = vld [vmem:[%s4237_s6 + $0x1b0] sm:$0xff]  ;;  %v888_v0 = vld [vmem:[%s4237_s6 + $0x198] sm:$0xff] }
 0x146   : > { %2464 = vmatprep.subr.bf16.mxu0 %v3333_v1  ;;  %2550 = vmatprep.subr.bf16.mxu1 %v3335_v2  ;;  %v892_v1 = vld [vmem:[%s4237_s6 + $0x1b8] sm:$0xff]  ;;  %v3136_v2 = vcombine.low %v879_v53, %v883_v54  ;;  %v3145_v4 = vcombine.high %v887_v62, %v891_v63 }
 0x147   : > { %v3147_v5 = vcombine.high %v888_v0, %v892_v1  ;;  %v3146_v11 = vcombine.low %v888_v0, %v892_v1  ;;  %v951_v1 = vld [vmem:[%s4237_s6 + $0x390] sm:$0xff] }
 0x149   : > { %2465 = vmatpush1.bf16.msra.mxu0 %v3332_v7  ;;  %2551 = vmatpush1.bf16.msra.mxu1 %v3334_v8  ;;  %v899_v7 = vld [vmem:[%s4237_s6 + $0x1f0] sm:$0xff]  ;;  %v896_v8 = vld [vmem:[%s4237_s6 + $0x1d8] sm:$0xff] }
 0x14a   : > { %2466 = vmatprep.subr.bf16.mxu0 %v3341_v9  ;;  %2552 = vmatprep.subr.bf16.mxu1 %v3343_v10  ;;  %v900_v9 = vld [vmem:[%s4237_s6 + $0x1f8] sm:$0xff]  ;;  %v3144_v10 = vcombine.low %v887_v62, %v891_v63  ;;  %v3153_v12 = vcombine.high %v895_v6, %v899_v7 }
 0x14b   : > { %v3155_v13 = vcombine.high %v896_v8, %v900_v9  ;;  %v3154_v20 = vcombine.low %v896_v8, %v900_v9  ;;  %v959_v9 = vld [vmem:[%s4237_s6 + $0x3d0] sm:$0xff] }
 0x14d   : > { %2467 = vmatpush1.bf16.msra.mxu0 %v3340_v16  ;;  %2553 = vmatpush1.bf16.msra.mxu1 %v3342_v17  ;;  %v907_v16 = vld [vmem:[%s4237_s6 + $0x230] sm:$0xff]  ;;  %v904_v17 = vld [vmem:[%s4237_s6 + $0x218] sm:$0xff] }
 0x14e   : > { %2565 = vmatprep.subr.bf16.mxu0 %v3097_v18  ;;  %2651 = vmatprep.subr.bf16.mxu1 %v3099_v19  ;;  %v908_v18 = vld [vmem:[%s4237_s6 + $0x238] sm:$0xff]  ;;  %v3152_v19 = vcombine.low %v895_v6, %v899_v7  ;;  %v3161_v21 = vcombine.high %v903_v14, %v907_v16 }
 0x14f   : > { %v3163_v23 = vcombine.high %v904_v17, %v908_v18  ;;  %v3162_v30 = vcombine.low %v904_v17, %v908_v18  ;;  %v967_v18 = vld [vmem:[%s4237_s6 + $0x410] sm:$0xff] }
 0x150   : > { %2469 = vmatmul.mubr.bf16.vlgmr.msra.gmra.mrb[0].mxu0 %v4392_v22  ;;  %2555 = vmatmul.mubr.bf16.vlgmr.msra.gmra.mrb[0].mxu1 %v4392_v22 }
 0x151   : > { %2566 = vmatpush1.bf16.msra.mxu0 %v3096_v26  ;;  %2652 = vmatpush1.bf16.msra.mxu1 %v3098_v27  ;;  %v915_v26 = vld [vmem:[%s4237_s6 + $0x270] sm:$0xff]  ;;  %v912_v27 = vld [vmem:[%s4237_s6 + $0x258] sm:$0xff] }
 0x152   : > { %2567 = vmatprep.subr.bf16.mxu0 %v3105_v28  ;;  %2653 = vmatprep.subr.bf16.mxu1 %v3107_v29  ;;  %v916_v28 = vld [vmem:[%s4237_s6 + $0x278] sm:$0xff]  ;;  %v3160_v29 = vcombine.low %v903_v14, %v907_v16  ;;  %v3169_v31 = vcombine.high %v911_v25, %v915_v26 }
 0x153   : > { %2597 = vmatprep.mubr.bf16.mxu0 %v4273_v61  ;;  %2683 = vmatprep.mubr.bf16.mxu1 %v4273_v61  ;;  %v3122_v61 = vcombine.low %v864_v40, %v868_v41  ;;  %v3171_v32 = vcombine.high %v912_v27, %v916_v28  ;;  %v3170_v38 = vcombine.low %v912_v27, %v916_v28  ;;  %v927_v41 = vld [vmem:[%s4237_s6 + $0x2d0] sm:$0xff] }
 0x154   : > { %v975_v28 = vld [vmem:[%s4237_s6 + $0x450] sm:$0xff] }
 0x155   : > { %2568 = vmatpush1.bf16.msra.mxu0 %v3104_v34  ;;  %2654 = vmatpush1.bf16.msra.mxu1 %v3106_v35  ;;  %v923_v34 = vld [vmem:[%s4237_s6 + $0x2b0] sm:$0xff]  ;;  %v920_v35 = vld [vmem:[%s4237_s6 + $0x298] sm:$0xff] }
 0x156   : > { %2569 = vmatprep.subr.bf16.mxu0 %v3113_v36  ;;  %2655 = vmatprep.subr.bf16.mxu1 %v3115_v37  ;;  %v924_v36 = vld [vmem:[%s4237_s6 + $0x2b8] sm:$0xff]  ;;  %v3168_v37 = vcombine.low %v911_v25, %v915_v26  ;;  %v3177_v39 = vcombine.high %v919_v33, %v923_v34 }
 0x157   : > { %v3179_v40 = vcombine.high %v920_v35, %v924_v36  ;;  %v3178_v46 = vcombine.low %v920_v35, %v924_v36  ;;  %v983_v36 = vld [vmem:[%s4237_s6 + $0x490] sm:$0xff] }
 0x159   : > { %2570 = vmatpush1.bf16.msra.mxu0 %v3112_v42  ;;  %2656 = vmatpush1.bf16.msra.mxu1 %v3114_v43  ;;  %v931_v42 = vld [vmem:[%s4237_s6 + $0x2f0] sm:$0xff]  ;;  %v928_v43 = vld [vmem:[%s4237_s6 + $0x2d8] sm:$0xff] }
 0x15a   : > { %2571 = vmatprep.subr.bf16.mxu0 %v3121_v44  ;;  %2657 = vmatprep.subr.bf16.mxu1 %v3123_v45  ;;  %v932_v44 = vld [vmem:[%s4237_s6 + $0x2f8] sm:$0xff]  ;;  %v3176_v45 = vcombine.low %v919_v33, %v923_v34  ;;  %v3185_v47 = vcombine.high %v927_v41, %v931_v42 }
 0x15b   : > { %v3187_v48 = vcombine.high %v928_v43, %v932_v44  ;;  %v3186_v53 = vcombine.low %v928_v43, %v932_v44  ;;  %v991_v44 = vld [vmem:[%s4237_s6 + $0x4d0] sm:$0xff] }
 0x15d   : > { %2572 = vmatpush1.bf16.msra.mxu0 %v3120_v50  ;;  %2658 = vmatpush1.bf16.msra.mxu1 %v3122_v61  ;;  %v939_v50 = vld [vmem:[%s4237_s6 + $0x330] sm:$0xff]  ;;  %v936_v61 = vld [vmem:[%s4237_s6 + $0x318] sm:$0xff] }
 0x15e   : > { %2573 = vmatprep.subr.bf16.mxu0 %v3129_v51  ;;  %2659 = vmatprep.subr.bf16.mxu1 %v3131_v52  ;;  %v940_v51 = vld [vmem:[%s4237_s6 + $0x338] sm:$0xff]  ;;  %v3184_v52 = vcombine.low %v927_v41, %v931_v42  ;;  %v3193_v54 = vcombine.high %v935_v49, %v939_v50 }
 0x15f   : > { %v3195_v55 = vcombine.high %v936_v61, %v940_v51  ;;  %v3194_v62 = vcombine.low %v936_v61, %v940_v51  ;;  %v999_v61 = vld [vmem:[%s4237_s6 + $0x510] sm:$0xff] }
 0x160   : > { %v1003_v51 = vld [vmem:[%s4237_s6 + $0x530] sm:$0xff] }
 0x161   : > { %2574 = vmatpush1.bf16.msra.mxu0 %v3128_v57  ;;  %2660 = vmatpush1.bf16.msra.mxu1 %v3130_v58  ;;  %v947_v57 = vld [vmem:[%s4237_s6 + $0x370] sm:$0xff]  ;;  %v944_v58 = vld [vmem:[%s4237_s6 + $0x358] sm:$0xff] }
 0x162   : > { %2575 = vmatprep.subr.bf16.mxu0 %v3137_v59  ;;  %2661 = vmatprep.subr.bf16.mxu1 %v3139_v60  ;;  %v948_v59 = vld [vmem:[%s4237_s6 + $0x378] sm:$0xff]  ;;  %v3192_v60 = vcombine.low %v935_v49, %v939_v50  ;;  %v3201_v63 = vcombine.high %v943_v56, %v947_v57 }
 0x163   : > { %v3203_v0 = vcombine.high %v944_v58, %v948_v59  ;;  %v3202_v6 = vcombine.low %v944_v58, %v948_v59  ;;  %v1011_v58 = vld [vmem:[%s4237_s6 + $0x570] sm:$0xff]  ;;  %v1008_v59 = vld [vmem:[%s4237_s6 + $0x558] sm:$0xff] }
 0x165   : > { %2576 = vmatpush1.bf16.msra.mxu0 %v3136_v2  ;;  %2662 = vmatpush1.bf16.msra.mxu1 %v3138_v3  ;;  %v955_v2 = vld [vmem:[%s4237_s6 + $0x3b0] sm:$0xff]  ;;  %v952_v3 = vld [vmem:[%s4237_s6 + $0x398] sm:$0xff] }
 0x166   : > { %2577 = vmatprep.subr.bf16.mxu0 %v3145_v4  ;;  %2663 = vmatprep.subr.bf16.mxu1 %v3147_v5  ;;  %v956_v4 = vld [vmem:[%s4237_s6 + $0x3b8] sm:$0xff]  ;;  %v3200_v5 = vcombine.low %v943_v56, %v947_v57  ;;  %v3209_v7 = vcombine.high %v951_v1, %v955_v2  ;;  %v1007_v57 = vld [vmem:[%s4237_s6 + $0x550] sm:$0xff] }
 0x167   : > { %v3211_v8 = vcombine.high %v952_v3, %v956_v4  ;;  %v3210_v14 = vcombine.low %v952_v3, %v956_v4  ;;  %v1019_v3 = vld [vmem:[%s4237_s6 + $0x5b0] sm:$0xff]  ;;  %v1016_v4 = vld [vmem:[%s4237_s6 + $0x598] sm:$0xff] }
 0x169   : > { %2578 = vmatpush1.bf16.msra.mxu0 %v3144_v10  ;;  %2664 = vmatpush1.bf16.msra.mxu1 %v3146_v11  ;;  %v963_v10 = vld [vmem:[%s4237_s6 + $0x3f0] sm:$0xff]  ;;  %v960_v11 = vld [vmem:[%s4237_s6 + $0x3d8] sm:$0xff] }
 0x16a   : > { %2579 = vmatprep.subr.bf16.mxu0 %v3153_v12  ;;  %2665 = vmatprep.subr.bf16.mxu1 %v3155_v13  ;;  %v964_v12 = vld [vmem:[%s4237_s6 + $0x3f8] sm:$0xff]  ;;  %v3208_v13 = vcombine.low %v951_v1, %v955_v2  ;;  %v3217_v16 = vcombine.high %v959_v9, %v963_v10  ;;  %v1015_v2 = vld [vmem:[%s4237_s6 + $0x590] sm:$0xff] }
 0x16b   : > { %v3219_v17 = vcombine.high %v960_v11, %v964_v12  ;;  %v3218_v25 = vcombine.low %v960_v11, %v964_v12  ;;  %v1027_v11 = vld [vmem:[%s4237_s6 + $0x5f0] sm:$0xff]  ;;  %v1024_v12 = vld [vmem:[%s4237_s6 + $0x5d8] sm:$0xff] }
 0x16d   : > { %2580 = vmatpush1.bf16.msra.mxu0 %v3152_v19  ;;  %2666 = vmatpush1.bf16.msra.mxu1 %v3154_v20  ;;  %v971_v19 = vld [vmem:[%s4237_s6 + $0x430] sm:$0xff]  ;;  %v968_v20 = vld [vmem:[%s4237_s6 + $0x418] sm:$0xff] }
 0x16e   : > { %2581 = vmatprep.subr.bf16.mxu0 %v3161_v21  ;;  %2667 = vmatprep.subr.bf16.mxu1 %v3163_v23  ;;  %v972_v21 = vld [vmem:[%s4237_s6 + $0x438] sm:$0xff]  ;;  %v3216_v23 = vcombine.low %v959_v9, %v963_v10  ;;  %v3225_v26 = vcombine.high %v967_v18, %v971_v19  ;;  %v1023_v10 = vld [vmem:[%s4237_s6 + $0x5d0] sm:$0xff] }
 0x16f   : > { %v3227_v27 = vcombine.high %v968_v20, %v972_v21  ;;  %v3226_v33 = vcombine.low %v968_v20, %v972_v21  ;;  %v1035_v20 = vld [vmem:[%s4237_s6 + $0x630] sm:$0xff]  ;;  %v1032_v21 = vld [vmem:[%s4237_s6 + $0x618] sm:$0xff] }
 0x171   : > { %2582 = vmatpush1.bf16.msra.mxu0 %v3160_v29  ;;  %2668 = vmatpush1.bf16.msra.mxu1 %v3162_v30  ;;  %v979_v29 = vld [vmem:[%s4237_s6 + $0x470] sm:$0xff]  ;;  %v976_v30 = vld [vmem:[%s4237_s6 + $0x458] sm:$0xff] }
 0x172   : > { %2583 = vmatprep.subr.bf16.mxu0 %v3169_v31  ;;  %2669 = vmatprep.subr.bf16.mxu1 %v3171_v32  ;;  %v980_v31 = vld [vmem:[%s4237_s6 + $0x478] sm:$0xff]  ;;  %v3224_v32 = vcombine.low %v967_v18, %v971_v19  ;;  %v3233_v34 = vcombine.high %v975_v28, %v979_v29  ;;  %v1031_v19 = vld [vmem:[%s4237_s6 + $0x610] sm:$0xff] }
 0x173   : > { %v3235_v35 = vcombine.high %v976_v30, %v980_v31  ;;  %v3234_v41 = vcombine.low %v976_v30, %v980_v31  ;;  %v1043_v30 = vld [vmem:[%s4237_s6 + $0x670] sm:$0xff]  ;;  %v1040_v31 = vld [vmem:[%s4237_s6 + $0x658] sm:$0xff] }
 0x175   : > { %2584 = vmatpush1.bf16.msra.mxu0 %v3168_v37  ;;  %2670 = vmatpush1.bf16.msra.mxu1 %v3170_v38  ;;  %v987_v37 = vld [vmem:[%s4237_s6 + $0x4b0] sm:$0xff]  ;;  %v984_v38 = vld [vmem:[%s4237_s6 + $0x498] sm:$0xff] }
 0x176   : > { %2585 = vmatprep.subr.bf16.mxu0 %v3177_v39  ;;  %2671 = vmatprep.subr.bf16.mxu1 %v3179_v40  ;;  %v988_v39 = vld [vmem:[%s4237_s6 + $0x4b8] sm:$0xff]  ;;  %v3232_v40 = vcombine.low %v975_v28, %v979_v29  ;;  %v3241_v42 = vcombine.high %v983_v36, %v987_v37  ;;  %v1039_v29 = vld [vmem:[%s4237_s6 + $0x650] sm:$0xff] }
 0x177   : > { %v3243_v43 = vcombine.high %v984_v38, %v988_v39 }
 0x179   : > { %2586 = vmatpush1.bf16.msra.mxu0 %v3176_v45  ;;  %2672 = vmatpush1.bf16.msra.mxu1 %v3178_v46  ;;  %v995_v45 = vld [vmem:[%s4237_s6 + $0x4f0] sm:$0xff]  ;;  %v992_v46 = vld [vmem:[%s4237_s6 + $0x4d8] sm:$0xff] }
 0x17a   : > { %2587 = vmatprep.subr.bf16.mxu0 %v3185_v47  ;;  %2673 = vmatprep.subr.bf16.mxu1 %v3187_v48  ;;  %v996_v47 = vld [vmem:[%s4237_s6 + $0x4f8] sm:$0xff]  ;;  %v3242_v48 = vcombine.low %v984_v38, %v988_v39  ;;  %v3249_v49 = vcombine.high %v991_v44, %v995_v45  ;;  %v1051_v38 = vld [vmem:[%s4237_s6 + $0x6b0] sm:$0xff] }
 0x17b   : > { %v3251_v50 = vcombine.high %v992_v46, %v996_v47  ;;  %v1048_v39 = vld [vmem:[%s4237_s6 + $0x698] sm:$0xff] }
 0x17d   : > { %2588 = vmatpush1.bf16.msra.mxu0 %v3184_v52  ;;  %2674 = vmatpush1.bf16.msra.mxu1 %v3186_v53  ;;  %v1000_v52 = vld [vmem:[%s4237_s6 + $0x518] sm:$0xff] }
 0x17e   : > { %2589 = vmatprep.subr.bf16.mxu0 %v3193_v54  ;;  %2675 = vmatprep.subr.bf16.mxu1 %v3195_v55  ;;  %v1004_v53 = vld [vmem:[%s4237_s6 + $0x538] sm:$0xff]  ;;  %v3248_v54 = vcombine.low %v991_v44, %v995_v45  ;;  %v3257_v55 = vcombine.high %v999_v61, %v1003_v51  ;;  %v1055_v45 = vld [vmem:[%s4237_s6 + $0x6d0] sm:$0xff] }
 0x17f   : > { %v3259_v56 = vcombine.high %v1000_v52, %v1004_v53 }
 0x181   : > { %2590 = vmatpush1.bf16.msra.mxu0 %v3192_v60  ;;  %2676 = vmatpush1.bf16.msra.mxu1 %v3194_v62  ;;  %v1012_v60 = vld [vmem:[%s4237_s6 + $0x578] sm:$0xff]  ;;  %v3256_v62 = vcombine.low %v999_v61, %v1003_v51  ;;  %v1063_v51 = vld [vmem:[%s4237_s6 + $0x710] sm:$0xff] }
 0x182   : > { %2591 = vmatprep.subr.bf16.mxu0 %v3201_v63  ;;  %2677 = vmatprep.subr.bf16.mxu1 %v3203_v0  ;;  %v3258_v63 = vcombine.low %v1000_v52, %v1004_v53  ;;  %v3265_v0 = vcombine.high %v1007_v57, %v1011_v58  ;;  %v3267_v1 = vcombine.high %v1008_v59, %v1012_v60  ;;  %v1067_v52 = vld [vmem:[%s4237_s6 + $0x730] sm:$0xff]  ;;  %v1064_v53 = vld [vmem:[%s4237_s6 + $0x718] sm:$0xff] }
 0x185   : > { %2592 = vmatpush1.bf16.msra.mxu0 %v3200_v5  ;;  %2678 = vmatpush1.bf16.msra.mxu1 %v3202_v6  ;;  %v1020_v5 = vld [vmem:[%s4237_s6 + $0x5b8] sm:$0xff]  ;;  %v3264_v6 = vcombine.low %v1007_v57, %v1011_v58  ;;  %v1071_v58 = vld [vmem:[%s4237_s6 + $0x750] sm:$0xff] }
 0x186   : > { %2593 = vmatprep.subr.bf16.mxu0 %v3209_v7  ;;  %2679 = vmatprep.subr.bf16.mxu1 %v3211_v8  ;;  %v3266_v7 = vcombine.low %v1008_v59, %v1012_v60  ;;  %v3273_v8 = vcombine.high %v1015_v2, %v1019_v3  ;;  %v3275_v9 = vcombine.high %v1016_v4, %v1020_v5  ;;  %v1075_v59 = vld [vmem:[%s4237_s6 + $0x770] sm:$0xff]  ;;  %v1072_v60 = vld [vmem:[%s4237_s6 + $0x758] sm:$0xff] }
 0x189   : > { %2594 = vmatpush1.bf16.msra.mxu0 %v3208_v13  ;;  %2680 = vmatpush1.bf16.msra.mxu1 %v3210_v14  ;;  %v1028_v13 = vld [vmem:[%s4237_s6 + $0x5f8] sm:$0xff]  ;;  %v3272_v14 = vcombine.low %v1015_v2, %v1019_v3  ;;  %v1079_v3 = vld [vmem:[%s4237_s6 + $0x790] sm:$0xff] }
 0x18a   : > { %2595 = vmatprep.subr.bf16.mxu0 %v3217_v16  ;;  %2681 = vmatprep.subr.bf16.mxu1 %v3219_v17  ;;  %v3274_v16 = vcombine.low %v1016_v4, %v1020_v5  ;;  %v3281_v17 = vcombine.high %v1023_v10, %v1027_v11  ;;  %v3283_v18 = vcombine.high %v1024_v12, %v1028_v13  ;;  %v1083_v4 = vld [vmem:[%s4237_s6 + $0x7b0] sm:$0xff]  ;;  %v1080_v5 = vld [vmem:[%s4237_s6 + $0x798] sm:$0xff] }
 0x18d   : > { %2596 = vmatpush1.bf16.msra.mxu0 %v3216_v23  ;;  %2682 = vmatpush1.bf16.msra.mxu1 %v3218_v25  ;;  %v1036_v23 = vld [vmem:[%s4237_s6 + $0x638] sm:$0xff]  ;;  %v3280_v25 = vcombine.low %v1023_v10, %v1027_v11  ;;  %v1087_v11 = vld [vmem:[%s4237_s6 + $0x7d0] sm:$0xff] }
 0x18e   : > { %2608 = vmatprep.subr.bf16.mxu0 %v3225_v26  ;;  %2694 = vmatprep.subr.bf16.mxu1 %v3227_v27  ;;  %v3282_v26 = vcombine.low %v1024_v12, %v1028_v13  ;;  %v3289_v27 = vcombine.high %v1031_v19, %v1035_v20  ;;  %v3291_v28 = vcombine.high %v1032_v21, %v1036_v23  ;;  %v1091_v12 = vld [vmem:[%s4237_s6 + $0x7f0] sm:$0xff]  ;;  %v1088_v13 = vld [vmem:[%s4237_s6 + $0x7d8] sm:$0xff] }
 0x190   : > { %2598 = vmatmul.mubr.bf16.vlgmr.msra.gmra.mrb[4].mxu0 %v4318_v15  ;;  %2684 = vmatmul.mubr.bf16.vlgmr.msra.gmra.mrb[4].mxu1 %v4318_v15  ;;  %v3240_v15 = vcombine.low %v983_v36, %v987_v37  ;;  %v1047_v37 = vld [vmem:[%s4237_s6 + $0x690] sm:$0xff] }
 0x191   : > { %2609 = vmatpush1.bf16.msra.mxu0 %v3224_v32  ;;  %2695 = vmatpush1.bf16.msra.mxu1 %v3226_v33  ;;  %v1044_v32 = vld [vmem:[%s4237_s6 + $0x678] sm:$0xff]  ;;  %v3288_v33 = vcombine.low %v1031_v19, %v1035_v20  ;;  %v3344_v20 = vcombine.low %v1087_v11, %v1091_v12 }
 0x192   : > { %2610 = vmatprep.subr.bf16.mxu0 %v3233_v34  ;;  %2696 = vmatprep.subr.bf16.mxu1 %v3235_v35  ;;  %v3290_v34 = vcombine.low %v1032_v21, %v1036_v23  ;;  %v3297_v35 = vcombine.high %v1039_v29, %v1043_v30  ;;  %v3299_v36 = vcombine.high %v1040_v31, %v1044_v32  ;;  %v817_v23 = vld [vmem:[#allocation2] sm:$0xff] }
 0x193   : > { %2640 = vmatprep.mubr.bf16.mxu0 %v4325_v24  ;;  %2726 = vmatprep.mubr.bf16.mxu1 %v4325_v24  ;;  %v3250_v24 = vcombine.low %v992_v46, %v996_v47  ;;  %v1059_v46 = vld [vmem:[%s4237_s6 + $0x6f0] sm:$0xff]  ;;  %v1056_v47 = vld [vmem:[%s4237_s6 + $0x6d8] sm:$0xff] }
 0x195   : > { %2611 = vmatpush1.bf16.msra.mxu0 %v3232_v40  ;;  %2697 = vmatpush1.bf16.msra.mxu1 %v3234_v41  ;;  %v1052_v40 = vld [vmem:[%s4237_s6 + $0x6b8] sm:$0xff]  ;;  %v3296_v41 = vcombine.low %v1039_v29, %v1043_v30  ;;  %v825_v29 = vld [vmem:[#allocation2 + $0x40] sm:$0xff] }
 0x196   : > { %2612 = vmatprep.subr.bf16.mxu0 %v3241_v42  ;;  %2698 = vmatprep.subr.bf16.mxu1 %v3243_v43  ;;  %v3298_v42 = vcombine.low %v1040_v31, %v1044_v32  ;;  %v3305_v43 = vcombine.high %v1047_v37, %v1051_v38  ;;  %v3307_v44 = vcombine.high %v1048_v39, %v1052_v40 }
 0x199   : > { %2613 = vmatpush1.bf16.msra.mxu0 %v3240_v15  ;;  %2699 = vmatpush1.bf16.msra.mxu1 %v3242_v48  ;;  %v1060_v15 = vld [vmem:[%s4237_s6 + $0x6f8] sm:$0xff]  ;;  %v3304_v48 = vcombine.low %v1047_v37, %v1051_v38 }
 0x19a   : > { %2614 = vmatprep.subr.bf16.mxu0 %v3249_v49  ;;  %2700 = vmatprep.subr.bf16.mxu1 %v3251_v50  ;;  %v3306_v49 = vcombine.low %v1048_v39, %v1052_v40  ;;  %v3313_v50 = vcombine.high %v1055_v45, %v1059_v46  ;;  %v3315_v61 = vcombine.high %v1056_v47, %v1060_v15  ;;  %v828_v39 = vld [vmem:[#allocation2 + $0x58] sm:$0xff] }
 0x19d   : > { %2615 = vmatpush1.bf16.msra.mxu0 %v3248_v54  ;;  %2701 = vmatpush1.bf16.msra.mxu1 %v3250_v24  ;;  %v1068_v54 = vld [vmem:[%s4237_s6 + $0x738] sm:$0xff]  ;;  %v3312_v24 = vcombine.low %v1055_v45, %v1059_v46 }
 0x19e   : > { %2616 = vmatprep.subr.bf16.mxu0 %v3257_v55  ;;  %2702 = vmatprep.subr.bf16.mxu1 %v3259_v56  ;;  %v3314_v55 = vcombine.low %v1056_v47, %v1060_v15  ;;  %v3321_v56 = vcombine.high %v1063_v51, %v1067_v52  ;;  %v3323_v57 = vcombine.high %v1064_v53, %v1068_v54  ;;  %v821_v47 = vld [vmem:[#allocation2 + $0x20] sm:$0xff]  ;;  %v823_v15 = vld [vmem:[#allocation2 + $0x30] sm:$0xff] }
 0x1a1   : > { %2617 = vmatpush1.bf16.msra.mxu0 %v3256_v62  ;;  %2703 = vmatpush1.bf16.msra.mxu1 %v3258_v63  ;;  %v1076_v62 = vld [vmem:[%s4237_s6 + $0x778] sm:$0xff]  ;;  %v3320_v63 = vcombine.low %v1063_v51, %v1067_v52 }
 0x1a2   : > { %2618 = vmatprep.subr.bf16.mxu0 %v3265_v0  ;;  %2704 = vmatprep.subr.bf16.mxu1 %v3267_v1  ;;  %v3322_v0 = vcombine.low %v1064_v53, %v1068_v54  ;;  %v3329_v1 = vcombine.high %v1071_v58, %v1075_v59  ;;  %v3331_v2 = vcombine.high %v1072_v60, %v1076_v62  ;;  %v831_v54 = vld [vmem:[#allocation2 + $0x70] sm:$0xff] }
 0x1a5   : > { %2619 = vmatpush1.bf16.msra.mxu0 %v3264_v6  ;;  %2705 = vmatpush1.bf16.msra.mxu1 %v3266_v7  ;;  %v1084_v6 = vld [vmem:[%s4237_s6 + $0x7b8] sm:$0xff]  ;;  %v3328_v7 = vcombine.low %v1071_v58, %v1075_v59 }
 0x1a6   : > { %2620 = vmatprep.subr.bf16.mxu0 %v3273_v8  ;;  %2706 = vmatprep.subr.bf16.mxu1 %v3275_v9  ;;  %v3330_v8 = vcombine.low %v1072_v60, %v1076_v62  ;;  %v3337_v9 = vcombine.high %v1079_v3, %v1083_v4  ;;  %v3339_v10 = vcombine.high %v1080_v5, %v1084_v6  ;;  %v832_v59 = vld [vmem:[#allocation2 + $0x78] sm:$0xff] }
 0x1a9   : > { %2621 = vmatpush1.bf16.msra.mxu0 %v3272_v14  ;;  %2707 = vmatpush1.bf16.msra.mxu1 %v3274_v16  ;;  %v1092_v14 = vld [vmem:[%s4237_s6 + $0x7f8] sm:$0xff]  ;;  %v3336_v16 = vcombine.low %v1079_v3, %v1083_v4 }
 0x1aa   : > { %2622 = vmatprep.subr.bf16.mxu0 %v3281_v17  ;;  %2708 = vmatprep.subr.bf16.mxu1 %v3283_v18  ;;  %v3338_v17 = vcombine.low %v1080_v5, %v1084_v6  ;;  %v3345_v18 = vcombine.high %v1087_v11, %v1091_v12  ;;  %v3347_v19 = vcombine.high %v1088_v13, %v1092_v14  ;;  %v2791_v5 = vlaneseq (!%p3348_p5) }
 0x1ab   : > { %v3346_v21 = vcombine.low %v1088_v13, %v1092_v14 }
 0x1ac   : > { %v2792_v6 = vshrl.u32 (!%p3348_p5), %v2791_v5, 7 }
 0x1ad   : > { %2623 = vmatpush1.bf16.msra.mxu0 %v3280_v25  ;;  %2709 = vmatpush1.bf16.msra.mxu1 %v3282_v26  ;;  %v819_v25 = vld [vmem:[#allocation2 + $0x10] sm:$0xff]  ;;  %v818_v26 = vld [vmem:[#allocation2 + $0x8] sm:$0xff] }
 0x1ae   : > { %2624 = vmatprep.subr.bf16.mxu0 %v3289_v27  ;;  %2710 = vmatprep.subr.bf16.mxu1 %v3291_v28  ;;  %v820_v28 = vld [vmem:[#allocation2 + $0x18] sm:$0xff]  ;;  %v2797_v11 = vsub.s32 (!%p3348_p5), 1, %v2792_v6  ;;  %v2801_v13 = vsub.s32 (!%p3348_p5), 2, %v2792_v6  ;;  %v2805_v14 = vsub.s32 (!%p3348_p5), 3, %v2792_v6 }
 0x1b1   : > { %2625 = vmatpush1.bf16.msra.mxu0 %v3288_v33  ;;  %2711 = vmatpush1.bf16.msra.mxu1 %v3290_v34  ;;  %v827_v33 = vld [vmem:[#allocation2 + $0x50] sm:$0xff]  ;;  %v826_v34 = vld [vmem:[#allocation2 + $0x48] sm:$0xff] }
 0x1b2   : > { %2626 = vmatprep.subr.bf16.mxu0 %v3297_v35  ;;  %2712 = vmatprep.subr.bf16.mxu1 %v3299_v36 }
 0x1b5   : > { %2627 = vmatpush1.bf16.msra.mxu0 %v3296_v41  ;;  %2713 = vmatpush1.bf16.msra.mxu1 %v3298_v42 }
 0x1b6   : > { %2628 = vmatprep.subr.bf16.mxu0 %v3305_v43  ;;  %2714 = vmatprep.subr.bf16.mxu1 %v3307_v44 }
 0x1b9   : > { %2629 = vmatpush1.bf16.msra.mxu0 %v3304_v48  ;;  %2715 = vmatpush1.bf16.msra.mxu1 %v3306_v49  ;;  %v822_v48 = vld [vmem:[#allocation2 + $0x28] sm:$0xff] }
 0x1ba   : > { %2630 = vmatprep.subr.bf16.mxu0 %v3313_v50  ;;  %2716 = vmatprep.subr.bf16.mxu1 %v3315_v61  ;;  %v824_v50 = vld [vmem:[#allocation2 + $0x38] sm:$0xff]  ;;  %v829_v61 = vld [vmem:[#allocation2 + $0x60] sm:$0xff] }
 0x1bd   : > { %2631 = vmatpush1.bf16.msra.mxu0 %v3312_v24  ;;  %2717 = vmatpush1.bf16.msra.mxu1 %v3314_v55  ;;  %v830_v24 = vld [vmem:[#allocation2 + $0x68] sm:$0xff] }
 0x1be   : > { %2632 = vmatprep.subr.bf16.mxu0 %v3321_v56  ;;  %2718 = vmatprep.subr.bf16.mxu1 %v3323_v57 }
 0x1c1   : > { %2633 = vmatpush1.bf16.msra.mxu0 %v3320_v63  ;;  %2719 = vmatpush1.bf16.msra.mxu1 %v3322_v0 }
 0x1c2   : > { %2634 = vmatprep.subr.bf16.mxu0 %v3329_v1  ;;  %2720 = vmatprep.subr.bf16.mxu1 %v3331_v2 }
 0x1c5   : > { %2635 = vmatpush1.bf16.msra.mxu0 %v3328_v7  ;;  %2721 = vmatpush1.bf16.msra.mxu1 %v3330_v8  ;;  %v2789_v8 = vld [vmem:[%s793_s4] sm:$0xff] (!%p3348_p5) }
 0x1c6   : > { %2636 = vmatprep.subr.bf16.mxu0 %v3337_v9  ;;  %2722 = vmatprep.subr.bf16.mxu1 %v3339_v10  ;;  %v2793_v10 = vsub.s32 (!%p3348_p5), 0, %v2792_v6 }
 0x1c9   : > { %2637 = vmatpush1.bf16.msra.mxu0 %v3336_v16  ;;  %2723 = vmatpush1.bf16.msra.mxu1 %v3338_v17 }
 0x1ca   : > { %2638 = vmatprep.subr.bf16.mxu0 %v3345_v18  ;;  %2724 = vmatprep.subr.bf16.mxu1 %v3347_v19  ;;  %v2809_v18 = vsub.s32 (!%p3348_p5), 4, %v2792_v6  ;;  %v2813_v19 = vsub.s32 (!%p3348_p5), 5, %v2792_v6 }
 0x1cd   : > { %2639 = vmatpush1.bf16.msra.mxu0 %v3344_v20  ;;  %2725 = vmatpush1.bf16.msra.mxu1 %v3346_v21  ;;  %v2817_v20 = vsub.s32 (!%p3348_p5), 6, %v2792_v6  ;;  %v2821_v21 = vsub.s32 (!%p3348_p5), 7, %v2792_v6 }
 0x1d0   : > { %2641 = vmatmul.mubr.bf16.vlgmr.msra.gmra.mrb[4].mxu0 %v4392_v22  ;;  %2727 = vmatmul.mubr.bf16.vlgmr.msra.gmra.mrb[4].mxu1 %v4392_v22 }
 0x223   : > { %v2470_v27 = vpop.f32.mrb[0].mxu0  ;;  %v2556_v31 = vpop.f32.mrb[0].mxu1 }
 0x224   : > { %v2737_v30 = vadd.f32 %v2470_v27, %v817_v23  ;;  %v2472_v32 = vpop.f32.mrb[1].mxu0  ;;  %v2739_v35 = vadd.f32 %v2556_v31, %v819_v25  ;;  %v2558_v37 = vpop.f32.mrb[1].mxu1  ;;  %v2794_v23 = vrot.slane (!%p3348_p5), %v2789_v8, %v2793_v10  ;;  %v2798_v25 = vrot.slane (!%p3348_p5), %v2789_v8, %v2797_v11 }
 0x225   : > { %v2738_v36 = vadd.f32 %v2472_v32, %v818_v26  ;;  %v2474_v38 = vpop.f32.mrb[2].mxu0  ;;  %v2740_v40 = vadd.f32 %v2558_v37, %v820_v28  ;;  %v2560_v22 = vpop.f32.mrb[2].mxu1  ;;  %v2802_v26 = vrot.slane (!%p3348_p5), %v2789_v8, %v2801_v13  ;;  %v2806_v27 = vrot.slane (!%p3348_p5), %v2789_v8, %v2805_v14 }
 0x226   : > { %2753 = vst [vmem:[#allocation2] sm:$0xff] %v2737_v30  ;;  %v2745_v41 = vadd.f32 %v2474_v38, %v825_v29  ;;  %v2476_v42 = vpop.f32.mrb[3].mxu0  ;;  %2755 = vst [vmem:[#allocation2 + $0x10] sm:$0xff] %v2739_v35  ;;  %v2747_v43 = vadd.f32 %v2560_v22, %v827_v33  ;;  %v2562_v45 = vpop.f32.mrb[3].mxu1  ;;  %v2810_v31 = vrot.slane (!%p3348_p5), %v2789_v8, %v2809_v18 }
 0x227   : > { %2754 = vst [vmem:[#allocation2 + $0x8] sm:$0xff] %v2738_v36  ;;  %v2746_v44 = vadd.f32 %v2476_v42, %v826_v34  ;;  %2756 = vst [vmem:[#allocation2 + $0x18] sm:$0xff] %v2740_v40  ;;  %v2748_v46 = vadd.f32 %v2562_v45, %v828_v39  ;;  %v2814_v32 = vrot.slane (!%p3348_p5), %v2789_v8, %v2813_v19 }
 0x228   : > { %2761 = vst [vmem:[#allocation2 + $0x40] sm:$0xff] %v2745_v41  ;;  %2763 = vst [vmem:[#allocation2 + $0x50] sm:$0xff] %v2747_v43  ;;  %v2818_v33 = vrot.slane (!%p3348_p5), %v2789_v8, %v2817_v20  ;;  %v2822_v34 = vrot.slane (!%p3348_p5), %v2789_v8, %v2821_v21 }
 0x229   : > { %2762 = vst [vmem:[#allocation2 + $0x48] sm:$0xff] %v2746_v44  ;;  %2764 = vst [vmem:[#allocation2 + $0x58] sm:$0xff] %v2748_v46 }
 0x22d   : > { %v2773_v7 = vld [vmem:[#allocation2] sm:$0xff] (!%p3348_p5)  ;;  %v2775_v12 = vld [vmem:[#allocation2 + $0x10] sm:$0xff] (!%p3348_p5) }
 0x22e   : > { %v2774_v9 = vld [vmem:[#allocation2 + $0x8] sm:$0xff] (!%p3348_p5)  ;;  %v2776_v16 = vld [vmem:[#allocation2 + $0x18] sm:$0xff] (!%p3348_p5)  ;;  %v2831_v35 = vadd.f32 (!%p3348_p5), %v2794_v23, %v2773_v7  ;;  %v2833_v37 = vadd.f32 (!%p3348_p5), %v2802_v26, %v2775_v12 }
 0x22f   : > { %v2832_v36 = vadd.f32 (!%p3348_p5), %v2798_v25, %v2774_v9  ;;  %v2834_v38 = vadd.f32 (!%p3348_p5), %v2806_v27, %v2776_v16  ;;  %v2781_v42 = vld [vmem:[#allocation2 + $0x40] sm:$0xff] (!%p3348_p5) }
 0x230   : > { %v2782_v43 = vld [vmem:[#allocation2 + $0x48] sm:$0xff] (!%p3348_p5)  ;;  %v2847_v44 = vmax.f32 (!%p3348_p5), %v2831_v35, 0.0  ;;  %v2849_v46 = vmax.f32 (!%p3348_p5), %v2833_v37, 0.0 }
 0x231   : > { %v2848_v45 = vmax.f32 (!%p3348_p5), %v2832_v36, 0.0 }
 0x2a3   : > { %v2642_v49 = vpop.f32.mrb[4].mxu0  ;;  %v2728_v52 = vpop.f32.mrb[4].mxu1  ;;  %2772 = sbr.rel (%p3348_p5) target bundleno = 696 (0x2b8), region = 86 }
 0x2a4   : > { %v2741_v51 = vadd.f32 %v2642_v49, %v821_v47  ;;  %v2644_v53 = vpop.f32.mrb[5].mxu0  ;;  %v2743_v55 = vadd.f32 %v2728_v52, %v823_v15  ;;  %v2730_v57 = vpop.f32.mrb[5].mxu1  ;;  %v2850_v47 = vmax.f32 (!%p3348_p5), %v2834_v38, 0.0  ;;  %v2783_v15 = vld [vmem:[#allocation2 + $0x50] sm:$0xff] (!%p3348_p5) }
 0x2a5   : > { %v2742_v56 = vadd.f32 %v2644_v53, %v822_v48  ;;  %v2646_v58 = vpop.f32.mrb[6].mxu0  ;;  %v2744_v60 = vadd.f32 %v2730_v57, %v824_v50  ;;  %v2732_v63 = vpop.f32.mrb[6].mxu1  ;;  %v2784_v48 = vld [vmem:[#allocation2 + $0x58] sm:$0xff] (!%p3348_p5) }
 0x2a6   : > { %2757 = vst [vmem:[#allocation2 + $0x20] sm:$0xff] %v2741_v51  ;;  %v2749_v62 = vadd.f32 %v2646_v58, %v829_v61  ;;  %v2648_v0 = vpop.f32.mrb[7].mxu0  ;;  %2759 = vst [vmem:[#allocation2 + $0x30] sm:$0xff] %v2743_v55  ;;  %v2751_v1 = vadd.f32 %v2732_v63, %v831_v54  ;;  %v2734_v3 = vpop.f32.mrb[7].mxu1  ;;  %v3364_v54 = vpack.c.bf16 (!%p3348_p5), %v2848_v45, %v2847_v44 }
 0x2a7   : > { %2758 = vst [vmem:[#allocation2 + $0x28] sm:$0xff] %v2742_v56  ;;  %v2750_v2 = vadd.f32 %v2648_v0, %v830_v24  ;;  %2760 = vst [vmem:[#allocation2 + $0x38] sm:$0xff] %v2744_v60  ;;  %v2752_v4 = vadd.f32 %v2734_v3, %v832_v59  ;;  %v3365_v24 = vpack.c.bf16 (!%p3348_p5), %v2850_v47, %v2849_v46 }
 0x2a8   : > { %2765 = vst [vmem:[#allocation2 + $0x60] sm:$0xff] %v2749_v62  ;;  %2767 = vst [vmem:[#allocation2 + $0x70] sm:$0xff] %v2751_v1  ;;  %v2839_v55 = vadd.f32 (!%p3348_p5), %v2794_v23, %v2781_v42  ;;  %v2840_v56 = vadd.f32 (!%p3348_p5), %v2798_v25, %v2782_v43  ;;  %v2841_v62 = vadd.f32 (!%p3348_p5), %v2802_v26, %v2783_v15 }
 0x2a9   : > { %2766 = vst [vmem:[#allocation2 + $0x68] sm:$0xff] %v2750_v2  ;;  %2768 = vst [vmem:[#allocation2 + $0x78] sm:$0xff] %v2752_v4  ;;  %v2842_v63 = vadd.f32 (!%p3348_p5), %v2806_v27, %v2784_v48 }
 0x2aa   : > { %2911 = vst [vmem:[%s4239_s1] sm:$0xff] %v3364_v54  ;;  %2912 = vst [vmem:[%s4239_s1 + $0x8] sm:$0xff] %v3365_v24  ;;  %v2855_v0 = vmax.f32 %v2839_v55, 0.0  ;;  %v2856_v1 = vmax.f32 %v2840_v56, 0.0  ;;  %v2857_v4 = vmax.f32 %v2841_v62, 0.0 }
 0x2ab   : > { %v2858_v5 = vmax.f32 %v2842_v63, 0.0 }
 0x2ac   : > { %v3368_v8 = vpack.c.bf16 %v2856_v1, %v2855_v0 }
 0x2ad   : > { %v2777_v17 = vld [vmem:[#allocation2 + $0x20] sm:$0xff]  ;;  %v2779_v29 = vld [vmem:[#allocation2 + $0x30] sm:$0xff]  ;;  %v3369_v11 = vpack.c.bf16 %v2858_v5, %v2857_v4 }
 0x2ae   : > { %v2778_v28 = vld [vmem:[#allocation2 + $0x28] sm:$0xff]  ;;  %v2780_v30 = vld [vmem:[#allocation2 + $0x38] sm:$0xff]  ;;  %v2835_v39 = vadd.f32 %v2810_v31, %v2777_v17  ;;  %v2837_v41 = vadd.f32 %v2818_v33, %v2779_v29  ;;  %2915 = vst [vmem:[%s4239_s1 + $0x20] sm:$0xff] %v3368_v8 }
 0x2af   : > { %v2836_v40 = vadd.f32 %v2814_v32, %v2778_v28  ;;  %v2838_v22 = vadd.f32 %v2822_v34, %v2780_v30  ;;  %v2785_v52 = vld [vmem:[#allocation2 + $0x60] sm:$0xff]  ;;  %v2787_v57 = vld [vmem:[#allocation2 + $0x70] sm:$0xff]  ;;  %2916 = vst [vmem:[%s4239_s1 + $0x28] sm:$0xff] %v3369_v11 }
 0x2b0   : > { %v2851_v49 = vmax.f32 %v2835_v39, 0.0  ;;  %v2853_v61 = vmax.f32 %v2837_v41, 0.0  ;;  %v2786_v53 = vld [vmem:[#allocation2 + $0x68] sm:$0xff]  ;;  %v2788_v58 = vld [vmem:[#allocation2 + $0x78] sm:$0xff]  ;;  %v2843_v2 = vadd.f32 %v2810_v31, %v2785_v52  ;;  %v2845_v6 = vadd.f32 %v2818_v33, %v2787_v57 }
 0x2b1   : > { %v2852_v50 = vmax.f32 %v2836_v40, 0.0  ;;  %v2854_v51 = vmax.f32 %v2838_v22, 0.0  ;;  %v2844_v3 = vadd.f32 %v2814_v32, %v2786_v53  ;;  %v2846_v7 = vadd.f32 %v2822_v34, %v2788_v58 }
 0x2b2   : > { %v2859_v9 = vmax.f32 %v2843_v2, 0.0  ;;  %v2861_v12 = vmax.f32 %v2845_v6, 0.0 }
 0x2b3   : > { %v3366_v59 = vpack.c.bf16 %v2852_v50, %v2851_v49  ;;  %v3367_v60 = vpack.c.bf16 %v2854_v51, %v2853_v61  ;;  %v2860_v10 = vmax.f32 %v2844_v3, 0.0  ;;  %v2862_v13 = vmax.f32 %v2846_v7, 0.0 }
 0x2b5   : > { %2913 = vst [vmem:[%s4239_s1 + $0x10] sm:$0xff] %v3366_v59  ;;  %2914 = vst [vmem:[%s4239_s1 + $0x18] sm:$0xff] %v3367_v60  ;;  %v3370_v14 = vpack.c.bf16 %v2860_v10, %v2859_v9  ;;  %v3371_v16 = vpack.c.bf16 %v2862_v13, %v2861_v12 }
 0x2b7   : > { %2917 = vst [vmem:[%s4239_s1 + $0x30] sm:$0xff] %v3370_v14  ;;  %2918 = vst [vmem:[%s4239_s1 + $0x38] sm:$0xff] %v3371_v16 }
 0x2b8 PF: > { %2925 = sbr.rel (!%p3687_p12) target bundleno = 705 (0x2c1), region = 90  ;;  %s3372_s16 = sshll.u32 (%p3687_p12), %s3558_s19, 5  ;;  %v2952_v21 = vld [vmem:[%s4239_s1 + $0x20] sm:$0xff] (%p3687_p12)  ;;  %v2954_v23 = vld [vmem:[%s4239_s1 + $0x28] sm:$0xff] (%p3687_p12) }
 0x2b9   : > { %s2931_s5 = scalar_lea.vmem (%p3687_p12), %s4590_s3, %s3372_s16 }
 0x2ba   : > { %2953 = vst [vmem:[%s2931_s5 + $0x40] sm:$0xff] (%p3687_p12), %v2952_v21  ;;  %2955 = vst [vmem:[%s2931_s5 + $0x48] sm:$0xff] (%p3687_p12), %v2954_v23 }
 0x2bc   : > { %v2948_v19 = vld [vmem:[%s4239_s1 + $0x10] sm:$0xff] (%p3687_p12)  ;;  %v2950_v20 = vld [vmem:[%s4239_s1 + $0x18] sm:$0xff] (%p3687_p12) }
 0x2bd   : > { %2949 = vst [vmem:[%s2931_s5 + $0x10] sm:$0xff] (%p3687_p12), %v2948_v19  ;;  %2951 = vst [vmem:[%s2931_s5 + $0x18] sm:$0xff] (%p3687_p12), %v2950_v20 }
 0x2be   : > { %v2956_v25 = vld [vmem:[%s4239_s1 + $0x30] sm:$0xff] (%p3687_p12)  ;;  %v2958_v26 = vld [vmem:[%s4239_s1 + $0x38] sm:$0xff] (%p3687_p12) }
 0x2bf   : > { %v2944_v17 = vld [vmem:[%s4239_s1] sm:$0xff]  ;;  %v2946_v18 = vld [vmem:[%s4239_s1 + $0x8] sm:$0xff]  ;;  %2957 = vst [vmem:[%s2931_s5 + $0x50] sm:$0xff] %v2956_v25  ;;  %2959 = vst [vmem:[%s2931_s5 + $0x58] sm:$0xff] %v2958_v26 }
 0x2c0   : > { %2945 = vst [vmem:[%s2931_s5] sm:$0xff] %v2944_v17  ;;  %2947 = vst [vmem:[%s2931_s5 + $0x8] sm:$0xff] %v2946_v18 }
 0x2c1 PF: > { %s13_s22 = sadd.s32 1, %s3570_s22   ;;  %s4600_s10 = sld [smem:[#allocation6_spill]] }
 0x2c2   : > { %p10_p6 = scmp.ge.s32.totalorder %s13_s22, 6   ;;  %s4601_s12 = smov %s3534_s13 }
 0x2c3   : > { %s4602_s13 = smov %s3685_s9  ;;  %s4603_s14 = smov %s3542_s15 }
 0x2c4   : > { %s4604_s15 = smov %s3682_s8  ;;  %s4605_s16 = smov %s3550_s17 }
 0x2c5   : > { %s4606_s17 = smov %s3668_s30  ;;  %s4607_s18 = smov %s3562_s20 }
 0x2c6   : > { %s4608_s19 = smov %s3566_s21  ;;  %s4609_s20 = smov %s4612_s24 }
 0x2c7   : > { %s4610_s21 = smov %s4600_s10  ;;  %12 = sbr.rel (!%p10_p6) target bundleno = 9 (0x9), region = 155 }

// kernel: _lambda_.35
= control target key start
LH: loop header
LB: loop body
LE: loop exit
PB: predicated region body
PF: predicated region fallthrough
CT: control target
= control target key end

     0   :  { %s2599_s0 = inlined_call_operand.vmem [shape: bf16[2,16,2048], index: 0, kind: input, shape index: {}]   ;;  %s2600_s1 = inlined_call_operand.vmem [shape: bf16[2,16,2048], index: 1, kind: input, shape index: {}]   ;;  %s2601_s2 = inlined_call_operand.vmem [shape: f32[2,1,2048], index: 2, kind: input, shape index: {}]   ;;  %s2602_s3 = inlined_call_operand.vmem [shape: bf16[2048,512], index: 3, kind: input, shape index: {}]   ;;  %s2603_s4 = inlined_call_operand.vmem [shape: f32[1,512], index: 4, kind: input, shape index: {}]   ;;  %s2604_s5 = inlined_call_operand.vmem [shape: bf16[2,16,512], index: 5, kind: output, shape index: {}]  }
   0x1   :  { %2605 = sst [smem:[#allocation5_spill]] %s2599_s0 }
   0x2   :  { %s2279_s18 = smov 0   ;;  %s2281_s19 = smov 0  }
   0x3   :  { %s2283_s20 = smov 0   ;;  %s2285_s21 = smov 0  }
   0x4   :  { %s2287_s22 = smov 0   ;;  %s2289_s23 = smov 0  }
   0x5   :  { %s2291_s24 = smov 0  }
   0x6 LB: > { %s30_s25 = sadd.s32 1, %s2238_s22  ;;  %s41_s26 = sadd.s32 1, %s2242_s23  ;;  %s2246_s24 = sphi %s2291_s24, %s15_s24   ;;  %s2242_s23 = sphi %s2289_s23, %s2613_s23   ;;  %s2238_s22 = sphi %s2287_s22, %s2612_s22   ;;  %s2234_s21 = sphi %s2285_s21, %s2611_s21   ;;  %s2230_s20 = sphi %s2283_s20, %s2610_s20   ;;  %s2226_s19 = sphi %s2281_s19, %s2609_s19   ;;  %s2222_s18 = sphi %s2279_s18, %s2608_s18  }
   0x7   : > { %p31_p0 = scmp.ge.s32.totalorder %s30_s25, 4  ;;  %p59_p1 = scmp.ne.s32.totalorder %s2226_s19, %s2222_s18 }
   0x8   : > { %p60_p2 = scmp.eq.s32.totalorder %s2246_s24, 0  ;;  %s52_s6 = sadd.s32 1, %s2226_s19 }
   0x9   : > { %s2615_s25 = smov (%p31_p0, %s30_s25), 0  ;;  %s2617_s26 = smov (!%p31_p0, %s41_s26), %s2242_s23 }
   0xa   : > { %p2322_p3 = por %p60_p2, %p59_p1  ;;  %p43_p4 = scmp.ge.s32.totalorder %s2617_s26, 2 }
   0xb   : > { %s48_s28 = ssub.s32 %s2238_s22, %s2615_s25  ;;  %p1774_p6 = scmp.ge.s32.totalorder %s2246_s24, 8 }
   0xc   : > { %s2619_s26 = smov (%p43_p4, %s2617_s26), 0 }
   0xd   : > { %s45_s29 = ssub.s32 %s2242_s23, %s2619_s26  ;;  %235 = sbr.rel (%p1774_p6) target bundleno = 41 (0x29), region = 20 }
   0xe   : > { %s49_s30 = sor.u32 %s48_s28, %s45_s29 }
   0xf   : > { %p50_p5 = scmp.eq.s32.totalorder %s49_s30, 0 }
  0x11   : > { %s2334_s7 = scalar_select %p50_p5, %s2226_s19, %s52_s6  }
  0x14   : > { %238 = sbr.rel (!%p2322_p3) target bundleno = 32 (0x20), region = 24  ;;  %s240_s8 = sand.u32 (%p2322_p3), 1, %s2226_s19  }
  0x15   : > { %s1776_s9 = sshll.u32 (%p2322_p3), %s2238_s22, 2  ;;  %s1775_s10 = sshll.u32 (%p2322_p3), %s240_s8, 5 }
  0x16   : > { %s1777_s11 = sshll.u32 (%p2322_p3), %s2242_s23, 5  ;;  %s2607_s0 = sld [smem:[#allocation5_spill]] (%p2322_p3) }
  0x17   : > { %s248_s12 = sadd.s32 (%p2322_p3), %s1777_s11, %s1776_s9  ;;  %s242_s17 = scalar_lea.vmem (%p2322_p3), [#allocation3], %s1775_s10 }
  0x18   : > { %s1778_s13 = sshll.u32 (%p2322_p3), %s248_s12, 2 }
  0x1c   : > { %s250_s16 = scalar_lea.vmem %s2607_s0, %s1778_s13 }
  0x1d   : > { %v263_v0 = vld [vmem:[%s250_s16] sm:$0xff]  ;;  %v265_v1 = vld [vmem:[%s250_s16 + $0x8] sm:$0xff] }
  0x1e   : > { %v267_v2 = vld [vmem:[%s250_s16 + $0x40] sm:$0xff]  ;;  %264 = vst [vmem:[%s242_s17] sm:$0xff] %v263_v0  ;;  %266 = vst [vmem:[%s242_s17 + $0x8] sm:$0xff] %v265_v1  ;;  %v269_v3 = vld [vmem:[%s250_s16 + $0x48] sm:$0xff] }
  0x1f   : > { %268 = vst [vmem:[%s242_s17 + $0x10] sm:$0xff] %v267_v2  ;;  %270 = vst [vmem:[%s242_s17 + $0x18] sm:$0xff] %v269_v3 }
  0x20 PF: > { %276 = sbr.rel (!%p2322_p3) target bundleno = 41 (0x29), region = 47  ;;  %s278_s28 = sand.u32 (%p2322_p3), 1, %s2226_s19  }
  0x21   : > { %s1780_s29 = sshll.u32 (%p2322_p3), %s2238_s22, 2  ;;  %s1779_s30 = sshll.u32 (%p2322_p3), %s278_s28, 5 }
  0x22   : > { %s1781_s6 = sshll.u32 (%p2322_p3), %s2242_s23, 5  ;;  %s280_s13 = scalar_lea.vmem (%p2322_p3), [#allocation4], %s1779_s30 }
  0x23   : > { %s286_s8 = sadd.s32 (%p2322_p3), %s1781_s6, %s1780_s29 }
  0x24   : > { %s1782_s9 = sshll.u32 (%p2322_p3), %s286_s8, 2 }
  0x25   : > { %s288_s12 = scalar_lea.vmem (%p2322_p3), %s2600_s1, %s1782_s9 }
  0x26   : > { %v301_v4 = vld [vmem:[%s288_s12] sm:$0xff] (%p2322_p3)  ;;  %v303_v5 = vld [vmem:[%s288_s12 + $0x8] sm:$0xff] (%p2322_p3) }
  0x27   : > { %v305_v6 = vld [vmem:[%s288_s12 + $0x40] sm:$0xff]  ;;  %302 = vst [vmem:[%s280_s13] sm:$0xff] %v301_v4  ;;  %304 = vst [vmem:[%s280_s13 + $0x8] sm:$0xff] %v303_v5  ;;  %v307_v7 = vld [vmem:[%s288_s12 + $0x48] sm:$0xff] }
  0x28   : > { %306 = vst [vmem:[%s280_s13 + $0x10] sm:$0xff] %v305_v6  ;;  %308 = vst [vmem:[%s280_s13 + $0x18] sm:$0xff] %v307_v7 }
  0x29 PF: > { %p1783_p7 = scmp.ge.s32.totalorder %s2246_s24, 1  ;;  %p340_p8 = scmp.lt.s32.totalorder %s2246_s24, 9 }
  0x2b   : > { %p341_p9 = pnand %p1783_p7, %p340_p8 }
  0x2c   : > { %s347_s27 = sand.u32 (!%p341_p9), 1, %s2222_s18   ;;  %s1786_s14 = sshll.u32 (!%p341_p9), %s2230_s20, 2 }
  0x2d   : > { %344 = sbr.rel (%p341_p9) target bundleno = 425 (0x1a9), region = 78  ;;  %s1784_s15 = sshll.u32 (!%p341_p9), %s347_s27, 5 }
  0x2e   : > { %p421_p10 = scmp.lt.s32.totalorder (!%p341_p9), %s2234_s21, 1  ;;  %p423_p11 = scmp.lt.s32.totalorder (!%p341_p9), %s1786_s14, 15 }
  0x2f   : > { %s1788_s16 = sshll.u32 (!%p341_p9), %s2230_s20, 6  ;;  %s2376_s0 = scalar_lea.vmem (!%p341_p9), [#allocation3], %s1784_s15 }
  0x30   : > { %p431_p12 = scmp.lt.s32.totalorder (!%p341_p9), %s1788_s16, 255  ;;  %p1793_p13 = scmp.ne.s32.totalorder (!%p341_p9), %s2230_s20, 0 }
  0x34   : > { %s2621_s21 = smov (!%p421_p10, %s2234_s21), 1  ;;  %s2623_s14 = smov (!%p423_p11, %s1786_s14), 15 }
  0x35   : > { %s1787_s17 = sshll.u32 %s2621_s21, 4  ;;  %s2625_s16 = smov (!%p431_p12, %s1788_s16), 255  ;;  %v2248_v8 = vmov (!%p1793_p13), 0.0  }
  0x36   : > { %s2360_s28 = sadd.s32 %s1787_s17, %s2623_s14  ;;  %s1930_s29 = sshll.u32 %s2621_s21, 5  ;;  %466 = vst [vmem:[#allocation2] sm:$0xff] (!%p1793_p13), %v2248_v8  ;;  %467 = vst [vmem:[#allocation2 + $0x8] sm:$0xff] (!%p1793_p13), %v2248_v8 }
  0x37   : > { %s427_s8 = scalar_lea.vmem %s2601_s2, %s2360_s28  ;;  %s1929_s9 = sshll.u32 %s2625_s16, 4  ;;  %468 = vst [vmem:[#allocation2 + $0x10] sm:$0xff] (!%p1793_p13), %v2248_v8  ;;  %469 = vst [vmem:[#allocation2 + $0x18] sm:$0xff] (!%p1793_p13), %v2248_v8 }
  0x38   : > { %s2369_s10 = scalar_lea.vmem %s2602_s3, %s1929_s9  ;;  %s2374_s27 = scalar_lea.vmem %s2604_s5, %s1930_s29  ;;  %470 = vst [vmem:[#allocation2 + $0x20] sm:$0xff] (!%p1793_p13), %v2248_v8  ;;  %471 = vst [vmem:[#allocation2 + $0x28] sm:$0xff] (!%p1793_p13), %v2248_v8 }
  0x39   : > { %s2378_s14 = scalar_lea.vmem [#allocation4], %s1784_s15  ;;  %465 = sbr.rel (%p1793_p13) target bundleno = 64 (0x40), region = 90  ;;  %472 = vst [vmem:[#allocation2 + $0x30] sm:$0xff] (!%p1793_p13), %v2248_v8  ;;  %473 = vst [vmem:[#allocation2 + $0x38] sm:$0xff] (!%p1793_p13), %v2248_v8 }
  0x40 PF: > { %v2000_v9 = vld [vmem:[%s2369_s10 + $0x4] ss:$16 sps:$4 sm:$0xff]   ;;  %v2002_v10 = vld [vmem:[%s2369_s10 + $0xc] ss:$16 sps:$4 sm:$0xff]   ;;  %v2004_v11 = vld [vmem:[%s2369_s10] ss:$16 sps:$4 sm:$0xff]   ;;  %v488_v46 = vlaneseq }
  0x41   : > { %1316 = vmatprep.subr.bf16.mxu0 %v2000_v9  ;;  %v2005_v12 = vld [vmem:[%s2369_s10 + $0x8] ss:$16 sps:$4 sm:$0xff]   ;;  %1402 = vmatprep.subr.bf16.mxu1 %v2002_v10  ;;  %v2006_v13 = vld [vmem:[%s2369_s10 + $0x24] ss:$16 sps:$4 sm:$0xff]   ;;  %v2008_v14 = vld [vmem:[%s2369_s10 + $0x2c] ss:$16 sps:$4 sm:$0xff]  }
  0x42   : > { %1317 = vmatpush1.bf16.msra.mxu0 %v2004_v11  ;;  %1403 = vmatpush1.bf16.msra.mxu1 %v2005_v12  ;;  %v2010_v15 = vld [vmem:[%s2369_s10 + $0x20] ss:$16 sps:$4 sm:$0xff]   ;;  %v2011_v16 = vld [vmem:[%s2369_s10 + $0x28] ss:$16 sps:$4 sm:$0xff]   ;;  %v2012_v17 = vld [vmem:[%s2369_s10 + $0x44] ss:$16 sps:$4 sm:$0xff]  }
  0x43   : > { %1318 = vmatprep.subr.bf16.mxu0 %v2006_v13  ;;  %1404 = vmatprep.subr.bf16.mxu1 %v2008_v14  ;;  %v2014_v18 = vld [vmem:[%s2369_s10 + $0x4c] ss:$16 sps:$4 sm:$0xff]   ;;  %v2016_v19 = vld [vmem:[%s2369_s10 + $0x40] ss:$16 sps:$4 sm:$0xff]   ;;  %v2017_v20 = vld [vmem:[%s2369_s10 + $0x48] ss:$16 sps:$4 sm:$0xff]  }
  0x44   : > { %v2018_v21 = vld [vmem:[%s2369_s10 + $0x64] ss:$16 sps:$4 sm:$0xff]   ;;  %v2020_v22 = vld [vmem:[%s2369_s10 + $0x6c] ss:$16 sps:$4 sm:$0xff]   ;;  %v2022_v23 = vld [vmem:[%s2369_s10 + $0x60] ss:$16 sps:$4 sm:$0xff]  }
  0x45   : > { %v2023_v24 = vld [vmem:[%s2369_s10 + $0x68] ss:$16 sps:$4 sm:$0xff]   ;;  %v2024_v25 = vld [vmem:[%s2369_s10 + $0x84] ss:$16 sps:$4 sm:$0xff]   ;;  %v2026_v26 = vld [vmem:[%s2369_s10 + $0x8c] ss:$16 sps:$4 sm:$0xff]  }
  0x46   : > { %1319 = vmatpush1.bf16.msra.mxu0 %v2010_v15  ;;  %1405 = vmatpush1.bf16.msra.mxu1 %v2011_v16  ;;  %v2028_v27 = vld [vmem:[%s2369_s10 + $0x80] ss:$16 sps:$4 sm:$0xff]   ;;  %v2029_v28 = vld [vmem:[%s2369_s10 + $0x88] ss:$16 sps:$4 sm:$0xff]   ;;  %v2030_v29 = vld [vmem:[%s2369_s10 + $0xa4] ss:$16 sps:$4 sm:$0xff]  }
  0x47   : > { %1320 = vmatprep.subr.bf16.mxu0 %v2012_v17  ;;  %1406 = vmatprep.subr.bf16.mxu1 %v2014_v18  ;;  %v2032_v30 = vld [vmem:[%s2369_s10 + $0xac] ss:$16 sps:$4 sm:$0xff]   ;;  %v2034_v31 = vld [vmem:[%s2369_s10 + $0xa0] ss:$16 sps:$4 sm:$0xff]   ;;  %v2035_v32 = vld [vmem:[%s2369_s10 + $0xa8] ss:$16 sps:$4 sm:$0xff]  }
  0x48   : > { %v2036_v33 = vld [vmem:[%s2369_s10 + $0xc4] ss:$16 sps:$4 sm:$0xff]   ;;  %v2038_v34 = vld [vmem:[%s2369_s10 + $0xcc] ss:$16 sps:$4 sm:$0xff]   ;;  %v2040_v35 = vld [vmem:[%s2369_s10 + $0xc0] ss:$16 sps:$4 sm:$0xff]  }
  0x49   : > { %v2041_v36 = vld [vmem:[%s2369_s10 + $0xc8] ss:$16 sps:$4 sm:$0xff]   ;;  %v2042_v37 = vld [vmem:[%s2369_s10 + $0xe4] ss:$16 sps:$4 sm:$0xff]   ;;  %v2044_v38 = vld [vmem:[%s2369_s10 + $0xec] ss:$16 sps:$4 sm:$0xff]  }
  0x4a   : > { %1321 = vmatpush1.bf16.msra.mxu0 %v2016_v19  ;;  %1407 = vmatpush1.bf16.msra.mxu1 %v2017_v20  ;;  %v2046_v39 = vld [vmem:[%s2369_s10 + $0xe0] ss:$16 sps:$4 sm:$0xff]   ;;  %v2047_v40 = vld [vmem:[%s2369_s10 + $0xe8] ss:$16 sps:$4 sm:$0xff]   ;;  %v2048_v41 = vld [vmem:[%s2369_s10 + $0x104] ss:$16 sps:$4 sm:$0xff]  }
  0x4b   : > { %1322 = vmatprep.subr.bf16.mxu0 %v2018_v21  ;;  %1408 = vmatprep.subr.bf16.mxu1 %v2020_v22  ;;  %v2050_v42 = vld [vmem:[%s2369_s10 + $0x10c] ss:$16 sps:$4 sm:$0xff]   ;;  %v2052_v43 = vld [vmem:[%s2369_s10 + $0x100] ss:$16 sps:$4 sm:$0xff]   ;;  %v2053_v44 = vld [vmem:[%s2369_s10 + $0x108] ss:$16 sps:$4 sm:$0xff]  }
  0x4c   : > { %v2054_v45 = vld [vmem:[%s2369_s10 + $0x124] ss:$16 sps:$4 sm:$0xff]   ;;  %v2056_v47 = vld [vmem:[%s2369_s10 + $0x12c] ss:$16 sps:$4 sm:$0xff]   ;;  %v2058_v48 = vld [vmem:[%s2369_s10 + $0x120] ss:$16 sps:$4 sm:$0xff]  }
  0x4d   : > { %v2059_v49 = vld [vmem:[%s2369_s10 + $0x128] ss:$16 sps:$4 sm:$0xff]   ;;  %v2060_v50 = vld [vmem:[%s2369_s10 + $0x144] ss:$16 sps:$4 sm:$0xff]   ;;  %v2422_v51 = vshrl.u32 %v488_v46, 7  ;;  %p1922_p0 = scmp.ne.s32.totalorder %s2230_s20, 3 }
  0x4e   : > { %1323 = vmatpush1.bf16.msra.mxu0 %v2022_v23  ;;  %1409 = vmatpush1.bf16.msra.mxu1 %v2023_v24  ;;  %v2062_v52 = vld [vmem:[%s2369_s10 + $0x14c] ss:$16 sps:$4 sm:$0xff]   ;;  %v2064_v53 = vld [vmem:[%s2369_s10 + $0x140] ss:$16 sps:$4 sm:$0xff]   ;;  %v2065_v54 = vld [vmem:[%s2369_s10 + $0x148] ss:$16 sps:$4 sm:$0xff]  }
  0x4f   : > { %1324 = vmatprep.subr.bf16.mxu0 %v2024_v25  ;;  %1410 = vmatprep.subr.bf16.mxu1 %v2026_v26  ;;  %v2066_v55 = vld [vmem:[%s2369_s10 + $0x164] ss:$16 sps:$4 sm:$0xff]   ;;  %v494_v56 = vsub.s32 1, %v2422_v51  ;;  %v2068_v57 = vld [vmem:[%s2369_s10 + $0x16c] ss:$16 sps:$4 sm:$0xff]   ;;  %v498_v61 = vsub.s32 2, %v2422_v51 }
  0x50   : > { %v2070_v58 = vld [vmem:[%s2369_s10 + $0x160] ss:$16 sps:$4 sm:$0xff]   ;;  %v2071_v59 = vld [vmem:[%s2369_s10 + $0x168] ss:$16 sps:$4 sm:$0xff]   ;;  %v2072_v5 = vld [vmem:[%s2369_s10 + $0x184] ss:$16 sps:$4 sm:$0xff]  }
  0x51   : > { %v474_v60 = vld [vmem:[%s2376_s0] sm:$0xff]  ;;  %v476_v62 = vld [vmem:[%s2376_s0 + $0x10] sm:$0xff]  ;;  %v2074_v6 = vld [vmem:[%s2369_s10 + $0x18c] ss:$16 sps:$4 sm:$0xff]   ;;  %v490_v13 = vsub.s32 0, %v2422_v51 }
  0x52   : > { %1325 = vmatpush1.bf16.msra.mxu0 %v2028_v27  ;;  %1411 = vmatpush1.bf16.msra.mxu1 %v2029_v28  ;;  %v479_v63 = vunpack.c.h.bf16 %v474_v60  ;;  %v2440_v0 = vld [vmem:[%s427_s8] sm:$0xf]  ;;  %v483_v2 = vunpack.c.h.bf16 %v476_v62  ;;  %v518_v4 = vld [vmem:[%s2378_s14 + $0x10] sm:$0xff]  ;;  %v2077_v14 = vld [vmem:[%s2369_s10 + $0x188] ss:$16 sps:$4 sm:$0xff]   ;;  %v478_v21 = vunpack.c.l.bf16 %v474_v60  ;;  %v482_v22 = vunpack.c.l.bf16 %v476_v62 }
  0x53   : > { %1326 = vmatprep.subr.bf16.mxu0 %v2030_v29  ;;  %1412 = vmatprep.subr.bf16.mxu1 %v2032_v30  ;;  %v516_v1 = vld [vmem:[%s2378_s14] sm:$0xff]  ;;  %v495_v3 = vrot.slane %v2440_v0, %v494_v56  ;;  %v525_v8 = vunpack.c.h.bf16 %v518_v4  ;;  %v2452_v11 = vrot.slane %v2440_v0, %v498_v61  ;;  %v2080_v18 = vld [vmem:[%s2369_s10 + $0x1ac] ss:$16 sps:$4 sm:$0xff]   ;;  %v491_v23 = vrot.slane %v2440_v0, %v490_v13  ;;  %v2083_v24 = vld [vmem:[%s2369_s10 + $0x1a8] ss:$16 sps:$4 sm:$0xff]  }
  0x54   : > { %v521_v7 = vunpack.c.h.bf16 %v516_v1  ;;  %v2076_v12 = vld [vmem:[%s2369_s10 + $0x180] ss:$16 sps:$4 sm:$0xff]   ;;  %v2078_v17 = vld [vmem:[%s2369_s10 + $0x1a4] ss:$16 sps:$4 sm:$0xff]   ;;  %v2086_v26 = vld [vmem:[%s2369_s10 + $0x1cc] ss:$16 sps:$4 sm:$0xff]   ;;  %v520_v28 = vunpack.c.l.bf16 %v516_v1  ;;  %v524_v29 = vunpack.c.l.bf16 %v518_v4 }
  0x55   : > { %v509_v9 = vmul.f32 %v495_v3, %v479_v63  ;;  %v513_v10 = vmul.f32 %v495_v3, %v483_v2  ;;  %v2082_v20 = vld [vmem:[%s2369_s10 + $0x1a0] ss:$16 sps:$4 sm:$0xff]   ;;  %v2084_v25 = vld [vmem:[%s2369_s10 + $0x1c4] ss:$16 sps:$4 sm:$0xff]   ;;  %v508_v30 = vmul.f32 %v491_v23, %v478_v21  ;;  %v2123_v62 = vld [vmem:[%s2369_s10 + $0x288] ss:$16 sps:$4 sm:$0xff]  }
  0x56   : > { %1327 = vmatpush1.bf16.msra.mxu0 %v2034_v31  ;;  %1413 = vmatpush1.bf16.msra.mxu1 %v2035_v32  ;;  %v2088_v27 = vld [vmem:[%s2369_s10 + $0x1c0] ss:$16 sps:$4 sm:$0xff]   ;;  %v512_v31 = vmul.f32 %v491_v23, %v482_v22  ;;  %v2089_v32 = vld [vmem:[%s2369_s10 + $0x1c8] ss:$16 sps:$4 sm:$0xff]   ;;  %v2128_v63 = vld [vmem:[%s2369_s10 + $0x2a4] ss:$16 sps:$4 sm:$0xff]  }
  0x57   : > { %1328 = vmatprep.subr.bf16.mxu0 %v2036_v33  ;;  %1414 = vmatprep.subr.bf16.mxu1 %v2038_v34  ;;  %v529_v15 = vadd.f32 %v521_v7, %v509_v9  ;;  %v533_v16 = vadd.f32 %v525_v8, %v513_v10  ;;  %v2090_v33 = vld [vmem:[%s2369_s10 + $0x1e4] ss:$16 sps:$4 sm:$0xff]   ;;  %v2092_v34 = vld [vmem:[%s2369_s10 + $0x1ec] ss:$16 sps:$4 sm:$0xff]   ;;  %v2102_v46 = vld [vmem:[%s2369_s10 + $0x220] ss:$16 sps:$4 sm:$0xff]  }
  0x58   : > { %v2120_v60 = vld [vmem:[%s2369_s10 + $0x280] ss:$16 sps:$4 sm:$0xff]   ;;  %v2131_v1 = vld [vmem:[%s2369_s10 + $0x2ac] ss:$16 sps:$4 sm:$0xff]   ;;  %v502_v2 = vsub.s32 3, %v2422_v51 }
  0x59   : > { %v537_v19 = vpack.c.bf16 %v533_v16, %v529_v15  ;;  %v2126_v3 = vld [vmem:[%s2369_s10 + $0x2a0] ss:$16 sps:$4 sm:$0xff]   ;;  %v2129_v4 = vld [vmem:[%s2369_s10 + $0x2a8] ss:$16 sps:$4 sm:$0xff]  }
  0x5a   : > { %1329 = vmatpush1.bf16.msra.mxu0 %v2040_v35  ;;  %1415 = vmatpush1.bf16.msra.mxu1 %v2041_v36  ;;  %v2094_v35 = vld [vmem:[%s2369_s10 + $0x1e0] ss:$16 sps:$4 sm:$0xff]   ;;  %v528_v36 = vadd.f32 %v520_v28, %v508_v30  ;;  %v503_v7 = vrot.slane %v2440_v0, %v502_v2  ;;  %v2503_v8 = vld [vmem:[%s2376_s0 + $0x8] sm:$0xff]  ;;  %v2506_v9 = vld [vmem:[%s2376_s0 + $0x18] sm:$0xff] }
  0x5b   : > { %1330 = vmatprep.subr.bf16.mxu0 %v2042_v37  ;;  %1416 = vmatprep.subr.bf16.mxu1 %v2044_v38  ;;  %v532_v37 = vadd.f32 %v524_v29, %v512_v31  ;;  %v2095_v38 = vld [vmem:[%s2369_s10 + $0x1e8] ss:$16 sps:$4 sm:$0xff]   ;;  %v481_v15 = vunpack.c.h.bf16 %v2503_v8  ;;  %v485_v16 = vunpack.c.h.bf16 %v2506_v9  ;;  %v2140_v0 = vld [vmem:[%s2369_s10 + $0x2e4] ss:$16 sps:$4 sm:$0xff]   ;;  %v2138_v23 = vld [vmem:[%s2369_s10 + $0x2e0] ss:$16 sps:$4 sm:$0xff]  }
  0x5c   : > { %1348 = vmatprep.mubr.bf16.mxu0 %v537_v19  ;;  %1434 = vmatprep.mubr.bf16.mxu1 %v537_v19  ;;  %v2509_v10 = vld [vmem:[%s2378_s14 + $0x8] sm:$0xff]  ;;  %v2144_v30 = vld [vmem:[%s2369_s10 + $0x300] ss:$16 sps:$4 sm:$0xff]  }
  0x5d   : > { %v523_v19 = vunpack.c.h.bf16 %v2509_v10  ;;  %v511_v21 = vmul.f32 %v503_v7, %v481_v15  ;;  %v515_v22 = vmul.f32 %v503_v7, %v485_v16  ;;  %v2149_v28 = vld [vmem:[%s2369_s10 + $0x30c] ss:$16 sps:$4 sm:$0xff]   ;;  %v2147_v31 = vld [vmem:[%s2369_s10 + $0x308] ss:$16 sps:$4 sm:$0xff]   ;;  %v2186_v7 = vld [vmem:[%s2369_s10 + $0x3e0] ss:$16 sps:$4 sm:$0xff]  }
  0x5e   : > { %1331 = vmatpush1.bf16.msra.mxu0 %v2046_v39  ;;  %1417 = vmatpush1.bf16.msra.mxu1 %v2047_v40  ;;  %v2098_v39 = vld [vmem:[%s2369_s10 + $0x204] ss:$16 sps:$4 sm:$0xff]   ;;  %v2101_v40 = vld [vmem:[%s2369_s10 + $0x20c] ss:$16 sps:$4 sm:$0xff]  }
  0x5f   : > { %1332 = vmatprep.subr.bf16.mxu0 %v2048_v41  ;;  %1418 = vmatprep.subr.bf16.mxu1 %v2050_v42  ;;  %v2096_v41 = vld [vmem:[%s2369_s10 + $0x200] ss:$16 sps:$4 sm:$0xff]   ;;  %v536_v42 = vpack.c.bf16 %v532_v37, %v528_v36  ;;  %v2158_v36 = vld [vmem:[%s2369_s10 + $0x344] ss:$16 sps:$4 sm:$0xff]   ;;  %v2161_v37 = vld [vmem:[%s2369_s10 + $0x34c] ss:$16 sps:$4 sm:$0xff]  }
  0x62   : > { %1333 = vmatpush1.bf16.msra.mxu0 %v2052_v43  ;;  %1419 = vmatpush1.bf16.msra.mxu1 %v2053_v44  ;;  %v2099_v43 = vld [vmem:[%s2369_s10 + $0x208] ss:$16 sps:$4 sm:$0xff]   ;;  %v2104_v44 = vld [vmem:[%s2369_s10 + $0x224] ss:$16 sps:$4 sm:$0xff]  }
  0x63   : > { %1334 = vmatprep.subr.bf16.mxu0 %v2054_v45  ;;  %1420 = vmatprep.subr.bf16.mxu1 %v2056_v47  ;;  %v2107_v45 = vld [vmem:[%s2369_s10 + $0x22c] ss:$16 sps:$4 sm:$0xff]   ;;  %v2105_v47 = vld [vmem:[%s2369_s10 + $0x228] ss:$16 sps:$4 sm:$0xff]  }
  0x66   : > { %1335 = vmatpush1.bf16.msra.mxu0 %v2058_v48  ;;  %1421 = vmatpush1.bf16.msra.mxu1 %v2059_v49  ;;  %v2110_v48 = vld [vmem:[%s2369_s10 + $0x244] ss:$16 sps:$4 sm:$0xff]   ;;  %v2113_v49 = vld [vmem:[%s2369_s10 + $0x24c] ss:$16 sps:$4 sm:$0xff]  }
  0x67   : > { %1336 = vmatprep.subr.bf16.mxu0 %v2060_v50  ;;  %1422 = vmatprep.subr.bf16.mxu1 %v2062_v52  ;;  %v2108_v50 = vld [vmem:[%s2369_s10 + $0x240] ss:$16 sps:$4 sm:$0xff]   ;;  %v2111_v52 = vld [vmem:[%s2369_s10 + $0x248] ss:$16 sps:$4 sm:$0xff]  }
  0x6a   : > { %1337 = vmatpush1.bf16.msra.mxu0 %v2064_v53  ;;  %1423 = vmatpush1.bf16.msra.mxu1 %v2065_v54  ;;  %v2116_v53 = vld [vmem:[%s2369_s10 + $0x264] ss:$16 sps:$4 sm:$0xff]   ;;  %v2119_v54 = vld [vmem:[%s2369_s10 + $0x26c] ss:$16 sps:$4 sm:$0xff]  }
  0x6b   : > { %1338 = vmatprep.subr.bf16.mxu0 %v2066_v55  ;;  %1424 = vmatprep.subr.bf16.mxu1 %v2068_v57  ;;  %v2114_v55 = vld [vmem:[%s2369_s10 + $0x260] ss:$16 sps:$4 sm:$0xff]   ;;  %v2117_v57 = vld [vmem:[%s2369_s10 + $0x268] ss:$16 sps:$4 sm:$0xff]  }
  0x6e   : > { %1339 = vmatpush1.bf16.msra.mxu0 %v2070_v58  ;;  %1425 = vmatpush1.bf16.msra.mxu1 %v2071_v59  ;;  %v2122_v58 = vld [vmem:[%s2369_s10 + $0x284] ss:$16 sps:$4 sm:$0xff]   ;;  %v2125_v59 = vld [vmem:[%s2369_s10 + $0x28c] ss:$16 sps:$4 sm:$0xff]  }
  0x6f   : > { %1340 = vmatprep.subr.bf16.mxu0 %v2072_v5  ;;  %1426 = vmatprep.subr.bf16.mxu1 %v2074_v6  ;;  %v2134_v5 = vld [vmem:[%s2369_s10 + $0x2c4] ss:$16 sps:$4 sm:$0xff]   ;;  %v2137_v6 = vld [vmem:[%s2369_s10 + $0x2cc] ss:$16 sps:$4 sm:$0xff]  }
  0x72   : > { %1341 = vmatpush1.bf16.msra.mxu0 %v2076_v12  ;;  %1427 = vmatpush1.bf16.msra.mxu1 %v2077_v14  ;;  %v2132_v12 = vld [vmem:[%s2369_s10 + $0x2c0] ss:$16 sps:$4 sm:$0xff]   ;;  %v2135_v14 = vld [vmem:[%s2369_s10 + $0x2c8] ss:$16 sps:$4 sm:$0xff]  }
  0x73   : > { %1342 = vmatprep.subr.bf16.mxu0 %v2078_v17  ;;  %1428 = vmatprep.subr.bf16.mxu1 %v2080_v18  ;;  %v2516_v17 = vld [vmem:[%s2378_s14 + $0x18] sm:$0xff] }
  0x74   : > { %v2143_v18 = vld [vmem:[%s2369_s10 + $0x2ec] ss:$16 sps:$4 sm:$0xff]  }
  0x76   : > { %1343 = vmatpush1.bf16.msra.mxu0 %v2082_v20  ;;  %1429 = vmatpush1.bf16.msra.mxu1 %v2083_v24  ;;  %v527_v20 = vunpack.c.h.bf16 %v2516_v17  ;;  %v2141_v24 = vld [vmem:[%s2369_s10 + $0x2e8] ss:$16 sps:$4 sm:$0xff]  }
  0x77   : > { %1344 = vmatprep.subr.bf16.mxu0 %v2084_v25  ;;  %1430 = vmatprep.subr.bf16.mxu1 %v2086_v26  ;;  %v531_v25 = vadd.f32 %v523_v19, %v511_v21 }
  0x78   : > { %v535_v26 = vadd.f32 %v527_v20, %v515_v22  ;;  %v545_v22 = vld [vmem:[#allocation2 + $0x28] sm:$0xff] }
  0x7a   : > { %1345 = vmatpush1.bf16.msra.mxu0 %v2088_v27  ;;  %1431 = vmatpush1.bf16.msra.mxu1 %v2089_v32  ;;  %v2146_v27 = vld [vmem:[%s2369_s10 + $0x304] ss:$16 sps:$4 sm:$0xff]   ;;  %v539_v29 = vpack.c.bf16 %v535_v26, %v531_v25 }
  0x7b   : > { %1346 = vmatprep.subr.bf16.mxu0 %v2090_v33  ;;  %1432 = vmatprep.subr.bf16.mxu1 %v2092_v34  ;;  %v2152_v32 = vld [vmem:[%s2369_s10 + $0x324] ss:$16 sps:$4 sm:$0xff]   ;;  %v2155_v33 = vld [vmem:[%s2369_s10 + $0x32c] ss:$16 sps:$4 sm:$0xff]   ;;  %v2150_v34 = vld [vmem:[%s2369_s10 + $0x320] ss:$16 sps:$4 sm:$0xff]  }
  0x7e   : > { %1347 = vmatpush1.bf16.msra.mxu0 %v2094_v35  ;;  %1433 = vmatpush1.bf16.msra.mxu1 %v2095_v38  ;;  %v2153_v35 = vld [vmem:[%s2369_s10 + $0x328] ss:$16 sps:$4 sm:$0xff]   ;;  %v2156_v38 = vld [vmem:[%s2369_s10 + $0x340] ss:$16 sps:$4 sm:$0xff]  }
  0x7f   : > { %1359 = vmatprep.subr.bf16.mxu0 %v2098_v39  ;;  %1445 = vmatprep.subr.bf16.mxu1 %v2101_v40  ;;  %v2159_v39 = vld [vmem:[%s2369_s10 + $0x348] ss:$16 sps:$4 sm:$0xff]   ;;  %v2164_v40 = vld [vmem:[%s2369_s10 + $0x364] ss:$16 sps:$4 sm:$0xff]  }
  0x81   : > { %1349 = vmatmul.mubr.bf16.vlgmr.msra.gmra.mrb[0].mxu0 %v536_v42  ;;  %1435 = vmatmul.mubr.bf16.vlgmr.msra.gmra.mrb[0].mxu1 %v536_v42  ;;  %v2162_v42 = vld [vmem:[%s2369_s10 + $0x360] ss:$16 sps:$4 sm:$0xff]  }
  0x82   : > { %1360 = vmatpush1.bf16.msra.mxu0 %v2096_v41  ;;  %1446 = vmatpush1.bf16.msra.mxu1 %v2099_v43  ;;  %v2167_v41 = vld [vmem:[%s2369_s10 + $0x36c] ss:$16 sps:$4 sm:$0xff]   ;;  %v2165_v43 = vld [vmem:[%s2369_s10 + $0x368] ss:$16 sps:$4 sm:$0xff]  }
  0x83   : > { %1361 = vmatprep.subr.bf16.mxu0 %v2104_v44  ;;  %1447 = vmatprep.subr.bf16.mxu1 %v2107_v45  ;;  %v2170_v44 = vld [vmem:[%s2369_s10 + $0x384] ss:$16 sps:$4 sm:$0xff]   ;;  %v2173_v45 = vld [vmem:[%s2369_s10 + $0x38c] ss:$16 sps:$4 sm:$0xff]  }
  0x84   : > { %1391 = vmatprep.mubr.bf16.mxu0 %v539_v29  ;;  %1477 = vmatprep.mubr.bf16.mxu1 %v539_v29 }
  0x86   : > { %1362 = vmatpush1.bf16.msra.mxu0 %v2102_v46  ;;  %1448 = vmatpush1.bf16.msra.mxu1 %v2105_v47  ;;  %v2168_v46 = vld [vmem:[%s2369_s10 + $0x380] ss:$16 sps:$4 sm:$0xff]   ;;  %v2171_v47 = vld [vmem:[%s2369_s10 + $0x388] ss:$16 sps:$4 sm:$0xff]  }
  0x87   : > { %1363 = vmatprep.subr.bf16.mxu0 %v2110_v48  ;;  %1449 = vmatprep.subr.bf16.mxu1 %v2113_v49  ;;  %v2176_v48 = vld [vmem:[%s2369_s10 + $0x3a4] ss:$16 sps:$4 sm:$0xff]   ;;  %v2179_v49 = vld [vmem:[%s2369_s10 + $0x3ac] ss:$16 sps:$4 sm:$0xff]  }
  0x8a   : > { %1364 = vmatpush1.bf16.msra.mxu0 %v2108_v50  ;;  %1450 = vmatpush1.bf16.msra.mxu1 %v2111_v52  ;;  %v480_v50 = vunpack.c.l.bf16 %v2503_v8  ;;  %v484_v52 = vunpack.c.l.bf16 %v2506_v9  ;;  %v2189_v8 = vld [vmem:[%s2369_s10 + $0x3e8] ss:$16 sps:$4 sm:$0xff]  }
  0x8b   : > { %1365 = vmatprep.subr.bf16.mxu0 %v2116_v53  ;;  %1451 = vmatprep.subr.bf16.mxu1 %v2119_v54  ;;  %v2174_v53 = vld [vmem:[%s2369_s10 + $0x3a0] ss:$16 sps:$4 sm:$0xff]   ;;  %v2177_v54 = vld [vmem:[%s2369_s10 + $0x3a8] ss:$16 sps:$4 sm:$0xff]  }
  0x8e   : > { %1366 = vmatpush1.bf16.msra.mxu0 %v2114_v55  ;;  %1452 = vmatpush1.bf16.msra.mxu1 %v2117_v57  ;;  %v2182_v55 = vld [vmem:[%s2369_s10 + $0x3c4] ss:$16 sps:$4 sm:$0xff]   ;;  %v2185_v57 = vld [vmem:[%s2369_s10 + $0x3cc] ss:$16 sps:$4 sm:$0xff]  }
  0x8f   : > { %1367 = vmatprep.subr.bf16.mxu0 %v2122_v58  ;;  %1453 = vmatprep.subr.bf16.mxu1 %v2125_v59  ;;  %v522_v58 = vunpack.c.l.bf16 %v2509_v10  ;;  %v526_v59 = vunpack.c.l.bf16 %v2516_v17  ;;  %v542_v10 = vld [vmem:[#allocation2 + $0x10] sm:$0xff]  ;;  %v544_v17 = vld [vmem:[#allocation2 + $0x20] sm:$0xff] }
  0x92   : > { %1368 = vmatpush1.bf16.msra.mxu0 %v2120_v60  ;;  %1454 = vmatpush1.bf16.msra.mxu1 %v2123_v62  ;;  %v510_v60 = vmul.f32 %v2452_v11, %v480_v50  ;;  %v514_v62 = vmul.f32 %v2452_v11, %v484_v52  ;;  %v540_v11 = vld [vmem:[#allocation2] sm:$0xff] }
  0x93   : > { %1369 = vmatprep.subr.bf16.mxu0 %v2128_v63  ;;  %1455 = vmatprep.subr.bf16.mxu1 %v2131_v1  ;;  %v2180_v63 = vld [vmem:[%s2369_s10 + $0x3c0] ss:$16 sps:$4 sm:$0xff]   ;;  %v2183_v1 = vld [vmem:[%s2369_s10 + $0x3c8] ss:$16 sps:$4 sm:$0xff]  }
  0x96   : > { %1370 = vmatpush1.bf16.msra.mxu0 %v2126_v3  ;;  %1456 = vmatpush1.bf16.msra.mxu1 %v2129_v4  ;;  %v2188_v3 = vld [vmem:[%s2369_s10 + $0x3e4] ss:$16 sps:$4 sm:$0xff]   ;;  %v2191_v4 = vld [vmem:[%s2369_s10 + $0x3ec] ss:$16 sps:$4 sm:$0xff]  }
  0x97   : > { %1371 = vmatprep.subr.bf16.mxu0 %v2134_v5  ;;  %1457 = vmatprep.subr.bf16.mxu1 %v2137_v6  ;;  %v530_v5 = vadd.f32 %v522_v58, %v510_v60  ;;  %v534_v6 = vadd.f32 %v526_v59, %v514_v62 }
  0x99   : > { %v538_v9 = vpack.c.bf16 %v534_v6, %v530_v5 }
  0x9a   : > { %1372 = vmatpush1.bf16.msra.mxu0 %v2132_v12  ;;  %1458 = vmatpush1.bf16.msra.mxu1 %v2135_v14  ;;  %v541_v12 = vld [vmem:[#allocation2 + $0x8] sm:$0xff]  ;;  %v543_v14 = vld [vmem:[#allocation2 + $0x18] sm:$0xff] }
  0x9b   : > { %1373 = vmatprep.subr.bf16.mxu0 %v2140_v0  ;;  %1459 = vmatprep.subr.bf16.mxu1 %v2143_v18  ;;  %v546_v0 = vld [vmem:[#allocation2 + $0x30] sm:$0xff] }
  0x9e   : > { %1374 = vmatpush1.bf16.msra.mxu0 %v2138_v23  ;;  %1460 = vmatpush1.bf16.msra.mxu1 %v2141_v24  ;;  %v547_v23 = vld [vmem:[#allocation2 + $0x38] sm:$0xff] }
  0x9f   : > { %1375 = vmatprep.subr.bf16.mxu0 %v2146_v27  ;;  %1461 = vmatprep.subr.bf16.mxu1 %v2149_v28 }
  0xa2   : > { %1376 = vmatpush1.bf16.msra.mxu0 %v2144_v30  ;;  %1462 = vmatpush1.bf16.msra.mxu1 %v2147_v31 }
  0xa3   : > { %1377 = vmatprep.subr.bf16.mxu0 %v2152_v32  ;;  %1463 = vmatprep.subr.bf16.mxu1 %v2155_v33 }
  0xa6   : > { %1378 = vmatpush1.bf16.msra.mxu0 %v2150_v34  ;;  %1464 = vmatpush1.bf16.msra.mxu1 %v2153_v35 }
  0xa7   : > { %1379 = vmatprep.subr.bf16.mxu0 %v2158_v36  ;;  %1465 = vmatprep.subr.bf16.mxu1 %v2161_v37  ;;  %v1516_v36 = vld [vmem:[%s2603_s4] sm:$0xf] (!%p1922_p0) }
  0xa8   : > { %v1521_v37 = vrot.slane (!%p1922_p0), %v1516_v36, %v490_v13 }
  0xaa   : > { %1380 = vmatpush1.bf16.msra.mxu0 %v2156_v38  ;;  %1466 = vmatpush1.bf16.msra.mxu1 %v2159_v39  ;;  %v1525_v38 = vrot.slane (!%p1922_p0), %v1516_v36, %v494_v56 }
  0xab   : > { %1381 = vmatprep.subr.bf16.mxu0 %v2164_v40  ;;  %1467 = vmatprep.subr.bf16.mxu1 %v2167_v41  ;;  %v1529_v41 = vrot.slane (!%p1922_p0), %v1516_v36, %v498_v61 }
  0xae   : > { %1382 = vmatpush1.bf16.msra.mxu0 %v2162_v42  ;;  %1468 = vmatpush1.bf16.msra.mxu1 %v2165_v43  ;;  %v1533_v42 = vrot.slane (!%p1922_p0), %v1516_v36, %v502_v2 }
  0xaf   : > { %1383 = vmatprep.subr.bf16.mxu0 %v2170_v44  ;;  %1469 = vmatprep.subr.bf16.mxu1 %v2173_v45 }
  0xb2   : > { %1384 = vmatpush1.bf16.msra.mxu0 %v2168_v46  ;;  %1470 = vmatpush1.bf16.msra.mxu1 %v2171_v47 }
  0xb3   : > { %1385 = vmatprep.subr.bf16.mxu0 %v2176_v48  ;;  %1471 = vmatprep.subr.bf16.mxu1 %v2179_v49 }
  0xb6   : > { %1386 = vmatpush1.bf16.msra.mxu0 %v2174_v53  ;;  %1472 = vmatpush1.bf16.msra.mxu1 %v2177_v54 }
  0xb7   : > { %1387 = vmatprep.subr.bf16.mxu0 %v2182_v55  ;;  %1473 = vmatprep.subr.bf16.mxu1 %v2185_v57 }
  0xba   : > { %1388 = vmatpush1.bf16.msra.mxu0 %v2180_v63  ;;  %1474 = vmatpush1.bf16.msra.mxu1 %v2183_v1 }
  0xbb   : > { %1389 = vmatprep.subr.bf16.mxu0 %v2188_v3  ;;  %1475 = vmatprep.subr.bf16.mxu1 %v2191_v4 }
  0xbe   : > { %1390 = vmatpush1.bf16.msra.mxu0 %v2186_v7  ;;  %1476 = vmatpush1.bf16.msra.mxu1 %v2189_v8 }
  0xc1   : > { %1392 = vmatmul.mubr.bf16.vlgmr.msra.gmra.mrb[0].mxu0 %v538_v9  ;;  %1478 = vmatmul.mubr.bf16.vlgmr.msra.gmra.mrb[0].mxu1 %v538_v9 }
 0x194   : > { %v1393_v15 = vpop.f32.mrb[0].mxu0  ;;  %v1479_v16 = vpop.f32.mrb[0].mxu1  ;;  %1507 = sbr.rel (%p1922_p0) target bundleno = 425 (0x1a9), region = 94 }
 0x195   : > { %v1488_v18 = vadd.f32 %v1393_v15, %v540_v11  ;;  %v1490_v19 = vadd.f32 %v1479_v16, %v542_v10  ;;  %v1395_v20 = vpop.f32.mrb[1].mxu0  ;;  %v1481_v21 = vpop.f32.mrb[1].mxu1 }
 0x196   : > { %v1489_v24 = vadd.f32 %v1395_v20, %v541_v12  ;;  %v1491_v25 = vadd.f32 %v1481_v21, %v543_v14  ;;  %v1397_v26 = vpop.f32.mrb[2].mxu0  ;;  %v1483_v27 = vpop.f32.mrb[2].mxu1 }
 0x197   : > { %1496 = vst [vmem:[#allocation2] sm:$0xff] %v1488_v18  ;;  %1498 = vst [vmem:[#allocation2 + $0x10] sm:$0xff] %v1490_v19  ;;  %v1492_v28 = vadd.f32 %v1397_v26, %v544_v17  ;;  %v1494_v29 = vadd.f32 %v1483_v27, %v546_v0  ;;  %v1399_v30 = vpop.f32.mrb[3].mxu0  ;;  %v1485_v31 = vpop.f32.mrb[3].mxu1 }
 0x198   : > { %1497 = vst [vmem:[#allocation2 + $0x8] sm:$0xff] %v1489_v24  ;;  %1499 = vst [vmem:[#allocation2 + $0x18] sm:$0xff] %v1491_v25  ;;  %v1493_v32 = vadd.f32 %v1399_v30, %v545_v22  ;;  %v1495_v33 = vadd.f32 %v1485_v31, %v547_v23 }
 0x199   : > { %1500 = vst [vmem:[#allocation2 + $0x20] sm:$0xff] %v1492_v28  ;;  %1502 = vst [vmem:[#allocation2 + $0x30] sm:$0xff] %v1494_v29 }
 0x19a   : > { %1501 = vst [vmem:[#allocation2 + $0x28] sm:$0xff] %v1493_v32  ;;  %1503 = vst [vmem:[#allocation2 + $0x38] sm:$0xff] %v1495_v33 }
 0x19e   : > { %v1508_v34 = vld [vmem:[#allocation2] sm:$0xff]  ;;  %v1510_v39 = vld [vmem:[#allocation2 + $0x10] sm:$0xff] }
 0x19f   : > { %v1509_v35 = vld [vmem:[#allocation2 + $0x8] sm:$0xff]  ;;  %v1511_v40 = vld [vmem:[#allocation2 + $0x18] sm:$0xff]  ;;  %v1538_v47 = vadd.f32 %v1521_v37, %v1508_v34  ;;  %v1540_v49 = vadd.f32 %v1529_v41, %v1510_v39 }
 0x1a0   : > { %v1512_v43 = vld [vmem:[#allocation2 + $0x20] sm:$0xff]  ;;  %v1514_v45 = vld [vmem:[#allocation2 + $0x30] sm:$0xff]  ;;  %v1539_v48 = vadd.f32 %v1525_v38, %v1509_v35  ;;  %v1541_v50 = vadd.f32 %v1533_v42, %v1511_v40 }
 0x1a1   : > { %v1513_v44 = vld [vmem:[#allocation2 + $0x28] sm:$0xff]  ;;  %v1515_v46 = vld [vmem:[#allocation2 + $0x38] sm:$0xff]  ;;  %v1542_v13 = vadd.f32 %v1521_v37, %v1512_v43  ;;  %v1544_v56 = vadd.f32 %v1529_v41, %v1514_v45  ;;  %v1546_v61 = vmax.f32 %v1538_v47, 0.0  ;;  %v1548_v51 = vmax.f32 %v1540_v49, 0.0 }
 0x1a2   : > { %v1543_v52 = vadd.f32 %v1525_v38, %v1513_v44  ;;  %v1545_v53 = vadd.f32 %v1533_v42, %v1515_v46  ;;  %v1547_v54 = vmax.f32 %v1539_v48, 0.0  ;;  %v1549_v2 = vmax.f32 %v1541_v50, 0.0 }
 0x1a3   : > { %v1550_v55 = vmax.f32 %v1542_v13, 0.0  ;;  %v1552_v58 = vmax.f32 %v1544_v56, 0.0 }
 0x1a4   : > { %v1551_v57 = vmax.f32 %v1543_v52, 0.0  ;;  %v1553_v59 = vmax.f32 %v1545_v53, 0.0  ;;  %v1931_v60 = vpack.c.bf16 %v1547_v54, %v1546_v61  ;;  %v1932_v62 = vpack.c.bf16 %v1549_v2, %v1548_v51 }
 0x1a6   : > { %v1933_v63 = vpack.c.bf16 %v1551_v57, %v1550_v55  ;;  %v1934_v1 = vpack.c.bf16 %v1553_v59, %v1552_v58  ;;  %1578 = vst [vmem:[%s2374_s27] sm:$0xff] %v1931_v60  ;;  %1579 = vst [vmem:[%s2374_s27 + $0x8] sm:$0xff] %v1932_v62 }
 0x1a8   : > { %1580 = vst [vmem:[%s2374_s27 + $0x10] sm:$0xff] %v1933_v63  ;;  %1581 = vst [vmem:[%s2374_s27 + $0x18] sm:$0xff] %v1934_v1 }
 0x1a9 PF: > { %s15_s24 = sadd.s32 1, %s2246_s24   ;;  %s2608_s18 = smov %s2226_s19 }
 0x1aa   : > { %p12_p1 = scmp.ge.s32.totalorder %s15_s24, 10   ;;  %s2609_s19 = smov %s2334_s7 }
 0x1ab   : > { %s2610_s20 = smov %s2238_s22  ;;  %s2611_s21 = smov %s2242_s23 }
 0x1ac   : > { %s2612_s22 = smov %s2615_s25  ;;  %s2613_s23 = smov %s2619_s26 }
 0x1ad   :  { %14 = sbr.rel (!%p12_p1) target bundleno = 6 (0x6), region = 146 }

// kernel: _lambda_.36
= control target key start
LH: loop header
LB: loop body
LE: loop exit
PB: predicated region body
PF: predicated region fallthrough
CT: control target
= control target key end

     0   :  { %s681_s1 = inlined_call_operand.vmem [shape: bf16[512,128], index: 1, kind: input, shape index: {}]   ;;  %s682_s0 = inlined_call_operand.vmem [shape: bf16[16,512], index: 0, kind: input, shape index: {}]   ;;  %s683_s2 = inlined_call_operand.vmem [shape: f32[1,128], index: 2, kind: input, shape index: {}]   ;;  %s684_s3 = inlined_call_operand.vmem [shape: bf16[16,128], index: 3, kind: output, shape index: {}]  }
   0x1   :  { %v509_v0 = vld [vmem:[%s681_s1 + $0x40] sm:$0xff]   ;;  %v513_v4 = vld [vmem:[%s681_s1 + $0x48] sm:$0xff]   ;;  %v517_v8 = vld [vmem:[%s681_s1 + $0x50] sm:$0xff]  }
   0x2   :  { %v510_v1 = vld [vmem:[%s681_s1 + $0xc0] sm:$0xff]   ;;  %465 = vmatprep.subr.bf16.mxu0 %v509_v0  ;;  %v514_v5 = vld [vmem:[%s681_s1 + $0xc8] sm:$0xff]   ;;  %v518_v9 = vld [vmem:[%s681_s1 + $0xd0] sm:$0xff]  }
   0x3   :  { %v511_v2 = vld [vmem:[%s681_s1] sm:$0xff]   ;;  %487 = vmatprep.subr.bf16.mxu1 %v510_v1  ;;  %v515_v6 = vld [vmem:[%s681_s1 + $0x8] sm:$0xff]   ;;  %v519_v10 = vld [vmem:[%s681_s1 + $0x10] sm:$0xff]  }
   0x4   :  { %v512_v3 = vld [vmem:[%s681_s1 + $0x80] sm:$0xff]   ;;  %466 = vmatpush3.bf16.msra.mxu0 %v511_v2  ;;  %v516_v7 = vld [vmem:[%s681_s1 + $0x88] sm:$0xff]   ;;  %v520_v11 = vld [vmem:[%s681_s1 + $0x90] sm:$0xff]  }
   0x5   :  { %488 = vmatpush3.bf16.msra.mxu1 %v512_v3  ;;  %467 = vmatprep.subr.bf16.mxu0 %v513_v4  ;;  %v521_v12 = vld [vmem:[%s681_s1 + $0x58] sm:$0xff]   ;;  %v525_v16 = vld [vmem:[%s681_s1 + $0x60] sm:$0xff]   ;;  %v529_v20 = vld [vmem:[%s681_s1 + $0x68] sm:$0xff]  }
   0x6   :  { %489 = vmatprep.subr.bf16.mxu1 %v514_v5  ;;  %v522_v13 = vld [vmem:[%s681_s1 + $0xd8] sm:$0xff]   ;;  %v526_v17 = vld [vmem:[%s681_s1 + $0xe0] sm:$0xff]   ;;  %v530_v21 = vld [vmem:[%s681_s1 + $0xe8] sm:$0xff]  }
   0x7   :  { %v523_v14 = vld [vmem:[%s681_s1 + $0x18] sm:$0xff]   ;;  %v527_v18 = vld [vmem:[%s681_s1 + $0x20] sm:$0xff]   ;;  %v531_v22 = vld [vmem:[%s681_s1 + $0x28] sm:$0xff]  }
   0x8   :  { %468 = vmatpush3.bf16.msra.mxu0 %v515_v6  ;;  %v524_v15 = vld [vmem:[%s681_s1 + $0x98] sm:$0xff]   ;;  %v528_v19 = vld [vmem:[%s681_s1 + $0xa0] sm:$0xff]   ;;  %v532_v23 = vld [vmem:[%s681_s1 + $0xa8] sm:$0xff]  }
   0x9   :  { %490 = vmatpush3.bf16.msra.mxu1 %v516_v7  ;;  %469 = vmatprep.subr.bf16.mxu0 %v517_v8  ;;  %v533_v24 = vld [vmem:[%s681_s1 + $0x70] sm:$0xff]   ;;  %v537_v28 = vld [vmem:[%s681_s1 + $0x78] sm:$0xff]   ;;  %v455_v45 = vld [vmem:[%s683_s2] ss:$0 sm:$0xff] }
   0xa   :  { %491 = vmatprep.subr.bf16.mxu1 %v518_v9  ;;  %v534_v25 = vld [vmem:[%s681_s1 + $0xf0] sm:$0xff]   ;;  %v538_v29 = vld [vmem:[%s681_s1 + $0xf8] sm:$0xff]  }
   0xb   :  { %v535_v26 = vld [vmem:[%s681_s1 + $0x30] sm:$0xff]   ;;  %v539_v30 = vld [vmem:[%s681_s1 + $0x38] sm:$0xff]  }
   0xc   :  { %470 = vmatpush3.bf16.msra.mxu0 %v519_v10  ;;  %v536_v27 = vld [vmem:[%s681_s1 + $0xb0] sm:$0xff]   ;;  %v540_v31 = vld [vmem:[%s681_s1 + $0xb8] sm:$0xff]  }
   0xd   :  { %492 = vmatpush3.bf16.msra.mxu1 %v520_v11  ;;  %471 = vmatprep.subr.bf16.mxu0 %v521_v12  ;;  %v541_v32 = vld [vmem:[%s682_s0] ss:$16 sps:$4 sm:$0xff]   ;;  %v543_v33 = vld [vmem:[%s682_s0 + $0x4] ss:$16 sps:$4 sm:$0xff]   ;;  %v544_v34 = vld [vmem:[%s682_s0 + $0x8] ss:$16 sps:$4 sm:$0xff]  }
   0xe   :  { %493 = vmatprep.subr.bf16.mxu1 %v522_v13  ;;  %v546_v35 = vld [vmem:[%s682_s0 + $0xc] ss:$16 sps:$4 sm:$0xff]   ;;  %335 = vmatprep.mubr.bf16.mxu0 %v543_v33 }
   0xf   :  { %376 = vmatprep.mubr.bf16.mxu1 %v546_v35 }
  0x10   :  { %472 = vmatpush3.bf16.msra.mxu0 %v523_v14 }
  0x11   :  { %494 = vmatpush3.bf16.msra.mxu1 %v524_v15  ;;  %473 = vmatprep.subr.bf16.mxu0 %v525_v16 }
  0x12   :  { %495 = vmatprep.subr.bf16.mxu1 %v526_v17 }
  0x14   :  { %474 = vmatpush3.bf16.msra.mxu0 %v527_v18 }
  0x15   :  { %496 = vmatpush3.bf16.msra.mxu1 %v528_v19  ;;  %475 = vmatprep.subr.bf16.mxu0 %v529_v20 }
  0x16   :  { %497 = vmatprep.subr.bf16.mxu1 %v530_v21 }
  0x18   :  { %476 = vmatpush3.bf16.msra.mxu0 %v531_v22 }
  0x19   :  { %498 = vmatpush3.bf16.msra.mxu1 %v532_v23  ;;  %477 = vmatprep.subr.bf16.mxu0 %v533_v24 }
  0x1a   :  { %499 = vmatprep.subr.bf16.mxu1 %v534_v25 }
  0x1c   :  { %478 = vmatpush3.bf16.msra.mxu0 %v535_v26 }
  0x1d   :  { %500 = vmatpush3.bf16.msra.mxu1 %v536_v27  ;;  %479 = vmatprep.subr.bf16.mxu0 %v537_v28 }
  0x1e   :  { %501 = vmatprep.subr.bf16.mxu1 %v538_v29 }
  0x20   :  { %480 = vmatpush3.bf16.msra.mxu0 %v539_v30 }
  0x21   :  { %502 = vmatpush3.bf16.msra.mxu1 %v540_v31 }
  0x23   :  { %336 = vmatmul.mubr.bf16.vlgmr.msra.gmra.mrb[0].mxu0 %v541_v32 }
  0x24   :  { %377 = vmatmul.mubr.bf16.vlgmr.msra.gmra.mrb[0].mxu1 %v544_v34 }
  0xf6   :  { %v481_v36 = vpop.f32.mrb[0].mxu0 }
  0xf7   :  { %v503_v37 = vpop.f32.mrb[0].mxu1  ;;  %v482_v38 = vpop.f32.mrb[1].mxu0 }
  0xf8   :  { %v483_v39 = vadd.f32 %v482_v38, %v481_v36  ;;  %v504_v40 = vpop.f32.mrb[1].mxu1  ;;  %v484_v41 = vpop.f32.mrb[2].mxu0 }
  0xf9   :  { %v505_v42 = vadd.f32 %v504_v40, %v503_v37  ;;  %v506_v43 = vpop.f32.mrb[2].mxu1  ;;  %v485_v44 = vpop.f32.mrb[3].mxu0 }
  0xfa   :  { %v486_v46 = vadd.f32 %v485_v44, %v484_v41  ;;  %v507_v47 = vpop.f32.mrb[3].mxu1 }
  0xfb   :  { %v379_v48 = vadd.f32 %v505_v42, %v483_v39  ;;  %v508_v49 = vadd.f32 %v507_v47, %v506_v43 }
  0xfd   :  { %v401_v50 = vadd.f32 %v455_v45, %v379_v48  ;;  %v382_v51 = vadd.f32 %v508_v49, %v486_v46 }
  0xff   :  { %v402_v52 = vadd.f32 %v455_v45, %v382_v51  ;;  %v403_v53 = vmax.f32 %v401_v50, 0.0 }
 0x101   :  { %v404_v54 = vmax.f32 %v402_v52, 0.0 }
 0x103   :  { %v463_v55 = vpack.c.bf16 %v404_v54, %v403_v53 }
 0x105   :  { %464 = vst [vmem:[%s684_s3] sm:$0xff] %v463_v55  }

// kernel: _lambda_.37
= control target key start
LH: loop header
LB: loop body
LE: loop exit
PB: predicated region body
PF: predicated region fallthrough
CT: control target
= control target key end

     0   :  { %s408_s1 = inlined_call_operand.vmem [shape: bf16[256,128], index: 1, kind: input, shape index: {}]   ;;  %s409_s0 = inlined_call_operand.vmem [shape: bf16[16,256], index: 0, kind: input, shape index: {}]   ;;  %s410_s2 = inlined_call_operand.vmem [shape: f32[1,128], index: 2, kind: input, shape index: {}]   ;;  %s411_s3 = inlined_call_operand.vmem [shape: bf16[16,128], index: 3, kind: input, shape index: {}]   ;;  %s412_s4 = inlined_call_operand.vmem [shape: bf16[16,128], index: 4, kind: output, shape index: {}]  }
   0x1   :  { %v301_v0 = vld [vmem:[%s408_s1 + $0x40] sm:$0xff]   ;;  %v303_v2 = vld [vmem:[%s408_s1 + $0x48] sm:$0xff]   ;;  %v305_v4 = vld [vmem:[%s408_s1 + $0x50] sm:$0xff]  }
   0x2   :  { %v302_v1 = vld [vmem:[%s408_s1] sm:$0xff]   ;;  %279 = vmatprep.subr.bf16.mxu0 %v301_v0  ;;  %v304_v3 = vld [vmem:[%s408_s1 + $0x8] sm:$0xff]   ;;  %v306_v5 = vld [vmem:[%s408_s1 + $0x10] sm:$0xff]  }
   0x3   :  { %280 = vmatpush3.bf16.msra.mxu0 %v302_v1  ;;  %v307_v6 = vld [vmem:[%s408_s1 + $0x58] sm:$0xff]   ;;  %v309_v8 = vld [vmem:[%s408_s1 + $0x60] sm:$0xff]   ;;  %v311_v10 = vld [vmem:[%s408_s1 + $0x68] sm:$0xff]  }
   0x4   :  { %281 = vmatprep.subr.bf16.mxu0 %v303_v2  ;;  %v308_v7 = vld [vmem:[%s408_s1 + $0x18] sm:$0xff]   ;;  %v310_v9 = vld [vmem:[%s408_s1 + $0x20] sm:$0xff]   ;;  %v312_v12 = vld [vmem:[%s408_s1 + $0x28] sm:$0xff]  }
   0x5   :  { %v319_v11 = vld [vmem:[%s409_s0 + $0x4] ss:$8 sps:$4 sm:$0xff]   ;;  %v313_v13 = vld [vmem:[%s408_s1 + $0x70] sm:$0xff]   ;;  %v315_v15 = vld [vmem:[%s408_s1 + $0x78] sm:$0xff]  }
   0x6   :  { %198 = vmatprep.mubr.bf16.mxu0 %v319_v11  ;;  %v314_v14 = vld [vmem:[%s408_s1 + $0x30] sm:$0xff]   ;;  %v316_v16 = vld [vmem:[%s408_s1 + $0x38] sm:$0xff]   ;;  %v317_v17 = vld [vmem:[%s409_s0] ss:$8 sps:$4 sm:$0xff]  }
   0x7   :  { %282 = vmatpush3.bf16.msra.mxu0 %v304_v3  ;;  %v265_v20 = vld [vmem:[%s410_s2] ss:$0 sm:$0xff] }
   0x8   :  { %283 = vmatprep.subr.bf16.mxu0 %v305_v4  ;;  %v271_v23 = vld [vmem:[%s411_s3] sm:$0xff]  }
   0x9   :  { %v272_v28 = vunpack.c.l.bf16 %v271_v23  ;;  %v273_v30 = vunpack.c.h.bf16 %v271_v23 }
   0xb   :  { %284 = vmatpush3.bf16.msra.mxu0 %v306_v5 }
   0xc   :  { %285 = vmatprep.subr.bf16.mxu0 %v307_v6 }
   0xf   :  { %286 = vmatpush3.bf16.msra.mxu0 %v308_v7 }
  0x10   :  { %287 = vmatprep.subr.bf16.mxu0 %v309_v8 }
  0x13   :  { %288 = vmatpush3.bf16.msra.mxu0 %v310_v9 }
  0x14   :  { %289 = vmatprep.subr.bf16.mxu0 %v311_v10 }
  0x17   :  { %290 = vmatpush3.bf16.msra.mxu0 %v312_v12 }
  0x18   :  { %291 = vmatprep.subr.bf16.mxu0 %v313_v13 }
  0x1b   :  { %292 = vmatpush3.bf16.msra.mxu0 %v314_v14 }
  0x1c   :  { %293 = vmatprep.subr.bf16.mxu0 %v315_v15 }
  0x1f   :  { %294 = vmatpush3.bf16.msra.mxu0 %v316_v16 }
  0x22   :  { %199 = vmatmul.mubr.bf16.vlgmr.msra.gmra.mrb[0].mxu0 %v317_v17 }
  0xf5   :  { %v295_v18 = vpop.f32.mrb[0].mxu0 }
  0xf6   :  { %v296_v19 = vpop.f32.mrb[1].mxu0 }
  0xf7   :  { %v297_v21 = vadd.f32 %v296_v19, %v295_v18  ;;  %v298_v22 = vpop.f32.mrb[2].mxu0 }
  0xf8   :  { %v299_v24 = vpop.f32.mrb[3].mxu0 }
  0xf9   :  { %v223_v25 = vadd.f32 %v297_v21, %v265_v20  ;;  %v300_v26 = vadd.f32 %v299_v24, %v298_v22 }
  0xfb   :  { %v225_v27 = vmax.f32 %v223_v25, 0.0  ;;  %v224_v29 = vadd.f32 %v300_v26, %v265_v20 }
  0xfd   :  { %v226_v31 = vmax.f32 %v224_v29, 0.0  ;;  %v231_v32 = vadd.f32 %v272_v28, %v225_v27 }
  0xff   :  { %v232_v33 = vadd.f32 %v273_v30, %v226_v31 }
 0x101   :  { %v277_v34 = vpack.c.bf16 %v232_v33, %v231_v32 }
 0x103   :  { %278 = vst [vmem:[%s412_s4] sm:$0xff] %v277_v34  }

// kernel: _lambda_.38
= control target key start
LH: loop header
LB: loop body
LE: loop exit
PB: predicated region body
PF: predicated region fallthrough
CT: control target
= control target key end

     0   :  { %s374_s1 = inlined_call_operand.vmem [shape: bf16[128,128], index: 1, kind: input, shape index: {}]   ;;  %s375_s0 = inlined_call_operand.vmem [shape: bf16[32,128], index: 0, kind: input, shape index: {}]   ;;  %s376_s2 = inlined_call_operand.vmem [shape: f32[1,128], index: 2, kind: input, shape index: {}]   ;;  %s377_s3 = inlined_call_operand.vmem [shape: bf16[32,128], index: 3, kind: input, shape index: {}]   ;;  %s378_s4 = inlined_call_operand.vmem [shape: bf16[32,128], index: 4, kind: output, shape index: {}]  }
   0x1   :  { %v294_v0 = vld [vmem:[%s374_s1] sm:$0xff]   ;;  %v295_v1 = vld [vmem:[%s374_s1 + $0x8] sm:$0xff]   ;;  %v296_v2 = vld [vmem:[%s374_s1 + $0x10] sm:$0xff]  }
   0x2   :  { %274 = vmatprep.subr.bf16.mxu0 %v294_v0  ;;  %v297_v3 = vld [vmem:[%s374_s1 + $0x18] sm:$0xff]   ;;  %v302_v4 = vld [vmem:[%s375_s0] sm:$0xff]   ;;  %v299_v6 = vld [vmem:[%s374_s1 + $0x28] sm:$0xff]  }
   0x3   :  { %275 = vmatpush3.bf16.msra.mxu0 %v294_v0  ;;  %290 = vmatprep.mubr.bf16.mxu0 %v302_v4  ;;  %v298_v5 = vld [vmem:[%s374_s1 + $0x20] sm:$0xff]   ;;  %v300_v7 = vld [vmem:[%s374_s1 + $0x30] sm:$0xff]   ;;  %v301_v8 = vld [vmem:[%s374_s1 + $0x38] sm:$0xff]  }
   0x4   :  { %276 = vmatprep.subr.bf16.mxu0 %v295_v1  ;;  %v303_v9 = vld [vmem:[%s375_s0 + $0x8] sm:$0xff]   ;;  %v235_v10 = vld [vmem:[%s376_s2] ss:$0 sm:$0xff] }
   0x5   :  { %v262_v12 = vld [vmem:[%s377_s3 + $0x8] sm:$0xff]   ;;  %v245_v15 = vld [vmem:[%s377_s3] sm:$0xff]  }
   0x6   :  { %v250_v19 = vunpack.c.l.bf16 %v262_v12  ;;  %v251_v21 = vunpack.c.h.bf16 %v262_v12  ;;  %v246_v24 = vunpack.c.l.bf16 %v245_v15  ;;  %v247_v26 = vunpack.c.h.bf16 %v245_v15 }
   0x7   :  { %277 = vmatpush3.bf16.msra.mxu0 %v295_v1 }
   0x8   :  { %278 = vmatprep.subr.bf16.mxu0 %v296_v2 }
   0xb   :  { %279 = vmatpush3.bf16.msra.mxu0 %v296_v2 }
   0xc   :  { %280 = vmatprep.subr.bf16.mxu0 %v297_v3 }
   0xf   :  { %281 = vmatpush3.bf16.msra.mxu0 %v297_v3 }
  0x10   :  { %282 = vmatprep.subr.bf16.mxu0 %v298_v5 }
  0x13   :  { %283 = vmatpush3.bf16.msra.mxu0 %v298_v5 }
  0x14   :  { %284 = vmatprep.subr.bf16.mxu0 %v299_v6 }
  0x17   :  { %285 = vmatpush3.bf16.msra.mxu0 %v299_v6 }
  0x18   :  { %286 = vmatprep.subr.bf16.mxu0 %v300_v7 }
  0x1b   :  { %287 = vmatpush3.bf16.msra.mxu0 %v300_v7 }
  0x1c   :  { %288 = vmatprep.subr.bf16.mxu0 %v301_v8 }
  0x1f   :  { %289 = vmatpush3.bf16.msra.mxu0 %v301_v8 }
  0x22   :  { %291 = vmatmul.mubr.bf16.vlgmr.msra.gmra.mrb[0].mxu0 %v303_v9 }
  0xf5   :  { %v292_v11 = vpop.f32.mrb[0].mxu0 }
  0xf6   :  { %v183_v13 = vadd.f32 %v292_v11, %v235_v10  ;;  %v144_v14 = vpop.f32.mrb[1].mxu0 }
  0xf7   :  { %v181_v16 = vadd.f32 %v235_v10, %v144_v14  ;;  %v293_v17 = vpop.f32.mrb[2].mxu0 }
  0xf8   :  { %v187_v18 = vmax.f32 %v183_v13, 0.0  ;;  %v184_v20 = vadd.f32 %v293_v17, %v235_v10  ;;  %v147_v22 = vpop.f32.mrb[3].mxu0 }
  0xf9   :  { %v185_v23 = vmax.f32 %v181_v16, 0.0  ;;  %v182_v25 = vadd.f32 %v235_v10, %v147_v22 }
  0xfa   :  { %v188_v27 = vmax.f32 %v184_v20, 0.0  ;;  %v199_v29 = vadd.f32 %v250_v19, %v187_v18 }
  0xfb   :  { %v186_v28 = vmax.f32 %v182_v25, 0.0  ;;  %v197_v31 = vadd.f32 %v246_v24, %v185_v23 }
  0xfc   :  { %v200_v30 = vadd.f32 %v251_v21, %v188_v27 }
  0xfd   :  { %v198_v32 = vadd.f32 %v247_v26, %v186_v28 }
  0xfe   :  { %v260_v33 = vpack.c.bf16 %v200_v30, %v199_v29 }
  0xff   :  { %v255_v34 = vpack.c.bf16 %v198_v32, %v197_v31 }
 0x100   :  { %263 = vst [vmem:[%s378_s4 + $0x8] sm:$0xff] %v260_v33  }
 0x101   :  { %256 = vst [vmem:[%s378_s4] sm:$0xff] %v255_v34  }

// kernel: _lambda_.39
= control target key start
LH: loop header
LB: loop body
LE: loop exit
PB: predicated region body
PF: predicated region fallthrough
CT: control target
= control target key end

     0   :  { %s882_s1 = inlined_call_operand.vmem [shape: bf16[128,128], index: 1, kind: input, shape index: {}]   ;;  %s883_s0 = inlined_call_operand.vmem [shape: bf16[128,128], index: 0, kind: input, shape index: {}]   ;;  %s884_s3 = inlined_call_operand.vmem [shape: bf16[128,128], index: 3, kind: input, shape index: {}]   ;;  %s885_s2 = inlined_call_operand.vmem [shape: f32[1,128], index: 2, kind: input, shape index: {}]   ;;  %s886_s4 = inlined_call_operand.vmem [shape: bf16[128,128], index: 4, kind: output, shape index: {}]  }
   0x1   :  { %v700_v0 = vld [vmem:[%s882_s1] sm:$0xff]   ;;  %v701_v1 = vld [vmem:[%s882_s1 + $0x8] sm:$0xff]   ;;  %v702_v2 = vld [vmem:[%s882_s1 + $0x10] sm:$0xff]  }
   0x2   :  { %652 = vmatprep.subr.bf16.mxu0 %v700_v0  ;;  %684 = vmatprep.subr.bf16.mxu1 %v700_v0  ;;  %v703_v3 = vld [vmem:[%s882_s1 + $0x18] sm:$0xff]   ;;  %v708_v4 = vld [vmem:[%s883_s0] sm:$0xff]   ;;  %v705_v7 = vld [vmem:[%s882_s1 + $0x28] sm:$0xff]  }
   0x3   :  { %653 = vmatpush3.bf16.msra.mxu0 %v700_v0  ;;  %692 = vmatpush3.bf16.msra.mxu1 %v700_v0  ;;  %v709_v5 = vld [vmem:[%s883_s0 + $0x20] sm:$0xff]   ;;  %v706_v8 = vld [vmem:[%s882_s1 + $0x30] sm:$0xff]   ;;  %v707_v9 = vld [vmem:[%s882_s1 + $0x38] sm:$0xff]  }
   0x4   :  { %654 = vmatprep.subr.bf16.mxu0 %v701_v1  ;;  %685 = vmatprep.subr.bf16.mxu1 %v701_v1  ;;  %v704_v6 = vld [vmem:[%s882_s1 + $0x20] sm:$0xff]   ;;  %v710_v10 = vld [vmem:[%s883_s0 + $0x8] sm:$0xff]   ;;  %v712_v12 = vld [vmem:[%s883_s0 + $0x10] sm:$0xff]  }
   0x5   :  { %668 = vmatprep.mubr.bf16.mxu0 %v708_v4  ;;  %676 = vmatprep.mubr.bf16.mxu1 %v709_v5  ;;  %v711_v11 = vld [vmem:[%s883_s0 + $0x28] sm:$0xff]   ;;  %v713_v13 = vld [vmem:[%s883_s0 + $0x30] sm:$0xff]   ;;  %v714_v14 = vld [vmem:[%s883_s0 + $0x18] sm:$0xff]  }
   0x6   :  { %v715_v15 = vld [vmem:[%s883_s0 + $0x38] sm:$0xff]   ;;  %v622_v16 = vld [vmem:[%s884_s3 + $0x8] sm:$0xff]   ;;  %v551_v18 = vld [vmem:[%s884_s3] sm:$0xff]  }
   0x7   :  { %655 = vmatpush3.bf16.msra.mxu0 %v701_v1  ;;  %693 = vmatpush3.bf16.msra.mxu1 %v701_v1  ;;  %v626_v17 = vld [vmem:[%s884_s3 + $0x28] sm:$0xff]   ;;  %v625_v19 = vld [vmem:[%s884_s3 + $0x20] sm:$0xff]   ;;  %v809_v21 = vld [vmem:[%s884_s3 + $0x18] sm:$0xff]   ;;  %v556_v23 = vunpack.c.l.bf16 %v622_v16  ;;  %v552_v25 = vunpack.c.l.bf16 %v551_v18  ;;  %v557_v31 = vunpack.c.h.bf16 %v622_v16  ;;  %v553_v33 = vunpack.c.h.bf16 %v551_v18 }
   0x8   :  { %656 = vmatprep.subr.bf16.mxu0 %v702_v2  ;;  %686 = vmatprep.subr.bf16.mxu1 %v702_v2  ;;  %v804_v20 = vld [vmem:[%s885_s2] ss:$0 sm:$0xff]  ;;  %v814_v22 = vld [vmem:[%s884_s3 + $0x38] sm:$0xff]   ;;  %v572_v24 = vunpack.c.l.bf16 %v626_v17  ;;  %v568_v26 = vunpack.c.l.bf16 %v625_v19  ;;  %v819_v27 = vld [vmem:[%s884_s3 + $0x10] sm:$0xff]   ;;  %v573_v32 = vunpack.c.h.bf16 %v626_v17  ;;  %v569_v34 = vunpack.c.h.bf16 %v625_v19 }
   0x9   :  { %v824_v28 = vld [vmem:[%s884_s3 + $0x30] sm:$0xff]   ;;  %v564_v39 = vunpack.c.l.bf16 %v809_v21  ;;  %v580_v40 = vunpack.c.l.bf16 %v814_v22  ;;  %v560_v45 = vunpack.c.l.bf16 %v819_v27  ;;  %v565_v59 = vunpack.c.h.bf16 %v809_v21 }
   0xa   :  { %v576_v46 = vunpack.c.l.bf16 %v824_v28  ;;  %v581_v60 = vunpack.c.h.bf16 %v814_v22  ;;  %v561_v63 = vunpack.c.h.bf16 %v819_v27  ;;  %v577_v0 = vunpack.c.h.bf16 %v824_v28 }
   0xb   :  { %657 = vmatpush3.bf16.msra.mxu0 %v702_v2  ;;  %694 = vmatpush3.bf16.msra.mxu1 %v702_v2 }
   0xc   :  { %658 = vmatprep.subr.bf16.mxu0 %v703_v3  ;;  %687 = vmatprep.subr.bf16.mxu1 %v703_v3 }
   0xf   :  { %659 = vmatpush3.bf16.msra.mxu0 %v703_v3  ;;  %695 = vmatpush3.bf16.msra.mxu1 %v703_v3 }
  0x10   :  { %660 = vmatprep.subr.bf16.mxu0 %v704_v6  ;;  %688 = vmatprep.subr.bf16.mxu1 %v704_v6 }
  0x13   :  { %661 = vmatpush3.bf16.msra.mxu0 %v704_v6  ;;  %696 = vmatpush3.bf16.msra.mxu1 %v704_v6 }
  0x14   :  { %662 = vmatprep.subr.bf16.mxu0 %v705_v7  ;;  %689 = vmatprep.subr.bf16.mxu1 %v705_v7 }
  0x17   :  { %663 = vmatpush3.bf16.msra.mxu0 %v705_v7  ;;  %697 = vmatpush3.bf16.msra.mxu1 %v705_v7 }
  0x18   :  { %664 = vmatprep.subr.bf16.mxu0 %v706_v8  ;;  %690 = vmatprep.subr.bf16.mxu1 %v706_v8 }
  0x1b   :  { %665 = vmatpush3.bf16.msra.mxu0 %v706_v8  ;;  %698 = vmatpush3.bf16.msra.mxu1 %v706_v8 }
  0x1c   :  { %666 = vmatprep.subr.bf16.mxu0 %v707_v9  ;;  %691 = vmatprep.subr.bf16.mxu1 %v707_v9 }
  0x1f   :  { %667 = vmatpush3.bf16.msra.mxu0 %v707_v9  ;;  %699 = vmatpush3.bf16.msra.mxu1 %v707_v9 }
  0x22   :  { %669 = vmatmul.mubr.bf16.vlgmr.msra.gmra.mrb[0].mxu0 %v710_v10  ;;  %677 = vmatmul.mubr.bf16.vlgmr.msra.gmra.mrb[0].mxu1 %v711_v11 }
  0x23   :  { %672 = vmatprep.mubr.bf16.mxu0 %v712_v12  ;;  %680 = vmatprep.mubr.bf16.mxu1 %v713_v13 }
  0x2a   :  { %673 = vmatmul.mubr.bf16.gmra.mrb[4].mxu0 %v714_v14  ;;  %681 = vmatmul.mubr.bf16.gmra.mrb[4].mxu1 %v715_v15 }
  0xf5   :  { %v670_v29 = vpop.f32.mrb[0].mxu0  ;;  %v678_v30 = vpop.f32.mrb[0].mxu1 }
  0xf6   :  { %v339_v35 = vadd.f32 %v670_v29, %v804_v20  ;;  %v347_v36 = vadd.f32 %v678_v30, %v804_v20  ;;  %v216_v37 = vpop.f32.mrb[1].mxu0  ;;  %v248_v38 = vpop.f32.mrb[1].mxu1 }
  0xf7   :  { %v337_v41 = vadd.f32 %v804_v20, %v216_v37  ;;  %v345_v42 = vadd.f32 %v804_v20, %v248_v38  ;;  %v671_v43 = vpop.f32.mrb[2].mxu0  ;;  %v679_v44 = vpop.f32.mrb[2].mxu1 }
  0xf8   :  { %v355_v47 = vmax.f32 %v339_v35, 0.0  ;;  %v363_v48 = vmax.f32 %v347_v36, 0.0  ;;  %v340_v49 = vadd.f32 %v671_v43, %v804_v20  ;;  %v348_v50 = vadd.f32 %v679_v44, %v804_v20  ;;  %v219_v51 = vpop.f32.mrb[3].mxu0  ;;  %v251_v52 = vpop.f32.mrb[3].mxu1 }
  0xf9   :  { %v353_v53 = vmax.f32 %v337_v41, 0.0  ;;  %v361_v54 = vmax.f32 %v345_v42, 0.0  ;;  %v338_v55 = vadd.f32 %v804_v20, %v219_v51  ;;  %v346_v56 = vadd.f32 %v804_v20, %v251_v52 }
  0xfa   :  { %v356_v57 = vmax.f32 %v340_v49, 0.0  ;;  %v364_v58 = vmax.f32 %v348_v50, 0.0  ;;  %v403_v1 = vadd.f32 %v556_v23, %v355_v47  ;;  %v411_v2 = vadd.f32 %v572_v24, %v363_v48 }
  0xfb   :  { %v354_v61 = vmax.f32 %v338_v55, 0.0  ;;  %v362_v62 = vmax.f32 %v346_v56, 0.0  ;;  %v401_v5 = vadd.f32 %v552_v25, %v353_v53  ;;  %v409_v6 = vadd.f32 %v568_v26, %v361_v54 }
  0xfc   :  { %v404_v3 = vadd.f32 %v557_v31, %v356_v57  ;;  %v412_v4 = vadd.f32 %v573_v32, %v364_v58 }
  0xfd   :  { %v402_v7 = vadd.f32 %v553_v33, %v354_v61  ;;  %v410_v8 = vadd.f32 %v569_v34, %v362_v62  ;;  %v674_v9 = vpop.f32.mrb[4].mxu0  ;;  %v682_v10 = vpop.f32.mrb[4].mxu1 }
  0xfe   :  { %v590_v11 = vpack.c.bf16 %v404_v3, %v403_v1  ;;  %v610_v12 = vpack.c.bf16 %v412_v4, %v411_v2  ;;  %v343_v13 = vadd.f32 %v674_v9, %v804_v20  ;;  %v351_v14 = vadd.f32 %v682_v10, %v804_v20  ;;  %v232_v15 = vpop.f32.mrb[5].mxu0  ;;  %v264_v16 = vpop.f32.mrb[5].mxu1 }
  0xff   :  { %v585_v17 = vpack.c.bf16 %v402_v7, %v401_v5  ;;  %v605_v18 = vpack.c.bf16 %v410_v8, %v409_v6  ;;  %v341_v19 = vadd.f32 %v804_v20, %v232_v15  ;;  %v349_v23 = vadd.f32 %v804_v20, %v264_v16  ;;  %v675_v24 = vpop.f32.mrb[6].mxu0  ;;  %v683_v25 = vpop.f32.mrb[6].mxu1 }
 0x100   :  { %629 = vst [vmem:[%s886_s4 + $0x8] sm:$0xff] %v590_v11   ;;  %633 = vst [vmem:[%s886_s4 + $0x28] sm:$0xff] %v610_v12   ;;  %v359_v26 = vmax.f32 %v343_v13, 0.0  ;;  %v367_v29 = vmax.f32 %v351_v14, 0.0  ;;  %v344_v30 = vadd.f32 %v675_v24, %v804_v20  ;;  %v352_v31 = vadd.f32 %v683_v25, %v804_v20  ;;  %v235_v32 = vpop.f32.mrb[7].mxu0  ;;  %v267_v33 = vpop.f32.mrb[7].mxu1 }
 0x101   :  { %586 = vst [vmem:[%s886_s4] sm:$0xff] %v585_v17   ;;  %632 = vst [vmem:[%s886_s4 + $0x20] sm:$0xff] %v605_v18   ;;  %v357_v34 = vmax.f32 %v341_v19, 0.0  ;;  %v365_v35 = vmax.f32 %v349_v23, 0.0  ;;  %v342_v36 = vadd.f32 %v804_v20, %v235_v32  ;;  %v350_v37 = vadd.f32 %v804_v20, %v267_v33 }
 0x102   :  { %v360_v38 = vmax.f32 %v344_v30, 0.0  ;;  %v368_v41 = vmax.f32 %v352_v31, 0.0  ;;  %v407_v44 = vadd.f32 %v564_v39, %v359_v26  ;;  %v415_v47 = vadd.f32 %v580_v40, %v367_v29 }
 0x103   :  { %v358_v42 = vmax.f32 %v342_v36, 0.0  ;;  %v366_v43 = vmax.f32 %v350_v37, 0.0  ;;  %v405_v50 = vadd.f32 %v560_v45, %v357_v34  ;;  %v413_v51 = vadd.f32 %v576_v46, %v365_v35 }
 0x104   :  { %v408_v48 = vadd.f32 %v565_v59, %v360_v38  ;;  %v416_v49 = vadd.f32 %v581_v60, %v368_v41 }
 0x105   :  { %v406_v52 = vadd.f32 %v561_v63, %v358_v42  ;;  %v414_v20 = vadd.f32 %v577_v0, %v366_v43 }
 0x106   :  { %v600_v53 = vpack.c.bf16 %v408_v48, %v407_v44  ;;  %v620_v54 = vpack.c.bf16 %v416_v49, %v415_v47 }
 0x107   :  { %v595_v55 = vpack.c.bf16 %v406_v52, %v405_v50  ;;  %v615_v56 = vpack.c.bf16 %v414_v20, %v413_v51 }
 0x108   :  { %631 = vst [vmem:[%s886_s4 + $0x18] sm:$0xff] %v600_v53   ;;  %635 = vst [vmem:[%s886_s4 + $0x38] sm:$0xff] %v620_v54  }
 0x109   :  { %630 = vst [vmem:[%s886_s4 + $0x10] sm:$0xff] %v595_v55   ;;  %634 = vst [vmem:[%s886_s4 + $0x30] sm:$0xff] %v615_v56  }

</bundles_post_ra>
